<compile_context>
chip_gen: v7x
topology: tpu7x:2x2x1
jax: 0.10.0
libtpu: 0.0.40
codegen_flags: <defaults>
</compile_context>

<pallas_src>
import jax
import jax.numpy as jnp
from jax.experimental import pallas as pl
from jax.experimental.pallas import tpu as pltpu


def srcnn_kernel(x_ref,
                 w1_ref, b1_ref,
                 w2_ref, b2_ref,
                 w3_ref, b3_ref,
                 w4_ref, b4_ref,
                 o_ref):
    zero = jnp.bfloat16(0.0)

    # layer1 (Conv1d k=1 == Linear) + ReLU     -- bf16 operands, f32 accumulate
    h = jnp.dot(x_ref[...].astype(jnp.bfloat16), w1_ref[...],
                preferred_element_type=jnp.float32) + b1_ref[...]
    h = jnp.maximum(h.astype(jnp.bfloat16), zero)      # packed bf16 VPU epilogue

    # layer2 (Conv1d k=1 == Linear) + ReLU
    h = jnp.dot(h, w2_ref[...], preferred_element_type=jnp.float32) + b2_ref[...]
    h = jnp.maximum(h.astype(jnp.bfloat16), zero)

    # fc1 + ReLU
    h = jnp.dot(h, w3_ref[...], preferred_element_type=jnp.float32) + b3_ref[...]
    h = jnp.maximum(h.astype(jnp.bfloat16), zero)

    # fc2 + sigmoid (f32 output)
    h = jnp.dot(h, w4_ref[...], preferred_element_type=jnp.float32) + b4_ref[...]
    o_ref[...] = jax.nn.sigmoid(h)


def _round_up(n, m):
    return ((n + m - 1) // m) * m


def _tpu_info():
    """Return (num_tensorcores, vmem_capacity_bytes) with safe fallbacks."""
    cores, vmem = 1, 64 << 20  # conservative defaults (v7x per-TC VMEM)
    try:
        info = pltpu.get_tpu_info()
        for name in ("num_cores", "cores_per_chip", "core_count", "num_tensorcores"):
            v = getattr(info, name, None)
            if isinstance(v, int) and v > 0:
                cores = v
                break
        v = getattr(info, "vmem_capacity_bytes", None)
        if isinstance(v, int) and v > 0:
            vmem = v
    except Exception:
        pass
    return cores, vmem


def srcnn_forward(x, params, *, tile_b=None, num_tensorcores=None):
    """x: (B, window) f32.  params: bf16 (in, out) weights + f32 (1, out) biases."""
    B, W = x.shape
    w1t, b1 = params["w1t"], params["b1"]   # (W,  W)   bf16, (1,  W) f32
    w2t, b2 = params["w2t"], params["b2"]   # (W,  2W)  bf16, (1, 2W) f32
    w3t, b3 = params["w3t"], params["b3"]   # (2W, 4W)  bf16, (1, 4W) f32
    w4t, b4 = params["w4t"], params["b4"]   # (4W, W)   bf16, (1,  W) f32
    weights = (w1t, b1, w2t, b2, w3t, b3, w4t, b4)
    weight_bytes = sum(int(a.size) * a.dtype.itemsize for a in weights)

    detected_cores, vmem_cap = _tpu_info()
    ncores = num_tensorcores if num_tensorcores is not None else detected_cores

    # Tiny-batch guard: keep blocks no larger than the (8-aligned) array.
    orig_B = B
    if B < 8:
        x = jnp.pad(x, ((0, 8 - B), (0, 0)))
        B = 8

    # --- batch tile selection -------------------------------------------------
    # Per-row VMEM cost ~ 64*W bytes: double-buffered f32 x/out tiles (16*W) plus
    # f32/bf16 inter-layer activations dominated by the (tb, 4W) fc1 output.  Keep
    # resident weights + tiles within ~75% of physical VMEM for Mosaic headroom.
    per_row_bytes = 64 * W
    vmem_budget = int(0.75 * vmem_cap)
    tb_cap = max(8, ((vmem_budget - weight_bytes) // per_row_bytes) // 8 * 8)
    b_align = max(8, (B // 8) * 8)          # largest 8-multiple <= B
    tb = min(tile_b if tile_b is not None else 512, tb_cap, b_align)
    tb = max(8, (tb // 8) * 8)

    # Multi-TensorCore chips only (v7x): make the grid a multiple of the core count
    # so ("parallel",) sharding is balanced.  On single-TC v5e/v6e, splitting a
    # small batch only adds per-step overhead and shrinks the MXU LHS height.
    if ncores > 1 and B >= 8 * ncores:
        g = pl.cdiv(B, tb)
        if g % ncores != 0:
            g = _round_up(g, ncores)
            tb = max(8, _round_up(pl.cdiv(B, g), 8))

    grid = (pl.cdiv(B, tb),)

    # --- advisory cost estimate (scheduling hint for XLA) ----------------------
    flops = 2 * B * 15 * W * W                 # W*W + W*2W + 2W*4W + 4W*W = 15 W^2
    bytes_accessed = weight_bytes + 2 * B * W * 4
    cost = pl.CostEstimate(flops=flops, transcendentals=B * W,
                           bytes_accessed=bytes_accessed)

    # --- explicit VMEM budget from the actual plan -----------------------------
    io_bytes = 2 * 2 * tb * W * 4                          # x + out, double-buffered
    act_bytes = tb * (W + 2 * W + 4 * W + 4 * W + W) * 4   # f32 intermediate bound
    plan = weight_bytes + io_bytes + act_bytes
    vmem_limit = int(min(vmem_cap, max(16 << 20, int(plan * 1.25) + (2 << 20))))

    def build(single_buffer_weights):
        def resident(arr):
            # Grid-invariant block: same tile for every grid step.  Single-buffer it
            # so its VMEM footprint is 1x instead of 2x.
            if single_buffer_weights:
                return pl.BlockSpec(arr.shape, lambda i: (0, 0),
                                    pipeline_mode=pl.Buffered(1))
            return pl.BlockSpec(arr.shape, lambda i: (0, 0))

        return pl.pallas_call(
            srcnn_kernel,
            out_shape=jax.ShapeDtypeStruct((B, W), jnp.float32),
            grid_spec=pl.GridSpec(
                grid=grid,
                in_specs=[
                    pl.BlockSpec((tb, W), lambda i: (i, 0)),   # x batch tile
                    resident(w1t), resident(b1),
                    resident(w2t), resident(b2),
                    resident(w3t), resident(b3),
                    resident(w4t), resident(b4),
                ],
                out_specs=pl.BlockSpec((tb, W), lambda i: (i, 0)),
            ),
            compiler_params=pltpu.CompilerParams(
                dimension_semantics=("parallel",),
                vmem_limit_bytes=vmem_limit,
            ),
            cost_estimate=cost,
        )

    try:
        out = build(True)(x, *weights)
    except Exception:
        # TODO(synk): this jax build rejected pl.Buffered(1); fall back to default
        # double-buffered weights (2x weight VMEM; harmless at the demo window).
        out = build(False)(x, *weights)
    return out[:orig_B]


def init_params(key, window):
    """Deterministic synthetic parameters (PyTorch-default-style uniform init).

    Weights are stored transposed (in, out) and cast to bf16 (matmul operands);
    biases stay f32 as (1, out) rows.
    """
    keys = jax.random.split(key, 8)

    def lin(kw, kb, fan_in, fan_out):
        bound = 1.0 / jnp.sqrt(fan_in)
        w = jax.random.uniform(kw, (fan_out, fan_in), jnp.float32, -bound, bound)
        b = jax.random.uniform(kb, (fan_out,), jnp.float32, -bound, bound)
        return w.T.astype(jnp.bfloat16), b.reshape(1, fan_out)

    w1t, b1 = lin(keys[0], keys[1], window, window)          # layer1 (Conv1d k=1)
    w2t, b2 = lin(keys[2], keys[3], window, 2 * window)      # layer2 (Conv1d k=1)
    w3t, b3 = lin(keys[4], keys[5], 2 * window, 4 * window)  # fc1
    w4t, b4 = lin(keys[6], keys[7], 4 * window, window)      # fc2
    return {"w1t": w1t, "b1": b1, "w2t": w2t, "b2": b2,
            "w3t": w3t, "b3": b3, "w4t": w4t, "b4": b4}


def srcnn_reference(x, params):
    """Pure-JAX reference of the PyTorch forward with the kernel's rounding policy."""
    def dense(h, wt, b):
        return jnp.dot(h.astype(jnp.bfloat16), wt,
                       preferred_element_type=jnp.float32) + b

    zero = jnp.bfloat16(0.0)
    h = jnp.maximum(dense(x, params["w1t"], params["b1"]).astype(jnp.bfloat16), zero)
    h = jnp.maximum(dense(h, params["w2t"], params["b2"]).astype(jnp.bfloat16), zero)
    h = jnp.maximum(dense(h, params["w3t"], params["b3"]).astype(jnp.bfloat16), zero)
    h = dense(h, params["w4t"], params["b4"])
    return jax.nn.sigmoid(h)


if __name__ == "__main__":
    # Small, TPU-friendly demo shapes: window=128 (production uses 1024), batch=384.
    # Auto tile selection gives one 384-row tile on single-TC chips (v5e/v6e) or two
    # balanced 192-row tiles on multi-TC chips (v7x); no wrapper-side padding.
    window = 128
    batch = 384

    key = jax.random.PRNGKey(0)
    k_x, k_p = jax.random.split(key)
    x = jax.random.normal(k_x, (batch, window), jnp.float32)
    params = init_params(k_p, window)

    out = jax.block_until_ready(srcnn_forward(x, params))
    ref = srcnn_reference(x, params)

    assert out.shape == (batch, window)
    # bf16 matmul operands / bf16 activations (f32 accumulation): relaxed tolerance.
    assert jnp.allclose(out, ref, atol=2e-2, rtol=2e-2), "mismatch vs reference"

    print("KERNEL_OK")
</pallas_src>

<mosaic_0001>
module attributes {stable_mosaic.version = 11 : i64} {
  func.func @srcnn_kernel(%arg0: i32, %arg1: memref<384x128xf32, #tpu.memory_space<vmem>>, %arg2: memref<128x128xbf16, #tpu.memory_space<vmem>>, %arg3: memref<1x128xf32, #tpu.memory_space<vmem>>, %arg4: memref<128x256xbf16, #tpu.memory_space<vmem>>, %arg5: memref<1x256xf32, #tpu.memory_space<vmem>>, %arg6: memref<256x512xbf16, #tpu.memory_space<vmem>>, %arg7: memref<1x512xf32, #tpu.memory_space<vmem>>, %arg8: memref<512x128xbf16, #tpu.memory_space<vmem>>, %arg9: memref<1x128xf32, #tpu.memory_space<vmem>>, %arg10: memref<384x128xf32, #tpu.memory_space<vmem>>) attributes {dimension_semantics = [#tpu.dimension_semantics<parallel>], iteration_bounds = array<i64: 1>, scalar_prefetch = 0 : i64, scratch_operands = 0 : i64, tpu.core_type = #tpu.core_type<tc>, window_params = [{transform_indices = @transform_0, window_bounds = array<i64: 384, 128>}, {pipeline_mode = #tpu.pipeline_mode<synchronous>, transform_indices = @transform_1, window_bounds = array<i64: 128, 128>}, {pipeline_mode = #tpu.pipeline_mode<synchronous>, transform_indices = @transform_2, window_bounds = array<i64: 1, 128>}, {pipeline_mode = #tpu.pipeline_mode<synchronous>, transform_indices = @transform_3, window_bounds = array<i64: 128, 256>}, {pipeline_mode = #tpu.pipeline_mode<synchronous>, transform_indices = @transform_4, window_bounds = array<i64: 1, 256>}, {pipeline_mode = #tpu.pipeline_mode<synchronous>, transform_indices = @transform_5, window_bounds = array<i64: 256, 512>}, {pipeline_mode = #tpu.pipeline_mode<synchronous>, transform_indices = @transform_6, window_bounds = array<i64: 1, 512>}, {pipeline_mode = #tpu.pipeline_mode<synchronous>, transform_indices = @transform_7, window_bounds = array<i64: 512, 128>}, {pipeline_mode = #tpu.pipeline_mode<synchronous>, transform_indices = @transform_8, window_bounds = array<i64: 1, 128>}, {transform_indices = @transform_9, window_bounds = array<i64: 384, 128>}]} {
    %c0 = arith.constant 0 : index
    %c0_0 = arith.constant 0 : index
    %0 = vector.load %arg1[%c0, %c0_0] : memref<384x128xf32, #tpu.memory_space<vmem>>, vector<384x128xf32>
    %1 = arith.truncf %0 : vector<384x128xf32> to vector<384x128xbf16>
    %c0_1 = arith.constant 0 : index
    %c0_2 = arith.constant 0 : index
    %2 = vector.load %arg2[%c0_1, %c0_2] : memref<128x128xbf16, #tpu.memory_space<vmem>>, vector<128x128xbf16>
    %cst = arith.constant dense<0.000000e+00> : vector<384x128xf32>
    %3 = tpu.matmul %1, %2, %cst {dimension_numbers = #tpu.dot_dimension_numbers<[1], [0], [0], [1], [0, 0, 1, 1], [], []>} : vector<384x128xbf16>, vector<128x128xbf16>, vector<384x128xf32> -> vector<384x128xf32>
    %c0_3 = arith.constant 0 : index
    %c0_4 = arith.constant 0 : index
    %4 = vector.load %arg3[%c0_3, %c0_4] : memref<1x128xf32, #tpu.memory_space<vmem>>, vector<1x128xf32>
    %5 = vector.broadcast %4 : vector<1x128xf32> to vector<384x128xf32>
    %6 = arith.addf %3, %5 : vector<384x128xf32>
    %7 = arith.truncf %6 : vector<384x128xf32> to vector<384x128xbf16>
    %cst_5 = arith.constant 0.000000e+00 : bf16
    %8 = vector.broadcast %cst_5 : bf16 to vector<384x128xbf16>
    %9 = arith.maximumf %7, %8 : vector<384x128xbf16>
    %c0_6 = arith.constant 0 : index
    %c0_7 = arith.constant 0 : index
    %10 = vector.load %arg4[%c0_6, %c0_7] : memref<128x256xbf16, #tpu.memory_space<vmem>>, vector<128x256xbf16>
    %cst_8 = arith.constant dense<0.000000e+00> : vector<384x256xf32>
    %11 = tpu.matmul %9, %10, %cst_8 {dimension_numbers = #tpu.dot_dimension_numbers<[1], [0], [0], [1], [0, 0, 1, 1], [], []>} : vector<384x128xbf16>, vector<128x256xbf16>, vector<384x256xf32> -> vector<384x256xf32>
    %c0_9 = arith.constant 0 : index
    %c0_10 = arith.constant 0 : index
    %12 = vector.load %arg5[%c0_9, %c0_10] : memref<1x256xf32, #tpu.memory_space<vmem>>, vector<1x256xf32>
    %13 = vector.broadcast %12 : vector<1x256xf32> to vector<384x256xf32>
    %14 = arith.addf %11, %13 : vector<384x256xf32>
    %15 = arith.truncf %14 : vector<384x256xf32> to vector<384x256xbf16>
    %cst_11 = arith.constant 0.000000e+00 : bf16
    %16 = vector.broadcast %cst_11 : bf16 to vector<384x256xbf16>
    %17 = arith.maximumf %15, %16 : vector<384x256xbf16>
    %c0_12 = arith.constant 0 : index
    %c0_13 = arith.constant 0 : index
    %18 = vector.load %arg6[%c0_12, %c0_13] : memref<256x512xbf16, #tpu.memory_space<vmem>>, vector<256x512xbf16>
    %cst_14 = arith.constant dense<0.000000e+00> : vector<384x512xf32>
    %19 = tpu.matmul %17, %18, %cst_14 {dimension_numbers = #tpu.dot_dimension_numbers<[1], [0], [0], [1], [0, 0, 1, 1], [], []>} : vector<384x256xbf16>, vector<256x512xbf16>, vector<384x512xf32> -> vector<384x512xf32>
    %c0_15 = arith.constant 0 : index
    %c0_16 = arith.constant 0 : index
    %20 = vector.load %arg7[%c0_15, %c0_16] : memref<1x512xf32, #tpu.memory_space<vmem>>, vector<1x512xf32>
    %21 = vector.broadcast %20 : vector<1x512xf32> to vector<384x512xf32>
    %22 = arith.addf %19, %21 : vector<384x512xf32>
    %23 = arith.truncf %22 : vector<384x512xf32> to vector<384x512xbf16>
    %cst_17 = arith.constant 0.000000e+00 : bf16
    %24 = vector.broadcast %cst_17 : bf16 to vector<384x512xbf16>
    %25 = arith.maximumf %23, %24 : vector<384x512xbf16>
    %c0_18 = arith.constant 0 : index
    %c0_19 = arith.constant 0 : index
    %26 = vector.load %arg8[%c0_18, %c0_19] : memref<512x128xbf16, #tpu.memory_space<vmem>>, vector<512x128xbf16>
    %cst_20 = arith.constant dense<0.000000e+00> : vector<384x128xf32>
    %27 = tpu.matmul %25, %26, %cst_20 {dimension_numbers = #tpu.dot_dimension_numbers<[1], [0], [0], [1], [0, 0, 1, 1], [], []>} : vector<384x512xbf16>, vector<512x128xbf16>, vector<384x128xf32> -> vector<384x128xf32>
    %c0_21 = arith.constant 0 : index
    %c0_22 = arith.constant 0 : index
    %28 = vector.load %arg9[%c0_21, %c0_22] : memref<1x128xf32, #tpu.memory_space<vmem>>, vector<1x128xf32>
    %29 = vector.broadcast %28 : vector<1x128xf32> to vector<384x128xf32>
    %30 = arith.addf %27, %29 : vector<384x128xf32>
    %31 = arith.negf %30 : vector<384x128xf32>
    %32 = math.exp %31 : vector<384x128xf32>
    %cst_23 = arith.constant 1.000000e+00 : f32
    %33 = vector.broadcast %cst_23 : f32 to vector<384x128xf32>
    %34 = arith.addf %33, %32 : vector<384x128xf32>
    %35 = arith.divf %33, %34 : vector<384x128xf32>
    %c0_24 = arith.constant 0 : index
    %c0_25 = arith.constant 0 : index
    %36 = vector.load %arg10[%c0_24, %c0_25] : memref<384x128xf32, #tpu.memory_space<vmem>>, vector<384x128xf32>
    tpu.vector_store %arg10[%c0_24, %c0_25], %35 {strides = array<i32>} : memref<384x128xf32, #tpu.memory_space<vmem>>, vector<384x128xf32>,
    return
  }
  func.func @transform_0(%arg0: i32) -> (i32, i32) {
    %c0_i32 = arith.constant 0 : i32
    %c0_i32_0 = arith.constant 0 : i32
    return %arg0, %c0_i32 : i32, i32
  }
  func.func @transform_1(%arg0: i32) -> (i32, i32) {
    %c0_i32 = arith.constant 0 : i32
    %c0_i32_0 = arith.constant 0 : i32
    %c0_i32_1 = arith.constant 0 : i32
    return %c0_i32, %c0_i32_0 : i32, i32
  }
  func.func @transform_2(%arg0: i32) -> (i32, i32) {
    %c0_i32 = arith.constant 0 : i32
    %c0_i32_0 = arith.constant 0 : i32
    %c0_i32_1 = arith.constant 0 : i32
    return %c0_i32, %c0_i32_0 : i32, i32
  }
  func.func @transform_3(%arg0: i32) -> (i32, i32) {
    %c0_i32 = arith.constant 0 : i32
    %c0_i32_0 = arith.constant 0 : i32
    %c0_i32_1 = arith.constant 0 : i32
    return %c0_i32, %c0_i32_0 : i32, i32
  }
  func.func @transform_4(%arg0: i32) -> (i32, i32) {
    %c0_i32 = arith.constant 0 : i32
    %c0_i32_0 = arith.constant 0 : i32
    %c0_i32_1 = arith.constant 0 : i32
    return %c0_i32, %c0_i32_0 : i32, i32
  }
  func.func @transform_5(%arg0: i32) -> (i32, i32) {
    %c0_i32 = arith.constant 0 : i32
    %c0_i32_0 = arith.constant 0 : i32
    %c0_i32_1 = arith.constant 0 : i32
    return %c0_i32, %c0_i32_0 : i32, i32
  }
  func.func @transform_6(%arg0: i32) -> (i32, i32) {
    %c0_i32 = arith.constant 0 : i32
    %c0_i32_0 = arith.constant 0 : i32
    %c0_i32_1 = arith.constant 0 : i32
    return %c0_i32, %c0_i32_0 : i32, i32
  }
  func.func @transform_7(%arg0: i32) -> (i32, i32) {
    %c0_i32 = arith.constant 0 : i32
    %c0_i32_0 = arith.constant 0 : i32
    %c0_i32_1 = arith.constant 0 : i32
    return %c0_i32, %c0_i32_0 : i32, i32
  }
  func.func @transform_8(%arg0: i32) -> (i32, i32) {
    %c0_i32 = arith.constant 0 : i32
    %c0_i32_0 = arith.constant 0 : i32
    %c0_i32_1 = arith.constant 0 : i32
    return %c0_i32, %c0_i32_0 : i32, i32
  }
  func.func @transform_9(%arg0: i32) -> (i32, i32) {
    %c0_i32 = arith.constant 0 : i32
    %c0_i32_0 = arith.constant 0 : i32
    return %arg0, %c0_i32 : i32, i32
  }
}

module attributes {stable_mosaic.version = 11 : i64} {
  func.func @srcnn_kernel(%arg0: i32, %arg1: memref<384x128xf32, #tpu.memory_space<vmem>>, %arg2: memref<128x128xbf16, #tpu.memory_space<vmem>>, %arg3: memref<1x128xf32, #tpu.memory_space<vmem>>, %arg4: memref<128x256xbf16, #tpu.memory_space<vmem>>, %arg5: memref<1x256xf32, #tpu.memory_space<vmem>>, %arg6: memref<256x512xbf16, #tpu.memory_space<vmem>>, %arg7: memref<1x512xf32, #tpu.memory_space<vmem>>, %arg8: memref<512x128xbf16, #tpu.memory_space<vmem>>, %arg9: memref<1x128xf32, #tpu.memory_space<vmem>>, %arg10: memref<384x128xf32, #tpu.memory_space<vmem>>) attributes {dimension_semantics = [#tpu.dimension_semantics<parallel>], iteration_bounds = array<i64: 1>, scalar_prefetch = 0 : i64, scratch_operands = 0 : i64, tpu.core_type = #tpu.core_type<tc>, window_params = [{transform_indices = @transform_0, window_bounds = array<i64: 384, 128>}, {pipeline_mode = #tpu.pipeline_mode<synchronous>, transform_indices = @transform_1, window_bounds = array<i64: 128, 128>}, {pipeline_mode = #tpu.pipeline_mode<synchronous>, transform_indices = @transform_2, window_bounds = array<i64: 1, 128>}, {pipeline_mode = #tpu.pipeline_mode<synchronous>, transform_indices = @transform_3, window_bounds = array<i64: 128, 256>}, {pipeline_mode = #tpu.pipeline_mode<synchronous>, transform_indices = @transform_4, window_bounds = array<i64: 1, 256>}, {pipeline_mode = #tpu.pipeline_mode<synchronous>, transform_indices = @transform_5, window_bounds = array<i64: 256, 512>}, {pipeline_mode = #tpu.pipeline_mode<synchronous>, transform_indices = @transform_6, window_bounds = array<i64: 1, 512>}, {pipeline_mode = #tpu.pipeline_mode<synchronous>, transform_indices = @transform_7, window_bounds = array<i64: 512, 128>}, {pipeline_mode = #tpu.pipeline_mode<synchronous>, transform_indices = @transform_8, window_bounds = array<i64: 1, 128>}, {transform_indices = @transform_9, window_bounds = array<i64: 384, 128>}]} {
    %c0 = arith.constant 0 : index
    %c0_0 = arith.constant 0 : index
    %0 = vector.load %arg1[%c0, %c0_0] : memref<384x128xf32, #tpu.memory_space<vmem>>, vector<384x128xf32>
    %1 = arith.truncf %0 : vector<384x128xf32> to vector<384x128xbf16>
    %c0_1 = arith.constant 0 : index
    %c0_2 = arith.constant 0 : index
    %2 = vector.load %arg2[%c0_1, %c0_2] : memref<128x128xbf16, #tpu.memory_space<vmem>>, vector<128x128xbf16>
    %cst = arith.constant dense<0.000000e+00> : vector<384x128xf32>
    %3 = tpu.matmul %1, %2, %cst {dimension_numbers = #tpu.dot_dimension_numbers<[1], [0], [0], [1], [0, 0, 1, 1], [], []>} : vector<384x128xbf16>, vector<128x128xbf16>, vector<384x128xf32> -> vector<384x128xf32>
    %c0_3 = arith.constant 0 : index
    %c0_4 = arith.constant 0 : index
    %4 = vector.load %arg3[%c0_3, %c0_4] : memref<1x128xf32, #tpu.memory_space<vmem>>, vector<1x128xf32>
    %5 = vector.broadcast %4 : vector<1x128xf32> to vector<384x128xf32>
    %6 = arith.addf %3, %5 : vector<384x128xf32>
    %7 = arith.truncf %6 : vector<384x128xf32> to vector<384x128xbf16>
    %cst_5 = arith.constant 0.000000e+00 : bf16
    %8 = vector.broadcast %cst_5 : bf16 to vector<384x128xbf16>
    %9 = arith.maximumf %7, %8 : vector<384x128xbf16>
    %c0_6 = arith.constant 0 : index
    %c0_7 = arith.constant 0 : index
    %10 = vector.load %arg4[%c0_6, %c0_7] : memref<128x256xbf16, #tpu.memory_space<vmem>>, vector<128x256xbf16>
    %cst_8 = arith.constant dense<0.000000e+00> : vector<384x256xf32>
    %11 = tpu.matmul %9, %10, %cst_8 {dimension_numbers = #tpu.dot_dimension_numbers<[1], [0], [0], [1], [0, 0, 1, 1], [], []>} : vector<384x128xbf16>, vector<128x256xbf16>, vector<384x256xf32> -> vector<384x256xf32>
    %c0_9 = arith.constant 0 : index
    %c0_10 = arith.constant 0 : index
    %12 = vector.load %arg5[%c0_9, %c0_10] : memref<1x256xf32, #tpu.memory_space<vmem>>, vector<1x256xf32>
    %13 = vector.broadcast %12 : vector<1x256xf32> to vector<384x256xf32>
    %14 = arith.addf %11, %13 : vector<384x256xf32>
    %15 = arith.truncf %14 : vector<384x256xf32> to vector<384x256xbf16>
    %cst_11 = arith.constant 0.000000e+00 : bf16
    %16 = vector.broadcast %cst_11 : bf16 to vector<384x256xbf16>
    %17 = arith.maximumf %15, %16 : vector<384x256xbf16>
    %c0_12 = arith.constant 0 : index
    %c0_13 = arith.constant 0 : index
    %18 = vector.load %arg6[%c0_12, %c0_13] : memref<256x512xbf16, #tpu.memory_space<vmem>>, vector<256x512xbf16>
    %cst_14 = arith.constant dense<0.000000e+00> : vector<384x512xf32>
    %19 = tpu.matmul %17, %18, %cst_14 {dimension_numbers = #tpu.dot_dimension_numbers<[1], [0], [0], [1], [0, 0, 1, 1], [], []>} : vector<384x256xbf16>, vector<256x512xbf16>, vector<384x512xf32> -> vector<384x512xf32>
    %c0_15 = arith.constant 0 : index
    %c0_16 = arith.constant 0 : index
    %20 = vector.load %arg7[%c0_15, %c0_16] : memref<1x512xf32, #tpu.memory_space<vmem>>, vector<1x512xf32>
    %21 = vector.broadcast %20 : vector<1x512xf32> to vector<384x512xf32>
    %22 = arith.addf %19, %21 : vector<384x512xf32>
    %23 = arith.truncf %22 : vector<384x512xf32> to vector<384x512xbf16>
    %cst_17 = arith.constant 0.000000e+00 : bf16
    %24 = vector.broadcast %cst_17 : bf16 to vector<384x512xbf16>
    %25 = arith.maximumf %23, %24 : vector<384x512xbf16>
    %c0_18 = arith.constant 0 : index
    %c0_19 = arith.constant 0 : index
    %26 = vector.load %arg8[%c0_18, %c0_19] : memref<512x128xbf16, #tpu.memory_space<vmem>>, vector<512x128xbf16>
    %cst_20 = arith.constant dense<0.000000e+00> : vector<384x128xf32>
    %27 = tpu.matmul %25, %26, %cst_20 {dimension_numbers = #tpu.dot_dimension_numbers<[1], [0], [0], [1], [0, 0, 1, 1], [], []>} : vector<384x512xbf16>, vector<512x128xbf16>, vector<384x128xf32> -> vector<384x128xf32>
    %c0_21 = arith.constant 0 : index
    %c0_22 = arith.constant 0 : index
    %28 = vector.load %arg9[%c0_21, %c0_22] : memref<1x128xf32, #tpu.memory_space<vmem>>, vector<1x128xf32>
    %29 = vector.broadcast %28 : vector<1x128xf32> to vector<384x128xf32>
    %30 = arith.addf %27, %29 : vector<384x128xf32>
    %31 = arith.negf %30 : vector<384x128xf32>
    %32 = math.exp %31 : vector<384x128xf32>
    %cst_23 = arith.constant 1.000000e+00 : f32
    %33 = vector.broadcast %cst_23 : f32 to vector<384x128xf32>
    %34 = arith.addf %33, %32 : vector<384x128xf32>
    %35 = arith.divf %33, %34 : vector<384x128xf32>
    %c0_24 = arith.constant 0 : index
    %c0_25 = arith.constant 0 : index
    %36 = vector.load %arg10[%c0_24, %c0_25] : memref<384x128xf32, #tpu.memory_space<vmem>>, vector<384x128xf32>
    tpu.vector_store %arg10[%c0_24, %c0_25], %35 {strides = array<i32>} : memref<384x128xf32, #tpu.memory_space<vmem>>, vector<384x128xf32>,
    return
  }
  func.func @transform_0(%arg0: i32) -> (i32, i32) {
    %c0_i32 = arith.constant 0 : i32
    %c0_i32_0 = arith.constant 0 : i32
    return %arg0, %c0_i32 : i32, i32
  }
  func.func @transform_1(%arg0: i32) -> (i32, i32) {
    %c0_i32 = arith.constant 0 : i32
    %c0_i32_0 = arith.constant 0 : i32
    %c0_i32_1 = arith.constant 0 : i32
    return %c0_i32, %c0_i32_0 : i32, i32
  }
  func.func @transform_2(%arg0: i32) -> (i32, i32) {
    %c0_i32 = arith.constant 0 : i32
    %c0_i32_0 = arith.constant 0 : i32
    %c0_i32_1 = arith.constant 0 : i32
    return %c0_i32, %c0_i32_0 : i32, i32
  }
  func.func @transform_3(%arg0: i32) -> (i32, i32) {
    %c0_i32 = arith.constant 0 : i32
    %c0_i32_0 = arith.constant 0 : i32
    %c0_i32_1 = arith.constant 0 : i32
    return %c0_i32, %c0_i32_0 : i32, i32
  }
  func.func @transform_4(%arg0: i32) -> (i32, i32) {
    %c0_i32 = arith.constant 0 : i32
    %c0_i32_0 = arith.constant 0 : i32
    %c0_i32_1 = arith.constant 0 : i32
    return %c0_i32, %c0_i32_0 : i32, i32
  }
  func.func @transform_5(%arg0: i32) -> (i32, i32) {
    %c0_i32 = arith.constant 0 : i32
    %c0_i32_0 = arith.constant 0 : i32
    %c0_i32_1 = arith.constant 0 : i32
    return %c0_i32, %c0_i32_0 : i32, i32
  }
  func.func @transform_6(%arg0: i32) -> (i32, i32) {
    %c0_i32 = arith.constant 0 : i32
    %c0_i32_0 = arith.constant 0 : i32
    %c0_i32_1 = arith.constant 0 : i32
    return %c0_i32, %c0_i32_0 : i32, i32
  }
  func.func @transform_7(%arg0: i32) -> (i32, i32) {
    %c0_i32 = arith.constant 0 : i32
    %c0_i32_0 = arith.constant 0 : i32
    %c0_i32_1 = arith.constant 0 : i32
    return %c0_i32, %c0_i32_0 : i32, i32
  }
  func.func @transform_8(%arg0: i32) -> (i32, i32) {
    %c0_i32 = arith.constant 0 : i32
    %c0_i32_0 = arith.constant 0 : i32
    %c0_i32_1 = arith.constant 0 : i32
    return %c0_i32, %c0_i32_0 : i32, i32
  }
  func.func @transform_9(%arg0: i32) -> (i32, i32) {
    %c0_i32 = arith.constant 0 : i32
    %c0_i32_0 = arith.constant 0 : i32
    return %arg0, %c0_i32 : i32, i32
  }
}

</mosaic_0001>

<bundles_post_ra>
// kernel: tpu_custom_call.1
= control target key start
LH: loop header
LB: loop body
LE: loop exit
PB: predicated region body
PF: predicated region fallthrough
CT: control target
= control target key end

     0   :  { %14 = vsyncpa [#allocation3], 0  ;;  %s5258_s0 = inlined_call_operand.hbm [shape: f32[384,128], index: 0, kind: input, shape index: {}]   ;;  %s5259_s1 = inlined_call_operand.hbm [shape: bf16[128,128], index: 1, kind: input, shape index: {}]   ;;  %s5260_s2 = inlined_call_operand.vmem [shape: f32[1,128], index: 2, kind: input, shape index: {}]   ;;  %s5261_s3 = inlined_call_operand.hbm [shape: bf16[128,256], index: 3, kind: input, shape index: {}]   ;;  %s5262_s4 = inlined_call_operand.vmem [shape: f32[1,256], index: 4, kind: input, shape index: {}]   ;;  %s5263_s5 = inlined_call_operand.hbm [shape: bf16[256,512], index: 5, kind: input, shape index: {}]   ;;  %s5264_s6 = inlined_call_operand.vmem [shape: f32[1,512], index: 6, kind: input, shape index: {}]   ;;  %s5265_s7 = inlined_call_operand.hbm [shape: bf16[512,128], index: 7, kind: input, shape index: {}]   ;;  %s5266_s8 = inlined_call_operand.vmem [shape: f32[1,128], index: 8, kind: input, shape index: {}]   ;;  %s5267_s9 = inlined_call_operand.hbm [shape: f32[384,128], index: 9, kind: output, shape index: {}]  }
   0x1   :  { %15 = vsyncpa [#allocation6], 0 }
   0x2   :  { %16 = vsyncpa [#allocation9], 0 }
   0x3   :  { %17 = vsyncpa [#allocation4], 0  ;;  %s4119_s30 = smov [#allocation5]   ;;  %s3979_s13 = scalar_lea.hbm %s5259_s1, 1024 }
   0x4   :  { %s35_s10 = sshll.u32 %s4119_s30, 4  ;;  %p3980_p0 = scmp.ne.s32.totalorder %s5259_s1, %s3979_s13  ;;  %s36_s10 = int_to_ptr.vmem [resolvable:$true] %s35_s10 }
   0x5   :  { %p3983_p1 = scmp.lt.u32.totalorder %s3979_s13, %s5259_s1 }
   0x7   :  { %p3985_p2 = pnand %p3983_p1, %p3980_p0 }
   0x9   :  { %3988 = shalt.err (!%p3985_p2)
}
   0xa   :  { %s3989_s18 = scalar_lea.vmem %s36_s10, 1024  ;;  %p3994_p4 = scmp.lt.s32.totalorder %s36_s10, %s36_s10 }
   0xb   :  { %p3990_p3 = scmp.ne.s32.totalorder %s36_s10, %s3989_s18  ;;  %p3995_p5 = scmp.lt.s32.totalorder %s3989_s18, %s3989_s18 }
   0xd   :  { %p3996_p6 = por %p3995_p5, %p3994_p4 }
   0xf   :  { %p3997_p7 = pnand %p3996_p6, %p3990_p3 }
  0x11   :  { %4000 = shalt.err (!%p3997_p7)
}
  0x12   :  { %s4120_s19 = smov 64   ;;  %s4121_s20 = smov 4  }
  0x13   :  { %41 = dma.hbm_to_vmem [thread:$0]  %s5259_s1, 1024, %s36_s10, [#allocation6], %s4120_s19, %s4120_s19, %s4121_s20  }
  0x14   :  { %s4122_s23 = smov [#allocation8]   ;;  %s4001_s27 = scalar_lea.hbm %s5263_s5, 8192 }
  0x15   :  { %s63_s24 = sshll.u32 %s4122_s23, 4  ;;  %p4002_p8 = scmp.ne.s32.totalorder %s5263_s5, %s4001_s27  ;;  %s64_s24 = int_to_ptr.vmem [resolvable:$true] %s63_s24 }
  0x16   :  { %p4005_p9 = scmp.lt.u32.totalorder %s4001_s27, %s5263_s5 }
  0x18   :  { %p4007_p10 = pnand %p4005_p9, %p4002_p8 }
  0x1a   :  { %4010 = shalt.err (!%p4007_p10)
}
  0x1b   :  { %s4011_s12 = scalar_lea.vmem %s64_s24, 8192  ;;  %p4016_p12 = scmp.lt.s32.totalorder %s64_s24, %s64_s24 }
  0x1c   :  { %p4012_p11 = scmp.ne.s32.totalorder %s64_s24, %s4011_s12  ;;  %p4017_p13 = scmp.lt.s32.totalorder %s4011_s12, %s4011_s12 }
  0x1e   :  { %p4018_p0 = por %p4017_p13, %p4016_p12 }
  0x20   :  { %p4019_p1 = pnand %p4018_p0, %p4012_p11 }
  0x22   :  { %4022 = shalt.err (!%p4019_p1)
}
  0x23   :  { %s4123_s1 = smov 256   ;;  %s4124_s10 = smov 16  }
  0x24   :  { %69 = dma.hbm_to_vmem [thread:$0]  %s5263_s5, 8192, %s64_s24, [#allocation9], %s4123_s1, %s4123_s1, %s4124_s10  }
  0x25   :  { %s4125_s15 = smov [#allocation2]   ;;  %s4023_s21 = scalar_lea.hbm %s5258_s0, 6144 }
  0x26   :  { %s23_s16 = sshll.u32 %s4125_s15, 4  ;;  %p4024_p2 = scmp.ne.s32.totalorder %s5258_s0, %s4023_s21  ;;  %s24_s16 = int_to_ptr.vmem [resolvable:$true] %s23_s16 }
  0x27   :  { %p4027_p3 = scmp.lt.u32.totalorder %s4023_s21, %s5258_s0 }
  0x29   :  { %p4029_p4 = pnand %p4027_p3, %p4024_p2 }
  0x2b   :  { %4032 = shalt.err (!%p4029_p4)
}
  0x2c   :  { %s4033_s27 = scalar_lea.vmem %s24_s16, 6144  ;;  %p4038_p6 = scmp.lt.s32.totalorder %s24_s16, %s24_s16 }
  0x2d   :  { %p4034_p5 = scmp.ne.s32.totalorder %s24_s16, %s4033_s27  ;;  %p4039_p7 = scmp.lt.s32.totalorder %s4033_s27, %s4033_s27 }
  0x2f   :  { %p4040_p8 = por %p4039_p7, %p4038_p6 }
  0x31   :  { %p4041_p9 = pnand %p4040_p8, %p4034_p5 }
  0x33   :  { %4044 = shalt.err (!%p4041_p9)
}
  0x34   :  { %s4126_s5 = smov 128   ;;  %s4127_s24 = smov 8  }
  0x35   :  { %29 = dma.hbm_to_vmem [thread:$0]  %s5258_s0, 6144, %s24_s16, [#allocation3], %s4126_s5, %s4126_s5, %s4127_s24  }
  0x36   :  { %s4128_s30 = smov [#allocation7]   ;;  %s4129_s12 = smov [#allocation10]  }
  0x37   :  { %s49_s11 = sshll.u32 %s4128_s30, 4  ;;  %s77_s1 = sshll.u32 %s4129_s12, 4  ;;  %s50_s11 = int_to_ptr.vmem [resolvable:$true] %s49_s11  ;;  %s78_s1 = int_to_ptr.vmem [resolvable:$true] %s77_s1 }
  0x38   :  { %s4045_s14 = scalar_lea.hbm %s5261_s3, 2048 }
  0x39   :  { %p4046_p10 = scmp.ne.s32.totalorder %s5261_s3, %s4045_s14  ;;  %p4049_p11 = scmp.lt.u32.totalorder %s4045_s14, %s5261_s3 }
  0x3b   :  { %p4051_p12 = pnand %p4049_p11, %p4046_p10 }
  0x3d   :  { %4054 = shalt.err (!%p4051_p12)
}
  0x3e   :  { %s4055_s0 = scalar_lea.vmem %s50_s11, 2048  ;;  %p4060_p0 = scmp.lt.s32.totalorder %s50_s11, %s50_s11 }
  0x3f   :  { %p4056_p13 = scmp.ne.s32.totalorder %s50_s11, %s4055_s0  ;;  %p4061_p1 = scmp.lt.s32.totalorder %s4055_s0, %s4055_s0 }
  0x41   :  { %p4062_p2 = por %p4061_p1, %p4060_p0 }
  0x43   :  { %p4063_p3 = pnand %p4062_p2, %p4056_p13 }
  0x45   :  { %4066 = shalt.err (!%p4063_p3)
}
  0x46   :  { %55 = dma.hbm_to_vmem [thread:$0]  %s5261_s3, 2048, %s50_s11, [#allocation6], %s4126_s5, %s4126_s5, %s4127_s24  }
  0x47   :  { %s4067_s26 = scalar_lea.hbm %s5265_s7, 4096 }
  0x48   :  { %p4068_p4 = scmp.ne.s32.totalorder %s5265_s7, %s4067_s26  ;;  %p4071_p5 = scmp.lt.u32.totalorder %s4067_s26, %s5265_s7 }
  0x4a   :  { %p4073_p6 = pnand %p4071_p5, %p4068_p4 }
  0x4c   :  { %4076 = shalt.err (!%p4073_p6)
}
  0x4d   :  { %s4077_s12 = scalar_lea.vmem %s78_s1, 4096  ;;  %p4082_p8 = scmp.lt.s32.totalorder %s78_s1, %s78_s1 }
  0x4e   :  { %p4078_p7 = scmp.ne.s32.totalorder %s78_s1, %s4077_s12  ;;  %p4083_p9 = scmp.lt.s32.totalorder %s4077_s12, %s4077_s12 }
  0x50   :  { %p4084_p10 = por %p4083_p9, %p4082_p8 }
  0x52   :  { %p4085_p11 = pnand %p4084_p10, %p4078_p7 }
  0x54   :  { %4088 = shalt.err (!%p4085_p11)
}
  0x55   :  { %83 = dma.hbm_to_vmem [thread:$0]  %s5265_s7, 4096, %s78_s1, [#allocation9], %s4120_s19, %s4120_s19, %s4121_s20  }
  0x56   :  { %4111 = dma.done.wait [#allocation3], 6144  }
  0x57   :  { %4112 = vsyncadd [#allocation3], 4294961152 }
  0x58   :  { %4113 = dma.done.wait [#allocation6], 3072  }
  0x59   :  { %4114 = vsyncadd [#allocation6], 4294964224 }
  0x5a   :  { %4115 = dma.done.wait [#allocation9], 12288  }
  0x5b   :  { %4116 = vsyncadd [#allocation9], 4294955008  ;;  %v3626_v0 = vld [vmem:[#allocation5] sm:$0xff]   ;;  %v3627_v1 = vld [vmem:[#allocation5 + $0x8] sm:$0xff]  }
  0x5c   :  { %3409 = vmatprep.subr.bf16.mxu0 %v3626_v0  ;;  %v3628_v2 = vld [vmem:[#allocation5 + $0x10] sm:$0xff]   ;;  %v3629_v3 = vld [vmem:[#allocation5 + $0x18] sm:$0xff]   ;;  %v102_v4 = vld [vmem:[#allocation2] sm:$0xff] }
  0x5d   :  { %3410 = vmatpush3.bf16.msra.mxu0 %v3626_v0  ;;  %v103_v5 = vld [vmem:[#allocation2 + $0x8] sm:$0xff]  ;;  %v3630_v7 = vld [vmem:[#allocation5 + $0x20] sm:$0xff]   ;;  %v3632_v9 = vld [vmem:[#allocation5 + $0x30] sm:$0xff]  }
  0x5e   :  { %3411 = vmatprep.subr.bf16.mxu0 %v3627_v1  ;;  %v150_v6 = vpack.c.bf16 %v103_v5, %v102_v4  ;;  %v3631_v8 = vld [vmem:[#allocation5 + $0x28] sm:$0xff]   ;;  %v3633_v10 = vld [vmem:[#allocation5 + $0x38] sm:$0xff]   ;;  %v104_v12 = vld [vmem:[#allocation2 + $0x10] sm:$0xff] }
  0x5f   :  { %v3634_v11 = vld [vmem:[#allocation7 + $0x4] ss:$8 sps:$4 sm:$0xff]   ;;  %v105_v13 = vld [vmem:[#allocation2 + $0x18] sm:$0xff]  ;;  %v3636_v14 = vld [vmem:[#allocation7] ss:$8 sps:$4 sm:$0xff]  }
  0x60   :  { %3425 = vmatprep.mubr.bf16.mxu0 %v150_v6  ;;  %v106_v15 = vld [vmem:[#allocation2 + $0x20] sm:$0xff]  ;;  %626 = vmatprep.subr.bf16.mxu1 %v3634_v11  ;;  %v3637_v16 = vld [vmem:[#allocation7 + $0x14] ss:$8 sps:$4 sm:$0xff]   ;;  %v107_v17 = vld [vmem:[#allocation2 + $0x28] sm:$0xff]  ;;  %v151_v20 = vpack.c.bf16 %v105_v13, %v104_v12 }
  0x61   :  { %3412 = vmatpush3.bf16.msra.mxu0 %v3627_v1  ;;  %627 = vmatpush1.bf16.msra.mxu1 %v3636_v14  ;;  %v3639_v18 = vld [vmem:[#allocation7 + $0x10] ss:$8 sps:$4 sm:$0xff]   ;;  %v3640_v19 = vld [vmem:[#allocation7 + $0x24] ss:$8 sps:$4 sm:$0xff]   ;;  %v152_v21 = vpack.c.bf16 %v107_v17, %v106_v15  ;;  %v3642_v22 = vld [vmem:[#allocation7 + $0x20] ss:$8 sps:$4 sm:$0xff]  }
  0x62   :  { %3413 = vmatprep.subr.bf16.mxu0 %v3628_v2  ;;  %628 = vmatprep.subr.bf16.mxu1 %v3637_v16  ;;  %v3643_v23 = vld [vmem:[#allocation7 + $0x34] ss:$8 sps:$4 sm:$0xff]   ;;  %v3645_v26 = vld [vmem:[#allocation7 + $0x30] ss:$8 sps:$4 sm:$0xff]   ;;  %v110_v27 = vld [vmem:[#allocation2 + $0x40] sm:$0xff] }
  0x63   :  { %v108_v24 = vld [vmem:[#allocation2 + $0x30] sm:$0xff]  ;;  %v109_v25 = vld [vmem:[#allocation2 + $0x38] sm:$0xff]  ;;  %v111_v28 = vld [vmem:[#allocation2 + $0x48] sm:$0xff] }
  0x64   :  { %v3646_v29 = vld [vmem:[#allocation7 + $0x44] ss:$8 sps:$4 sm:$0xff]   ;;  %v3648_v30 = vld [vmem:[#allocation7 + $0x40] ss:$8 sps:$4 sm:$0xff]   ;;  %v153_v31 = vpack.c.bf16 %v109_v25, %v108_v24  ;;  %v3649_v32 = vld [vmem:[#allocation7 + $0x54] ss:$8 sps:$4 sm:$0xff]   ;;  %v154_v33 = vpack.c.bf16 %v111_v28, %v110_v27 }
  0x65   :  { %3414 = vmatpush3.bf16.msra.mxu0 %v3628_v2  ;;  %629 = vmatpush1.bf16.msra.mxu1 %v3639_v18  ;;  %v112_v34 = vld [vmem:[#allocation2 + $0x50] sm:$0xff]  ;;  %v113_v35 = vld [vmem:[#allocation2 + $0x58] sm:$0xff]  ;;  %v114_v37 = vld [vmem:[#allocation2 + $0x60] sm:$0xff] }
  0x66   :  { %3415 = vmatprep.subr.bf16.mxu0 %v3629_v3  ;;  %630 = vmatprep.subr.bf16.mxu1 %v3640_v19  ;;  %v3651_v36 = vld [vmem:[#allocation7 + $0x50] ss:$8 sps:$4 sm:$0xff]   ;;  %v115_v38 = vld [vmem:[#allocation2 + $0x68] sm:$0xff]  ;;  %v155_v39 = vpack.c.bf16 %v113_v35, %v112_v34  ;;  %v118_v43 = vld [vmem:[#allocation2 + $0x80] sm:$0xff] }
  0x67   :  { %v156_v40 = vpack.c.bf16 %v115_v38, %v114_v37  ;;  %v116_v41 = vld [vmem:[#allocation2 + $0x70] sm:$0xff]  ;;  %v117_v42 = vld [vmem:[#allocation2 + $0x78] sm:$0xff]  ;;  %v119_v44 = vld [vmem:[#allocation2 + $0x88] sm:$0xff] }
  0x68   :  { %v157_v45 = vpack.c.bf16 %v117_v42, %v116_v41  ;;  %v158_v46 = vpack.c.bf16 %v119_v44, %v118_v43  ;;  %v120_v47 = vld [vmem:[#allocation2 + $0x90] sm:$0xff]  ;;  %v121_v48 = vld [vmem:[#allocation2 + $0x98] sm:$0xff]  ;;  %v122_v49 = vld [vmem:[#allocation2 + $0xa0] sm:$0xff] }
  0x69   :  { %3416 = vmatpush3.bf16.msra.mxu0 %v3629_v3  ;;  %631 = vmatpush1.bf16.msra.mxu1 %v3642_v22  ;;  %v123_v50 = vld [vmem:[#allocation2 + $0xa8] sm:$0xff]  ;;  %v159_v51 = vpack.c.bf16 %v121_v48, %v120_v47  ;;  %v124_v53 = vld [vmem:[#allocation2 + $0xb0] sm:$0xff]  ;;  %v125_v54 = vld [vmem:[#allocation2 + $0xb8] sm:$0xff] }
  0x6a   :  { %3417 = vmatprep.subr.bf16.mxu0 %v3630_v7  ;;  %632 = vmatprep.subr.bf16.mxu1 %v3643_v23  ;;  %v160_v52 = vpack.c.bf16 %v123_v50, %v122_v49  ;;  %v126_v55 = vld [vmem:[#allocation2 + $0xc0] sm:$0xff]  ;;  %v127_v56 = vld [vmem:[#allocation2 + $0xc8] sm:$0xff]  ;;  %v161_v57 = vpack.c.bf16 %v125_v54, %v124_v53  ;;  %v128_v59 = vld [vmem:[#allocation2 + $0xd0] sm:$0xff] }
  0x6b   :  { %v162_v58 = vpack.c.bf16 %v127_v56, %v126_v55  ;;  %v129_v60 = vld [vmem:[#allocation2 + $0xd8] sm:$0xff]  ;;  %v130_v61 = vld [vmem:[#allocation2 + $0xe0] sm:$0xff]  ;;  %v131_v62 = vld [vmem:[#allocation2 + $0xe8] sm:$0xff] }
  0x6c   :  { %v163_v63 = vpack.c.bf16 %v129_v60, %v128_v59  ;;  %v164_v0 = vpack.c.bf16 %v131_v62, %v130_v61  ;;  %v132_v1 = vld [vmem:[#allocation2 + $0xf0] sm:$0xff]  ;;  %v133_v2 = vld [vmem:[#allocation2 + $0xf8] sm:$0xff]  ;;  %v134_v3 = vld [vmem:[#allocation2 + $0x100] sm:$0xff] }
  0x6d   :  { %3418 = vmatpush3.bf16.msra.mxu0 %v3630_v7  ;;  %633 = vmatpush1.bf16.msra.mxu1 %v3645_v26  ;;  %v135_v4 = vld [vmem:[#allocation2 + $0x108] sm:$0xff]  ;;  %v165_v5 = vpack.c.bf16 %v133_v2, %v132_v1  ;;  %v136_v7 = vld [vmem:[#allocation2 + $0x110] sm:$0xff]  ;;  %v141_v14 = vld [vmem:[#allocation2 + $0x138] sm:$0xff] }
  0x6e   :  { %3419 = vmatprep.subr.bf16.mxu0 %v3631_v8  ;;  %634 = vmatprep.subr.bf16.mxu1 %v3646_v29  ;;  %v166_v6 = vpack.c.bf16 %v135_v4, %v134_v3  ;;  %v140_v13 = vld [vmem:[#allocation2 + $0x130] sm:$0xff]  ;;  %v142_v15 = vld [vmem:[#allocation2 + $0x140] sm:$0xff]  ;;  %v143_v16 = vld [vmem:[#allocation2 + $0x148] sm:$0xff] }
  0x6f   :  { %v169_v17 = vpack.c.bf16 %v141_v14, %v140_v13  ;;  %v170_v18 = vpack.c.bf16 %v143_v16, %v142_v15  ;;  %v144_v19 = vld [vmem:[#allocation2 + $0x150] sm:$0xff]  ;;  %v147_v22 = vld [vmem:[#allocation2 + $0x168] sm:$0xff]  ;;  %v149_v26 = vld [vmem:[#allocation2 + $0x178] sm:$0xff] }
  0x70   :  { %v148_v25 = vld [vmem:[#allocation2 + $0x170] sm:$0xff]  ;;  %v3652_v27 = vld [vmem:[#allocation7 + $0x64] ss:$8 sps:$4 sm:$0xff]   ;;  %v3654_v29 = vld [vmem:[#allocation7 + $0x60] ss:$8 sps:$4 sm:$0xff]  }
  0x71   :  { %3420 = vmatpush3.bf16.msra.mxu0 %v3631_v8  ;;  %635 = vmatpush1.bf16.msra.mxu1 %v3648_v30  ;;  %v137_v8 = vld [vmem:[#allocation2 + $0x118] sm:$0xff]  ;;  %v173_v28 = vpack.c.bf16 %v149_v26, %v148_v25  ;;  %v4258_v35 = vld [vmem:[%s5260_s2] ss:$0 sm:$0xff]  ;;  %v3678_v56 = vld [vmem:[#allocation8 + $0x24] ss:$16 sps:$4 sm:$0xff]  }
  0x72   :  { %3421 = vmatprep.subr.bf16.mxu0 %v3632_v9  ;;  %636 = vmatprep.subr.bf16.mxu1 %v3649_v32  ;;  %v167_v11 = vpack.c.bf16 %v137_v8, %v136_v7  ;;  %v3655_v30 = vld [vmem:[#allocation7 + $0x74] ss:$8 sps:$4 sm:$0xff]   ;;  %v4130_v32 = vmov 0   ;;  %v3670_v38 = vld [vmem:[#allocation8] ss:$16 sps:$4 sm:$0xff]  }
  0x73   :  { %658 = vmatprep.mubr.bf16.mxu1 %v4130_v32  ;;  %v3658_v47 = vld [vmem:[#allocation8 + $0x8] ss:$16 sps:$4 sm:$0xff]   ;;  %v3663_v50 = vld [vmem:[#allocation8 + $0x2c] ss:$16 sps:$4 sm:$0xff]   ;;  %v3676_v55 = vld [vmem:[#allocation8 + $0x20] ss:$16 sps:$4 sm:$0xff]  }
  0x74   :  { %v3661_v59 = vld [vmem:[#allocation8 + $0x28] ss:$16 sps:$4 sm:$0xff]   ;;  %v3666_v61 = vld [vmem:[#allocation8 + $0x4c] ss:$16 sps:$4 sm:$0xff]   ;;  %v3679_v8 = vld [vmem:[#allocation8 + $0x40] ss:$16 sps:$4 sm:$0xff]  }
  0x75   :  { %3422 = vmatpush3.bf16.msra.mxu0 %v3632_v9  ;;  %637 = vmatpush1.bf16.msra.mxu1 %v3651_v36  ;;  %v138_v9 = vld [vmem:[#allocation2 + $0x120] sm:$0xff]  ;;  %v3669_v3 = vld [vmem:[#allocation8 + $0x6c] ss:$16 sps:$4 sm:$0xff]  }
  0x76   :  { %3423 = vmatprep.subr.bf16.mxu0 %v3633_v10  ;;  %638 = vmatprep.subr.bf16.mxu1 %v3652_v27  ;;  %v3675_v14 = vld [vmem:[#allocation8 + $0x8c] ss:$16 sps:$4 sm:$0xff]   ;;  %v3687_v15 = vld [vmem:[#allocation8 + $0x64] ss:$16 sps:$4 sm:$0xff]   ;;  %v3688_v27 = vld [vmem:[#allocation8 + $0x80] ss:$16 sps:$4 sm:$0xff]  }
  0x79   :  { %3424 = vmatpush3.bf16.msra.mxu0 %v3633_v10  ;;  %v139_v10 = vld [vmem:[#allocation2 + $0x128] sm:$0xff]  ;;  %639 = vmatpush1.bf16.msra.mxu1 %v3654_v29 }
  0x7a   :  { %v168_v12 = vpack.c.bf16 %v139_v10, %v138_v9  ;;  %640 = vmatprep.subr.bf16.mxu1 %v3655_v30  ;;  %v3681_v9 = vld [vmem:[#allocation8 + $0x44] ss:$16 sps:$4 sm:$0xff]  }
  0x7c   :  { %3426 = vmatmul.mubr.bf16.vlgmr.msra.gmra.mrb[0].mxu0 %v151_v20  ;;  %v145_v20 = vld [vmem:[#allocation2 + $0x158] sm:$0xff] }
  0x7d   :  { %3429 = vmatprep.mubr.bf16.mxu0 %v152_v21  ;;  %v146_v21 = vld [vmem:[#allocation2 + $0x160] sm:$0xff]  ;;  %v171_v23 = vpack.c.bf16 %v145_v20, %v144_v19  ;;  %v3673_v19 = vld [vmem:[#allocation8 + $0x88] ss:$16 sps:$4 sm:$0xff]  }
  0x7e   :  { %v172_v24 = vpack.c.bf16 %v147_v22, %v146_v21  ;;  %v3684_v22 = vld [vmem:[#allocation8 + $0xac] ss:$16 sps:$4 sm:$0xff]  }
  0x84   :  { %3430 = vmatmul.mubr.bf16.gmra.mrb[4].mxu0 %v153_v31  ;;  %v3657_v31 = vld [vmem:[#allocation7 + $0x70] ss:$8 sps:$4 sm:$0xff]  }
  0x85   :  { %3433 = vmatprep.mubr.bf16.mxu0 %v154_v33  ;;  %641 = vmatpush1.bf16.msra.mxu1 %v3657_v31  ;;  %v3660_v33 = vld [vmem:[#allocation8 + $0xc] ss:$16 sps:$4 sm:$0xff]   ;;  %v3682_v31 = vld [vmem:[#allocation8 + $0xa8] ss:$16 sps:$4 sm:$0xff]  }
  0x86   :  { %1674 = vmatprep.subr.bf16.mxu1 %v3660_v33 }
  0x8c   :  { %3434 = vmatmul.mubr.bf16.gmra.mrb[8].mxu0 %v155_v39  ;;  %v3672_v39 = vld [vmem:[#allocation8 + $0x4] ss:$16 sps:$4 sm:$0xff]  }
  0x8d   :  { %3437 = vmatprep.mubr.bf16.mxu0 %v156_v40  ;;  %1401 = vmatprep.subr.bf16.mxu0 %v3672_v39 }
  0x8e   :  { %1402 = vmatpush1.bf16.msra.mxu0 %v3670_v38  ;;  %v3691_v38 = vld [vmem:[#allocation8 + $0xc8] ss:$16 sps:$4 sm:$0xff]  }
  0x8f   :  { %1403 = vmatprep.subr.bf16.mxu0 %v3678_v56 }
  0x92   :  { %1404 = vmatpush1.bf16.msra.mxu0 %v3676_v55 }
  0x93   :  { %1405 = vmatprep.subr.bf16.mxu0 %v3681_v9 }
  0x94   :  { %3438 = vmatmul.mubr.bf16.gmra.mrb[12].mxu0 %v157_v45 }
  0x95   :  { %3441 = vmatprep.mubr.bf16.mxu0 %v158_v46 }
  0x96   :  { %1406 = vmatpush1.bf16.msra.mxu0 %v3679_v8 }
  0x97   :  { %1407 = vmatprep.subr.bf16.mxu0 %v3687_v15 }
  0x9c   :  { %3442 = vmatmul.mubr.bf16.gmra.mrb[16].mxu0 %v159_v51 }
  0x9d   :  { %3445 = vmatprep.mubr.bf16.mxu0 %v160_v52 }
  0xa4   :  { %3446 = vmatmul.mubr.bf16.gmra.mrb[20].mxu0 %v161_v57 }
  0xa5   :  { %3449 = vmatprep.mubr.bf16.mxu0 %v162_v58 }
  0xac   :  { %3450 = vmatmul.mubr.bf16.gmra.mrb[24].mxu0 %v163_v63 }
  0xad   :  { %3453 = vmatprep.mubr.bf16.mxu0 %v164_v0  ;;  %v3664_v0 = vld [vmem:[#allocation8 + $0x48] ss:$16 sps:$4 sm:$0xff]  }
  0xb4   :  { %3454 = vmatmul.mubr.bf16.gmra.mrb[28].mxu0 %v165_v5 }
  0xb5   :  { %3457 = vmatprep.mubr.bf16.mxu0 %v166_v6 }
  0xbc   :  { %3458 = vmatmul.mubr.bf16.gmra.mrb[32].mxu0 %v167_v11 }
  0xbd   :  { %3461 = vmatprep.mubr.bf16.mxu0 %v168_v12  ;;  %v3667_v12 = vld [vmem:[#allocation8 + $0x68] ss:$16 sps:$4 sm:$0xff]  }
  0xc4   :  { %3462 = vmatmul.mubr.bf16.gmra.mrb[36].mxu0 %v169_v17  ;;  %v3685_v17 = vld [vmem:[#allocation8 + $0x60] ss:$16 sps:$4 sm:$0xff]  }
  0xc5   :  { %3465 = vmatprep.mubr.bf16.mxu0 %v170_v18  ;;  %1408 = vmatpush1.bf16.msra.mxu0 %v3685_v17 }
  0xcc   :  { %3466 = vmatmul.mubr.bf16.gmra.mrb[40].mxu0 %v171_v23 }
  0xcd   :  { %3469 = vmatprep.mubr.bf16.mxu0 %v172_v24 }
  0xd4   :  { %3470 = vmatmul.mubr.bf16.gmra.mrb[44].mxu0 %v173_v28  ;;  %v3690_v28 = vld [vmem:[#allocation8 + $0x84] ss:$16 sps:$4 sm:$0xff]  }
  0xd5   :  { %1409 = vmatprep.subr.bf16.mxu0 %v3690_v28  ;;  %v3712_v28 = vld [vmem:[#allocation8 + $0x120] ss:$16 sps:$4 sm:$0xff]  }
  0xd6   :  { %1410 = vmatpush1.bf16.msra.mxu0 %v3688_v27 }
 0x14f   :  { %v3427_v34 = vpop.f32.mrb[0].mxu0 }
 0x150   :  { %v279_v36 = vpop.f32.mrb[1].mxu0  ;;  %v288_v40 = vadd.f32 %v3427_v34, %v4258_v35  ;;  %v3693_v34 = vld [vmem:[#allocation8 + $0xcc] ss:$16 sps:$4 sm:$0xff]  }
 0x151   :  { %v3428_v37 = vpop.f32.mrb[2].mxu0  ;;  %v280_v43 = vadd.f32 %v4258_v35, %v279_v36 }
 0x152   :  { %v291_v41 = vadd.f32 %v3428_v37, %v4258_v35  ;;  %v282_v42 = vpop.f32.mrb[3].mxu0 }
 0x153   :  { %v283_v44 = vadd.f32 %v4258_v35, %v282_v42 }
 0x154   :  { %v471_v45 = vpack.c.bf16 %v291_v41, %v288_v40 }
 0x155   :  { %v470_v46 = vpack.c.bf16 %v283_v44, %v280_v43 }
 0x156   :  { %v495_v1 = vmax.bf16 %v4130_v32, %v471_v45  ;;  %v3694_v45 = vld [vmem:[#allocation8 + $0xa0] ss:$16 sps:$4 sm:$0xff]  }
 0x157   :  { %v494_v48 = vmax.bf16 %v4130_v32, %v470_v46  ;;  %v3431_v49 = vpop.f32.mrb[4].mxu0  ;;  %v3696_v46 = vld [vmem:[#allocation8 + $0xa4] ss:$16 sps:$4 sm:$0xff]  }
 0x158   :  { %v4266_v51 = vadd.f32 %v3431_v49, %v4258_v35  ;;  %v295_v52 = vpop.f32.mrb[5].mxu0  ;;  %1411 = vmatprep.subr.bf16.mxu0 %v3696_v46  ;;  %v3715_v46 = vld [vmem:[#allocation8 + $0x140] ss:$16 sps:$4 sm:$0xff]  }
 0x159   :  { %659 = vmatmul.mubr.bf16.vlgmr.msra.gmra.mrb[0].mxu1 %v494_v48  ;;  %v296_v53 = vadd.f32 %v4258_v35, %v295_v52  ;;  %v3432_v54 = vpop.f32.mrb[6].mxu0  ;;  %1412 = vmatpush1.bf16.msra.mxu0 %v3694_v45 }
 0x15a   :  { %v4270_v57 = vadd.f32 %v3432_v54, %v4258_v35  ;;  %v298_v58 = vpop.f32.mrb[7].mxu0  ;;  %668 = vmatprep.mubr.bf16.mxu1 %v4130_v32  ;;  %1675 = vmatpush1.bf16.msra.mxu1 %v3658_v47 }
 0x15b   :  { %v299_v60 = vadd.f32 %v4258_v35, %v298_v58  ;;  %1676 = vmatprep.subr.bf16.mxu1 %v3663_v50  ;;  %v3697_v58 = vld [vmem:[#allocation8 + $0xc0] ss:$16 sps:$4 sm:$0xff]  }
 0x15c   :  { %v473_v62 = vpack.c.bf16 %v4270_v57, %v4266_v51 }
 0x15d   :  { %v472_v63 = vpack.c.bf16 %v299_v60, %v296_v53 }
 0x15e   :  { %1677 = vmatpush1.bf16.msra.mxu1 %v3661_v59  ;;  %v497_v39 = vmax.bf16 %v4130_v32, %v473_v62  ;;  %v3699_v59 = vld [vmem:[#allocation8 + $0xc4] ss:$16 sps:$4 sm:$0xff]   ;;  %v3700_v62 = vld [vmem:[#allocation8 + $0xe8] ss:$16 sps:$4 sm:$0xff]  }
 0x15f   :  { %v3435_v2 = vpop.f32.mrb[8].mxu0  ;;  %1678 = vmatprep.subr.bf16.mxu1 %v3666_v61  ;;  %v496_v20 = vmax.bf16 %v4130_v32, %v472_v63  ;;  %v3702_v63 = vld [vmem:[#allocation8 + $0xec] ss:$16 sps:$4 sm:$0xff]   ;;  %1413 = vmatprep.subr.bf16.mxu0 %v3699_v59 }
 0x160   :  { %v4278_v4 = vadd.f32 %v3435_v2, %v4258_v35  ;;  %v311_v5 = vpop.f32.mrb[9].mxu0  ;;  %1414 = vmatpush1.bf16.msra.mxu0 %v3697_v58  ;;  %v3721_v58 = vld [vmem:[#allocation8 + $0x160] ss:$16 sps:$4 sm:$0xff]   ;;  %v3729_v59 = vld [vmem:[#allocation8 + $0x14c] ss:$16 sps:$4 sm:$0xff]  }
 0x161   :  { %669 = vmatmul.mubr.bf16.gmra.mrb[4].mxu1 %v495_v1  ;;  %v4281_v6 = vadd.f32 %v4258_v35, %v311_v5  ;;  %v3436_v7 = vpop.f32.mrb[10].mxu0  ;;  %v3705_v1 = vld [vmem:[#allocation8 + $0xe4] ss:$16 sps:$4 sm:$0xff]  }
 0x162   :  { %678 = vmatprep.mubr.bf16.mxu1 %v4130_v32  ;;  %v4285_v10 = vadd.f32 %v3436_v7, %v4258_v35  ;;  %v314_v11 = vpop.f32.mrb[11].mxu0  ;;  %1679 = vmatpush1.bf16.msra.mxu1 %v3664_v0 }
 0x163   :  { %v315_v13 = vadd.f32 %v4258_v35, %v314_v11  ;;  %1680 = vmatprep.subr.bf16.mxu1 %v3669_v3  ;;  %v3703_v3 = vld [vmem:[#allocation8 + $0xe0] ss:$16 sps:$4 sm:$0xff]   ;;  %1415 = vmatprep.subr.bf16.mxu0 %v3705_v1 }
 0x164   :  { %v475_v16 = vpack.c.bf16 %v4285_v10, %v4278_v4  ;;  %1416 = vmatpush1.bf16.msra.mxu0 %v3703_v3  ;;  %v3709_v10 = vld [vmem:[#allocation8 + $0x108] ss:$16 sps:$4 sm:$0xff]  }
 0x165   :  { %v474_v18 = vpack.c.bf16 %v315_v13, %v4281_v6  ;;  %v3706_v13 = vld [vmem:[#allocation8 + $0x100] ss:$16 sps:$4 sm:$0xff]  }
 0x166   :  { %1681 = vmatpush1.bf16.msra.mxu1 %v3667_v12  ;;  %v499_v6 = vmax.bf16 %v4130_v32, %v475_v16  ;;  %v3711_v16 = vld [vmem:[#allocation8 + $0x10c] ss:$16 sps:$4 sm:$0xff]  }
 0x167   :  { %v3439_v21 = vpop.f32.mrb[12].mxu0  ;;  %1682 = vmatprep.subr.bf16.mxu1 %v3675_v14  ;;  %v498_v52 = vmax.bf16 %v4130_v32, %v474_v18  ;;  %v3708_v14 = vld [vmem:[#allocation8 + $0x104] ss:$16 sps:$4 sm:$0xff]  }
 0x168   :  { %v4293_v23 = vadd.f32 %v3439_v21, %v4258_v35  ;;  %v327_v24 = vpop.f32.mrb[13].mxu0  ;;  %1417 = vmatprep.subr.bf16.mxu0 %v3708_v14 }
 0x169   :  { %679 = vmatmul.mubr.bf16.gmra.mrb[8].mxu1 %v496_v20  ;;  %v4296_v25 = vadd.f32 %v4258_v35, %v327_v24  ;;  %v3440_v26 = vpop.f32.mrb[14].mxu0  ;;  %1418 = vmatpush1.bf16.msra.mxu0 %v3706_v13 }
 0x16a   :  { %688 = vmatprep.mubr.bf16.mxu1 %v4130_v32  ;;  %v4300_v29 = vadd.f32 %v3440_v26, %v4258_v35  ;;  %v330_v30 = vpop.f32.mrb[15].mxu0  ;;  %1683 = vmatpush1.bf16.msra.mxu1 %v3673_v19 }
 0x16b   :  { %v4303_v33 = vadd.f32 %v4258_v35, %v330_v30  ;;  %1684 = vmatprep.subr.bf16.mxu1 %v3684_v22  ;;  %v3714_v30 = vld [vmem:[#allocation8 + $0x124] ss:$16 sps:$4 sm:$0xff]  }
 0x16c   :  { %v477_v36 = vpack.c.bf16 %v4300_v29, %v4293_v23  ;;  %1419 = vmatprep.subr.bf16.mxu0 %v3714_v30  ;;  %v3718_v29 = vld [vmem:[#allocation8 + $0x128] ss:$16 sps:$4 sm:$0xff]  }
 0x16d   :  { %v476_v37 = vpack.c.bf16 %v4303_v33, %v4296_v25  ;;  %1420 = vmatpush1.bf16.msra.mxu0 %v3712_v28  ;;  %v3736_v28 = vld [vmem:[#allocation8 + $0x188] ss:$16 sps:$4 sm:$0xff]  }
 0x16e   :  { %1685 = vmatpush1.bf16.msra.mxu1 %v3682_v31 }
 0x16f   :  { %v3443_v40 = vpop.f32.mrb[16].mxu0  ;;  %1686 = vmatprep.subr.bf16.mxu1 %v3693_v34  ;;  %v500_v20 = vmax.bf16 %v4130_v32, %v476_v37 }
 0x170   :  { %v4311_v41 = vadd.f32 %v3443_v40, %v4258_v35  ;;  %v343_v42 = vpop.f32.mrb[17].mxu0 }
 0x171   :  { %689 = vmatmul.mubr.bf16.gmra.mrb[12].mxu1 %v497_v39  ;;  %v4314_v43 = vadd.f32 %v4258_v35, %v343_v42  ;;  %v3444_v44 = vpop.f32.mrb[18].mxu0 }
 0x172   :  { %698 = vmatprep.mubr.bf16.mxu1 %v4130_v32  ;;  %v4318_v47 = vadd.f32 %v3444_v44, %v4258_v35  ;;  %v346_v48 = vpop.f32.mrb[19].mxu0  ;;  %1687 = vmatpush1.bf16.msra.mxu1 %v3691_v38  ;;  %v501_v38 = vmax.bf16 %v4130_v32, %v477_v36  ;;  %v3720_v36 = vld [vmem:[#allocation8 + $0x12c] ss:$16 sps:$4 sm:$0xff]  }
 0x173   :  { %v4321_v49 = vadd.f32 %v4258_v35, %v346_v48  ;;  %1688 = vmatprep.subr.bf16.mxu1 %v3702_v63  ;;  %v3717_v48 = vld [vmem:[#allocation8 + $0x144] ss:$16 sps:$4 sm:$0xff]   ;;  %v3727_v63 = vld [vmem:[#allocation8 + $0x148] ss:$16 sps:$4 sm:$0xff]  }
 0x174   :  { %v479_v50 = vpack.c.bf16 %v4318_v47, %v4311_v41  ;;  %1421 = vmatprep.subr.bf16.mxu0 %v3717_v48 }
 0x175   :  { %v478_v51 = vpack.c.bf16 %v4321_v49, %v4314_v43  ;;  %1422 = vmatpush1.bf16.msra.mxu0 %v3715_v46 }
 0x176   :  { %1689 = vmatpush1.bf16.msra.mxu1 %v3700_v62  ;;  %v3726_v62 = vld [vmem:[#allocation8 + $0x184] ss:$16 sps:$4 sm:$0xff]   ;;  %v503_v30 = vmax.bf16 %v4130_v32, %v479_v50  ;;  %v3742_v50 = vld [vmem:[#allocation8 + $0x1a8] ss:$16 sps:$4 sm:$0xff]  }
 0x177   :  { %v3447_v53 = vpop.f32.mrb[20].mxu0  ;;  %1690 = vmatprep.subr.bf16.mxu1 %v3711_v16  ;;  %v502_v1 = vmax.bf16 %v4130_v32, %v478_v51  ;;  %v3730_v51 = vld [vmem:[#allocation8 + $0x168] ss:$16 sps:$4 sm:$0xff]   ;;  %v3738_v16 = vld [vmem:[#allocation8 + $0x18c] ss:$16 sps:$4 sm:$0xff]  }
 0x178   :  { %v4329_v54 = vadd.f32 %v3447_v53, %v4258_v35  ;;  %v359_v55 = vpop.f32.mrb[21].mxu0 }
 0x179   :  { %699 = vmatmul.mubr.bf16.gmra.mrb[16].mxu1 %v498_v52  ;;  %v4332_v56 = vadd.f32 %v4258_v35, %v359_v55  ;;  %v3448_v57 = vpop.f32.mrb[22].mxu0  ;;  %v3723_v55 = vld [vmem:[#allocation8 + $0x164] ss:$16 sps:$4 sm:$0xff]  }
 0x17a   :  { %708 = vmatprep.mubr.bf16.mxu1 %v4130_v32  ;;  %v4336_v60 = vadd.f32 %v3448_v57, %v4258_v35  ;;  %v362_v61 = vpop.f32.mrb[23].mxu0  ;;  %1691 = vmatpush1.bf16.msra.mxu1 %v3709_v10 }
 0x17b   :  { %v4339_v0 = vadd.f32 %v4258_v35, %v362_v61  ;;  %1692 = vmatprep.subr.bf16.mxu1 %v3720_v36  ;;  %1423 = vmatprep.subr.bf16.mxu0 %v3723_v55 }
 0x17c   :  { %v481_v2 = vpack.c.bf16 %v4336_v60, %v4329_v54  ;;  %1424 = vmatpush1.bf16.msra.mxu0 %v3721_v58 }
 0x17d   :  { %v480_v5 = vpack.c.bf16 %v4339_v0, %v4332_v56  ;;  %1425 = vmatprep.subr.bf16.mxu0 %v3726_v62  ;;  %v3747_v56 = vld [vmem:[#allocation8 + $0x1cc] ss:$16 sps:$4 sm:$0xff]   ;;  %v3745_v0 = vld [vmem:[#allocation8 + $0x1c8] ss:$16 sps:$4 sm:$0xff]  }
 0x17e   :  { %1693 = vmatpush1.bf16.msra.mxu1 %v3718_v29 }
 0x17f   :  { %v3451_v7 = vpop.f32.mrb[24].mxu0  ;;  %1694 = vmatprep.subr.bf16.mxu1 %v3729_v59  ;;  %v504_v55 = vmax.bf16 %v4130_v32, %v480_v5  ;;  %v505_v5 = vmax.bf16 %v4130_v32, %v481_v2 }
 0x180   :  { %v4350_v8 = vadd.f32 %v3451_v7, %v4258_v35  ;;  %v375_v9 = vpop.f32.mrb[25].mxu0 }
 0x181   :  { %709 = vmatmul.mubr.bf16.gmra.mrb[20].mxu1 %v499_v6  ;;  %v4353_v11 = vadd.f32 %v4258_v35, %v375_v9  ;;  %v3452_v12 = vpop.f32.mrb[26].mxu0  ;;  %v3732_v6 = vld [vmem:[#allocation8 + $0x16c] ss:$16 sps:$4 sm:$0xff]  }
 0x182   :  { %718 = vmatprep.mubr.bf16.mxu1 %v4130_v32  ;;  %v4357_v15 = vadd.f32 %v3452_v12, %v4258_v35  ;;  %v378_v4 = vpop.f32.mrb[27].mxu0  ;;  %v3724_v12 = vld [vmem:[#allocation8 + $0x180] ss:$16 sps:$4 sm:$0xff]   ;;  %1695 = vmatpush1.bf16.msra.mxu1 %v3727_v63 }
 0x183   :  { %v4360_v17 = vadd.f32 %v4258_v35, %v378_v4  ;;  %v3735_v4 = vld [vmem:[#allocation8 + $0x1a4] ss:$16 sps:$4 sm:$0xff]   ;;  %1696 = vmatprep.subr.bf16.mxu1 %v3732_v6  ;;  %1426 = vmatpush1.bf16.msra.mxu0 %v3724_v12 }
 0x184   :  { %v483_v18 = vpack.c.bf16 %v4357_v15, %v4350_v8  ;;  %1427 = vmatprep.subr.bf16.mxu0 %v3735_v4  ;;  %v3750_v4 = vld [vmem:[#allocation8 + $0x1e4] ss:$16 sps:$4 sm:$0xff]  }
 0x185   :  { %v482_v19 = vpack.c.bf16 %v4360_v17, %v4353_v11 }
 0x186   :  { %1697 = vmatpush1.bf16.msra.mxu1 %v3730_v51  ;;  %v3748_v51 = vld [vmem:[#allocation8 + $0x1e0] ss:$16 sps:$4 sm:$0xff]   ;;  %v507_v54 = vmax.bf16 %v4130_v32, %v483_v18 }
 0x187   :  { %v3455_v21 = vpop.f32.mrb[28].mxu0  ;;  %1698 = vmatprep.subr.bf16.mxu1 %v3738_v16  ;;  %v3751_v16 = vld [vmem:[#allocation8 + $0x1e8] ss:$16 sps:$4 sm:$0xff]  }
 0x188   :  { %v4371_v22 = vadd.f32 %v3455_v21, %v4258_v35  ;;  %v391_v24 = vpop.f32.mrb[29].mxu0  ;;  %v3733_v21 = vld [vmem:[#allocation8 + $0x1a0] ss:$16 sps:$4 sm:$0xff]  }
 0x189   :  { %719 = vmatmul.mubr.bf16.gmra.mrb[24].mxu1 %v500_v20  ;;  %v4374_v26 = vadd.f32 %v4258_v35, %v391_v24  ;;  %v3456_v27 = vpop.f32.mrb[30].mxu0  ;;  %1428 = vmatpush1.bf16.msra.mxu0 %v3733_v21 }
 0x18a   :  { %728 = vmatprep.mubr.bf16.mxu1 %v4130_v32  ;;  %v4378_v31 = vadd.f32 %v3456_v27, %v4258_v35  ;;  %v394_v25 = vpop.f32.mrb[31].mxu0  ;;  %v3741_v27 = vld [vmem:[#allocation8 + $0x1c4] ss:$16 sps:$4 sm:$0xff]   ;;  %1699 = vmatpush1.bf16.msra.mxu1 %v3736_v28 }
 0x18b   :  { %v4381_v33 = vadd.f32 %v4258_v35, %v394_v25  ;;  %1429 = vmatprep.subr.bf16.mxu0 %v3741_v27 }
 0x18c   :  { %v485_v34 = vpack.c.bf16 %v4378_v31, %v4371_v22  ;;  %v536_v31 = vlaneseq }
 0x18d   :  { %v484_v37 = vpack.c.bf16 %v4381_v33, %v4374_v26 }
 0x18e   :  { %v509_v2 = vmax.bf16 %v4130_v32, %v485_v34  ;;  %v4510_v33 = vshrl.u32 %v536_v31, 7  ;;  %v3760_v31 = vld [vmem:[#allocation10 + $0x30] sm:$0xff]  }
 0x18f   :  { %v3459_v39 = vpop.f32.mrb[32].mxu0  ;;  %v508_v60 = vmax.bf16 %v4130_v32, %v484_v37  ;;  %v534_v37 = vld [vmem:[%s5262_s4] sm:$0x3] }
 0x190   :  { %v4392_v40 = vadd.f32 %v3459_v39, %v4258_v35  ;;  %v407_v42 = vpop.f32.mrb[33].mxu0  ;;  %v538_v34 = vsub.s32 0, %v4510_v33 }
 0x191   :  { %729 = vmatmul.mubr.bf16.gmra.mrb[28].mxu1 %v501_v38  ;;  %v4395_v44 = vadd.f32 %v4258_v35, %v407_v42  ;;  %v3460_v45 = vpop.f32.mrb[34].mxu0  ;;  %v3744_v38 = vld [vmem:[#allocation8 + $0x1ac] ss:$16 sps:$4 sm:$0xff]  }
 0x192   :  { %738 = vmatprep.mubr.bf16.mxu1 %v4130_v32  ;;  %v4399_v52 = vadd.f32 %v3460_v45, %v4258_v35  ;;  %v410_v23 = vpop.f32.mrb[35].mxu0  ;;  %v3739_v45 = vld [vmem:[#allocation8 + $0x1c0] ss:$16 sps:$4 sm:$0xff]   ;;  %1700 = vmatprep.subr.bf16.mxu1 %v3744_v38 }
 0x193   :  { %v4402_v53 = vadd.f32 %v4258_v35, %v410_v23  ;;  %1430 = vmatpush1.bf16.msra.mxu0 %v3739_v45  ;;  %1701 = vmatpush1.bf16.msra.mxu1 %v3742_v50  ;;  %v3755_v50 = vld [vmem:[#allocation10 + $0x8] sm:$0xff]  }
 0x194   :  { %v487_v57 = vpack.c.bf16 %v4399_v52, %v4392_v40  ;;  %1702 = vmatprep.subr.bf16.mxu1 %v3747_v56  ;;  %1431 = vmatprep.subr.bf16.mxu0 %v3750_v4  ;;  %v542_v40 = vsub.s32 1, %v4510_v33 }
 0x195   :  { %v486_v61 = vpack.c.bf16 %v4402_v53, %v4395_v44  ;;  %v4519_v44 = vrot.slane %v534_v37, %v538_v34 }
 0x196   :  { %v511_v11 = vmax.bf16 %v4130_v32, %v487_v57  ;;  %v4523_v53 = vrot.slane %v534_v37, %v542_v40 }
 0x197   :  { %v3463_v3 = vpop.f32.mrb[36].mxu0  ;;  %1703 = vmatpush1.bf16.msra.mxu1 %v3745_v0  ;;  %1432 = vmatpush1.bf16.msra.mxu0 %v3748_v51  ;;  %v510_v8 = vmax.bf16 %v4130_v32, %v486_v61  ;;  %v3758_v51 = vld [vmem:[#allocation10 + $0x20] sm:$0xff]  }
 0x198   :  { %v4413_v7 = vadd.f32 %v3463_v3, %v4258_v35  ;;  %v423_v9 = vpop.f32.mrb[37].mxu0  ;;  %2402 = vmatprep.subr.bf16.mxu0 %v4130_v32 }
 0x199   :  { %739 = vmatmul.mubr.bf16.gmra.mrb[32].mxu1 %v502_v1  ;;  %v4416_v13 = vadd.f32 %v4258_v35, %v423_v9  ;;  %v3464_v14 = vpop.f32.mrb[38].mxu0 }
 0x19a   :  { %748 = vmatprep.mubr.bf16.mxu1 %v4130_v32  ;;  %v4420_v43 = vadd.f32 %v3464_v14, %v4258_v35  ;;  %v426_v49 = vpop.f32.mrb[39].mxu0 }
 0x19b   :  { %v4423_v10 = vadd.f32 %v4258_v35, %v426_v49  ;;  %v3753_v49 = vld [vmem:[#allocation8 + $0x1ec] ss:$16 sps:$4 sm:$0xff]  }
 0x19c   :  { %v489_v20 = vpack.c.bf16 %v4420_v43, %v4413_v7  ;;  %1704 = vmatprep.subr.bf16.mxu1 %v3753_v49 }
 0x19d   :  { %v488_v24 = vpack.c.bf16 %v4423_v10, %v4416_v13  ;;  %1705 = vmatpush1.bf16.msra.mxu1 %v3751_v16 }
 0x19e   :  { %3473 = vmatprep.subr.bf16.mxu1 %v4130_v32  ;;  %v513_v17 = vmax.bf16 %v4130_v32, %v489_v20 }
 0x19f   :  { %v3467_v25 = vpop.f32.mrb[40].mxu0  ;;  %v512_v15 = vmax.bf16 %v4130_v32, %v488_v24 }
 0x1a0   :  { %v4434_v39 = vadd.f32 %v3467_v25, %v4258_v35  ;;  %v439_v42 = vpop.f32.mrb[41].mxu0 }
 0x1a1   :  { %749 = vmatmul.mubr.bf16.gmra.mrb[36].mxu1 %v503_v30  ;;  %v4437_v46 = vadd.f32 %v4258_v35, %v439_v42  ;;  %v3468_v48 = vpop.f32.mrb[42].mxu0  ;;  %v3754_v30 = vld [vmem:[#allocation10] sm:$0xff]  }
 0x1a2   :  { %758 = vmatprep.mubr.bf16.mxu1 %v4130_v32  ;;  %v4441_v41 = vadd.f32 %v3468_v48, %v4258_v35  ;;  %v442_v47 = vpop.f32.mrb[43].mxu0  ;;  %v4531_v42 = vld [vmem:[#allocation10 + $0x80] sm:$0xff]  }
 0x1a3   :  { %v443_v23 = vadd.f32 %v4258_v35, %v442_v47 }
 0x1a4   :  { %v491_v29 = vpack.c.bf16 %v4441_v41, %v4434_v39 }
 0x1a5   :  { %v490_v36 = vpack.c.bf16 %v443_v23, %v4437_v46 }
 0x1a7   :  { %v3471_v58 = vpop.f32.mrb[44].mxu0  ;;  %v514_v18 = vmax.bf16 %v4130_v32, %v490_v36 }
 0x1a8   :  { %v464_v59 = vadd.f32 %v3471_v58, %v4258_v35  ;;  %v455_v62 = vpop.f32.mrb[45].mxu0  ;;  %v3756_v58 = vld [vmem:[#allocation10 + $0x10] sm:$0xff]  }
 0x1a9   :  { %759 = vmatmul.mubr.bf16.gmra.mrb[40].mxu1 %v504_v55  ;;  %v456_v63 = vadd.f32 %v4258_v35, %v455_v62  ;;  %v3472_v1 = vpop.f32.mrb[46].mxu0 }
 0x1aa   :  { %768 = vmatprep.mubr.bf16.mxu1 %v4130_v32  ;;  %v467_v3 = vadd.f32 %v3472_v1, %v4258_v35  ;;  %v458_v6 = vpop.f32.mrb[47].mxu0 }
 0x1ab   :  { %v459_v9 = vadd.f32 %v4258_v35, %v458_v6  ;;  %v506_v35 = vmax.bf16 %v4130_v32, %v482_v19  ;;  %v515_v19 = vmax.bf16 %v4130_v32, %v491_v29 }
 0x1ac   :  { %v493_v12 = vpack.c.bf16 %v467_v3, %v464_v59 }
 0x1ad   :  { %v492_v14 = vpack.c.bf16 %v459_v9, %v456_v63 }
 0x1ae   :  { %v517_v26 = vmax.bf16 %v4130_v32, %v493_v12 }
 0x1af   :  { %v516_v22 = vmax.bf16 %v4130_v32, %v492_v14  ;;  %v3757_v14 = vld [vmem:[#allocation10 + $0x18] sm:$0xff]  }
 0x1b1   :  { %769 = vmatmul.mubr.bf16.gmra.mrb[44].mxu1 %v505_v5  ;;  %v4548_v5 = vld [vmem:[#allocation10 + $0x88] sm:$0xff]  }
 0x1b2   :  { %778 = vmatprep.mubr.bf16.mxu1 %v4130_v32 }
 0x1b9   :  { %779 = vmatmul.mubr.bf16.gmra.mrb[48].mxu1 %v506_v35 }
 0x1ba   :  { %788 = vmatprep.mubr.bf16.mxu1 %v4130_v32 }
 0x1c1   :  { %789 = vmatmul.mubr.bf16.gmra.mrb[52].mxu1 %v507_v54 }
 0x1c2   :  { %798 = vmatprep.mubr.bf16.mxu1 %v4130_v32 }
 0x1c9   :  { %799 = vmatmul.mubr.bf16.gmra.mrb[56].mxu1 %v508_v60 }
 0x1ca   :  { %808 = vmatprep.mubr.bf16.mxu1 %v4130_v32 }
 0x1d1   :  { %809 = vmatmul.mubr.bf16.gmra.mrb[60].mxu1 %v509_v2 }
 0x1d2   :  { %818 = vmatprep.mubr.bf16.mxu1 %v4130_v32 }
 0x1d9   :  { %819 = vmatmul.mubr.bf16.gmra.mrb[64].mxu1 %v510_v8 }
 0x1da   :  { %828 = vmatprep.mubr.bf16.mxu1 %v4130_v32 }
 0x1e1   :  { %829 = vmatmul.mubr.bf16.gmra.mrb[68].mxu1 %v511_v11 }
 0x1e2   :  { %838 = vmatprep.mubr.bf16.mxu1 %v4130_v32 }
 0x1e9   :  { %839 = vmatmul.mubr.bf16.gmra.mrb[72].mxu1 %v512_v15 }
 0x1ea   :  { %848 = vmatprep.mubr.bf16.mxu1 %v4130_v32 }
 0x1f1   :  { %849 = vmatmul.mubr.bf16.gmra.mrb[76].mxu1 %v513_v17  ;;  %v3759_v17 = vld [vmem:[#allocation10 + $0x28] sm:$0xff]  }
 0x1f2   :  { %858 = vmatprep.mubr.bf16.mxu1 %v4130_v32 }
 0x1f9   :  { %859 = vmatmul.mubr.bf16.gmra.mrb[80].mxu1 %v514_v18 }
 0x1fa   :  { %868 = vmatprep.mubr.bf16.mxu1 %v4130_v32 }
 0x201   :  { %869 = vmatmul.mubr.bf16.gmra.mrb[84].mxu1 %v515_v19 }
 0x202   :  { %878 = vmatprep.mubr.bf16.mxu1 %v4130_v32 }
 0x209   :  { %879 = vmatmul.mubr.bf16.gmra.mrb[88].mxu1 %v516_v22 }
 0x20a   :  { %888 = vmatprep.mubr.bf16.mxu1 %v4130_v32 }
 0x211   :  { %889 = vmatmul.mubr.bf16.gmra.mrb[92].mxu1 %v517_v26 }
 0x22c   :  { %v660_v52 = vpop.f32.mrb[0].mxu1 }
 0x22d   :  { %v662_v57 = vpop.f32.mrb[1].mxu1  ;;  %v661_v7 = vadd.f32 %v660_v52, %v4519_v44 }
 0x22e   :  { %v664_v61 = vpop.f32.mrb[2].mxu1  ;;  %v663_v10 = vadd.f32 %v662_v57, %v4523_v53 }
 0x22f   :  { %v665_v13 = vadd.f32 %v664_v61, %v4519_v44  ;;  %v666_v43 = vpop.f32.mrb[3].mxu1  ;;  %v4563_v61 = vld [vmem:[#allocation10 + $0x90] sm:$0xff]  }
 0x230   :  { %v667_v20 = vadd.f32 %v666_v43, %v4523_v53 }
 0x231   :  { %v899_v21 = vpack.c.bf16 %v665_v13, %v661_v7 }
 0x232   :  { %v900_v24 = vpack.c.bf16 %v667_v20, %v663_v10 }
 0x233   :  { %v947_v25 = vmax.bf16 %v4130_v32, %v899_v21  ;;  %v3761_v21 = vld [vmem:[#allocation10 + $0x38] sm:$0xff]  }
 0x234   :  { %v670_v27 = vpop.f32.mrb[4].mxu1  ;;  %v948_v28 = vmax.bf16 %v4130_v32, %v900_v24 }
 0x235   :  { %v672_v38 = vpop.f32.mrb[5].mxu1  ;;  %v671_v45 = vadd.f32 %v670_v27, %v4519_v44 }
 0x236   :  { %v674_v39 = vpop.f32.mrb[6].mxu1  ;;  %1433 = vmatprep.mubr.bf16.mxu0 %v948_v28  ;;  %1706 = vmatprep.mubr.bf16.mxu1 %v948_v28  ;;  %v673_v41 = vadd.f32 %v672_v38, %v4523_v53 }
 0x237   :  { %v675_v46 = vadd.f32 %v674_v39, %v4519_v44  ;;  %v676_v48 = vpop.f32.mrb[7].mxu1  ;;  %1434 = vmatmul.mubr.bf16.vlgmr.msra.gmra.mrb[48].mxu0 %v947_v25  ;;  %1707 = vmatmul.mubr.bf16.vlgmr.msra.gmra.mrb[96].mxu1 %v947_v25  ;;  %v3762_v25 = vld [vmem:[#allocation10 + $0x40] sm:$0xff]  }
 0x238   :  { %v677_v47 = vadd.f32 %v676_v48, %v4523_v53  ;;  %2403 = vmatpush1.bf16.msra.mxu0 %v3754_v30  ;;  %3489 = vmatpush1.bf16.msra.mxu1 %v4531_v42 }
 0x239   :  { %v901_v23 = vpack.c.bf16 %v675_v46, %v671_v45  ;;  %2404 = vmatprep.subr.bf16.mxu0 %v4130_v32  ;;  %3474 = vmatprep.subr.bf16.mxu1 %v4130_v32 }
 0x23a   :  { %v902_v29 = vpack.c.bf16 %v677_v47, %v673_v41 }
 0x23b   :  { %v949_v62 = vmax.bf16 %v4130_v32, %v901_v23  ;;  %v3764_v23 = vld [vmem:[#allocation10 + $0x48] sm:$0xff]  }
 0x23c   :  { %v680_v36 = vpop.f32.mrb[8].mxu1  ;;  %v950_v55 = vmax.bf16 %v4130_v32, %v902_v29  ;;  %2405 = vmatpush1.bf16.msra.mxu0 %v3755_v50  ;;  %3490 = vmatpush1.bf16.msra.mxu1 %v4548_v5 }
 0x23d   :  { %v682_v59 = vpop.f32.mrb[9].mxu1  ;;  %2406 = vmatprep.subr.bf16.mxu0 %v4130_v32  ;;  %v681_v1 = vadd.f32 %v680_v36, %v4519_v44  ;;  %3475 = vmatprep.subr.bf16.mxu1 %v4130_v32 }
 0x23e   :  { %v684_v63 = vpop.f32.mrb[10].mxu1  ;;  %1443 = vmatprep.mubr.bf16.mxu0 %v950_v55  ;;  %1716 = vmatprep.mubr.bf16.mxu1 %v950_v55  ;;  %v683_v9 = vadd.f32 %v682_v59, %v4523_v53  ;;  %v4580_v55 = vld [vmem:[#allocation10 + $0x98] sm:$0xff]  }
 0x23f   :  { %v685_v3 = vadd.f32 %v684_v63, %v4519_v44  ;;  %v686_v6 = vpop.f32.mrb[11].mxu1  ;;  %1444 = vmatmul.mubr.bf16.gmra.mrb[52].mxu0 %v949_v62  ;;  %1717 = vmatmul.mubr.bf16.gmra.mrb[100].mxu1 %v949_v62  ;;  %v3766_v62 = vld [vmem:[#allocation10 + $0x50] sm:$0xff]  }
 0x240   :  { %v687_v12 = vadd.f32 %v686_v6, %v4523_v53  ;;  %2407 = vmatpush1.bf16.msra.mxu0 %v3756_v58  ;;  %3491 = vmatpush1.bf16.msra.mxu1 %v4563_v61 }
 0x241   :  { %v903_v56 = vpack.c.bf16 %v685_v3, %v681_v1  ;;  %2408 = vmatprep.subr.bf16.mxu0 %v4130_v32  ;;  %3476 = vmatprep.subr.bf16.mxu1 %v4130_v32 }
 0x242   :  { %v904_v0 = vpack.c.bf16 %v687_v12, %v683_v9 }
 0x243   :  { %v951_v35 = vmax.bf16 %v4130_v32, %v903_v56 }
 0x244   :  { %v690_v4 = vpop.f32.mrb[12].mxu1  ;;  %v952_v49 = vmax.bf16 %v4130_v32, %v904_v0  ;;  %2409 = vmatpush1.bf16.msra.mxu0 %v3757_v14  ;;  %3492 = vmatpush1.bf16.msra.mxu1 %v4580_v55  ;;  %v3768_v0 = vld [vmem:[#allocation10 + $0x58] sm:$0xff]  }
 0x245   :  { %v692_v16 = vpop.f32.mrb[13].mxu1  ;;  %2410 = vmatprep.subr.bf16.mxu0 %v4130_v32  ;;  %v691_v60 = vadd.f32 %v690_v4, %v4519_v44  ;;  %3477 = vmatprep.subr.bf16.mxu1 %v4130_v32 }
 0x246   :  { %v694_v54 = vpop.f32.mrb[14].mxu1  ;;  %1453 = vmatprep.mubr.bf16.mxu0 %v952_v49  ;;  %1726 = vmatprep.mubr.bf16.mxu1 %v952_v49  ;;  %v693_v11 = vadd.f32 %v692_v16, %v4523_v53 }
 0x247   :  { %v695_v2 = vadd.f32 %v694_v54, %v4519_v44  ;;  %v696_v8 = vpop.f32.mrb[15].mxu1  ;;  %1454 = vmatmul.mubr.bf16.gmra.mrb[56].mxu0 %v951_v35  ;;  %1727 = vmatmul.mubr.bf16.gmra.mrb[104].mxu1 %v951_v35 }
 0x248   :  { %v697_v15 = vadd.f32 %v696_v8, %v4523_v53  ;;  %2411 = vmatpush1.bf16.msra.mxu0 %v3758_v51  ;;  %v4595_v8 = vld [vmem:[#allocation10 + $0xa0] sm:$0xff]  }
 0x249   :  { %v905_v18 = vpack.c.bf16 %v695_v2, %v691_v60  ;;  %2412 = vmatprep.subr.bf16.mxu0 %v4130_v32  ;;  %v3770_v2 = vld [vmem:[#allocation10 + $0x60] sm:$0xff]   ;;  %3493 = vmatpush1.bf16.msra.mxu1 %v4595_v8 }
 0x24a   :  { %v906_v19 = vpack.c.bf16 %v697_v15, %v693_v11  ;;  %3478 = vmatprep.subr.bf16.mxu1 %v4130_v32 }
 0x24b   :  { %v953_v52 = vmax.bf16 %v4130_v32, %v905_v18 }
 0x24c   :  { %v700_v22 = vpop.f32.mrb[16].mxu1  ;;  %v954_v26 = vmax.bf16 %v4130_v32, %v906_v19  ;;  %2413 = vmatpush1.bf16.msra.mxu0 %v3759_v17 }
 0x24d   :  { %v702_v37 = vpop.f32.mrb[17].mxu1  ;;  %2414 = vmatprep.subr.bf16.mxu0 %v4130_v32  ;;  %v701_v7 = vadd.f32 %v700_v22, %v4519_v44 }
 0x24e   :  { %v704_v57 = vpop.f32.mrb[18].mxu1  ;;  %1463 = vmatprep.mubr.bf16.mxu0 %v954_v26  ;;  %1736 = vmatprep.mubr.bf16.mxu1 %v954_v26  ;;  %v703_v10 = vadd.f32 %v702_v37, %v4523_v53 }
 0x24f   :  { %v705_v13 = vadd.f32 %v704_v57, %v4519_v44  ;;  %v706_v43 = vpop.f32.mrb[19].mxu1  ;;  %1464 = vmatmul.mubr.bf16.gmra.mrb[60].mxu0 %v953_v52  ;;  %1737 = vmatmul.mubr.bf16.gmra.mrb[108].mxu1 %v953_v52 }
 0x250   :  { %v707_v20 = vadd.f32 %v706_v43, %v4523_v53  ;;  %2415 = vmatpush1.bf16.msra.mxu0 %v3760_v31 }
 0x251   :  { %v907_v24 = vpack.c.bf16 %v705_v13, %v701_v7  ;;  %2416 = vmatprep.subr.bf16.mxu0 %v4130_v32 }
 0x252   :  { %v908_v27 = vpack.c.bf16 %v707_v20, %v703_v10  ;;  %v3772_v20 = vld [vmem:[#allocation10 + $0x68] sm:$0xff]  }
 0x253   :  { %v955_v39 = vmax.bf16 %v4130_v32, %v907_v24 }
 0x254   :  { %v710_v28 = vpop.f32.mrb[20].mxu1  ;;  %v956_v30 = vmax.bf16 %v4130_v32, %v908_v27  ;;  %2417 = vmatpush1.bf16.msra.mxu0 %v3761_v21  ;;  %v4608_v21 = vld [vmem:[#allocation10 + $0xa8] sm:$0xff]  }
 0x255   :  { %v712_v38 = vpop.f32.mrb[21].mxu1  ;;  %2418 = vmatprep.subr.bf16.mxu0 %v4130_v32  ;;  %v711_v46 = vadd.f32 %v710_v28, %v4519_v44  ;;  %3494 = vmatpush1.bf16.msra.mxu1 %v4608_v21 }
 0x256   :  { %v714_v45 = vpop.f32.mrb[22].mxu1  ;;  %1473 = vmatprep.mubr.bf16.mxu0 %v956_v30  ;;  %1746 = vmatprep.mubr.bf16.mxu1 %v956_v30  ;;  %v713_v47 = vadd.f32 %v712_v38, %v4523_v53  ;;  %v3774_v30 = vld [vmem:[#allocation10 + $0x70] sm:$0xff]  }
 0x257   :  { %v715_v48 = vadd.f32 %v714_v45, %v4519_v44  ;;  %v716_v41 = vpop.f32.mrb[23].mxu1  ;;  %1474 = vmatmul.mubr.bf16.gmra.mrb[64].mxu0 %v955_v39  ;;  %1747 = vmatmul.mubr.bf16.gmra.mrb[112].mxu1 %v955_v39 }
 0x258   :  { %v717_v50 = vadd.f32 %v716_v41, %v4523_v53  ;;  %2419 = vmatpush1.bf16.msra.mxu0 %v3762_v25  ;;  %v4613_v25 = vld [vmem:[#allocation10 + $0xb0] sm:$0xff]   ;;  %3479 = vmatprep.subr.bf16.mxu1 %v4130_v32  ;;  %v3776_v41 = vld [vmem:[#allocation10 + $0x78] sm:$0xff]  }
 0x259   :  { %v909_v29 = vpack.c.bf16 %v715_v48, %v711_v46  ;;  %2420 = vmatprep.subr.bf16.mxu0 %v4130_v32  ;;  %3495 = vmatpush1.bf16.msra.mxu1 %v4613_v25 }
 0x25a   :  { %v910_v36 = vpack.c.bf16 %v717_v50, %v713_v47  ;;  %v4620_v47 = vld [vmem:[#allocation10 + $0xb8] sm:$0xff]   ;;  %3480 = vmatprep.subr.bf16.mxu1 %v4130_v32 }
 0x25b   :  { %v957_v1 = vmax.bf16 %v4130_v32, %v909_v29 }
 0x25c   :  { %v720_v58 = vpop.f32.mrb[24].mxu1  ;;  %v958_v59 = vmax.bf16 %v4130_v32, %v910_v36  ;;  %2421 = vmatpush1.bf16.msra.mxu0 %v3764_v23 }
 0x25d   :  { %v722_v63 = vpop.f32.mrb[25].mxu1  ;;  %2422 = vmatprep.subr.bf16.mxu0 %v4130_v32  ;;  %v721_v6 = vadd.f32 %v720_v58, %v4519_v44  ;;  %3496 = vmatpush1.bf16.msra.mxu1 %v4620_v47 }
 0x25e   :  { %v724_v3 = vpop.f32.mrb[26].mxu1  ;;  %1483 = vmatprep.mubr.bf16.mxu0 %v958_v59  ;;  %1756 = vmatprep.mubr.bf16.mxu1 %v958_v59  ;;  %v723_v14 = vadd.f32 %v722_v63, %v4523_v53 }
 0x25f   :  { %v725_v9 = vadd.f32 %v724_v3, %v4519_v44  ;;  %v726_v12 = vpop.f32.mrb[27].mxu1  ;;  %1484 = vmatmul.mubr.bf16.gmra.mrb[68].mxu0 %v957_v1  ;;  %1757 = vmatmul.mubr.bf16.gmra.mrb[116].mxu1 %v957_v1 }
 0x260   :  { %v727_v56 = vadd.f32 %v726_v12, %v4523_v53  ;;  %2423 = vmatpush1.bf16.msra.mxu0 %v3766_v62  ;;  %3481 = vmatprep.subr.bf16.mxu1 %v4130_v32 }
 0x261   :  { %v911_v4 = vpack.c.bf16 %v725_v9, %v721_v6  ;;  %2424 = vmatprep.subr.bf16.mxu0 %v4130_v32 }
 0x262   :  { %v912_v49 = vpack.c.bf16 %v727_v56, %v723_v14 }
 0x263   :  { %v959_v54 = vmax.bf16 %v4130_v32, %v911_v4 }
 0x264   :  { %v730_v51 = vpop.f32.mrb[28].mxu1  ;;  %v960_v16 = vmax.bf16 %v4130_v32, %v912_v49  ;;  %2425 = vmatpush1.bf16.msra.mxu0 %v3768_v0 }
 0x265   :  { %v732_v35 = vpop.f32.mrb[29].mxu1  ;;  %2426 = vmatprep.subr.bf16.mxu0 %v4130_v32  ;;  %v731_v11 = vadd.f32 %v730_v51, %v4519_v44 }
 0x266   :  { %v734_v60 = vpop.f32.mrb[30].mxu1  ;;  %1493 = vmatprep.mubr.bf16.mxu0 %v960_v16  ;;  %1766 = vmatprep.mubr.bf16.mxu1 %v960_v16  ;;  %v733_v18 = vadd.f32 %v732_v35, %v4523_v53 }
 0x267   :  { %v735_v15 = vadd.f32 %v734_v60, %v4519_v44  ;;  %v736_v17 = vpop.f32.mrb[31].mxu1  ;;  %1494 = vmatmul.mubr.bf16.gmra.mrb[72].mxu0 %v959_v54  ;;  %1767 = vmatmul.mubr.bf16.gmra.mrb[120].mxu1 %v959_v54 }
 0x268   :  { %v737_v19 = vadd.f32 %v736_v17, %v4523_v53  ;;  %2427 = vmatpush1.bf16.msra.mxu0 %v3770_v2 }
 0x269   :  { %v913_v22 = vpack.c.bf16 %v735_v15, %v731_v11  ;;  %2428 = vmatprep.subr.bf16.mxu0 %v4130_v32 }
 0x26a   :  { %v914_v26 = vpack.c.bf16 %v737_v19, %v733_v18 }
 0x26b   :  { %v961_v57 = vmax.bf16 %v4130_v32, %v913_v22 }
 0x26c   :  { %v740_v31 = vpop.f32.mrb[32].mxu1  ;;  %v962_v37 = vmax.bf16 %v4130_v32, %v914_v26  ;;  %2429 = vmatpush1.bf16.msra.mxu0 %v3772_v20 }
 0x26d   :  { %v742_v52 = vpop.f32.mrb[33].mxu1  ;;  %v741_v13 = vadd.f32 %v740_v31, %v4519_v44  ;;  %2430 = vmatprep.subr.bf16.mxu0 %v4130_v32 }
 0x26e   :  { %v744_v7 = vpop.f32.mrb[34].mxu1  ;;  %1503 = vmatprep.mubr.bf16.mxu0 %v962_v37  ;;  %1776 = vmatprep.mubr.bf16.mxu1 %v962_v37  ;;  %v743_v24 = vadd.f32 %v742_v52, %v4523_v53 }
 0x26f   :  { %v745_v43 = vadd.f32 %v744_v7, %v4519_v44  ;;  %v746_v10 = vpop.f32.mrb[35].mxu1  ;;  %1504 = vmatmul.mubr.bf16.gmra.mrb[76].mxu0 %v961_v57  ;;  %1777 = vmatmul.mubr.bf16.gmra.mrb[124].mxu1 %v961_v57 }
 0x270   :  { %v747_v27 = vadd.f32 %v746_v10, %v4523_v53  ;;  %2431 = vmatpush1.bf16.msra.mxu0 %v3774_v30 }
 0x271   :  { %v915_v28 = vpack.c.bf16 %v745_v43, %v741_v13  ;;  %2432 = vmatprep.subr.bf16.mxu0 %v4130_v32 }
 0x272   :  { %v916_v38 = vpack.c.bf16 %v747_v27, %v743_v24 }
 0x273   :  { %v963_v48 = vmax.bf16 %v4130_v32, %v915_v28 }
 0x274   :  { %v750_v39 = vpop.f32.mrb[36].mxu1  ;;  %v964_v45 = vmax.bf16 %v4130_v32, %v916_v38  ;;  %2433 = vmatpush1.bf16.msra.mxu0 %v3776_v41 }
 0x275   :  { %v752_v46 = vpop.f32.mrb[37].mxu1  ;;  %v751_v23 = vadd.f32 %v750_v39, %v4519_v44  ;;  %2627 = vmatprep.subr.bf16.mxu0 %v4130_v32 }
 0x276   :  { %v754_v50 = vpop.f32.mrb[38].mxu1  ;;  %1513 = vmatprep.mubr.bf16.mxu0 %v964_v45  ;;  %1786 = vmatprep.mubr.bf16.mxu1 %v964_v45  ;;  %v753_v58 = vadd.f32 %v752_v46, %v4523_v53 }
 0x277   :  { %v755_v29 = vadd.f32 %v754_v50, %v4519_v44  ;;  %v756_v36 = vpop.f32.mrb[39].mxu1  ;;  %1514 = vmatmul.mubr.bf16.gmra.mrb[80].mxu0 %v963_v48  ;;  %1787 = vmatmul.mubr.bf16.gmra.mrb[128].mxu1 %v963_v48 }
 0x278   :  { %v757_v59 = vadd.f32 %v756_v36, %v4523_v53 }
 0x279   :  { %v917_v62 = vpack.c.bf16 %v755_v29, %v751_v23 }
 0x27a   :  { %v918_v63 = vpack.c.bf16 %v757_v59, %v753_v58  ;;  %v4655_v58 = vld [vmem:[#allocation10 + $0xc0] sm:$0xff]  }
 0x27b   :  { %v965_v9 = vmax.bf16 %v4130_v32, %v917_v62  ;;  %3497 = vmatpush1.bf16.msra.mxu1 %v4655_v58 }
 0x27c   :  { %v760_v1 = vpop.f32.mrb[40].mxu1  ;;  %v966_v3 = vmax.bf16 %v4130_v32, %v918_v63  ;;  %3482 = vmatprep.subr.bf16.mxu1 %v4130_v32 }
 0x27d   :  { %v762_v6 = vpop.f32.mrb[41].mxu1  ;;  %v761_v14 = vadd.f32 %v760_v1, %v4519_v44 }
 0x27e   :  { %v764_v12 = vpop.f32.mrb[42].mxu1  ;;  %1523 = vmatprep.mubr.bf16.mxu0 %v966_v3  ;;  %1796 = vmatprep.mubr.bf16.mxu1 %v966_v3  ;;  %v763_v4 = vadd.f32 %v762_v6, %v4523_v53 }
 0x27f   :  { %v765_v56 = vadd.f32 %v764_v12, %v4519_v44  ;;  %v766_v0 = vpop.f32.mrb[43].mxu1  ;;  %1524 = vmatmul.mubr.bf16.gmra.mrb[84].mxu0 %v965_v9  ;;  %1797 = vmatmul.mubr.bf16.gmra.mrb[132].mxu1 %v965_v9 }
 0x280   :  { %v767_v49 = vadd.f32 %v766_v0, %v4523_v53 }
 0x281   :  { %v919_v51 = vpack.c.bf16 %v765_v56, %v761_v14 }
 0x282   :  { %v920_v16 = vpack.c.bf16 %v767_v49, %v763_v4  ;;  %v4665_v49 = vld [vmem:[#allocation10 + $0xc8] sm:$0xff]  }
 0x283   :  { %v967_v2 = vmax.bf16 %v4130_v32, %v919_v51  ;;  %3498 = vmatpush1.bf16.msra.mxu1 %v4665_v49 }
 0x284   :  { %v770_v35 = vpop.f32.mrb[44].mxu1  ;;  %v968_v54 = vmax.bf16 %v4130_v32, %v920_v16  ;;  %3483 = vmatprep.subr.bf16.mxu1 %v4130_v32 }
 0x285   :  { %v772_v60 = vpop.f32.mrb[45].mxu1  ;;  %v771_v15 = vadd.f32 %v770_v35, %v4519_v44 }
 0x286   :  { %v774_v11 = vpop.f32.mrb[46].mxu1  ;;  %1533 = vmatprep.mubr.bf16.mxu0 %v968_v54  ;;  %1806 = vmatprep.mubr.bf16.mxu1 %v968_v54  ;;  %v773_v19 = vadd.f32 %v772_v60, %v4523_v53 }
 0x287   :  { %v775_v17 = vadd.f32 %v774_v11, %v4519_v44  ;;  %v776_v18 = vpop.f32.mrb[47].mxu1  ;;  %1534 = vmatmul.mubr.bf16.gmra.mrb[88].mxu0 %v967_v2  ;;  %1807 = vmatmul.mubr.bf16.gmra.mrb[136].mxu1 %v967_v2 }
 0x288   :  { %v777_v22 = vadd.f32 %v776_v18, %v4523_v53 }
 0x289   :  { %v921_v26 = vpack.c.bf16 %v775_v17, %v771_v15 }
 0x28a   :  { %v922_v31 = vpack.c.bf16 %v777_v22, %v773_v19 }
 0x28b   :  { %v969_v7 = vmax.bf16 %v4130_v32, %v921_v26 }
 0x28c   :  { %v780_v37 = vpop.f32.mrb[48].mxu1  ;;  %v970_v52 = vmax.bf16 %v4130_v32, %v922_v31 }
 0x28d   :  { %v782_v57 = vpop.f32.mrb[49].mxu1  ;;  %v781_v43 = vadd.f32 %v780_v37, %v4519_v44 }
 0x28e   :  { %v784_v13 = vpop.f32.mrb[50].mxu1  ;;  %1543 = vmatprep.mubr.bf16.mxu0 %v970_v52  ;;  %1816 = vmatprep.mubr.bf16.mxu1 %v970_v52  ;;  %v783_v24 = vadd.f32 %v782_v57, %v4523_v53  ;;  %v4676_v57 = vld [vmem:[#allocation10 + $0xd0] sm:$0xff]  }
 0x28f   :  { %v785_v10 = vadd.f32 %v784_v13, %v4519_v44  ;;  %v786_v20 = vpop.f32.mrb[51].mxu1  ;;  %1544 = vmatmul.mubr.bf16.gmra.mrb[92].mxu0 %v969_v7  ;;  %1817 = vmatmul.mubr.bf16.gmra.mrb[140].mxu1 %v969_v7 }
 0x290   :  { %v787_v27 = vadd.f32 %v786_v20, %v4523_v53  ;;  %3499 = vmatpush1.bf16.msra.mxu1 %v4676_v57 }
 0x291   :  { %v923_v28 = vpack.c.bf16 %v785_v10, %v781_v43  ;;  %3484 = vmatprep.subr.bf16.mxu1 %v4130_v32 }
 0x292   :  { %v924_v30 = vpack.c.bf16 %v787_v27, %v783_v24 }
 0x293   :  { %v971_v46 = vmax.bf16 %v4130_v32, %v923_v28 }
 0x294   :  { %v790_v38 = vpop.f32.mrb[52].mxu1  ;;  %v972_v39 = vmax.bf16 %v4130_v32, %v924_v30  ;;  %v4684_v30 = vld [vmem:[#allocation10 + $0xd8] sm:$0xff]  }
 0x295   :  { %v792_v45 = vpop.f32.mrb[53].mxu1  ;;  %v791_v41 = vadd.f32 %v790_v38, %v4519_v44  ;;  %3500 = vmatpush1.bf16.msra.mxu1 %v4684_v30 }
 0x296   :  { %v794_v48 = vpop.f32.mrb[54].mxu1  ;;  %1553 = vmatprep.mubr.bf16.mxu0 %v972_v39  ;;  %1826 = vmatprep.mubr.bf16.mxu1 %v972_v39  ;;  %v793_v29 = vadd.f32 %v792_v45, %v4523_v53 }
 0x297   :  { %v795_v50 = vadd.f32 %v794_v48, %v4519_v44  ;;  %v796_v23 = vpop.f32.mrb[55].mxu1  ;;  %1554 = vmatmul.mubr.bf16.gmra.mrb[96].mxu0 %v971_v46  ;;  %1827 = vmatmul.mubr.bf16.gmra.mrb[144].mxu1 %v971_v46  ;;  %v4689_v48 = vld [vmem:[#allocation10 + $0xe0] sm:$0xff]  }
 0x298   :  { %v797_v36 = vadd.f32 %v796_v23, %v4523_v53  ;;  %3485 = vmatprep.subr.bf16.mxu1 %v4130_v32 }
 0x299   :  { %v925_v59 = vpack.c.bf16 %v795_v50, %v791_v41  ;;  %3501 = vmatpush1.bf16.msra.mxu1 %v4689_v48 }
 0x29a   :  { %v926_v62 = vpack.c.bf16 %v797_v36, %v793_v29  ;;  %3486 = vmatprep.subr.bf16.mxu1 %v4130_v32 }
 0x29b   :  { %v973_v6 = vmax.bf16 %v4130_v32, %v925_v59 }
 0x29c   :  { %v800_v63 = vpop.f32.mrb[56].mxu1  ;;  %v974_v1 = vmax.bf16 %v4130_v32, %v926_v62 }
 0x29d   :  { %v802_v3 = vpop.f32.mrb[57].mxu1  ;;  %v801_v12 = vadd.f32 %v800_v63, %v4519_v44 }
 0x29e   :  { %v804_v9 = vpop.f32.mrb[58].mxu1  ;;  %1563 = vmatprep.mubr.bf16.mxu0 %v974_v1  ;;  %1836 = vmatprep.mubr.bf16.mxu1 %v974_v1  ;;  %v803_v0 = vadd.f32 %v802_v3, %v4523_v53  ;;  %v4698_v1 = vld [vmem:[#allocation10 + $0xe8] sm:$0xff]  }
 0x29f   :  { %v805_v14 = vadd.f32 %v804_v9, %v4519_v44  ;;  %v806_v56 = vpop.f32.mrb[59].mxu1  ;;  %1564 = vmatmul.mubr.bf16.gmra.mrb[100].mxu0 %v973_v6  ;;  %1837 = vmatmul.mubr.bf16.gmra.mrb[148].mxu1 %v973_v6 }
 0x2a0   :  { %v807_v4 = vadd.f32 %v806_v56, %v4523_v53  ;;  %3502 = vmatpush1.bf16.msra.mxu1 %v4698_v1 }
 0x2a1   :  { %v927_v51 = vpack.c.bf16 %v805_v14, %v801_v12  ;;  %v4703_v14 = vld [vmem:[#allocation10 + $0xf0] sm:$0xff]   ;;  %3487 = vmatprep.subr.bf16.mxu1 %v4130_v32 }
 0x2a2   :  { %v928_v16 = vpack.c.bf16 %v807_v4, %v803_v0 }
 0x2a3   :  { %v975_v2 = vmax.bf16 %v4130_v32, %v927_v51 }
 0x2a4   :  { %v810_v35 = vpop.f32.mrb[60].mxu1  ;;  %v976_v54 = vmax.bf16 %v4130_v32, %v928_v16  ;;  %3503 = vmatpush1.bf16.msra.mxu1 %v4703_v14 }
 0x2a5   :  { %v812_v60 = vpop.f32.mrb[61].mxu1  ;;  %v811_v15 = vadd.f32 %v810_v35, %v4519_v44  ;;  %3488 = vmatprep.subr.bf16.mxu1 %v4130_v32 }
 0x2a6   :  { %v814_v11 = vpop.f32.mrb[62].mxu1  ;;  %1573 = vmatprep.mubr.bf16.mxu0 %v976_v54  ;;  %1846 = vmatprep.mubr.bf16.mxu1 %v976_v54  ;;  %v813_v19 = vadd.f32 %v812_v60, %v4523_v53 }
 0x2a7   :  { %v815_v17 = vadd.f32 %v814_v11, %v4519_v44  ;;  %v816_v18 = vpop.f32.mrb[63].mxu1  ;;  %1574 = vmatmul.mubr.bf16.gmra.mrb[104].mxu0 %v975_v2  ;;  %1847 = vmatmul.mubr.bf16.gmra.mrb[152].mxu1 %v975_v2  ;;  %v4712_v2 = vld [vmem:[#allocation10 + $0xf8] sm:$0xff]  }
 0x2a8   :  { %v817_v22 = vadd.f32 %v816_v18, %v4523_v53  ;;  %3504 = vmatpush1.bf16.msra.mxu1 %v4712_v2 }
 0x2a9   :  { %v929_v26 = vpack.c.bf16 %v815_v17, %v811_v15 }
 0x2aa   :  { %v930_v31 = vpack.c.bf16 %v817_v22, %v813_v19 }
 0x2ab   :  { %v977_v13 = vmax.bf16 %v4130_v32, %v929_v26 }
 0x2ac   :  { %v820_v37 = vpop.f32.mrb[64].mxu1  ;;  %v978_v52 = vmax.bf16 %v4130_v32, %v930_v31 }
 0x2ad   :  { %v822_v7 = vpop.f32.mrb[65].mxu1  ;;  %v821_v10 = vadd.f32 %v820_v37, %v4519_v44 }
 0x2ae   :  { %v824_v43 = vpop.f32.mrb[66].mxu1  ;;  %1583 = vmatprep.mubr.bf16.mxu0 %v978_v52  ;;  %1856 = vmatprep.mubr.bf16.mxu1 %v978_v52  ;;  %v823_v27 = vadd.f32 %v822_v7, %v4523_v53 }
 0x2af   :  { %v825_v20 = vadd.f32 %v824_v43, %v4519_v44  ;;  %v826_v24 = vpop.f32.mrb[67].mxu1  ;;  %1584 = vmatmul.mubr.bf16.gmra.mrb[108].mxu0 %v977_v13  ;;  %1857 = vmatmul.mubr.bf16.gmra.mrb[156].mxu1 %v977_v13 }
 0x2b0   :  { %v827_v28 = vadd.f32 %v826_v24, %v4523_v53 }
 0x2b1   :  { %v931_v38 = vpack.c.bf16 %v825_v20, %v821_v10 }
 0x2b2   :  { %v932_v39 = vpack.c.bf16 %v827_v28, %v823_v27 }
 0x2b3   :  { %v979_v50 = vmax.bf16 %v4130_v32, %v931_v38 }
 0x2b4   :  { %v830_v45 = vpop.f32.mrb[68].mxu1  ;;  %v980_v46 = vmax.bf16 %v4130_v32, %v932_v39 }
 0x2b5   :  { %v832_v41 = vpop.f32.mrb[69].mxu1  ;;  %v831_v29 = vadd.f32 %v830_v45, %v4519_v44 }
 0x2b6   :  { %v834_v23 = vpop.f32.mrb[70].mxu1  ;;  %1593 = vmatprep.mubr.bf16.mxu0 %v980_v46  ;;  %1866 = vmatprep.mubr.bf16.mxu1 %v980_v46  ;;  %v833_v62 = vadd.f32 %v832_v41, %v4523_v53 }
 0x2b7   :  { %v835_v36 = vadd.f32 %v834_v23, %v4519_v44  ;;  %v836_v59 = vpop.f32.mrb[71].mxu1  ;;  %1594 = vmatmul.mubr.bf16.gmra.mrb[112].mxu0 %v979_v50  ;;  %1867 = vmatmul.mubr.bf16.gmra.mrb[160].mxu1 %v979_v50 }
 0x2b8   :  { %v837_v63 = vadd.f32 %v836_v59, %v4523_v53 }
 0x2b9   :  { %v933_v3 = vpack.c.bf16 %v835_v36, %v831_v29 }
 0x2ba   :  { %v934_v6 = vpack.c.bf16 %v837_v63, %v833_v62 }
 0x2bb   :  { %v981_v0 = vmax.bf16 %v4130_v32, %v933_v3 }
 0x2bc   :  { %v840_v9 = vpop.f32.mrb[72].mxu1  ;;  %v982_v12 = vmax.bf16 %v4130_v32, %v934_v6 }
 0x2bd   :  { %v842_v56 = vpop.f32.mrb[73].mxu1  ;;  %v841_v51 = vadd.f32 %v840_v9, %v4519_v44 }
 0x2be   :  { %v844_v4 = vpop.f32.mrb[74].mxu1  ;;  %1603 = vmatprep.mubr.bf16.mxu0 %v982_v12  ;;  %1876 = vmatprep.mubr.bf16.mxu1 %v982_v12  ;;  %v843_v54 = vadd.f32 %v842_v56, %v4523_v53 }
 0x2bf   :  { %v845_v16 = vadd.f32 %v844_v4, %v4519_v44  ;;  %v846_v35 = vpop.f32.mrb[75].mxu1  ;;  %1604 = vmatmul.mubr.bf16.gmra.mrb[116].mxu0 %v981_v0  ;;  %1877 = vmatmul.mubr.bf16.gmra.mrb[164].mxu1 %v981_v0 }
 0x2c0   :  { %v847_v60 = vadd.f32 %v846_v35, %v4523_v53 }
 0x2c1   :  { %v935_v11 = vpack.c.bf16 %v845_v16, %v841_v51 }
 0x2c2   :  { %v936_v15 = vpack.c.bf16 %v847_v60, %v843_v54 }
 0x2c3   :  { %v983_v22 = vmax.bf16 %v4130_v32, %v935_v11 }
 0x2c4   :  { %v850_v17 = vpop.f32.mrb[76].mxu1  ;;  %v984_v18 = vmax.bf16 %v4130_v32, %v936_v15 }
 0x2c5   :  { %v852_v19 = vpop.f32.mrb[77].mxu1  ;;  %v851_v31 = vadd.f32 %v850_v17, %v4519_v44 }
 0x2c6   :  { %v854_v26 = vpop.f32.mrb[78].mxu1  ;;  %1613 = vmatprep.mubr.bf16.mxu0 %v984_v18  ;;  %1886 = vmatprep.mubr.bf16.mxu1 %v984_v18  ;;  %v853_v7 = vadd.f32 %v852_v19, %v4523_v53 }
 0x2c7   :  { %v855_v37 = vadd.f32 %v854_v26, %v4519_v44  ;;  %v856_v52 = vpop.f32.mrb[79].mxu1  ;;  %1614 = vmatmul.mubr.bf16.gmra.mrb[120].mxu0 %v983_v22  ;;  %1887 = vmatmul.mubr.bf16.gmra.mrb[168].mxu1 %v983_v22 }
 0x2c8   :  { %v857_v13 = vadd.f32 %v856_v52, %v4523_v53 }
 0x2c9   :  { %v937_v43 = vpack.c.bf16 %v855_v37, %v851_v31 }
 0x2ca   :  { %v938_v10 = vpack.c.bf16 %v857_v13, %v853_v7 }
 0x2cb   :  { %v985_v28 = vmax.bf16 %v4130_v32, %v937_v43 }
 0x2cc   :  { %v860_v20 = vpop.f32.mrb[80].mxu1  ;;  %v986_v24 = vmax.bf16 %v4130_v32, %v938_v10 }
 0x2cd   :  { %v862_v27 = vpop.f32.mrb[81].mxu1  ;;  %v861_v39 = vadd.f32 %v860_v20, %v4519_v44 }
 0x2ce   :  { %v864_v38 = vpop.f32.mrb[82].mxu1  ;;  %1623 = vmatprep.mubr.bf16.mxu0 %v986_v24  ;;  %1896 = vmatprep.mubr.bf16.mxu1 %v986_v24  ;;  %v863_v41 = vadd.f32 %v862_v27, %v4523_v53 }
 0x2cf   :  { %v865_v45 = vadd.f32 %v864_v38, %v4519_v44  ;;  %v866_v46 = vpop.f32.mrb[83].mxu1  ;;  %1624 = vmatmul.mubr.bf16.gmra.mrb[124].mxu0 %v985_v28  ;;  %1897 = vmatmul.mubr.bf16.gmra.mrb[172].mxu1 %v985_v28 }
 0x2d0   :  { %v867_v50 = vadd.f32 %v866_v46, %v4523_v53 }
 0x2d1   :  { %v939_v23 = vpack.c.bf16 %v865_v45, %v861_v39 }
 0x2d2   :  { %v940_v29 = vpack.c.bf16 %v867_v50, %v863_v41  ;;  %v1071_v41 = vsub.s32 2, %v4510_v33  ;;  %v1075_v50 = vsub.s32 3, %v4510_v33 }
 0x2d3   :  { %v987_v63 = vmax.bf16 %v4130_v32, %v939_v23 }
 0x2d4   :  { %v870_v36 = vpop.f32.mrb[84].mxu1  ;;  %v988_v59 = vmax.bf16 %v4130_v32, %v940_v29 }
 0x2d5   :  { %v872_v62 = vpop.f32.mrb[85].mxu1  ;;  %v871_v6 = vadd.f32 %v870_v36, %v4519_v44 }
 0x2d6   :  { %v874_v3 = vpop.f32.mrb[86].mxu1  ;;  %1633 = vmatprep.mubr.bf16.mxu0 %v988_v59  ;;  %1906 = vmatprep.mubr.bf16.mxu1 %v988_v59  ;;  %v873_v56 = vadd.f32 %v872_v62, %v4523_v53 }
 0x2d7   :  { %v875_v9 = vadd.f32 %v874_v3, %v4519_v44  ;;  %v876_v12 = vpop.f32.mrb[87].mxu1  ;;  %1634 = vmatmul.mubr.bf16.gmra.mrb[128].mxu0 %v987_v63  ;;  %1907 = vmatmul.mubr.bf16.gmra.mrb[176].mxu1 %v987_v63 }
 0x2d8   :  { %v877_v0 = vadd.f32 %v876_v12, %v4523_v53 }
 0x2d9   :  { %v941_v4 = vpack.c.bf16 %v875_v9, %v871_v6 }
 0x2da   :  { %v942_v51 = vpack.c.bf16 %v877_v0, %v873_v56 }
 0x2db   :  { %v989_v60 = vmax.bf16 %v4130_v32, %v941_v4 }
 0x2dc   :  { %v880_v16 = vpop.f32.mrb[88].mxu1  ;;  %v990_v35 = vmax.bf16 %v4130_v32, %v942_v51 }
 0x2dd   :  { %v882_v54 = vpop.f32.mrb[89].mxu1  ;;  %v881_v15 = vadd.f32 %v880_v16, %v4519_v44 }
 0x2de   :  { %v884_v11 = vpop.f32.mrb[90].mxu1  ;;  %1643 = vmatprep.mubr.bf16.mxu0 %v990_v35  ;;  %1916 = vmatprep.mubr.bf16.mxu1 %v990_v35  ;;  %v883_v19 = vadd.f32 %v882_v54, %v4523_v53 }
 0x2df   :  { %v885_v17 = vadd.f32 %v884_v11, %v4519_v44  ;;  %v886_v18 = vpop.f32.mrb[91].mxu1  ;;  %1644 = vmatmul.mubr.bf16.gmra.mrb[132].mxu0 %v989_v60  ;;  %1917 = vmatmul.mubr.bf16.gmra.mrb[180].mxu1 %v989_v60 }
 0x2e0   :  { %v887_v22 = vadd.f32 %v886_v18, %v4523_v53 }
 0x2e1   :  { %v943_v26 = vpack.c.bf16 %v885_v17, %v881_v15 }
 0x2e2   :  { %v944_v31 = vpack.c.bf16 %v887_v22, %v883_v19 }
 0x2e3   :  { %v991_v13 = vmax.bf16 %v4130_v32, %v943_v26 }
 0x2e4   :  { %v890_v37 = vpop.f32.mrb[92].mxu1  ;;  %v992_v52 = vmax.bf16 %v4130_v32, %v944_v31 }
 0x2e5   :  { %v892_v7 = vpop.f32.mrb[93].mxu1  ;;  %v891_v10 = vadd.f32 %v890_v37, %v4519_v44 }
 0x2e6   :  { %v894_v43 = vpop.f32.mrb[94].mxu1  ;;  %1653 = vmatprep.mubr.bf16.mxu0 %v992_v52  ;;  %1926 = vmatprep.mubr.bf16.mxu1 %v992_v52  ;;  %v893_v27 = vadd.f32 %v892_v7, %v4523_v53 }
 0x2e7   :  { %v895_v20 = vadd.f32 %v894_v43, %v4519_v44  ;;  %v896_v24 = vpop.f32.mrb[95].mxu1  ;;  %1654 = vmatmul.mubr.bf16.gmra.mrb[136].mxu0 %v991_v13  ;;  %1927 = vmatmul.mubr.bf16.gmra.mrb[184].mxu1 %v991_v13  ;;  %v1059_v44 = vld [vmem:[%s5264_s6] sm:$0xf] }
 0x2e8   :  { %v897_v28 = vadd.f32 %v896_v24, %v4523_v53  ;;  %v4755_v53 = vrot.slane %v1059_v44, %v538_v34  ;;  %v4757_v23 = vrot.slane %v1059_v44, %v1071_v41  ;;  %v4761_v59 = vrot.slane %v1059_v44, %v542_v40 }
 0x2e9   :  { %v945_v38 = vpack.c.bf16 %v895_v20, %v891_v10  ;;  %v4763_v62 = vrot.slane %v1059_v44, %v1075_v50 }
 0x2ea   :  { %v946_v39 = vpack.c.bf16 %v897_v28, %v893_v27 }
 0x2eb   :  { %v993_v46 = vmax.bf16 %v4130_v32, %v945_v38 }
 0x2ec   :  { %v994_v45 = vmax.bf16 %v4130_v32, %v946_v39 }
 0x2ee   :  { %1663 = vmatprep.mubr.bf16.mxu0 %v994_v45  ;;  %1936 = vmatprep.mubr.bf16.mxu1 %v994_v45 }
 0x2ef   :  { %1664 = vmatmul.mubr.bf16.gmra.mrb[140].mxu0 %v993_v46  ;;  %1937 = vmatmul.mubr.bf16.gmra.mrb[188].mxu1 %v993_v46 }
 0x30a   :  { %v1435_v29 = vpop.f32.mrb[48].mxu0  ;;  %v1708_v36 = vpop.f32.mrb[96].mxu1 }
 0x30b   :  { %v1437_v63 = vpop.f32.mrb[49].mxu0  ;;  %v1710_v3 = vpop.f32.mrb[97].mxu1  ;;  %v1436_v12 = vadd.f32 %v1435_v29, %v4755_v53  ;;  %v4767_v56 = vadd.f32 %v1708_v36, %v4757_v23 }
 0x30c   :  { %v1439_v6 = vpop.f32.mrb[50].mxu0  ;;  %v1712_v9 = vpop.f32.mrb[98].mxu1  ;;  %v1438_v40 = vadd.f32 %v1437_v63, %v4761_v59  ;;  %v4775_v51 = vadd.f32 %v1710_v3, %v4763_v62 }
 0x30d   :  { %v1440_v34 = vadd.f32 %v1439_v6, %v4755_v53  ;;  %v4771_v0 = vadd.f32 %v1712_v9, %v4757_v23  ;;  %v1441_v4 = vpop.f32.mrb[51].mxu0  ;;  %v1714_v33 = vpop.f32.mrb[99].mxu1 }
 0x30e   :  { %v1442_v16 = vadd.f32 %v1441_v4, %v4761_v59  ;;  %v4779_v35 = vadd.f32 %v1714_v33, %v4763_v62 }
 0x30f   :  { %v1947_v54 = vpack.c.bf16 %v1440_v34, %v1436_v12  ;;  %v1949_v60 = vpack.c.bf16 %v4771_v0, %v4767_v56 }
 0x310   :  { %v1948_v11 = vpack.c.bf16 %v1442_v16, %v1438_v40  ;;  %v1950_v15 = vpack.c.bf16 %v4779_v35, %v4775_v51 }
 0x311   :  { %v2043_v22 = vmax.bf16 %v4130_v32, %v1947_v54 }
 0x312   :  { %v1445_v17 = vpop.f32.mrb[52].mxu0  ;;  %v1718_v18 = vpop.f32.mrb[100].mxu1  ;;  %v2044_v19 = vmax.bf16 %v4130_v32, %v1948_v11 }
 0x313   :  { %v1447_v26 = vpop.f32.mrb[53].mxu0  ;;  %v1720_v31 = vpop.f32.mrb[101].mxu1  ;;  %v1446_v7 = vadd.f32 %v1445_v17, %v4755_v53  ;;  %v4789_v13 = vadd.f32 %v1718_v18, %v4757_v23 }
 0x314   :  { %v1449_v37 = vpop.f32.mrb[54].mxu0  ;;  %v1722_v52 = vpop.f32.mrb[102].mxu1  ;;  %2434 = vmatprep.mubr.bf16.mxu0 %v2044_v19  ;;  %v1448_v27 = vadd.f32 %v1447_v26, %v4761_v59  ;;  %v4797_v28 = vadd.f32 %v1720_v31, %v4763_v62 }
 0x315   :  { %v1450_v43 = vadd.f32 %v1449_v37, %v4755_v53  ;;  %v4793_v10 = vadd.f32 %v1722_v52, %v4757_v23  ;;  %v1451_v20 = vpop.f32.mrb[55].mxu0  ;;  %v1724_v24 = vpop.f32.mrb[103].mxu1  ;;  %2435 = vmatmul.mubr.bf16.vlgmr.msra.gmra.mrb[144].mxu0 %v2043_v22 }
 0x316   :  { %v1452_v38 = vadd.f32 %v1451_v20, %v4761_v59  ;;  %v4801_v39 = vadd.f32 %v1724_v24, %v4763_v62  ;;  %2628 = vmatpush1.bf16.msra.mxu0 %v4531_v42 }
 0x317   :  { %v1951_v45 = vpack.c.bf16 %v1450_v43, %v1446_v7  ;;  %v1953_v46 = vpack.c.bf16 %v4793_v10, %v4789_v13  ;;  %2629 = vmatprep.subr.bf16.mxu0 %v4130_v32 }
 0x318   :  { %v1952_v41 = vpack.c.bf16 %v1452_v38, %v1448_v27  ;;  %v1954_v44 = vpack.c.bf16 %v4801_v39, %v4797_v28 }
 0x319   :  { %v2047_v42 = vmax.bf16 %v4130_v32, %v1951_v45  ;;  %v2049_v51 = vmax.bf16 %v4130_v32, %v1953_v46 }
 0x31a   :  { %v1455_v50 = vpop.f32.mrb[56].mxu0  ;;  %v1728_v29 = vpop.f32.mrb[104].mxu1  ;;  %v2048_v36 = vmax.bf16 %v4130_v32, %v1952_v41  ;;  %2630 = vmatpush1.bf16.msra.mxu0 %v4548_v5 }
 0x31b   :  { %v1457_v63 = vpop.f32.mrb[57].mxu0  ;;  %v1730_v3 = vpop.f32.mrb[105].mxu1  ;;  %2631 = vmatprep.subr.bf16.mxu0 %v4130_v32  ;;  %v1456_v12 = vadd.f32 %v1455_v50, %v4755_v53  ;;  %v4815_v34 = vadd.f32 %v1728_v29, %v4757_v23 }
 0x31c   :  { %v1459_v6 = vpop.f32.mrb[58].mxu0  ;;  %v1732_v9 = vpop.f32.mrb[106].mxu1  ;;  %2442 = vmatprep.mubr.bf16.mxu0 %v2048_v36  ;;  %v1458_v16 = vadd.f32 %v1457_v63, %v4761_v59  ;;  %v4823_v54 = vadd.f32 %v1730_v3, %v4763_v62 }
 0x31d   :  { %v1460_v4 = vadd.f32 %v1459_v6, %v4755_v53  ;;  %v4819_v33 = vadd.f32 %v1732_v9, %v4757_v23  ;;  %v1461_v5 = vpop.f32.mrb[59].mxu0  ;;  %v1734_v40 = vpop.f32.mrb[107].mxu1  ;;  %2443 = vmatmul.mubr.bf16.gmra.mrb[148].mxu0 %v2047_v42 }
 0x31e   :  { %v1462_v11 = vadd.f32 %v1461_v5, %v4761_v59  ;;  %v4827_v17 = vadd.f32 %v1734_v40, %v4763_v62  ;;  %2632 = vmatpush1.bf16.msra.mxu0 %v4563_v61 }
 0x31f   :  { %v1955_v18 = vpack.c.bf16 %v1460_v4, %v1456_v12  ;;  %v1957_v19 = vpack.c.bf16 %v4819_v33, %v4815_v34  ;;  %2633 = vmatprep.subr.bf16.mxu0 %v4130_v32 }
 0x320   :  { %v1956_v22 = vpack.c.bf16 %v1462_v11, %v1458_v16  ;;  %v1958_v26 = vpack.c.bf16 %v4827_v17, %v4823_v54 }
 0x321   :  { %v2051_v61 = vmax.bf16 %v4130_v32, %v1955_v18  ;;  %v2053_v56 = vmax.bf16 %v4130_v32, %v1957_v19 }
 0x322   :  { %v1465_v31 = vpop.f32.mrb[60].mxu0  ;;  %v1738_v37 = vpop.f32.mrb[108].mxu1  ;;  %v2052_v52 = vmax.bf16 %v4130_v32, %v1956_v22  ;;  %2634 = vmatpush1.bf16.msra.mxu0 %v4580_v55  ;;  %v2054_v35 = vmax.bf16 %v4130_v32, %v1958_v26 }
 0x323   :  { %v1467_v7 = vpop.f32.mrb[61].mxu0  ;;  %v1740_v43 = vpop.f32.mrb[109].mxu1  ;;  %2635 = vmatprep.subr.bf16.mxu0 %v4130_v32  ;;  %v1466_v27 = vadd.f32 %v1465_v31, %v4755_v53  ;;  %v4841_v38 = vadd.f32 %v1738_v37, %v4757_v23 }
 0x324   :  { %v1469_v20 = vpop.f32.mrb[62].mxu0  ;;  %v1742_v24 = vpop.f32.mrb[110].mxu1  ;;  %2450 = vmatprep.mubr.bf16.mxu0 %v2052_v52  ;;  %v1468_v29 = vadd.f32 %v1467_v7, %v4761_v59  ;;  %v4849_v36 = vadd.f32 %v1740_v43, %v4763_v62 }
 0x325   :  { %v1470_v45 = vadd.f32 %v1469_v20, %v4755_v53  ;;  %v4845_v41 = vadd.f32 %v1742_v24, %v4757_v23  ;;  %v1471_v55 = vpop.f32.mrb[63].mxu0  ;;  %v1744_v50 = vpop.f32.mrb[111].mxu1  ;;  %2451 = vmatmul.mubr.bf16.gmra.mrb[152].mxu0 %v2051_v61 }
 0x326   :  { %v1472_v63 = vadd.f32 %v1471_v55, %v4761_v59  ;;  %v4853_v3 = vadd.f32 %v1744_v50, %v4763_v62  ;;  %2636 = vmatpush1.bf16.msra.mxu0 %v4595_v8 }
 0x327   :  { %v1959_v42 = vpack.c.bf16 %v1470_v45, %v1466_v27  ;;  %v1961_v6 = vpack.c.bf16 %v4845_v41, %v4841_v38  ;;  %2637 = vmatprep.subr.bf16.mxu0 %v4130_v32 }
 0x328   :  { %v1960_v9 = vpack.c.bf16 %v1472_v63, %v1468_v29  ;;  %v1962_v12 = vpack.c.bf16 %v4853_v3, %v4849_v36 }
 0x329   :  { %v2055_v8 = vmax.bf16 %v4130_v32, %v1959_v42 }
 0x32a   :  { %v1475_v4 = vpop.f32.mrb[64].mxu0  ;;  %v1748_v5 = vpop.f32.mrb[112].mxu1  ;;  %v2056_v40 = vmax.bf16 %v4130_v32, %v1960_v9  ;;  %2638 = vmatpush1.bf16.msra.mxu0 %v4608_v21  ;;  %v2058_v0 = vmax.bf16 %v4130_v32, %v1962_v12 }
 0x32b   :  { %v1477_v16 = vpop.f32.mrb[65].mxu0  ;;  %v1750_v11 = vpop.f32.mrb[113].mxu1  ;;  %2639 = vmatprep.subr.bf16.mxu0 %v4130_v32  ;;  %v1476_v31 = vadd.f32 %v1475_v4, %v4755_v53  ;;  %v4867_v37 = vadd.f32 %v1748_v5, %v4757_v23 }
 0x32c   :  { %v1479_v18 = vpop.f32.mrb[66].mxu0  ;;  %v1752_v22 = vpop.f32.mrb[114].mxu1  ;;  %2458 = vmatprep.mubr.bf16.mxu0 %v2056_v40  ;;  %v1478_v61 = vadd.f32 %v1477_v16, %v4761_v59  ;;  %v4875_v20 = vadd.f32 %v1750_v11, %v4763_v62 }
 0x32d   :  { %v1480_v52 = vadd.f32 %v1479_v18, %v4755_v53  ;;  %v4871_v7 = vadd.f32 %v1752_v22, %v4757_v23  ;;  %v1481_v21 = vpop.f32.mrb[67].mxu0  ;;  %v1754_v43 = vpop.f32.mrb[115].mxu1  ;;  %2459 = vmatmul.mubr.bf16.gmra.mrb[156].mxu0 %v2055_v8 }
 0x32e   :  { %v1482_v24 = vadd.f32 %v1481_v21, %v4761_v59  ;;  %v4879_v27 = vadd.f32 %v1754_v43, %v4763_v62  ;;  %2640 = vmatpush1.bf16.msra.mxu0 %v4613_v25 }
 0x32f   :  { %v1963_v45 = vpack.c.bf16 %v1480_v52, %v1476_v31  ;;  %v1965_v55 = vpack.c.bf16 %v4871_v7, %v4867_v37  ;;  %2641 = vmatprep.subr.bf16.mxu0 %v4130_v32 }
 0x330   :  { %v1964_v50 = vpack.c.bf16 %v1482_v24, %v1478_v61  ;;  %v1966_v29 = vpack.c.bf16 %v4879_v27, %v4875_v20 }
 0x331   :  { %v2059_v25 = vmax.bf16 %v4130_v32, %v1963_v45  ;;  %v2061_v13 = vmax.bf16 %v4130_v32, %v1965_v55 }
 0x332   :  { %v1485_v63 = vpop.f32.mrb[68].mxu0  ;;  %v1758_v42 = vpop.f32.mrb[116].mxu1  ;;  %v2060_v9 = vmax.bf16 %v4130_v32, %v1964_v50  ;;  %2642 = vmatpush1.bf16.msra.mxu0 %v4620_v47 }
 0x333   :  { %v1487_v4 = vpop.f32.mrb[69].mxu0  ;;  %v1760_v5 = vpop.f32.mrb[117].mxu1  ;;  %2643 = vmatprep.subr.bf16.mxu0 %v4130_v32  ;;  %v1486_v11 = vadd.f32 %v1485_v63, %v4755_v53  ;;  %v4893_v8 = vadd.f32 %v1758_v42, %v4757_v23 }
 0x334   :  { %v1489_v40 = vpop.f32.mrb[70].mxu0  ;;  %v1762_v16 = vpop.f32.mrb[118].mxu1  ;;  %2466 = vmatprep.mubr.bf16.mxu0 %v2060_v9  ;;  %v1488_v52 = vadd.f32 %v1487_v4, %v4761_v59  ;;  %v4901_v21 = vadd.f32 %v1760_v5, %v4763_v62 }
 0x335   :  { %v1490_v18 = vadd.f32 %v1489_v40, %v4755_v53  ;;  %v4897_v22 = vadd.f32 %v1762_v16, %v4757_v23  ;;  %v1491_v47 = vpop.f32.mrb[71].mxu0  ;;  %v1764_v31 = vpop.f32.mrb[119].mxu1  ;;  %2467 = vmatmul.mubr.bf16.gmra.mrb[160].mxu0 %v2059_v25 }
 0x336   :  { %v1492_v43 = vadd.f32 %v1491_v47, %v4761_v59  ;;  %v4905_v61 = vadd.f32 %v1764_v31, %v4763_v62  ;;  %2644 = vmatpush1.bf16.msra.mxu0 %v4655_v58 }
 0x337   :  { %v1967_v24 = vpack.c.bf16 %v1490_v18, %v1486_v11  ;;  %2645 = vmatprep.subr.bf16.mxu0 %v4130_v32  ;;  %v5269_v39 = vpack.c.bf16 %v4897_v22, %v4893_v8 }
 0x338   :  { %v1968_v50 = vpack.c.bf16 %v1492_v43, %v1488_v52  ;;  %v5268_v10 = vpack.c.bf16 %v4905_v61, %v4901_v21 }
 0x339   :  { %v2063_v58 = vmax.bf16 %v4130_v32, %v1967_v24  ;;  %v2065_v46 = vmax.bf16 %v4130_v32, %v5269_v39 }
 0x33a   :  { %v1495_v42 = vpop.f32.mrb[72].mxu0  ;;  %v1768_v9 = vpop.f32.mrb[120].mxu1  ;;  %v2064_v4 = vmax.bf16 %v4130_v32, %v1968_v50  ;;  %2646 = vmatpush1.bf16.msra.mxu0 %v4665_v49  ;;  %v2066_v28 = vmax.bf16 %v4130_v32, %v5268_v10 }
 0x33b   :  { %v1497_v5 = vpop.f32.mrb[73].mxu0  ;;  %v1770_v25 = vpop.f32.mrb[121].mxu1  ;;  %2647 = vmatprep.subr.bf16.mxu0 %v4130_v32  ;;  %v1496_v11 = vadd.f32 %v1495_v42, %v4755_v53  ;;  %v1769_v18 = vadd.f32 %v1768_v9, %v4757_v23 }
 0x33c   :  { %v1499_v40 = vpop.f32.mrb[74].mxu0  ;;  %v1772_v16 = vpop.f32.mrb[122].mxu1  ;;  %2474 = vmatprep.mubr.bf16.mxu0 %v2064_v4  ;;  %v1498_v49 = vadd.f32 %v1497_v5, %v4761_v59  ;;  %v1771_v24 = vadd.f32 %v1770_v25, %v4763_v62 }
 0x33d   :  { %v1500_v47 = vadd.f32 %v1499_v40, %v4755_v53  ;;  %v1773_v31 = vadd.f32 %v1772_v16, %v4757_v23  ;;  %v1501_v52 = vpop.f32.mrb[75].mxu0  ;;  %v1774_v43 = vpop.f32.mrb[123].mxu1  ;;  %2475 = vmatmul.mubr.bf16.gmra.mrb[164].mxu0 %v2063_v58 }
 0x33e   :  { %v1502_v50 = vadd.f32 %v1501_v52, %v4761_v59  ;;  %v1775_v45 = vadd.f32 %v1774_v43, %v4763_v62  ;;  %2648 = vmatpush1.bf16.msra.mxu0 %v4676_v57 }
 0x33f   :  { %v1971_v42 = vpack.c.bf16 %v1500_v47, %v1496_v11  ;;  %v1973_v4 = vpack.c.bf16 %v1773_v31, %v1769_v18  ;;  %2649 = vmatprep.subr.bf16.mxu0 %v4130_v32 }
 0x340   :  { %v1972_v9 = vpack.c.bf16 %v1502_v50, %v1498_v49  ;;  %v1974_v40 = vpack.c.bf16 %v1775_v45, %v1771_v24 }
 0x341   :  { %v2069_v25 = vmax.bf16 %v4130_v32, %v1973_v4  ;;  %v2067_v57 = vmax.bf16 %v4130_v32, %v1971_v42 }
 0x342   :  { %v1505_v16 = vpop.f32.mrb[76].mxu0  ;;  %v1778_v63 = vpop.f32.mrb[124].mxu1  ;;  %v2068_v58 = vmax.bf16 %v4130_v32, %v1972_v9  ;;  %v2070_v5 = vmax.bf16 %v4130_v32, %v1974_v40  ;;  %2650 = vmatpush1.bf16.msra.mxu0 %v4684_v30 }
 0x343   :  { %v1507_v52 = vpop.f32.mrb[77].mxu0  ;;  %v1780_v43 = vpop.f32.mrb[125].mxu1  ;;  %2651 = vmatprep.subr.bf16.mxu0 %v4130_v32  ;;  %v1506_v11 = vadd.f32 %v1505_v16, %v4755_v53  ;;  %v1779_v47 = vadd.f32 %v1778_v63, %v4757_v23 }
 0x344   :  { %v1509_v18 = vpop.f32.mrb[78].mxu0  ;;  %v1782_v45 = vpop.f32.mrb[126].mxu1  ;;  %2482 = vmatprep.mubr.bf16.mxu0 %v2068_v58  ;;  %2707 = vmatprep.mubr.bf16.mxu1 %v2070_v5  ;;  %v1508_v50 = vadd.f32 %v1507_v52, %v4761_v59  ;;  %v1781_v42 = vadd.f32 %v1780_v43, %v4763_v62 }
 0x345   :  { %v1510_v31 = vadd.f32 %v1509_v18, %v4755_v53  ;;  %v1783_v30 = vadd.f32 %v1782_v45, %v4757_v23  ;;  %v1511_v49 = vpop.f32.mrb[79].mxu0  ;;  %v1784_v24 = vpop.f32.mrb[127].mxu1  ;;  %2483 = vmatmul.mubr.bf16.gmra.mrb[168].mxu0 %v2067_v57  ;;  %2708 = vmatmul.mubr.bf16.vlgmr.msra.gmra.mrb[192].mxu1 %v2069_v25 }
 0x346   :  { %v1512_v4 = vadd.f32 %v1511_v49, %v4761_v59  ;;  %v1785_v9 = vadd.f32 %v1784_v24, %v4763_v62  ;;  %2652 = vmatpush1.bf16.msra.mxu0 %v4689_v48 }
 0x347   :  { %v1975_v40 = vpack.c.bf16 %v1510_v31, %v1506_v11  ;;  %v1977_v63 = vpack.c.bf16 %v1783_v30, %v1779_v47  ;;  %2653 = vmatprep.subr.bf16.mxu0 %v4130_v32 }
 0x348   :  { %v1976_v16 = vpack.c.bf16 %v1512_v4, %v1508_v50  ;;  %v1978_v58 = vpack.c.bf16 %v1785_v9, %v1781_v42 }
 0x349   :  { %v2071_v45 = vmax.bf16 %v4130_v32, %v1975_v40  ;;  %v2073_v48 = vmax.bf16 %v4130_v32, %v1977_v63 }
 0x34a   :  { %v1515_v5 = vpop.f32.mrb[80].mxu0  ;;  %v1788_v18 = vpop.f32.mrb[128].mxu1  ;;  %v2072_v25 = vmax.bf16 %v4130_v32, %v1976_v16  ;;  %v2074_v52 = vmax.bf16 %v4130_v32, %v1978_v58  ;;  %2654 = vmatpush1.bf16.msra.mxu0 %v4698_v1 }
 0x34b   :  { %v1517_v43 = vpop.f32.mrb[81].mxu0  ;;  %v1790_v57 = vpop.f32.mrb[129].mxu1  ;;  %2655 = vmatprep.subr.bf16.mxu0 %v4130_v32  ;;  %v1516_v11 = vadd.f32 %v1515_v5, %v4755_v53  ;;  %v1789_v30 = vadd.f32 %v1788_v18, %v4757_v23 }
 0x34c   :  { %v1519_v47 = vpop.f32.mrb[82].mxu0  ;;  %v1792_v31 = vpop.f32.mrb[130].mxu1  ;;  %2490 = vmatprep.mubr.bf16.mxu0 %v2072_v25  ;;  %2715 = vmatprep.mubr.bf16.mxu1 %v2074_v52  ;;  %v1518_v42 = vadd.f32 %v1517_v43, %v4761_v59  ;;  %v1791_v4 = vadd.f32 %v1790_v57, %v4763_v62 }
 0x34d   :  { %v1520_v49 = vadd.f32 %v1519_v47, %v4755_v53  ;;  %v1793_v1 = vadd.f32 %v1792_v31, %v4757_v23  ;;  %v1521_v24 = vpop.f32.mrb[83].mxu0  ;;  %v1794_v50 = vpop.f32.mrb[131].mxu1  ;;  %2491 = vmatmul.mubr.bf16.gmra.mrb[172].mxu0 %v2071_v45  ;;  %2716 = vmatmul.mubr.bf16.gmra.mrb[196].mxu1 %v2073_v48 }
 0x34e   :  { %v1522_v9 = vadd.f32 %v1521_v24, %v4761_v59  ;;  %v1795_v40 = vadd.f32 %v1794_v50, %v4763_v62  ;;  %2656 = vmatpush1.bf16.msra.mxu0 %v4703_v14 }
 0x34f   :  { %v1979_v63 = vpack.c.bf16 %v1520_v49, %v1516_v11  ;;  %v1981_v16 = vpack.c.bf16 %v1793_v1, %v1789_v30  ;;  %2657 = vmatprep.subr.bf16.mxu0 %v4130_v32 }
 0x350   :  { %v1980_v58 = vpack.c.bf16 %v1522_v9, %v1518_v42  ;;  %v1982_v5 = vpack.c.bf16 %v1795_v40, %v1791_v4 }
 0x351   :  { %v2075_v48 = vmax.bf16 %v4130_v32, %v1979_v63  ;;  %v2077_v14 = vmax.bf16 %v4130_v32, %v1981_v16 }
 0x352   :  { %v1525_v18 = vpop.f32.mrb[84].mxu0  ;;  %v1798_v25 = vpop.f32.mrb[132].mxu1  ;;  %v2076_v52 = vmax.bf16 %v4130_v32, %v1980_v58  ;;  %v2078_v43 = vmax.bf16 %v4130_v32, %v1982_v5  ;;  %2658 = vmatpush1.bf16.msra.mxu0 %v4712_v2 }
 0x353   :  { %v1527_v57 = vpop.f32.mrb[85].mxu0  ;;  %v1800_v45 = vpop.f32.mrb[133].mxu1  ;;  %v1526_v11 = vadd.f32 %v1525_v18, %v4755_v53  ;;  %v1799_v30 = vadd.f32 %v1798_v25, %v4757_v23 }
 0x354   :  { %v1529_v47 = vpop.f32.mrb[86].mxu0  ;;  %v1802_v31 = vpop.f32.mrb[134].mxu1  ;;  %2498 = vmatprep.mubr.bf16.mxu0 %v2076_v52  ;;  %2723 = vmatprep.mubr.bf16.mxu1 %v2078_v43  ;;  %v1528_v50 = vadd.f32 %v1527_v57, %v4761_v59  ;;  %v1801_v42 = vadd.f32 %v1800_v45, %v4763_v62 }
 0x355   :  { %v1530_v49 = vadd.f32 %v1529_v47, %v4755_v53  ;;  %v1803_v1 = vadd.f32 %v1802_v31, %v4757_v23  ;;  %v1531_v24 = vpop.f32.mrb[87].mxu0  ;;  %v1804_v2 = vpop.f32.mrb[135].mxu1  ;;  %2499 = vmatmul.mubr.bf16.gmra.mrb[176].mxu0 %v2075_v48  ;;  %2724 = vmatmul.mubr.bf16.gmra.mrb[200].mxu1 %v2077_v14 }
 0x356   :  { %v1532_v4 = vadd.f32 %v1531_v24, %v4761_v59  ;;  %v1805_v9 = vadd.f32 %v1804_v2, %v4763_v62 }
 0x357   :  { %v1983_v40 = vpack.c.bf16 %v1530_v49, %v1526_v11  ;;  %v1985_v63 = vpack.c.bf16 %v1803_v1, %v1799_v30 }
 0x358   :  { %v1984_v16 = vpack.c.bf16 %v1532_v4, %v1528_v50  ;;  %v1986_v58 = vpack.c.bf16 %v1805_v9, %v1801_v42 }
 0x359   :  { %v2079_v57 = vmax.bf16 %v4130_v32, %v1983_v40  ;;  %v2081_v45 = vmax.bf16 %v4130_v32, %v1985_v63 }
 0x35a   :  { %v1535_v5 = vpop.f32.mrb[88].mxu0  ;;  %v1808_v18 = vpop.f32.mrb[136].mxu1  ;;  %v2080_v25 = vmax.bf16 %v4130_v32, %v1984_v16  ;;  %v2082_v52 = vmax.bf16 %v4130_v32, %v1986_v58 }
 0x35b   :  { %v1537_v43 = vpop.f32.mrb[89].mxu0  ;;  %v1810_v48 = vpop.f32.mrb[137].mxu1  ;;  %v1536_v14 = vadd.f32 %v1535_v5, %v4755_v53  ;;  %v1809_v11 = vadd.f32 %v1808_v18, %v4757_v23 }
 0x35c   :  { %v1539_v47 = vpop.f32.mrb[90].mxu0  ;;  %v1812_v31 = vpop.f32.mrb[138].mxu1  ;;  %2506 = vmatprep.mubr.bf16.mxu0 %v2080_v25  ;;  %2731 = vmatprep.mubr.bf16.mxu1 %v2082_v52  ;;  %v1538_v2 = vadd.f32 %v1537_v43, %v4761_v59  ;;  %v1811_v50 = vadd.f32 %v1810_v48, %v4763_v62 }
 0x35d   :  { %v1540_v30 = vadd.f32 %v1539_v47, %v4755_v53  ;;  %v1813_v49 = vadd.f32 %v1812_v31, %v4757_v23  ;;  %v1541_v1 = vpop.f32.mrb[91].mxu0  ;;  %v1814_v24 = vpop.f32.mrb[139].mxu1  ;;  %2507 = vmatmul.mubr.bf16.gmra.mrb[180].mxu0 %v2079_v57  ;;  %2732 = vmatmul.mubr.bf16.gmra.mrb[204].mxu1 %v2081_v45 }
 0x35e   :  { %v1542_v42 = vadd.f32 %v1541_v1, %v4761_v59  ;;  %v1815_v4 = vadd.f32 %v1814_v24, %v4763_v62 }
 0x35f   :  { %v1987_v9 = vpack.c.bf16 %v1540_v30, %v1536_v14  ;;  %v1989_v40 = vpack.c.bf16 %v1813_v49, %v1809_v11 }
 0x360   :  { %v1988_v63 = vpack.c.bf16 %v1542_v42, %v1538_v2  ;;  %v1990_v16 = vpack.c.bf16 %v1815_v4, %v1811_v50 }
 0x361   :  { %v2083_v43 = vmax.bf16 %v4130_v32, %v1987_v9  ;;  %v2085_v48 = vmax.bf16 %v4130_v32, %v1989_v40 }
 0x362   :  { %v1545_v58 = vpop.f32.mrb[92].mxu0  ;;  %v1818_v5 = vpop.f32.mrb[140].mxu1  ;;  %v2084_v18 = vmax.bf16 %v4130_v32, %v1988_v63  ;;  %v2086_v25 = vmax.bf16 %v4130_v32, %v1990_v16 }
 0x363   :  { %v1547_v52 = vpop.f32.mrb[93].mxu0  ;;  %v1820_v57 = vpop.f32.mrb[141].mxu1  ;;  %v1546_v45 = vadd.f32 %v1545_v58, %v4755_v53  ;;  %v1819_v14 = vadd.f32 %v1818_v5, %v4757_v23 }
 0x364   :  { %v1549_v47 = vpop.f32.mrb[94].mxu0  ;;  %v1822_v31 = vpop.f32.mrb[142].mxu1  ;;  %2514 = vmatprep.mubr.bf16.mxu0 %v2084_v18  ;;  %2739 = vmatprep.mubr.bf16.mxu1 %v2086_v25  ;;  %v1548_v24 = vadd.f32 %v1547_v52, %v4761_v59  ;;  %v1821_v2 = vadd.f32 %v1820_v57, %v4763_v62 }
 0x365   :  { %v1550_v11 = vadd.f32 %v1549_v47, %v4755_v53  ;;  %v1823_v30 = vadd.f32 %v1822_v31, %v4757_v23  ;;  %v1551_v49 = vpop.f32.mrb[95].mxu0  ;;  %v1824_v1 = vpop.f32.mrb[143].mxu1  ;;  %2515 = vmatmul.mubr.bf16.gmra.mrb[184].mxu0 %v2083_v43  ;;  %2740 = vmatmul.mubr.bf16.gmra.mrb[208].mxu1 %v2085_v48 }
 0x366   :  { %v1552_v50 = vadd.f32 %v1551_v49, %v4761_v59  ;;  %v1825_v42 = vadd.f32 %v1824_v1, %v4763_v62 }
 0x367   :  { %v1991_v4 = vpack.c.bf16 %v1550_v11, %v1546_v45  ;;  %v1993_v9 = vpack.c.bf16 %v1823_v30, %v1819_v14 }
 0x368   :  { %v1992_v40 = vpack.c.bf16 %v1552_v50, %v1548_v24  ;;  %v1994_v63 = vpack.c.bf16 %v1825_v42, %v1821_v2 }
 0x369   :  { %v2087_v52 = vmax.bf16 %v4130_v32, %v1991_v4  ;;  %v2089_v57 = vmax.bf16 %v4130_v32, %v1993_v9 }
 0x36a   :  { %v1555_v16 = vpop.f32.mrb[96].mxu0  ;;  %v1828_v58 = vpop.f32.mrb[144].mxu1  ;;  %v2088_v5 = vmax.bf16 %v4130_v32, %v1992_v40  ;;  %v2090_v18 = vmax.bf16 %v4130_v32, %v1994_v63 }
 0x36b   :  { %v1557_v25 = vpop.f32.mrb[97].mxu0  ;;  %v1830_v43 = vpop.f32.mrb[145].mxu1  ;;  %v1556_v48 = vadd.f32 %v1555_v16, %v4755_v53  ;;  %v1829_v45 = vadd.f32 %v1828_v58, %v4757_v23 }
 0x36c   :  { %v1559_v47 = vpop.f32.mrb[98].mxu0  ;;  %v1832_v31 = vpop.f32.mrb[146].mxu1  ;;  %2522 = vmatprep.mubr.bf16.mxu0 %v2088_v5  ;;  %2747 = vmatprep.mubr.bf16.mxu1 %v2090_v18  ;;  %v1558_v1 = vadd.f32 %v1557_v25, %v4761_v59  ;;  %v1831_v24 = vadd.f32 %v1830_v43, %v4763_v62 }
 0x36d   :  { %v1560_v14 = vadd.f32 %v1559_v47, %v4755_v53  ;;  %v1833_v11 = vadd.f32 %v1832_v31, %v4757_v23  ;;  %v1561_v30 = vpop.f32.mrb[99].mxu0  ;;  %v1834_v49 = vpop.f32.mrb[147].mxu1  ;;  %2523 = vmatmul.mubr.bf16.gmra.mrb[188].mxu0 %v2087_v52  ;;  %2748 = vmatmul.mubr.bf16.gmra.mrb[212].mxu1 %v2089_v57 }
 0x36e   :  { %v1562_v2 = vadd.f32 %v1561_v30, %v4761_v59  ;;  %v1835_v50 = vadd.f32 %v1834_v49, %v4763_v62 }
 0x36f   :  { %v1995_v42 = vpack.c.bf16 %v1560_v14, %v1556_v48  ;;  %v1997_v4 = vpack.c.bf16 %v1833_v11, %v1829_v45 }
 0x370   :  { %v1996_v9 = vpack.c.bf16 %v1562_v2, %v1558_v1  ;;  %v1998_v40 = vpack.c.bf16 %v1835_v50, %v1831_v24 }
 0x371   :  { %v2091_v25 = vmax.bf16 %v4130_v32, %v1995_v42  ;;  %v2093_v43 = vmax.bf16 %v4130_v32, %v1997_v4 }
 0x372   :  { %v1565_v63 = vpop.f32.mrb[100].mxu0  ;;  %v1838_v16 = vpop.f32.mrb[148].mxu1  ;;  %v2092_v58 = vmax.bf16 %v4130_v32, %v1996_v9  ;;  %v2094_v5 = vmax.bf16 %v4130_v32, %v1998_v40 }
 0x373   :  { %v1567_v18 = vpop.f32.mrb[101].mxu0  ;;  %v1840_v52 = vpop.f32.mrb[149].mxu1  ;;  %v1566_v57 = vadd.f32 %v1565_v63, %v4755_v53  ;;  %v1839_v48 = vadd.f32 %v1838_v16, %v4757_v23 }
 0x374   :  { %v1569_v47 = vpop.f32.mrb[102].mxu0  ;;  %v1842_v31 = vpop.f32.mrb[150].mxu1  ;;  %2530 = vmatprep.mubr.bf16.mxu0 %v2092_v58  ;;  %2755 = vmatprep.mubr.bf16.mxu1 %v2094_v5  ;;  %v1568_v49 = vadd.f32 %v1567_v18, %v4761_v59  ;;  %v1841_v1 = vadd.f32 %v1840_v52, %v4763_v62 }
 0x375   :  { %v1570_v45 = vadd.f32 %v1569_v47, %v4755_v53  ;;  %v1843_v14 = vadd.f32 %v1842_v31, %v4757_v23  ;;  %v1571_v11 = vpop.f32.mrb[103].mxu0  ;;  %v1844_v30 = vpop.f32.mrb[151].mxu1  ;;  %2531 = vmatmul.mubr.bf16.gmra.mrb[192].mxu0 %v2091_v25  ;;  %2756 = vmatmul.mubr.bf16.gmra.mrb[216].mxu1 %v2093_v43 }
 0x376   :  { %v1572_v24 = vadd.f32 %v1571_v11, %v4761_v59  ;;  %v1845_v2 = vadd.f32 %v1844_v30, %v4763_v62 }
 0x377   :  { %v1999_v50 = vpack.c.bf16 %v1570_v45, %v1566_v57  ;;  %v2001_v42 = vpack.c.bf16 %v1843_v14, %v1839_v48 }
 0x378   :  { %v2000_v4 = vpack.c.bf16 %v1572_v24, %v1568_v49  ;;  %v2002_v9 = vpack.c.bf16 %v1845_v2, %v1841_v1 }
 0x379   :  { %v2095_v18 = vmax.bf16 %v4130_v32, %v1999_v50  ;;  %v2097_v52 = vmax.bf16 %v4130_v32, %v2001_v42 }
 0x37a   :  { %v1575_v40 = vpop.f32.mrb[104].mxu0  ;;  %v1848_v63 = vpop.f32.mrb[152].mxu1  ;;  %v2096_v16 = vmax.bf16 %v4130_v32, %v2000_v4  ;;  %v2098_v58 = vmax.bf16 %v4130_v32, %v2002_v9 }
 0x37b   :  { %v1577_v5 = vpop.f32.mrb[105].mxu0  ;;  %v1850_v25 = vpop.f32.mrb[153].mxu1  ;;  %v1576_v43 = vadd.f32 %v1575_v40, %v4755_v53  ;;  %v1849_v57 = vadd.f32 %v1848_v63, %v4757_v23 }
 0x37c   :  { %v1579_v47 = vpop.f32.mrb[106].mxu0  ;;  %v1852_v31 = vpop.f32.mrb[154].mxu1  ;;  %2538 = vmatprep.mubr.bf16.mxu0 %v2096_v16  ;;  %2763 = vmatprep.mubr.bf16.mxu1 %v2098_v58  ;;  %v1578_v30 = vadd.f32 %v1577_v5, %v4761_v59  ;;  %v1851_v49 = vadd.f32 %v1850_v25, %v4763_v62 }
 0x37d   :  { %v1580_v48 = vadd.f32 %v1579_v47, %v4755_v53  ;;  %v1853_v45 = vadd.f32 %v1852_v31, %v4757_v23  ;;  %v1581_v14 = vpop.f32.mrb[107].mxu0  ;;  %v1854_v11 = vpop.f32.mrb[155].mxu1  ;;  %2539 = vmatmul.mubr.bf16.gmra.mrb[196].mxu0 %v2095_v18  ;;  %2764 = vmatmul.mubr.bf16.gmra.mrb[220].mxu1 %v2097_v52 }
 0x37e   :  { %v1582_v1 = vadd.f32 %v1581_v14, %v4761_v59  ;;  %v1855_v24 = vadd.f32 %v1854_v11, %v4763_v62 }
 0x37f   :  { %v2003_v2 = vpack.c.bf16 %v1580_v48, %v1576_v43  ;;  %v2005_v50 = vpack.c.bf16 %v1853_v45, %v1849_v57 }
 0x380   :  { %v2004_v42 = vpack.c.bf16 %v1582_v1, %v1578_v30  ;;  %v2006_v4 = vpack.c.bf16 %v1855_v24, %v1851_v49 }
 0x381   :  { %v2099_v5 = vmax.bf16 %v4130_v32, %v2003_v2  ;;  %v2101_v25 = vmax.bf16 %v4130_v32, %v2005_v50 }
 0x382   :  { %v1585_v9 = vpop.f32.mrb[108].mxu0  ;;  %v1858_v40 = vpop.f32.mrb[156].mxu1  ;;  %v2100_v63 = vmax.bf16 %v4130_v32, %v2004_v42  ;;  %v2102_v16 = vmax.bf16 %v4130_v32, %v2006_v4 }
 0x383   :  { %v1587_v58 = vpop.f32.mrb[109].mxu0  ;;  %v1860_v18 = vpop.f32.mrb[157].mxu1  ;;  %v1586_v52 = vadd.f32 %v1585_v9, %v4755_v53  ;;  %v1859_v43 = vadd.f32 %v1858_v40, %v4757_v23 }
 0x384   :  { %v1589_v47 = vpop.f32.mrb[110].mxu0  ;;  %v1862_v31 = vpop.f32.mrb[158].mxu1  ;;  %2546 = vmatprep.mubr.bf16.mxu0 %v2100_v63  ;;  %2771 = vmatprep.mubr.bf16.mxu1 %v2102_v16  ;;  %v1588_v11 = vadd.f32 %v1587_v58, %v4761_v59  ;;  %v1861_v30 = vadd.f32 %v1860_v18, %v4763_v62 }
 0x385   :  { %v1590_v57 = vadd.f32 %v1589_v47, %v4755_v53  ;;  %v1863_v48 = vadd.f32 %v1862_v31, %v4757_v23  ;;  %v1591_v45 = vpop.f32.mrb[111].mxu0  ;;  %v1864_v14 = vpop.f32.mrb[159].mxu1  ;;  %2547 = vmatmul.mubr.bf16.gmra.mrb[200].mxu0 %v2099_v5  ;;  %2772 = vmatmul.mubr.bf16.gmra.mrb[224].mxu1 %v2101_v25 }
 0x386   :  { %v1592_v49 = vadd.f32 %v1591_v45, %v4761_v59  ;;  %v1865_v1 = vadd.f32 %v1864_v14, %v4763_v62 }
 0x387   :  { %v2007_v24 = vpack.c.bf16 %v1590_v57, %v1586_v52  ;;  %v2009_v2 = vpack.c.bf16 %v1863_v48, %v1859_v43 }
 0x388   :  { %v2008_v50 = vpack.c.bf16 %v1592_v49, %v1588_v11  ;;  %v2010_v42 = vpack.c.bf16 %v1865_v1, %v1861_v30 }
 0x389   :  { %v2103_v58 = vmax.bf16 %v4130_v32, %v2007_v24  ;;  %v2105_v18 = vmax.bf16 %v4130_v32, %v2009_v2 }
 0x38a   :  { %v1595_v4 = vpop.f32.mrb[112].mxu0  ;;  %v1868_v9 = vpop.f32.mrb[160].mxu1  ;;  %v2104_v40 = vmax.bf16 %v4130_v32, %v2008_v50  ;;  %v2106_v63 = vmax.bf16 %v4130_v32, %v2010_v42 }
 0x38b   :  { %v1597_v16 = vpop.f32.mrb[113].mxu0  ;;  %v1870_v5 = vpop.f32.mrb[161].mxu1  ;;  %v1596_v25 = vadd.f32 %v1595_v4, %v4755_v53  ;;  %v1869_v52 = vadd.f32 %v1868_v9, %v4757_v23 }
 0x38c   :  { %v1599_v47 = vpop.f32.mrb[114].mxu0  ;;  %v1872_v31 = vpop.f32.mrb[162].mxu1  ;;  %2554 = vmatprep.mubr.bf16.mxu0 %v2104_v40  ;;  %2779 = vmatprep.mubr.bf16.mxu1 %v2106_v63  ;;  %v1598_v14 = vadd.f32 %v1597_v16, %v4761_v59  ;;  %v1871_v11 = vadd.f32 %v1870_v5, %v4763_v62 }
 0x38d   :  { %v1600_v43 = vadd.f32 %v1599_v47, %v4755_v53  ;;  %v1873_v57 = vadd.f32 %v1872_v31, %v4757_v23  ;;  %v1601_v48 = vpop.f32.mrb[115].mxu0  ;;  %v1874_v45 = vpop.f32.mrb[163].mxu1  ;;  %2555 = vmatmul.mubr.bf16.gmra.mrb[204].mxu0 %v2103_v58  ;;  %2780 = vmatmul.mubr.bf16.gmra.mrb[228].mxu1 %v2105_v18 }
 0x38e   :  { %v1602_v30 = vadd.f32 %v1601_v48, %v4761_v59  ;;  %v1875_v49 = vadd.f32 %v1874_v45, %v4763_v62 }
 0x38f   :  { %v2011_v1 = vpack.c.bf16 %v1600_v43, %v1596_v25  ;;  %v2013_v24 = vpack.c.bf16 %v1873_v57, %v1869_v52 }
 0x390   :  { %v2012_v2 = vpack.c.bf16 %v1602_v30, %v1598_v14  ;;  %v2014_v50 = vpack.c.bf16 %v1875_v49, %v1871_v11 }
 0x391   :  { %v2107_v16 = vmax.bf16 %v4130_v32, %v2011_v1  ;;  %v2109_v5 = vmax.bf16 %v4130_v32, %v2013_v24 }
 0x392   :  { %v1605_v42 = vpop.f32.mrb[116].mxu0  ;;  %v1878_v4 = vpop.f32.mrb[164].mxu1  ;;  %v2108_v9 = vmax.bf16 %v4130_v32, %v2012_v2  ;;  %v2110_v40 = vmax.bf16 %v4130_v32, %v2014_v50 }
 0x393   :  { %v1607_v63 = vpop.f32.mrb[117].mxu0  ;;  %v1880_v58 = vpop.f32.mrb[165].mxu1  ;;  %v1606_v18 = vadd.f32 %v1605_v42, %v4755_v53  ;;  %v1879_v25 = vadd.f32 %v1878_v4, %v4757_v23 }
 0x394   :  { %v1609_v47 = vpop.f32.mrb[118].mxu0  ;;  %v1882_v31 = vpop.f32.mrb[166].mxu1  ;;  %2562 = vmatprep.mubr.bf16.mxu0 %v2108_v9  ;;  %2787 = vmatprep.mubr.bf16.mxu1 %v2110_v40  ;;  %v1608_v45 = vadd.f32 %v1607_v63, %v4761_v59  ;;  %v1881_v14 = vadd.f32 %v1880_v58, %v4763_v62 }
 0x395   :  { %v1610_v52 = vadd.f32 %v1609_v47, %v4755_v53  ;;  %v1883_v43 = vadd.f32 %v1882_v31, %v4757_v23  ;;  %v1611_v57 = vpop.f32.mrb[119].mxu0  ;;  %v1884_v48 = vpop.f32.mrb[167].mxu1  ;;  %2563 = vmatmul.mubr.bf16.gmra.mrb[208].mxu0 %v2107_v16  ;;  %2788 = vmatmul.mubr.bf16.gmra.mrb[232].mxu1 %v2109_v5 }
 0x396   :  { %v1612_v11 = vadd.f32 %v1611_v57, %v4761_v59  ;;  %v1885_v30 = vadd.f32 %v1884_v48, %v4763_v62 }
 0x397   :  { %v2015_v49 = vpack.c.bf16 %v1610_v52, %v1606_v18  ;;  %v2017_v1 = vpack.c.bf16 %v1883_v43, %v1879_v25 }
 0x398   :  { %v2016_v24 = vpack.c.bf16 %v1612_v11, %v1608_v45  ;;  %v2018_v2 = vpack.c.bf16 %v1885_v30, %v1881_v14 }
 0x399   :  { %v2111_v63 = vmax.bf16 %v4130_v32, %v2015_v49  ;;  %v2113_v58 = vmax.bf16 %v4130_v32, %v2017_v1 }
 0x39a   :  { %v1615_v50 = vpop.f32.mrb[120].mxu0  ;;  %v1888_v42 = vpop.f32.mrb[168].mxu1  ;;  %v2112_v4 = vmax.bf16 %v4130_v32, %v2016_v24  ;;  %v2114_v9 = vmax.bf16 %v4130_v32, %v2018_v2 }
 0x39b   :  { %v1617_v40 = vpop.f32.mrb[121].mxu0  ;;  %v1890_v16 = vpop.f32.mrb[169].mxu1  ;;  %v1616_v5 = vadd.f32 %v1615_v50, %v4755_v53  ;;  %v1889_v18 = vadd.f32 %v1888_v42, %v4757_v23 }
 0x39c   :  { %v1619_v47 = vpop.f32.mrb[122].mxu0  ;;  %v1892_v31 = vpop.f32.mrb[170].mxu1  ;;  %2570 = vmatprep.mubr.bf16.mxu0 %v2112_v4  ;;  %2795 = vmatprep.mubr.bf16.mxu1 %v2114_v9  ;;  %v1618_v48 = vadd.f32 %v1617_v40, %v4761_v59  ;;  %v1891_v45 = vadd.f32 %v1890_v16, %v4763_v62 }
 0x39d   :  { %v1620_v25 = vadd.f32 %v1619_v47, %v4755_v53  ;;  %v1893_v52 = vadd.f32 %v1892_v31, %v4757_v23  ;;  %v1621_v43 = vpop.f32.mrb[123].mxu0  ;;  %v1894_v57 = vpop.f32.mrb[171].mxu1  ;;  %2571 = vmatmul.mubr.bf16.gmra.mrb[212].mxu0 %v2111_v63  ;;  %2796 = vmatmul.mubr.bf16.gmra.mrb[236].mxu1 %v2113_v58 }
 0x39e   :  { %v1622_v14 = vadd.f32 %v1621_v43, %v4761_v59  ;;  %v1895_v11 = vadd.f32 %v1894_v57, %v4763_v62 }
 0x39f   :  { %v2019_v30 = vpack.c.bf16 %v1620_v25, %v1616_v5  ;;  %v2021_v49 = vpack.c.bf16 %v1893_v52, %v1889_v18 }
 0x3a0   :  { %v2020_v1 = vpack.c.bf16 %v1622_v14, %v1618_v48  ;;  %v2022_v24 = vpack.c.bf16 %v1895_v11, %v1891_v45 }
 0x3a1   :  { %v2115_v40 = vmax.bf16 %v4130_v32, %v2019_v30  ;;  %v2117_v16 = vmax.bf16 %v4130_v32, %v2021_v49 }
 0x3a2   :  { %v1625_v2 = vpop.f32.mrb[124].mxu0  ;;  %v1898_v50 = vpop.f32.mrb[172].mxu1  ;;  %v2116_v42 = vmax.bf16 %v4130_v32, %v2020_v1  ;;  %v2118_v4 = vmax.bf16 %v4130_v32, %v2022_v24 }
 0x3a3   :  { %v1627_v9 = vpop.f32.mrb[125].mxu0  ;;  %v1900_v63 = vpop.f32.mrb[173].mxu1  ;;  %v1626_v58 = vadd.f32 %v1625_v2, %v4755_v53  ;;  %v1899_v5 = vadd.f32 %v1898_v50, %v4757_v23 }
 0x3a4   :  { %v1629_v47 = vpop.f32.mrb[126].mxu0  ;;  %v1902_v31 = vpop.f32.mrb[174].mxu1  ;;  %2578 = vmatprep.mubr.bf16.mxu0 %v2116_v42  ;;  %2803 = vmatprep.mubr.bf16.mxu1 %v2118_v4  ;;  %v1628_v57 = vadd.f32 %v1627_v9, %v4761_v59  ;;  %v1901_v48 = vadd.f32 %v1900_v63, %v4763_v62 }
 0x3a5   :  { %v1630_v18 = vadd.f32 %v1629_v47, %v4755_v53  ;;  %v1903_v25 = vadd.f32 %v1902_v31, %v4757_v23  ;;  %v1631_v52 = vpop.f32.mrb[127].mxu0  ;;  %v1904_v43 = vpop.f32.mrb[175].mxu1  ;;  %2579 = vmatmul.mubr.bf16.gmra.mrb[216].mxu0 %v2115_v40  ;;  %2804 = vmatmul.mubr.bf16.gmra.mrb[240].mxu1 %v2117_v16 }
 0x3a6   :  { %v1632_v45 = vadd.f32 %v1631_v52, %v4761_v59  ;;  %v1905_v14 = vadd.f32 %v1904_v43, %v4763_v62 }
 0x3a7   :  { %v2023_v11 = vpack.c.bf16 %v1630_v18, %v1626_v58  ;;  %v2025_v30 = vpack.c.bf16 %v1903_v25, %v1899_v5 }
 0x3a8   :  { %v2024_v49 = vpack.c.bf16 %v1632_v45, %v1628_v57  ;;  %v2026_v1 = vpack.c.bf16 %v1905_v14, %v1901_v48 }
 0x3a9   :  { %v2119_v9 = vmax.bf16 %v4130_v32, %v2023_v11  ;;  %v2121_v63 = vmax.bf16 %v4130_v32, %v2025_v30 }
 0x3aa   :  { %v1635_v24 = vpop.f32.mrb[128].mxu0  ;;  %v1908_v2 = vpop.f32.mrb[176].mxu1  ;;  %v2120_v50 = vmax.bf16 %v4130_v32, %v2024_v49  ;;  %v2122_v42 = vmax.bf16 %v4130_v32, %v2026_v1 }
 0x3ab   :  { %v1637_v4 = vpop.f32.mrb[129].mxu0  ;;  %v1910_v40 = vpop.f32.mrb[177].mxu1  ;;  %v1636_v16 = vadd.f32 %v1635_v24, %v4755_v53  ;;  %v1909_v58 = vadd.f32 %v1908_v2, %v4757_v23 }
 0x3ac   :  { %v1639_v47 = vpop.f32.mrb[130].mxu0  ;;  %v1912_v31 = vpop.f32.mrb[178].mxu1  ;;  %2586 = vmatprep.mubr.bf16.mxu0 %v2120_v50  ;;  %2811 = vmatprep.mubr.bf16.mxu1 %v2122_v42  ;;  %v1638_v43 = vadd.f32 %v1637_v4, %v4761_v59  ;;  %v1911_v57 = vadd.f32 %v1910_v40, %v4763_v62 }
 0x3ad   :  { %v1640_v5 = vadd.f32 %v1639_v47, %v4755_v53  ;;  %v1913_v18 = vadd.f32 %v1912_v31, %v4757_v23  ;;  %v1641_v25 = vpop.f32.mrb[131].mxu0  ;;  %v1914_v52 = vpop.f32.mrb[179].mxu1  ;;  %2587 = vmatmul.mubr.bf16.gmra.mrb[220].mxu0 %v2119_v9  ;;  %2812 = vmatmul.mubr.bf16.gmra.mrb[244].mxu1 %v2121_v63 }
 0x3ae   :  { %v1642_v48 = vadd.f32 %v1641_v25, %v4761_v59  ;;  %v1915_v45 = vadd.f32 %v1914_v52, %v4763_v62 }
 0x3af   :  { %v2027_v14 = vpack.c.bf16 %v1640_v5, %v1636_v16  ;;  %v2029_v11 = vpack.c.bf16 %v1913_v18, %v1909_v58 }
 0x3b0   :  { %v2028_v30 = vpack.c.bf16 %v1642_v48, %v1638_v43  ;;  %v2030_v49 = vpack.c.bf16 %v1915_v45, %v1911_v57 }
 0x3b1   :  { %v2123_v4 = vmax.bf16 %v4130_v32, %v2027_v14  ;;  %v2125_v40 = vmax.bf16 %v4130_v32, %v2029_v11 }
 0x3b2   :  { %v1645_v1 = vpop.f32.mrb[132].mxu0  ;;  %v1918_v24 = vpop.f32.mrb[180].mxu1  ;;  %v2124_v2 = vmax.bf16 %v4130_v32, %v2028_v30  ;;  %v2126_v50 = vmax.bf16 %v4130_v32, %v2030_v49 }
 0x3b3   :  { %v1647_v42 = vpop.f32.mrb[133].mxu0  ;;  %v1920_v9 = vpop.f32.mrb[181].mxu1  ;;  %v1646_v63 = vadd.f32 %v1645_v1, %v4755_v53  ;;  %v1919_v16 = vadd.f32 %v1918_v24, %v4757_v23 }
 0x3b4   :  { %v1649_v47 = vpop.f32.mrb[134].mxu0  ;;  %v1922_v31 = vpop.f32.mrb[182].mxu1  ;;  %2594 = vmatprep.mubr.bf16.mxu0 %v2124_v2  ;;  %2819 = vmatprep.mubr.bf16.mxu1 %v2126_v50  ;;  %v1648_v52 = vadd.f32 %v1647_v42, %v4761_v59  ;;  %v1921_v43 = vadd.f32 %v1920_v9, %v4763_v62 }
 0x3b5   :  { %v1650_v58 = vadd.f32 %v1649_v47, %v4755_v53  ;;  %v1923_v5 = vadd.f32 %v1922_v31, %v4757_v23  ;;  %v1651_v18 = vpop.f32.mrb[135].mxu0  ;;  %v1924_v25 = vpop.f32.mrb[183].mxu1  ;;  %2595 = vmatmul.mubr.bf16.gmra.mrb[224].mxu0 %v2123_v4  ;;  %2820 = vmatmul.mubr.bf16.gmra.mrb[248].mxu1 %v2125_v40 }
 0x3b6   :  { %v1652_v57 = vadd.f32 %v1651_v18, %v4761_v59  ;;  %v1925_v48 = vadd.f32 %v1924_v25, %v4763_v62 }
 0x3b7   :  { %v2031_v45 = vpack.c.bf16 %v1650_v58, %v1646_v63  ;;  %v2033_v14 = vpack.c.bf16 %v1923_v5, %v1919_v16 }
 0x3b8   :  { %v2032_v11 = vpack.c.bf16 %v1652_v57, %v1648_v52  ;;  %v2034_v30 = vpack.c.bf16 %v1925_v48, %v1921_v43 }
 0x3b9   :  { %v2127_v42 = vmax.bf16 %v4130_v32, %v2031_v45  ;;  %v2129_v9 = vmax.bf16 %v4130_v32, %v2033_v14 }
 0x3ba   :  { %v1655_v49 = vpop.f32.mrb[136].mxu0  ;;  %v1928_v1 = vpop.f32.mrb[184].mxu1  ;;  %v2128_v24 = vmax.bf16 %v4130_v32, %v2032_v11  ;;  %v2130_v2 = vmax.bf16 %v4130_v32, %v2034_v30 }
 0x3bb   :  { %v1657_v50 = vpop.f32.mrb[137].mxu0  ;;  %v1930_v4 = vpop.f32.mrb[185].mxu1  ;;  %v1656_v40 = vadd.f32 %v1655_v49, %v4755_v53  ;;  %v1929_v63 = vadd.f32 %v1928_v1, %v4757_v23 }
 0x3bc   :  { %v1659_v47 = vpop.f32.mrb[138].mxu0  ;;  %v1932_v31 = vpop.f32.mrb[186].mxu1  ;;  %2602 = vmatprep.mubr.bf16.mxu0 %v2128_v24  ;;  %2827 = vmatprep.mubr.bf16.mxu1 %v2130_v2  ;;  %v1658_v25 = vadd.f32 %v1657_v50, %v4761_v59  ;;  %v1931_v52 = vadd.f32 %v1930_v4, %v4763_v62 }
 0x3bd   :  { %v1660_v16 = vadd.f32 %v1659_v47, %v4755_v53  ;;  %v1933_v58 = vadd.f32 %v1932_v31, %v4757_v23  ;;  %v1661_v5 = vpop.f32.mrb[139].mxu0  ;;  %v1934_v18 = vpop.f32.mrb[187].mxu1  ;;  %2603 = vmatmul.mubr.bf16.gmra.mrb[228].mxu0 %v2127_v42  ;;  %2828 = vmatmul.mubr.bf16.gmra.mrb[252].mxu1 %v2129_v9 }
 0x3be   :  { %v1662_v43 = vadd.f32 %v1661_v5, %v4761_v59  ;;  %v1935_v57 = vadd.f32 %v1934_v18, %v4763_v62 }
 0x3bf   :  { %v2035_v48 = vpack.c.bf16 %v1660_v16, %v1656_v40  ;;  %v2037_v45 = vpack.c.bf16 %v1933_v58, %v1929_v63 }
 0x3c0   :  { %v2036_v14 = vpack.c.bf16 %v1662_v43, %v1658_v25  ;;  %v2038_v11 = vpack.c.bf16 %v1935_v57, %v1931_v52 }
 0x3c1   :  { %v2133_v2 = vmax.bf16 %v4130_v32, %v2037_v45  ;;  %v2131_v4 = vmax.bf16 %v4130_v32, %v2035_v48 }
 0x3c2   :  { %v1665_v30 = vpop.f32.mrb[140].mxu0  ;;  %v1938_v49 = vpop.f32.mrb[188].mxu1  ;;  %v2132_v1 = vmax.bf16 %v4130_v32, %v2036_v14  ;;  %v2134_v24 = vmax.bf16 %v4130_v32, %v2038_v11 }
 0x3c3   :  { %v1667_v42 = vpop.f32.mrb[141].mxu0  ;;  %v1940_v50 = vpop.f32.mrb[189].mxu1  ;;  %v1666_v9 = vadd.f32 %v1665_v30, %v4755_v53  ;;  %v1939_v40 = vadd.f32 %v1938_v49, %v4757_v23  ;;  %v2050_v49 = vmax.bf16 %v4130_v32, %v1954_v44  ;;  %v5195_v44 = vld [vmem:[%s5266_s8] ss:$0 sm:$0xff] }
 0x3c4   :  { %v1669_v47 = vpop.f32.mrb[142].mxu0  ;;  %v1942_v31 = vpop.f32.mrb[190].mxu1  ;;  %2610 = vmatprep.mubr.bf16.mxu0 %v2132_v1  ;;  %2835 = vmatprep.mubr.bf16.mxu1 %v2134_v24  ;;  %v1668_v18 = vadd.f32 %v1667_v42, %v4761_v59  ;;  %v1941_v25 = vadd.f32 %v1940_v50, %v4763_v62 }
 0x3c5   :  { %v1670_v63 = vadd.f32 %v1669_v47, %v4755_v53  ;;  %v1943_v16 = vadd.f32 %v1942_v31, %v4757_v23  ;;  %v1671_v58 = vpop.f32.mrb[143].mxu0  ;;  %v1944_v5 = vpop.f32.mrb[191].mxu1  ;;  %2611 = vmatmul.mubr.bf16.gmra.mrb[232].mxu0 %v2131_v4  ;;  %2836 = vmatmul.mubr.bf16.gmra.mrb[0].mxu1 %v2133_v2 }
 0x3c6   :  { %v1672_v52 = vadd.f32 %v1671_v58, %v4761_v59  ;;  %v1945_v43 = vadd.f32 %v1944_v5, %v4763_v62  ;;  %v2046_v59 = vmax.bf16 %v4130_v32, %v1950_v15  ;;  %v2045_v62 = vmax.bf16 %v4130_v32, %v1949_v60 }
 0x3c7   :  { %v2039_v57 = vpack.c.bf16 %v1670_v63, %v1666_v9  ;;  %v2041_v48 = vpack.c.bf16 %v1943_v16, %v1939_v40  ;;  %v2057_v60 = vmax.bf16 %v4130_v32, %v1961_v6  ;;  %v2062_v15 = vmax.bf16 %v4130_v32, %v1966_v29 }
 0x3c8   :  { %v2040_v45 = vpack.c.bf16 %v1672_v52, %v1668_v18  ;;  %v2042_v14 = vpack.c.bf16 %v1945_v43, %v1941_v25 }
 0x3c9   :  { %v2137_v11 = vmax.bf16 %v4130_v32, %v2041_v48  ;;  %v2135_v30 = vmax.bf16 %v4130_v32, %v2039_v57 }
 0x3ca   :  { %v2136_v53 = vmax.bf16 %v4130_v32, %v2040_v45  ;;  %v2138_v23 = vmax.bf16 %v4130_v32, %v2042_v14 }
 0x3cc   :  { %2618 = vmatprep.mubr.bf16.mxu0 %v2136_v53  ;;  %2843 = vmatprep.mubr.bf16.mxu1 %v2138_v23 }
 0x3cd   :  { %2619 = vmatmul.mubr.bf16.gmra.mrb[236].mxu0 %v2135_v30  ;;  %2844 = vmatmul.mubr.bf16.gmra.mrb[4].mxu1 %v2137_v11 }
 0x3ce   :  { %2659 = vmatprep.mubr.bf16.mxu0 %v2046_v59 }
 0x3d5   :  { %2660 = vmatmul.mubr.bf16.vlgmr.msra.gmra.mrb[144].mxu0 %v2045_v62 }
 0x3d6   :  { %2667 = vmatprep.mubr.bf16.mxu0 %v2050_v49 }
 0x3dd   :  { %2668 = vmatmul.mubr.bf16.gmra.mrb[148].mxu0 %v2049_v51 }
 0x3de   :  { %2675 = vmatprep.mubr.bf16.mxu0 %v2054_v35 }
 0x3e5   :  { %2676 = vmatmul.mubr.bf16.gmra.mrb[152].mxu0 %v2053_v56 }
 0x3e6   :  { %2683 = vmatprep.mubr.bf16.mxu0 %v2058_v0 }
 0x3ed   :  { %2684 = vmatmul.mubr.bf16.gmra.mrb[156].mxu0 %v2057_v60 }
 0x3ee   :  { %2691 = vmatprep.mubr.bf16.mxu0 %v2062_v15 }
 0x3f5   :  { %2692 = vmatmul.mubr.bf16.gmra.mrb[160].mxu0 %v2061_v13 }
 0x3f6   :  { %2699 = vmatprep.mubr.bf16.mxu0 %v2066_v28 }
 0x3fd   :  { %2700 = vmatmul.mubr.bf16.gmra.mrb[164].mxu0 %v2065_v46 }
 0x418   :  { %v2484_v34 = vpop.f32.mrb[168].mxu0  ;;  %v2709_v33 = vpop.f32.mrb[192].mxu1 }
 0x419   :  { %v2485_v54 = vadd.f32 %v5195_v44, %v2484_v34  ;;  %v2486_v17 = vpop.f32.mrb[169].mxu0  ;;  %v2711_v19 = vpop.f32.mrb[193].mxu1 }
 0x41a   :  { %v2487_v26 = vpop.f32.mrb[170].mxu0  ;;  %v2712_v38 = vpop.f32.mrb[194].mxu1 }
 0x41b   :  { %v2710_v41 = vadd.f32 %v2709_v33, %v2485_v54  ;;  %v2488_v36 = vadd.f32 %v5195_v44, %v2487_v26  ;;  %v2489_v3 = vpop.f32.mrb[171].mxu0  ;;  %v2714_v6 = vpop.f32.mrb[195].mxu1 }
 0x41d   :  { %v3341_v32 = vmul.f32 -1.442695, %v2710_v41  ;;  %v2713_v12 = vadd.f32 %v2712_v38, %v2488_v36 }
 0x41f   :  { %3786 = vpow2.f32 %v3341_v32  ;;  %v3342_v37 = vmul.f32 -1.442695, %v2713_v12 }
 0x420   :  { %v2492_v7 = vpop.f32.mrb[172].mxu0  ;;  %v2717_v20 = vpop.f32.mrb[196].mxu1 }
 0x421   :  { %3788 = vpow2.f32 %v3342_v37  ;;  %v2493_v27 = vadd.f32 %v5195_v44, %v2492_v7  ;;  %v2494_v55 = vpop.f32.mrb[173].mxu0  ;;  %v2719_v29 = vpop.f32.mrb[197].mxu1 }
 0x422   :  { %v2495_v8 = vpop.f32.mrb[174].mxu0  ;;  %v2720_v22 = vpop.f32.mrb[198].mxu1 }
 0x423   :  { %v2718_v21 = vadd.f32 %v2717_v20, %v2493_v27  ;;  %v2496_v61 = vadd.f32 %v5195_v44, %v2495_v8  ;;  %v2497_v1 = vpop.f32.mrb[175].mxu0  ;;  %v2722_v24 = vpop.f32.mrb[199].mxu1 }
 0x425   :  { %v3343_v2 = vmul.f32 -1.442695, %v2718_v21  ;;  %v2721_v42 = vadd.f32 %v2720_v22, %v2496_v61 }
 0x427   :  { %3790 = vpow2.f32 %v3343_v2  ;;  %v3344_v50 = vmul.f32 -1.442695, %v2721_v42 }
 0x428   :  { %v2500_v4 = vpop.f32.mrb[176].mxu0  ;;  %v2725_v9 = vpop.f32.mrb[200].mxu1 }
 0x429   :  { %v3787_v47 = vpop.eup %3786  ;;  %3792 = vpow2.f32 %v3344_v50  ;;  %v2501_v31 = vadd.f32 %v5195_v44, %v2500_v4  ;;  %v2502_v40 = vpop.f32.mrb[177].mxu0 }
 0x42a   :  { %v2727_v63 = vpop.f32.mrb[201].mxu1  ;;  %v3008_v16 = vadd.f32 1.0, %v3787_v47  ;;  %v2503_v58 = vpop.f32.mrb[178].mxu0 }
 0x42b   :  { %v2728_v5 = vpop.f32.mrb[202].mxu1  ;;  %v3789_v18 = vpop.eup %3788  ;;  %v2726_v25 = vadd.f32 %v2725_v9, %v2501_v31  ;;  %v2504_v52 = vadd.f32 %v5195_v44, %v2503_v58 }
 0x42c   :  { %v2505_v43 = vpop.f32.mrb[179].mxu0  ;;  %v2730_v57 = vpop.f32.mrb[203].mxu1  ;;  %3794 = vrcp.f32 %v3008_v16  ;;  %v3009_v48 = vadd.f32 1.0, %v3789_v18 }
 0x42d   :  { %v3345_v45 = vmul.f32 -1.442695, %v2726_v25  ;;  %v2729_v14 = vadd.f32 %v2728_v5, %v2504_v52 }
 0x42e   :  { %3796 = vrcp.f32 %v3009_v48 }
 0x42f   :  { %3798 = vpow2.f32 %v3345_v45  ;;  %v3346_v53 = vmul.f32 -1.442695, %v2729_v14 }
 0x430   :  { %v2508_v23 = vpop.f32.mrb[180].mxu0  ;;  %v2733_v11 = vpop.f32.mrb[204].mxu1 }
 0x431   :  { %v3791_v30 = vpop.eup %3790  ;;  %3800 = vpow2.f32 %v3346_v53  ;;  %v2509_v59 = vadd.f32 %v5195_v44, %v2508_v23  ;;  %v2510_v62 = vpop.f32.mrb[181].mxu0 }
 0x432   :  { %v2735_v49 = vpop.f32.mrb[205].mxu1  ;;  %v3010_v51 = vadd.f32 1.0, %v3791_v30  ;;  %v2511_v35 = vpop.f32.mrb[182].mxu0 }
 0x433   :  { %v2736_v56 = vpop.f32.mrb[206].mxu1  ;;  %v3793_v0 = vpop.eup %3792  ;;  %v2734_v60 = vadd.f32 %v2733_v11, %v2509_v59  ;;  %v2512_v15 = vadd.f32 %v5195_v44, %v2511_v35 }
 0x434   :  { %v2513_v13 = vpop.f32.mrb[183].mxu0  ;;  %v2738_v10 = vpop.f32.mrb[207].mxu1  ;;  %3802 = vrcp.f32 %v3010_v51  ;;  %v3011_v28 = vadd.f32 1.0, %v3793_v0 }
 0x435   :  { %v3347_v39 = vmul.f32 -1.442695, %v2734_v60  ;;  %v2737_v46 = vadd.f32 %v2736_v56, %v2512_v15 }
 0x436   :  { %v3795_v34 = vpop.eup %3794  ;;  %3804 = vrcp.f32 %v3011_v28 }
 0x437   :  { %3152 = vst [vmem:[#allocation11 + $0x60] sm:$0xff] %v3795_v34  ;;  %3806 = vpow2.f32 %v3347_v39  ;;  %v3348_v33 = vmul.f32 -1.442695, %v2737_v46 }
 0x438   :  { %v3797_v54 = vpop.eup %3796  ;;  %v2516_v17 = vpop.f32.mrb[184].mxu0 }
 0x439   :  { %v2741_v19 = vpop.f32.mrb[208].mxu1  ;;  %v3799_v26 = vpop.eup %3798  ;;  %3153 = vst [vmem:[#allocation11 + $0x68] sm:$0xff] %v3797_v54  ;;  %3808 = vpow2.f32 %v3348_v33  ;;  %v2517_v38 = vadd.f32 %v5195_v44, %v2516_v17 }
 0x43a   :  { %v2518_v41 = vpop.f32.mrb[185].mxu0  ;;  %v2743_v36 = vpop.f32.mrb[209].mxu1  ;;  %v3012_v3 = vadd.f32 1.0, %v3799_v26 }
 0x43b   :  { %v2519_v6 = vpop.f32.mrb[186].mxu0  ;;  %v2744_v32 = vpop.f32.mrb[210].mxu1  ;;  %v2742_v37 = vadd.f32 %v2741_v19, %v2517_v38 }
 0x43c   :  { %v3801_v12 = vpop.eup %3800  ;;  %v2520_v7 = vadd.f32 %v5195_v44, %v2519_v6  ;;  %v2521_v20 = vpop.f32.mrb[187].mxu0  ;;  %3810 = vrcp.f32 %v3012_v3 }
 0x43d   :  { %v2746_v27 = vpop.f32.mrb[211].mxu1  ;;  %v3013_v55 = vadd.f32 1.0, %v3801_v12  ;;  %v3349_v29 = vmul.f32 -1.442695, %v2742_v37 }
 0x43e   :  { %v2745_v8 = vadd.f32 %v2744_v32, %v2520_v7  ;;  %v3803_v22 = vpop.eup %3802 }
 0x43f   :  { %3812 = vrcp.f32 %v3013_v55  ;;  %3154 = vst [vmem:[#allocation11 + $0x70] sm:$0xff] %v3803_v22 }
 0x440   :  { %3814 = vpow2.f32 %v3349_v29  ;;  %v3350_v21 = vmul.f32 -1.442695, %v2745_v8  ;;  %v3805_v61 = vpop.eup %3804  ;;  %v2524_v1 = vpop.f32.mrb[188].mxu0 }
 0x441   :  { %v2749_v24 = vpop.f32.mrb[212].mxu1  ;;  %v3807_v2 = vpop.eup %3806  ;;  %3155 = vst [vmem:[#allocation11 + $0x78] sm:$0xff] %v3805_v61  ;;  %v2525_v42 = vadd.f32 %v5195_v44, %v2524_v1 }
 0x442   :  { %3816 = vpow2.f32 %v3350_v21  ;;  %v2526_v50 = vpop.f32.mrb[189].mxu0  ;;  %v2751_v4 = vpop.f32.mrb[213].mxu1  ;;  %v3014_v9 = vadd.f32 1.0, %v3807_v2 }
 0x443   :  { %v2527_v47 = vpop.f32.mrb[190].mxu0  ;;  %v2752_v31 = vpop.f32.mrb[214].mxu1  ;;  %v2750_v63 = vadd.f32 %v2749_v24, %v2525_v42 }
 0x444   :  { %v3809_v40 = vpop.eup %3808  ;;  %v2528_v16 = vadd.f32 %v5195_v44, %v2527_v47  ;;  %v2529_v58 = vpop.f32.mrb[191].mxu0  ;;  %3818 = vrcp.f32 %v3014_v9 }
 0x445   :  { %v2754_v5 = vpop.f32.mrb[215].mxu1  ;;  %v3015_v18 = vadd.f32 1.0, %v3809_v40  ;;  %v3351_v25 = vmul.f32 -1.442695, %v2750_v63 }
 0x446   :  { %v2753_v52 = vadd.f32 %v2752_v31, %v2528_v16  ;;  %v3811_v43 = vpop.eup %3810 }
 0x447   :  { %3820 = vrcp.f32 %v3015_v18  ;;  %3156 = vst [vmem:[#allocation11 + $0x80] sm:$0xff] %v3811_v43 }
 0x448   :  { %3822 = vpow2.f32 %v3351_v25  ;;  %v3352_v57 = vmul.f32 -1.442695, %v2753_v52  ;;  %v2532_v45 = vpop.f32.mrb[192].mxu0  ;;  %v2757_v14 = vpop.f32.mrb[216].mxu1 }
 0x449   :  { %v3813_v48 = vpop.eup %3812  ;;  %v2533_v23 = vadd.f32 %v5195_v44, %v2532_v45  ;;  %v2534_v11 = vpop.f32.mrb[193].mxu0 }
 0x44a   :  { %v3815_v53 = vpop.eup %3814  ;;  %3157 = vst [vmem:[#allocation11 + $0x88] sm:$0xff] %v3813_v48  ;;  %3824 = vpow2.f32 %v3352_v57  ;;  %v2759_v30 = vpop.f32.mrb[217].mxu1 }
 0x44b   :  { %v3016_v59 = vadd.f32 1.0, %v3815_v53  ;;  %v2535_v62 = vpop.f32.mrb[194].mxu0  ;;  %v2760_v49 = vpop.f32.mrb[218].mxu1  ;;  %v2758_v35 = vadd.f32 %v2757_v14, %v2533_v23 }
 0x44c   :  { %v3817_v51 = vpop.eup %3816  ;;  %v2536_v56 = vadd.f32 %v5195_v44, %v2535_v62  ;;  %v2537_v0 = vpop.f32.mrb[195].mxu0 }
 0x44d   :  { %v2762_v60 = vpop.f32.mrb[219].mxu1  ;;  %3826 = vrcp.f32 %v3016_v59  ;;  %v3017_v15 = vadd.f32 1.0, %v3817_v51  ;;  %v3353_v13 = vmul.f32 -1.442695, %v2758_v35 }
 0x44e   :  { %v2761_v10 = vadd.f32 %v2760_v49, %v2536_v56  ;;  %v3819_v28 = vpop.eup %3818 }
 0x44f   :  { %3828 = vrcp.f32 %v3017_v15  ;;  %3158 = vst [vmem:[#allocation11 + $0x90] sm:$0xff] %v3819_v28 }
 0x450   :  { %3830 = vpow2.f32 %v3353_v13  ;;  %v3354_v39 = vmul.f32 -1.442695, %v2761_v10  ;;  %v2540_v34 = vpop.f32.mrb[196].mxu0  ;;  %v2765_v33 = vpop.f32.mrb[220].mxu1 }
 0x451   :  { %v3821_v46 = vpop.eup %3820  ;;  %v2541_v17 = vadd.f32 %v5195_v44, %v2540_v34  ;;  %v2542_v19 = vpop.f32.mrb[197].mxu0 }
 0x452   :  { %v3823_v54 = vpop.eup %3822  ;;  %3159 = vst [vmem:[#allocation11 + $0x98] sm:$0xff] %v3821_v46  ;;  %3832 = vpow2.f32 %v3354_v39  ;;  %v2767_v26 = vpop.f32.mrb[221].mxu1 }
 0x453   :  { %v3018_v38 = vadd.f32 1.0, %v3823_v54  ;;  %v2543_v41 = vpop.f32.mrb[198].mxu0  ;;  %v2768_v36 = vpop.f32.mrb[222].mxu1  ;;  %v2766_v6 = vadd.f32 %v2765_v33, %v2541_v17 }
 0x454   :  { %v3825_v3 = vpop.eup %3824  ;;  %v2544_v32 = vadd.f32 %v5195_v44, %v2543_v41  ;;  %v2545_v12 = vpop.f32.mrb[199].mxu0 }
 0x455   :  { %v2770_v37 = vpop.f32.mrb[223].mxu1  ;;  %3834 = vrcp.f32 %v3018_v38  ;;  %v3019_v7 = vadd.f32 1.0, %v3825_v3  ;;  %v3355_v20 = vmul.f32 -1.442695, %v2766_v6 }
 0x456   :  { %v2769_v27 = vadd.f32 %v2768_v36, %v2544_v32 }
 0x457   :  { %v3827_v55 = vpop.eup %3826  ;;  %3836 = vrcp.f32 %v3019_v7 }
 0x458   :  { %3160 = vst [vmem:[#allocation11 + $0xa0] sm:$0xff] %v3827_v55  ;;  %3838 = vpow2.f32 %v3355_v20  ;;  %v3356_v29 = vmul.f32 -1.442695, %v2769_v27  ;;  %v2548_v22 = vpop.f32.mrb[200].mxu0  ;;  %v2773_v21 = vpop.f32.mrb[224].mxu1 }
 0x459   :  { %v3829_v8 = vpop.eup %3828  ;;  %v2549_v1 = vadd.f32 %v5195_v44, %v2548_v22  ;;  %v2550_v24 = vpop.f32.mrb[201].mxu0 }
 0x45a   :  { %v3831_v61 = vpop.eup %3830  ;;  %3161 = vst [vmem:[#allocation11 + $0xa8] sm:$0xff] %v3829_v8  ;;  %3840 = vpow2.f32 %v3356_v29  ;;  %v2775_v2 = vpop.f32.mrb[225].mxu1 }
 0x45b   :  { %v3020_v42 = vadd.f32 1.0, %v3831_v61  ;;  %v2551_v50 = vpop.f32.mrb[202].mxu0  ;;  %v2776_v4 = vpop.f32.mrb[226].mxu1  ;;  %v2774_v47 = vadd.f32 %v2773_v21, %v2549_v1 }
 0x45c   :  { %v3833_v9 = vpop.eup %3832  ;;  %v2552_v31 = vadd.f32 %v5195_v44, %v2551_v50  ;;  %v2553_v40 = vpop.f32.mrb[203].mxu0 }
 0x45d   :  { %v2778_v63 = vpop.f32.mrb[227].mxu1  ;;  %3842 = vrcp.f32 %v3020_v42  ;;  %v3021_v16 = vadd.f32 1.0, %v3833_v9  ;;  %v3357_v58 = vmul.f32 -1.442695, %v2774_v47 }
 0x45e   :  { %v2777_v5 = vadd.f32 %v2776_v4, %v2552_v31 }
 0x45f   :  { %v3835_v18 = vpop.eup %3834  ;;  %3844 = vrcp.f32 %v3021_v16 }
 0x460   :  { %3162 = vst [vmem:[#allocation11 + $0xb0] sm:$0xff] %v3835_v18  ;;  %3846 = vpow2.f32 %v3357_v58  ;;  %v3358_v25 = vmul.f32 -1.442695, %v2777_v5  ;;  %v2556_v43 = vpop.f32.mrb[204].mxu0  ;;  %v2781_v57 = vpop.f32.mrb[228].mxu1 }
 0x461   :  { %v3837_v52 = vpop.eup %3836  ;;  %v2557_v45 = vadd.f32 %v5195_v44, %v2556_v43  ;;  %v2558_v14 = vpop.f32.mrb[205].mxu0 }
 0x462   :  { %v3839_v48 = vpop.eup %3838  ;;  %3163 = vst [vmem:[#allocation11 + $0xb8] sm:$0xff] %v3837_v52  ;;  %3848 = vpow2.f32 %v3358_v25  ;;  %v2783_v53 = vpop.f32.mrb[229].mxu1 }
 0x463   :  { %v3022_v23 = vadd.f32 1.0, %v3839_v48  ;;  %v2559_v11 = vpop.f32.mrb[206].mxu0  ;;  %v2784_v30 = vpop.f32.mrb[230].mxu1  ;;  %v2782_v62 = vadd.f32 %v2781_v57, %v2557_v45 }
 0x464   :  { %v3841_v59 = vpop.eup %3840  ;;  %v2560_v49 = vadd.f32 %v5195_v44, %v2559_v11  ;;  %v2561_v51 = vpop.f32.mrb[207].mxu0 }
 0x465   :  { %v2786_v35 = vpop.f32.mrb[231].mxu1  ;;  %3850 = vrcp.f32 %v3022_v23  ;;  %v3023_v56 = vadd.f32 1.0, %v3841_v59  ;;  %v3359_v0 = vmul.f32 -1.442695, %v2782_v62 }
 0x466   :  { %v2785_v60 = vadd.f32 %v2784_v30, %v2560_v49 }
 0x467   :  { %v3843_v15 = vpop.eup %3842  ;;  %3852 = vrcp.f32 %v3023_v56 }
 0x468   :  { %3164 = vst [vmem:[#allocation11 + $0xc0] sm:$0xff] %v3843_v15  ;;  %3854 = vpow2.f32 %v3359_v0  ;;  %v3360_v13 = vmul.f32 -1.442695, %v2785_v60  ;;  %v2564_v28 = vpop.f32.mrb[208].mxu0  ;;  %v2789_v39 = vpop.f32.mrb[232].mxu1 }
 0x469   :  { %v3845_v10 = vpop.eup %3844  ;;  %v2565_v34 = vadd.f32 %v5195_v44, %v2564_v28  ;;  %v2566_v33 = vpop.f32.mrb[209].mxu0 }
 0x46a   :  { %v3847_v46 = vpop.eup %3846  ;;  %3165 = vst [vmem:[#allocation11 + $0xc8] sm:$0xff] %v3845_v10  ;;  %3856 = vpow2.f32 %v3360_v13  ;;  %v2791_v54 = vpop.f32.mrb[233].mxu1 }
 0x46b   :  { %v3024_v17 = vadd.f32 1.0, %v3847_v46  ;;  %v2567_v19 = vpop.f32.mrb[210].mxu0  ;;  %v2792_v26 = vpop.f32.mrb[234].mxu1  ;;  %v2790_v41 = vadd.f32 %v2789_v39, %v2565_v34 }
 0x46c   :  { %v3849_v38 = vpop.eup %3848  ;;  %v2568_v36 = vadd.f32 %v5195_v44, %v2567_v19  ;;  %v2569_v3 = vpop.f32.mrb[211].mxu0 }
 0x46d   :  { %v2794_v6 = vpop.f32.mrb[235].mxu1  ;;  %3858 = vrcp.f32 %v3024_v17  ;;  %v3025_v32 = vadd.f32 1.0, %v3849_v38  ;;  %v3361_v12 = vmul.f32 -1.442695, %v2790_v41 }
 0x46e   :  { %v2793_v37 = vadd.f32 %v2792_v26, %v2568_v36 }
 0x46f   :  { %v3851_v7 = vpop.eup %3850  ;;  %3860 = vrcp.f32 %v3025_v32 }
 0x470   :  { %3166 = vst [vmem:[#allocation11 + $0xd0] sm:$0xff] %v3851_v7  ;;  %3862 = vpow2.f32 %v3361_v12  ;;  %v3362_v20 = vmul.f32 -1.442695, %v2793_v37  ;;  %v2572_v55 = vpop.f32.mrb[212].mxu0  ;;  %v2797_v29 = vpop.f32.mrb[236].mxu1 }
 0x471   :  { %v3853_v27 = vpop.eup %3852  ;;  %v2573_v22 = vadd.f32 %v5195_v44, %v2572_v55  ;;  %v2574_v21 = vpop.f32.mrb[213].mxu0 }
 0x472   :  { %v3855_v8 = vpop.eup %3854  ;;  %3167 = vst [vmem:[#allocation11 + $0xd8] sm:$0xff] %v3853_v27  ;;  %3864 = vpow2.f32 %v3362_v20  ;;  %v2799_v61 = vpop.f32.mrb[237].mxu1 }
 0x473   :  { %v3026_v1 = vadd.f32 1.0, %v3855_v8  ;;  %v2575_v24 = vpop.f32.mrb[214].mxu0  ;;  %v2800_v2 = vpop.f32.mrb[238].mxu1  ;;  %v2798_v50 = vadd.f32 %v2797_v29, %v2573_v22 }
 0x474   :  { %v3857_v42 = vpop.eup %3856  ;;  %v2576_v4 = vadd.f32 %v5195_v44, %v2575_v24  ;;  %v2577_v9 = vpop.f32.mrb[215].mxu0 }
 0x475   :  { %v2802_v47 = vpop.f32.mrb[239].mxu1  ;;  %3866 = vrcp.f32 %v3026_v1  ;;  %v3027_v31 = vadd.f32 1.0, %v3857_v42  ;;  %v3363_v40 = vmul.f32 -1.442695, %v2798_v50 }
 0x476   :  { %v2801_v63 = vadd.f32 %v2800_v2, %v2576_v4 }
 0x477   :  { %v3859_v16 = vpop.eup %3858  ;;  %3868 = vrcp.f32 %v3027_v31 }
 0x478   :  { %3168 = vst [vmem:[#allocation11 + $0xe0] sm:$0xff] %v3859_v16  ;;  %3870 = vpow2.f32 %v3363_v40  ;;  %v3364_v58 = vmul.f32 -1.442695, %v2801_v63  ;;  %v2580_v18 = vpop.f32.mrb[216].mxu0  ;;  %v2805_v25 = vpop.f32.mrb[240].mxu1 }
 0x479   :  { %v3861_v5 = vpop.eup %3860  ;;  %v2581_v43 = vadd.f32 %v5195_v44, %v2580_v18  ;;  %v2582_v57 = vpop.f32.mrb[217].mxu0 }
 0x47a   :  { %v3863_v52 = vpop.eup %3862  ;;  %3169 = vst [vmem:[#allocation11 + $0xe8] sm:$0xff] %v3861_v5  ;;  %3872 = vpow2.f32 %v3364_v58  ;;  %v2807_v48 = vpop.f32.mrb[241].mxu1 }
 0x47b   :  { %v3028_v45 = vadd.f32 1.0, %v3863_v52  ;;  %v2583_v14 = vpop.f32.mrb[218].mxu0  ;;  %v2808_v53 = vpop.f32.mrb[242].mxu1  ;;  %v2806_v11 = vadd.f32 %v2805_v25, %v2581_v43 }
 0x47c   :  { %v3865_v23 = vpop.eup %3864  ;;  %v2584_v30 = vadd.f32 %v5195_v44, %v2583_v14  ;;  %v2585_v59 = vpop.f32.mrb[219].mxu0 }
 0x47d   :  { %v2810_v62 = vpop.f32.mrb[243].mxu1  ;;  %3874 = vrcp.f32 %v3028_v45  ;;  %v3029_v49 = vadd.f32 1.0, %v3865_v23  ;;  %v3365_v51 = vmul.f32 -1.442695, %v2806_v11 }
 0x47e   :  { %v2809_v35 = vadd.f32 %v2808_v53, %v2584_v30 }
 0x47f   :  { %v3867_v56 = vpop.eup %3866  ;;  %3876 = vrcp.f32 %v3029_v49 }
 0x480   :  { %3170 = vst [vmem:[#allocation11 + $0xf0] sm:$0xff] %v3867_v56  ;;  %3878 = vpow2.f32 %v3365_v51  ;;  %v3366_v0 = vmul.f32 -1.442695, %v2809_v35  ;;  %v2588_v15 = vpop.f32.mrb[220].mxu0  ;;  %v2813_v13 = vpop.f32.mrb[244].mxu1 }
 0x481   :  { %v3869_v60 = vpop.eup %3868  ;;  %v2589_v28 = vadd.f32 %v5195_v44, %v2588_v15  ;;  %v2590_v39 = vpop.f32.mrb[221].mxu0 }
 0x482   :  { %v3871_v10 = vpop.eup %3870  ;;  %3171 = vst [vmem:[#allocation11 + $0xf8] sm:$0xff] %v3869_v60  ;;  %3880 = vpow2.f32 %v3366_v0  ;;  %v2815_v46 = vpop.f32.mrb[245].mxu1 }
 0x483   :  { %v3030_v34 = vadd.f32 1.0, %v3871_v10  ;;  %v2591_v33 = vpop.f32.mrb[222].mxu0  ;;  %v2816_v54 = vpop.f32.mrb[246].mxu1  ;;  %v2814_v19 = vadd.f32 %v2813_v13, %v2589_v28 }
 0x484   :  { %v3873_v17 = vpop.eup %3872  ;;  %v2592_v26 = vadd.f32 %v5195_v44, %v2591_v33  ;;  %v2593_v38 = vpop.f32.mrb[223].mxu0 }
 0x485   :  { %v2818_v41 = vpop.f32.mrb[247].mxu1  ;;  %3882 = vrcp.f32 %v3030_v34  ;;  %v3031_v36 = vadd.f32 1.0, %v3873_v17  ;;  %v3367_v3 = vmul.f32 -1.442695, %v2814_v19 }
 0x486   :  { %v2817_v6 = vadd.f32 %v2816_v54, %v2592_v26 }
 0x487   :  { %v3875_v32 = vpop.eup %3874  ;;  %3884 = vrcp.f32 %v3031_v36 }
 0x488   :  { %3172 = vst [vmem:[#allocation11 + $0x100] sm:$0xff] %v3875_v32  ;;  %3886 = vpow2.f32 %v3367_v3  ;;  %v3368_v12 = vmul.f32 -1.442695, %v2817_v6  ;;  %v2596_v7 = vpop.f32.mrb[224].mxu0  ;;  %v2821_v20 = vpop.f32.mrb[248].mxu1 }
 0x489   :  { %v3877_v37 = vpop.eup %3876  ;;  %v2597_v55 = vadd.f32 %v5195_v44, %v2596_v7  ;;  %v2598_v29 = vpop.f32.mrb[225].mxu0 }
 0x48a   :  { %v3879_v27 = vpop.eup %3878  ;;  %3173 = vst [vmem:[#allocation11 + $0x108] sm:$0xff] %v3877_v37  ;;  %3888 = vpow2.f32 %v3368_v12  ;;  %v2823_v8 = vpop.f32.mrb[249].mxu1 }
 0x48b   :  { %v3032_v22 = vadd.f32 1.0, %v3879_v27  ;;  %v2599_v21 = vpop.f32.mrb[226].mxu0  ;;  %v2824_v61 = vpop.f32.mrb[250].mxu1  ;;  %v2822_v24 = vadd.f32 %v2821_v20, %v2597_v55 }
 0x48c   :  { %v3881_v1 = vpop.eup %3880  ;;  %v2600_v2 = vadd.f32 %v5195_v44, %v2599_v21  ;;  %v2601_v42 = vpop.f32.mrb[227].mxu0 }
 0x48d   :  { %v2826_v50 = vpop.f32.mrb[251].mxu1  ;;  %3890 = vrcp.f32 %v3032_v22  ;;  %v3033_v4 = vadd.f32 1.0, %v3881_v1  ;;  %v3369_v9 = vmul.f32 -1.442695, %v2822_v24 }
 0x48e   :  { %v2825_v47 = vadd.f32 %v2824_v61, %v2600_v2 }
 0x48f   :  { %v3883_v31 = vpop.eup %3882  ;;  %3892 = vrcp.f32 %v3033_v4 }
 0x490   :  { %3174 = vst [vmem:[#allocation11 + $0x110] sm:$0xff] %v3883_v31  ;;  %3894 = vpow2.f32 %v3369_v9  ;;  %v3370_v40 = vmul.f32 -1.442695, %v2825_v47  ;;  %v2604_v16 = vpop.f32.mrb[228].mxu0  ;;  %v2829_v58 = vpop.f32.mrb[252].mxu1 }
 0x491   :  { %v3885_v63 = vpop.eup %3884  ;;  %v2605_v18 = vadd.f32 %v5195_v44, %v2604_v16  ;;  %v2606_v25 = vpop.f32.mrb[229].mxu0 }
 0x492   :  { %v3887_v5 = vpop.eup %3886  ;;  %3175 = vst [vmem:[#allocation11 + $0x118] sm:$0xff] %v3885_v63  ;;  %3896 = vpow2.f32 %v3370_v40  ;;  %v2831_v52 = vpop.f32.mrb[253].mxu1 }
 0x493   :  { %v3034_v43 = vadd.f32 1.0, %v3887_v5  ;;  %v2607_v57 = vpop.f32.mrb[230].mxu0  ;;  %v2832_v48 = vpop.f32.mrb[254].mxu1  ;;  %v2830_v14 = vadd.f32 %v2829_v58, %v2605_v18 }
 0x494   :  { %v3889_v45 = vpop.eup %3888  ;;  %v2608_v53 = vadd.f32 %v5195_v44, %v2607_v57  ;;  %v2609_v23 = vpop.f32.mrb[231].mxu0 }
 0x495   :  { %v2834_v11 = vpop.f32.mrb[255].mxu1  ;;  %3898 = vrcp.f32 %v3034_v43  ;;  %v3035_v30 = vadd.f32 1.0, %v3889_v45  ;;  %v3371_v59 = vmul.f32 -1.442695, %v2830_v14 }
 0x496   :  { %v2833_v62 = vadd.f32 %v2832_v48, %v2608_v53 }
 0x497   :  { %v3891_v49 = vpop.eup %3890  ;;  %3900 = vrcp.f32 %v3035_v30 }
 0x498   :  { %3176 = vst [vmem:[#allocation11 + $0x120] sm:$0xff] %v3891_v49  ;;  %3902 = vpow2.f32 %v3371_v59  ;;  %v3372_v51 = vmul.f32 -1.442695, %v2833_v62  ;;  %v2612_v56 = vpop.f32.mrb[232].mxu0  ;;  %v2837_v0 = vpop.f32.mrb[0].mxu1 }
 0x499   :  { %v3893_v35 = vpop.eup %3892  ;;  %v2613_v15 = vadd.f32 %v5195_v44, %v2612_v56  ;;  %v2614_v13 = vpop.f32.mrb[233].mxu0 }
 0x49a   :  { %v3895_v60 = vpop.eup %3894  ;;  %3177 = vst [vmem:[#allocation11 + $0x128] sm:$0xff] %v3893_v35  ;;  %3904 = vpow2.f32 %v3372_v51  ;;  %v2839_v10 = vpop.f32.mrb[1].mxu1 }
 0x49b   :  { %v3036_v28 = vadd.f32 1.0, %v3895_v60  ;;  %v2615_v39 = vpop.f32.mrb[234].mxu0  ;;  %v2840_v46 = vpop.f32.mrb[2].mxu1  ;;  %v2838_v33 = vadd.f32 %v2837_v0, %v2613_v15 }
 0x49c   :  { %v3897_v34 = vpop.eup %3896  ;;  %v2616_v54 = vadd.f32 %v5195_v44, %v2615_v39  ;;  %v2617_v17 = vpop.f32.mrb[235].mxu0 }
 0x49d   :  { %v2842_v19 = vpop.f32.mrb[3].mxu1  ;;  %3906 = vrcp.f32 %v3036_v28  ;;  %v3037_v26 = vadd.f32 1.0, %v3897_v34  ;;  %v3373_v38 = vmul.f32 -1.442695, %v2838_v33 }
 0x49e   :  { %v2841_v41 = vadd.f32 %v2840_v46, %v2616_v54 }
 0x49f   :  { %v3899_v36 = vpop.eup %3898  ;;  %3908 = vrcp.f32 %v3037_v26 }
 0x4a0   :  { %3178 = vst [vmem:[#allocation11 + $0x130] sm:$0xff] %v3899_v36  ;;  %3910 = vpow2.f32 %v3373_v38  ;;  %v3374_v3 = vmul.f32 -1.442695, %v2841_v41  ;;  %v2620_v32 = vpop.f32.mrb[236].mxu0  ;;  %v2845_v12 = vpop.f32.mrb[4].mxu1 }
 0x4a1   :  { %v3901_v6 = vpop.eup %3900  ;;  %v2621_v7 = vadd.f32 %v5195_v44, %v2620_v32  ;;  %v2622_v20 = vpop.f32.mrb[237].mxu0 }
 0x4a2   :  { %v3903_v37 = vpop.eup %3902  ;;  %3179 = vst [vmem:[#allocation11 + $0x138] sm:$0xff] %v3901_v6  ;;  %3912 = vpow2.f32 %v3374_v3  ;;  %v2847_v27 = vpop.f32.mrb[5].mxu1 }
 0x4a3   :  { %v3038_v55 = vadd.f32 1.0, %v3903_v37  ;;  %v2623_v29 = vpop.f32.mrb[238].mxu0  ;;  %v2848_v8 = vpop.f32.mrb[6].mxu1  ;;  %v2846_v21 = vadd.f32 %v2845_v12, %v2621_v7 }
 0x4a4   :  { %v3905_v22 = vpop.eup %3904  ;;  %v2624_v61 = vadd.f32 %v5195_v44, %v2623_v29  ;;  %v2625_v1 = vpop.f32.mrb[239].mxu0 }
 0x4a5   :  { %v2850_v24 = vpop.f32.mrb[7].mxu1  ;;  %3914 = vrcp.f32 %v3038_v55  ;;  %v3039_v2 = vadd.f32 1.0, %v3905_v22  ;;  %v3375_v42 = vmul.f32 -1.442695, %v2846_v21 }
 0x4a6   :  { %v2849_v50 = vadd.f32 %v2848_v8, %v2624_v61  ;;  %v3978_v8 = vld [vmem:[%s5266_s8] ss:$0 sm:$0xff]  ;;  %s4131_s8 = smov [#allocation11]  }
 0x4a7   :  { %v3907_v4 = vpop.eup %3906  ;;  %3916 = vrcp.f32 %v3039_v2  ;;  %s3193_s15 = sshll.u32 %s4131_s8, 4  ;;  %s3194_s15 = int_to_ptr.vmem [resolvable:$true] %s3193_s15 }
 0x4a8   :  { %3180 = vst [vmem:[#allocation11 + $0x140] sm:$0xff] %v3907_v4  ;;  %3918 = vpow2.f32 %v3375_v42  ;;  %v3376_v9 = vmul.f32 -1.442695, %v2849_v50  ;;  %v2661_v31 = vpop.f32.mrb[144].mxu0  ;;  %s4089_s17 = scalar_lea.vmem %s3194_s15, 6144  ;;  %p4094_p13 = scmp.lt.s32.totalorder %s3194_s15, %s3194_s15 }
 0x4a9   :  { %v3909_v47 = vpop.eup %3908  ;;  %v3505_v63 = vadd.f32 %v5195_v44, %v2661_v31  ;;  %v2663_v16 = vpop.f32.mrb[145].mxu0  ;;  %p4090_p12 = scmp.ne.s32.totalorder %s3194_s15, %s4089_s17  ;;  %p4095_p0 = scmp.lt.s32.totalorder %s4089_s17, %s4089_s17 }
 0x4aa   :  { %v3911_v40 = vpop.eup %3910  ;;  %3181 = vst [vmem:[#allocation11 + $0x148] sm:$0xff] %v3909_v47  ;;  %3920 = vpow2.f32 %v3376_v9  ;;  %v2664_v5 = vpop.f32.mrb[146].mxu0 }
 0x4ab   :  { %v3040_v58 = vadd.f32 1.0, %v3911_v40  ;;  %v3329_v25 = vmul.f32 -1.442695, %v3505_v63  ;;  %v3506_v52 = vadd.f32 %v5195_v44, %v2664_v5  ;;  %v2666_v43 = vpop.f32.mrb[147].mxu0  ;;  %p4096_p1 = por %p4095_p0, %p4094_p13 }
 0x4ac   :  { %v3913_v18 = vpop.eup %3912 }
 0x4ad   :  { %3922 = vrcp.f32 %v3040_v58  ;;  %v3041_v57 = vadd.f32 1.0, %v3913_v18  ;;  %v3330_v48 = vmul.f32 -1.442695, %v3506_v52  ;;  %p4097_p2 = pnand %p4096_p1, %p4090_p12 }
 0x4ae   :  { %3924 = vpow2.f32 %v3329_v25 }
 0x4af   :  { %v3915_v45 = vpop.eup %3914  ;;  %3926 = vrcp.f32 %v3041_v57 }
 0x4b0   :  { %3182 = vst [vmem:[#allocation11 + $0x150] sm:$0xff] %v3915_v45  ;;  %3928 = vpow2.f32 %v3330_v48  ;;  %v2669_v53 = vpop.f32.mrb[148].mxu0 }
 0x4b1   :  { %v3917_v14 = vpop.eup %3916  ;;  %v3507_v11 = vadd.f32 %v5195_v44, %v2669_v53  ;;  %v2671_v30 = vpop.f32.mrb[149].mxu0 }
 0x4b2   :  { %v3919_v23 = vpop.eup %3918  ;;  %3183 = vst [vmem:[#allocation11 + $0x158] sm:$0xff] %v3917_v14  ;;  %v2672_v62 = vpop.f32.mrb[150].mxu0 }
 0x4b3   :  { %v3042_v59 = vadd.f32 1.0, %v3919_v23  ;;  %v3331_v51 = vmul.f32 -1.442695, %v3507_v11  ;;  %v3508_v35 = vadd.f32 %v5195_v44, %v2672_v62  ;;  %v2674_v56 = vpop.f32.mrb[151].mxu0 }
 0x4b4   :  { %v3921_v49 = vpop.eup %3920 }
 0x4b5   :  { %3930 = vrcp.f32 %v3042_v59  ;;  %v3043_v0 = vadd.f32 1.0, %v3921_v49  ;;  %v3332_v60 = vmul.f32 -1.442695, %v3508_v35 }
 0x4b6   :  { %3932 = vpow2.f32 %v3331_v51 }
 0x4b7   :  { %v3923_v15 = vpop.eup %3922  ;;  %3934 = vrcp.f32 %v3043_v0 }
 0x4b8   :  { %v3925_v13 = vpop.eup %3924  ;;  %3184 = vst [vmem:[#allocation11 + $0x160] sm:$0xff] %v3923_v15  ;;  %3936 = vpow2.f32 %v3332_v60  ;;  %v2677_v39 = vpop.f32.mrb[152].mxu0 }
 0x4b9   :  { %v3927_v10 = vpop.eup %3926  ;;  %v2996_v28 = vadd.f32 1.0, %v3925_v13  ;;  %v3509_v34 = vadd.f32 %v5195_v44, %v2677_v39  ;;  %v2679_v33 = vpop.f32.mrb[153].mxu0 }
 0x4ba   :  { %v3929_v46 = vpop.eup %3928  ;;  %3185 = vst [vmem:[#allocation11 + $0x168] sm:$0xff] %v3927_v10  ;;  %v2680_v17 = vpop.f32.mrb[154].mxu0 }
 0x4bb   :  { %3938 = vrcp.f32 %v2996_v28  ;;  %v2997_v54 = vadd.f32 1.0, %v3929_v46  ;;  %v3333_v19 = vmul.f32 -1.442695, %v3509_v34  ;;  %v3510_v26 = vadd.f32 %v5195_v44, %v2680_v17  ;;  %v2682_v38 = vpop.f32.mrb[155].mxu0 }
 0x4bd   :  { %3940 = vrcp.f32 %v2997_v54  ;;  %v3334_v41 = vmul.f32 -1.442695, %v3510_v26 }
 0x4be   :  { %3942 = vpow2.f32 %v3333_v19 }
 0x4bf   :  { %v3931_v36 = vpop.eup %3930  ;;  %3944 = vpow2.f32 %v3334_v41 }
 0x4c0   :  { %v3933_v3 = vpop.eup %3932  ;;  %3186 = vst [vmem:[#allocation11 + $0x170] sm:$0xff] %v3931_v36  ;;  %v2685_v12 = vpop.f32.mrb[156].mxu0 }
 0x4c1   :  { %v3935_v6 = vpop.eup %3934  ;;  %v2998_v32 = vadd.f32 1.0, %v3933_v3  ;;  %v3511_v7 = vadd.f32 %v5195_v44, %v2685_v12  ;;  %v2687_v20 = vpop.f32.mrb[157].mxu0 }
 0x4c2   :  { %v3937_v37 = vpop.eup %3936  ;;  %3187 = vst [vmem:[#allocation11 + $0x178] sm:$0xff] %v3935_v6  ;;  %v2688_v55 = vpop.f32.mrb[158].mxu0 }
 0x4c3   :  { %3946 = vrcp.f32 %v2998_v32  ;;  %v2999_v27 = vadd.f32 1.0, %v3937_v37  ;;  %v3335_v29 = vmul.f32 -1.442695, %v3511_v7  ;;  %v3512_v22 = vadd.f32 %v3978_v8, %v2688_v55  ;;  %v2690_v21 = vpop.f32.mrb[159].mxu0 }
 0x4c5   :  { %v3939_v61 = vpop.eup %3938  ;;  %3948 = vrcp.f32 %v2999_v27  ;;  %v3336_v1 = vmul.f32 -1.442695, %v3512_v22 }
 0x4c6   :  { %3140 = vst [vmem:[#allocation11] sm:$0xff] %v3939_v61  ;;  %3950 = vpow2.f32 %v3335_v29 }
 0x4c7   :  { %v3941_v24 = vpop.eup %3940  ;;  %3952 = vpow2.f32 %v3336_v1 }
 0x4c8   :  { %v3943_v2 = vpop.eup %3942  ;;  %3141 = vst [vmem:[#allocation11 + $0x8] sm:$0xff] %v3941_v24  ;;  %v2693_v42 = vpop.f32.mrb[160].mxu0 }
 0x4c9   :  { %v3000_v44 = vadd.f32 1.0, %v3943_v2  ;;  %v3945_v50 = vpop.eup %3944  ;;  %v3513_v4 = vadd.f32 %v3978_v8, %v2693_v42  ;;  %v2695_v9 = vpop.f32.mrb[161].mxu0 }
 0x4ca   :  { %v3001_v47 = vadd.f32 1.0, %v3945_v50  ;;  %v2696_v31 = vpop.f32.mrb[162].mxu0 }
 0x4cb   :  { %3954 = vrcp.f32 %v3000_v44  ;;  %v3337_v40 = vmul.f32 -1.442695, %v3513_v4  ;;  %v3514_v63 = vadd.f32 %v3978_v8, %v2696_v31  ;;  %v2698_v16 = vpop.f32.mrb[163].mxu0 }
 0x4cc   :  { %3956 = vrcp.f32 %v3001_v47 }
 0x4cd   :  { %v3947_v58 = vpop.eup %3946  ;;  %3958 = vpow2.f32 %v3337_v40  ;;  %v3338_v5 = vmul.f32 -1.442695, %v3514_v63 }
 0x4ce   :  { %3142 = vst [vmem:[#allocation11 + $0x10] sm:$0xff] %v3947_v58 }
 0x4cf   :  { %v3949_v18 = vpop.eup %3948  ;;  %3960 = vpow2.f32 %v3338_v5 }
 0x4d0   :  { %v3951_v25 = vpop.eup %3950  ;;  %3143 = vst [vmem:[#allocation11 + $0x18] sm:$0xff] %v3949_v18  ;;  %v2701_v43 = vpop.f32.mrb[164].mxu0 }
 0x4d1   :  { %v3002_v52 = vadd.f32 1.0, %v3951_v25  ;;  %v3953_v57 = vpop.eup %3952  ;;  %v3515_v48 = vadd.f32 %v3978_v8, %v2701_v43  ;;  %v2703_v45 = vpop.f32.mrb[165].mxu0 }
 0x4d2   :  { %v3003_v14 = vadd.f32 1.0, %v3953_v57  ;;  %v2704_v53 = vpop.f32.mrb[166].mxu0 }
 0x4d3   :  { %3962 = vrcp.f32 %v3002_v52  ;;  %v3339_v23 = vmul.f32 -1.442695, %v3515_v48  ;;  %v3516_v11 = vadd.f32 %v3978_v8, %v2704_v53  ;;  %v2706_v30 = vpop.f32.mrb[167].mxu0 }
 0x4d4   :  { %3964 = vrcp.f32 %v3003_v14 }
 0x4d5   :  { %v3955_v59 = vpop.eup %3954  ;;  %3966 = vpow2.f32 %v3339_v23  ;;  %v3340_v62 = vmul.f32 -1.442695, %v3516_v11 }
 0x4d6   :  { %3144 = vst [vmem:[#allocation11 + $0x20] sm:$0xff] %v3955_v59  ;;  %v3957_v49 = vpop.eup %3956 }
 0x4d7   :  { %v3959_v51 = vpop.eup %3958  ;;  %3145 = vst [vmem:[#allocation11 + $0x28] sm:$0xff] %v3957_v49  ;;  %3968 = vpow2.f32 %v3340_v62 }
 0x4d8   :  { %v3004_v35 = vadd.f32 1.0, %v3959_v51 }
 0x4d9   :  { %v3961_v56 = vpop.eup %3960 }
 0x4da   :  { %3970 = vrcp.f32 %v3004_v35  ;;  %v3005_v0 = vadd.f32 1.0, %v3961_v56 }
 0x4dc   :  { %3972 = vrcp.f32 %v3005_v0 }
 0x4dd   :  { %v3963_v60 = vpop.eup %3962 }
 0x4de   :  { %3146 = vst [vmem:[#allocation11 + $0x30] sm:$0xff] %v3963_v60  ;;  %v3965_v15 = vpop.eup %3964 }
 0x4df   :  { %v3967_v13 = vpop.eup %3966  ;;  %3147 = vst [vmem:[#allocation11 + $0x38] sm:$0xff] %v3965_v15 }
 0x4e0   :  { %v3006_v10 = vadd.f32 1.0, %v3967_v13 }
 0x4e1   :  { %v3969_v28 = vpop.eup %3968 }
 0x4e2   :  { %3974 = vrcp.f32 %v3006_v10  ;;  %v3007_v39 = vadd.f32 1.0, %v3969_v28 }
 0x4e4   :  { %v3971_v46 = vpop.eup %3970  ;;  %3976 = vrcp.f32 %v3007_v39 }
 0x4e5   :  { %3148 = vst [vmem:[#allocation11 + $0x40] sm:$0xff] %v3971_v46 }
 0x4e6   :  { %v3973_v34 = vpop.eup %3972 }
 0x4e7   :  { %3149 = vst [vmem:[#allocation11 + $0x48] sm:$0xff] %v3973_v34 }
 0x4ec   :  { %v3975_v33 = vpop.eup %3974 }
 0x4ed   :  { %3150 = vst [vmem:[#allocation11 + $0x50] sm:$0xff] %v3975_v33 }
 0x4ee   :  { %v3977_v54 = vpop.eup %3976 }
 0x4ef   :  { %3151 = vst [vmem:[#allocation11 + $0x58] sm:$0xff] %v3977_v54 }
 0x4f0   :  { %4100 = shalt.err (!%p4097_p2)
}
 0x4f1   :  { %s4101_s0 = scalar_lea.hbm %s5267_s9, 6144 }
 0x4f2   :  { %p4102_p3 = scmp.ne.s32.totalorder %s5267_s9, %s4101_s0  ;;  %p4105_p4 = scmp.lt.u32.totalorder %s4101_s0, %s5267_s9 }
 0x4f4   :  { %p4107_p5 = pnand %p4105_p4, %p4102_p3 }
 0x4f6   :  { %4110 = shalt.err (!%p4107_p5)
}
 0x4f7   :  { %3199 = dma.vmem_to_hbm [thread:$0]  %s3194_s15, 6144, %s5267_s9, [#allocation4], %s4126_s5, %s4126_s5, %s4127_s24  }
 0x4f8   :  { %4117 = dma.done.wait [#allocation4], 6144  }
 0x4f9   :  { %4118 = vsyncadd [#allocation4], 4294961152 }
 0x4fa   :  { %3203 = vsyncpa [#allocation3], 1 }
 0x4fb   :  { %3204 = vsyncpa [#allocation6], 1 }
 0x4fc   :  { %3205 = vsyncpa [#allocation9], 1 }
 0x4fd   :  { %3206 = vsyncpa [#allocation4], 1 }

// kernel: tpu_custom_call.1
= control target key start
LH: loop header
LB: loop body
LE: loop exit
PB: predicated region body
PF: predicated region fallthrough
CT: control target
= control target key end

     0   :  { %14 = vsyncpa [#allocation3], 0  ;;  %s5258_s0 = inlined_call_operand.hbm [shape: f32[384,128], index: 0, kind: input, shape index: {}]   ;;  %s5259_s1 = inlined_call_operand.hbm [shape: bf16[128,128], index: 1, kind: input, shape index: {}]   ;;  %s5260_s2 = inlined_call_operand.vmem [shape: f32[1,128], index: 2, kind: input, shape index: {}]   ;;  %s5261_s3 = inlined_call_operand.hbm [shape: bf16[128,256], index: 3, kind: input, shape index: {}]   ;;  %s5262_s4 = inlined_call_operand.vmem [shape: f32[1,256], index: 4, kind: input, shape index: {}]   ;;  %s5263_s5 = inlined_call_operand.hbm [shape: bf16[256,512], index: 5, kind: input, shape index: {}]   ;;  %s5264_s6 = inlined_call_operand.vmem [shape: f32[1,512], index: 6, kind: input, shape index: {}]   ;;  %s5265_s7 = inlined_call_operand.hbm [shape: bf16[512,128], index: 7, kind: input, shape index: {}]   ;;  %s5266_s8 = inlined_call_operand.vmem [shape: f32[1,128], index: 8, kind: input, shape index: {}]   ;;  %s5267_s9 = inlined_call_operand.hbm [shape: f32[384,128], index: 9, kind: output, shape index: {}]  }
   0x1   :  { %15 = vsyncpa [#allocation6], 0 }
   0x2   :  { %16 = vsyncpa [#allocation9], 0 }
   0x3   :  { %17 = vsyncpa [#allocation4], 0  ;;  %s4119_s30 = smov [#allocation5]   ;;  %s3979_s13 = scalar_lea.hbm %s5259_s1, 1024 }
   0x4   :  { %s35_s10 = sshll.u32 %s4119_s30, 4  ;;  %p3980_p0 = scmp.ne.s32.totalorder %s5259_s1, %s3979_s13  ;;  %s36_s10 = int_to_ptr.vmem [resolvable:$true] %s35_s10 }
   0x5   :  { %p3983_p1 = scmp.lt.u32.totalorder %s3979_s13, %s5259_s1 }
   0x7   :  { %p3985_p2 = pnand %p3983_p1, %p3980_p0 }
   0x9   :  { %3988 = shalt.err (!%p3985_p2)
}
   0xa   :  { %s3989_s18 = scalar_lea.vmem %s36_s10, 1024  ;;  %p3994_p4 = scmp.lt.s32.totalorder %s36_s10, %s36_s10 }
   0xb   :  { %p3990_p3 = scmp.ne.s32.totalorder %s36_s10, %s3989_s18  ;;  %p3995_p5 = scmp.lt.s32.totalorder %s3989_s18, %s3989_s18 }
   0xd   :  { %p3996_p6 = por %p3995_p5, %p3994_p4 }
   0xf   :  { %p3997_p7 = pnand %p3996_p6, %p3990_p3 }
  0x11   :  { %4000 = shalt.err (!%p3997_p7)
}
  0x12   :  { %s4120_s19 = smov 64   ;;  %s4121_s20 = smov 4  }
  0x13   :  { %41 = dma.hbm_to_vmem [thread:$0]  %s5259_s1, 1024, %s36_s10, [#allocation6], %s4120_s19, %s4120_s19, %s4121_s20  }
  0x14   :  { %s4122_s23 = smov [#allocation8]   ;;  %s4001_s27 = scalar_lea.hbm %s5263_s5, 8192 }
  0x15   :  { %s63_s24 = sshll.u32 %s4122_s23, 4  ;;  %p4002_p8 = scmp.ne.s32.totalorder %s5263_s5, %s4001_s27  ;;  %s64_s24 = int_to_ptr.vmem [resolvable:$true] %s63_s24 }
  0x16   :  { %p4005_p9 = scmp.lt.u32.totalorder %s4001_s27, %s5263_s5 }
  0x18   :  { %p4007_p10 = pnand %p4005_p9, %p4002_p8 }
  0x1a   :  { %4010 = shalt.err (!%p4007_p10)
}
  0x1b   :  { %s4011_s12 = scalar_lea.vmem %s64_s24, 8192  ;;  %p4016_p12 = scmp.lt.s32.totalorder %s64_s24, %s64_s24 }
  0x1c   :  { %p4012_p11 = scmp.ne.s32.totalorder %s64_s24, %s4011_s12  ;;  %p4017_p13 = scmp.lt.s32.totalorder %s4011_s12, %s4011_s12 }
  0x1e   :  { %p4018_p0 = por %p4017_p13, %p4016_p12 }
  0x20   :  { %p4019_p1 = pnand %p4018_p0, %p4012_p11 }
  0x22   :  { %4022 = shalt.err (!%p4019_p1)
}
  0x23   :  { %s4123_s1 = smov 256   ;;  %s4124_s10 = smov 16  }
  0x24   :  { %69 = dma.hbm_to_vmem [thread:$0]  %s5263_s5, 8192, %s64_s24, [#allocation9], %s4123_s1, %s4123_s1, %s4124_s10  }
  0x25   :  { %s4125_s15 = smov [#allocation2]   ;;  %s4023_s21 = scalar_lea.hbm %s5258_s0, 6144 }
  0x26   :  { %s23_s16 = sshll.u32 %s4125_s15, 4  ;;  %p4024_p2 = scmp.ne.s32.totalorder %s5258_s0, %s4023_s21  ;;  %s24_s16 = int_to_ptr.vmem [resolvable:$true] %s23_s16 }
  0x27   :  { %p4027_p3 = scmp.lt.u32.totalorder %s4023_s21, %s5258_s0 }
  0x29   :  { %p4029_p4 = pnand %p4027_p3, %p4024_p2 }
  0x2b   :  { %4032 = shalt.err (!%p4029_p4)
}
  0x2c   :  { %s4033_s27 = scalar_lea.vmem %s24_s16, 6144  ;;  %p4038_p6 = scmp.lt.s32.totalorder %s24_s16, %s24_s16 }
  0x2d   :  { %p4034_p5 = scmp.ne.s32.totalorder %s24_s16, %s4033_s27  ;;  %p4039_p7 = scmp.lt.s32.totalorder %s4033_s27, %s4033_s27 }
  0x2f   :  { %p4040_p8 = por %p4039_p7, %p4038_p6 }
  0x31   :  { %p4041_p9 = pnand %p4040_p8, %p4034_p5 }
  0x33   :  { %4044 = shalt.err (!%p4041_p9)
}
  0x34   :  { %s4126_s5 = smov 128   ;;  %s4127_s24 = smov 8  }
  0x35   :  { %29 = dma.hbm_to_vmem [thread:$0]  %s5258_s0, 6144, %s24_s16, [#allocation3], %s4126_s5, %s4126_s5, %s4127_s24  }
  0x36   :  { %s4128_s30 = smov [#allocation7]   ;;  %s4129_s12 = smov [#allocation10]  }
  0x37   :  { %s49_s11 = sshll.u32 %s4128_s30, 4  ;;  %s77_s1 = sshll.u32 %s4129_s12, 4  ;;  %s50_s11 = int_to_ptr.vmem [resolvable:$true] %s49_s11  ;;  %s78_s1 = int_to_ptr.vmem [resolvable:$true] %s77_s1 }
  0x38   :  { %s4045_s14 = scalar_lea.hbm %s5261_s3, 2048 }
  0x39   :  { %p4046_p10 = scmp.ne.s32.totalorder %s5261_s3, %s4045_s14  ;;  %p4049_p11 = scmp.lt.u32.totalorder %s4045_s14, %s5261_s3 }
  0x3b   :  { %p4051_p12 = pnand %p4049_p11, %p4046_p10 }
  0x3d   :  { %4054 = shalt.err (!%p4051_p12)
}
  0x3e   :  { %s4055_s0 = scalar_lea.vmem %s50_s11, 2048  ;;  %p4060_p0 = scmp.lt.s32.totalorder %s50_s11, %s50_s11 }
  0x3f   :  { %p4056_p13 = scmp.ne.s32.totalorder %s50_s11, %s4055_s0  ;;  %p4061_p1 = scmp.lt.s32.totalorder %s4055_s0, %s4055_s0 }
  0x41   :  { %p4062_p2 = por %p4061_p1, %p4060_p0 }
  0x43   :  { %p4063_p3 = pnand %p4062_p2, %p4056_p13 }
  0x45   :  { %4066 = shalt.err (!%p4063_p3)
}
  0x46   :  { %55 = dma.hbm_to_vmem [thread:$0]  %s5261_s3, 2048, %s50_s11, [#allocation6], %s4126_s5, %s4126_s5, %s4127_s24  }
  0x47   :  { %s4067_s26 = scalar_lea.hbm %s5265_s7, 4096 }
  0x48   :  { %p4068_p4 = scmp.ne.s32.totalorder %s5265_s7, %s4067_s26  ;;  %p4071_p5 = scmp.lt.u32.totalorder %s4067_s26, %s5265_s7 }
  0x4a   :  { %p4073_p6 = pnand %p4071_p5, %p4068_p4 }
  0x4c   :  { %4076 = shalt.err (!%p4073_p6)
}
  0x4d   :  { %s4077_s12 = scalar_lea.vmem %s78_s1, 4096  ;;  %p4082_p8 = scmp.lt.s32.totalorder %s78_s1, %s78_s1 }
  0x4e   :  { %p4078_p7 = scmp.ne.s32.totalorder %s78_s1, %s4077_s12  ;;  %p4083_p9 = scmp.lt.s32.totalorder %s4077_s12, %s4077_s12 }
  0x50   :  { %p4084_p10 = por %p4083_p9, %p4082_p8 }
  0x52   :  { %p4085_p11 = pnand %p4084_p10, %p4078_p7 }
  0x54   :  { %4088 = shalt.err (!%p4085_p11)
}
  0x55   :  { %83 = dma.hbm_to_vmem [thread:$0]  %s5265_s7, 4096, %s78_s1, [#allocation9], %s4120_s19, %s4120_s19, %s4121_s20  }
  0x56   :  { %4111 = dma.done.wait [#allocation3], 6144  }
  0x57   :  { %4112 = vsyncadd [#allocation3], 4294961152 }
  0x58   :  { %4113 = dma.done.wait [#allocation6], 3072  }
  0x59   :  { %4114 = vsyncadd [#allocation6], 4294964224 }
  0x5a   :  { %4115 = dma.done.wait [#allocation9], 12288  }
  0x5b   :  { %4116 = vsyncadd [#allocation9], 4294955008  ;;  %v3626_v0 = vld [vmem:[#allocation5] sm:$0xff]   ;;  %v3627_v1 = vld [vmem:[#allocation5 + $0x8] sm:$0xff]  }
  0x5c   :  { %3409 = vmatprep.subr.bf16.mxu0 %v3626_v0  ;;  %v3628_v2 = vld [vmem:[#allocation5 + $0x10] sm:$0xff]   ;;  %v3629_v3 = vld [vmem:[#allocation5 + $0x18] sm:$0xff]   ;;  %v102_v4 = vld [vmem:[#allocation2] sm:$0xff] }
  0x5d   :  { %3410 = vmatpush3.bf16.msra.mxu0 %v3626_v0  ;;  %v103_v5 = vld [vmem:[#allocation2 + $0x8] sm:$0xff]  ;;  %v3630_v7 = vld [vmem:[#allocation5 + $0x20] sm:$0xff]   ;;  %v3632_v9 = vld [vmem:[#allocation5 + $0x30] sm:$0xff]  }
  0x5e   :  { %3411 = vmatprep.subr.bf16.mxu0 %v3627_v1  ;;  %v150_v6 = vpack.c.bf16 %v103_v5, %v102_v4  ;;  %v3631_v8 = vld [vmem:[#allocation5 + $0x28] sm:$0xff]   ;;  %v3633_v10 = vld [vmem:[#allocation5 + $0x38] sm:$0xff]   ;;  %v104_v12 = vld [vmem:[#allocation2 + $0x10] sm:$0xff] }
  0x5f   :  { %v3634_v11 = vld [vmem:[#allocation7 + $0x4] ss:$8 sps:$4 sm:$0xff]   ;;  %v105_v13 = vld [vmem:[#allocation2 + $0x18] sm:$0xff]  ;;  %v3636_v14 = vld [vmem:[#allocation7] ss:$8 sps:$4 sm:$0xff]  }
  0x60   :  { %3425 = vmatprep.mubr.bf16.mxu0 %v150_v6  ;;  %v106_v15 = vld [vmem:[#allocation2 + $0x20] sm:$0xff]  ;;  %626 = vmatprep.subr.bf16.mxu1 %v3634_v11  ;;  %v3637_v16 = vld [vmem:[#allocation7 + $0x14] ss:$8 sps:$4 sm:$0xff]   ;;  %v107_v17 = vld [vmem:[#allocation2 + $0x28] sm:$0xff]  ;;  %v151_v20 = vpack.c.bf16 %v105_v13, %v104_v12 }
  0x61   :  { %3412 = vmatpush3.bf16.msra.mxu0 %v3627_v1  ;;  %627 = vmatpush1.bf16.msra.mxu1 %v3636_v14  ;;  %v3639_v18 = vld [vmem:[#allocation7 + $0x10] ss:$8 sps:$4 sm:$0xff]   ;;  %v3640_v19 = vld [vmem:[#allocation7 + $0x24] ss:$8 sps:$4 sm:$0xff]   ;;  %v152_v21 = vpack.c.bf16 %v107_v17, %v106_v15  ;;  %v3642_v22 = vld [vmem:[#allocation7 + $0x20] ss:$8 sps:$4 sm:$0xff]  }
  0x62   :  { %3413 = vmatprep.subr.bf16.mxu0 %v3628_v2  ;;  %628 = vmatprep.subr.bf16.mxu1 %v3637_v16  ;;  %v3643_v23 = vld [vmem:[#allocation7 + $0x34] ss:$8 sps:$4 sm:$0xff]   ;;  %v3645_v26 = vld [vmem:[#allocation7 + $0x30] ss:$8 sps:$4 sm:$0xff]   ;;  %v110_v27 = vld [vmem:[#allocation2 + $0x40] sm:$0xff] }
  0x63   :  { %v108_v24 = vld [vmem:[#allocation2 + $0x30] sm:$0xff]  ;;  %v109_v25 = vld [vmem:[#allocation2 + $0x38] sm:$0xff]  ;;  %v111_v28 = vld [vmem:[#allocation2 + $0x48] sm:$0xff] }
  0x64   :  { %v3646_v29 = vld [vmem:[#allocation7 + $0x44] ss:$8 sps:$4 sm:$0xff]   ;;  %v3648_v30 = vld [vmem:[#allocation7 + $0x40] ss:$8 sps:$4 sm:$0xff]   ;;  %v153_v31 = vpack.c.bf16 %v109_v25, %v108_v24  ;;  %v3649_v32 = vld [vmem:[#allocation7 + $0x54] ss:$8 sps:$4 sm:$0xff]   ;;  %v154_v33 = vpack.c.bf16 %v111_v28, %v110_v27 }
  0x65   :  { %3414 = vmatpush3.bf16.msra.mxu0 %v3628_v2  ;;  %629 = vmatpush1.bf16.msra.mxu1 %v3639_v18  ;;  %v112_v34 = vld [vmem:[#allocation2 + $0x50] sm:$0xff]  ;;  %v113_v35 = vld [vmem:[#allocation2 + $0x58] sm:$0xff]  ;;  %v114_v37 = vld [vmem:[#allocation2 + $0x60] sm:$0xff] }
  0x66   :  { %3415 = vmatprep.subr.bf16.mxu0 %v3629_v3  ;;  %630 = vmatprep.subr.bf16.mxu1 %v3640_v19  ;;  %v3651_v36 = vld [vmem:[#allocation7 + $0x50] ss:$8 sps:$4 sm:$0xff]   ;;  %v115_v38 = vld [vmem:[#allocation2 + $0x68] sm:$0xff]  ;;  %v155_v39 = vpack.c.bf16 %v113_v35, %v112_v34  ;;  %v118_v43 = vld [vmem:[#allocation2 + $0x80] sm:$0xff] }
  0x67   :  { %v156_v40 = vpack.c.bf16 %v115_v38, %v114_v37  ;;  %v116_v41 = vld [vmem:[#allocation2 + $0x70] sm:$0xff]  ;;  %v117_v42 = vld [vmem:[#allocation2 + $0x78] sm:$0xff]  ;;  %v119_v44 = vld [vmem:[#allocation2 + $0x88] sm:$0xff] }
  0x68   :  { %v157_v45 = vpack.c.bf16 %v117_v42, %v116_v41  ;;  %v158_v46 = vpack.c.bf16 %v119_v44, %v118_v43  ;;  %v120_v47 = vld [vmem:[#allocation2 + $0x90] sm:$0xff]  ;;  %v121_v48 = vld [vmem:[#allocation2 + $0x98] sm:$0xff]  ;;  %v122_v49 = vld [vmem:[#allocation2 + $0xa0] sm:$0xff] }
  0x69   :  { %3416 = vmatpush3.bf16.msra.mxu0 %v3629_v3  ;;  %631 = vmatpush1.bf16.msra.mxu1 %v3642_v22  ;;  %v123_v50 = vld [vmem:[#allocation2 + $0xa8] sm:$0xff]  ;;  %v159_v51 = vpack.c.bf16 %v121_v48, %v120_v47  ;;  %v124_v53 = vld [vmem:[#allocation2 + $0xb0] sm:$0xff]  ;;  %v125_v54 = vld [vmem:[#allocation2 + $0xb8] sm:$0xff] }
  0x6a   :  { %3417 = vmatprep.subr.bf16.mxu0 %v3630_v7  ;;  %632 = vmatprep.subr.bf16.mxu1 %v3643_v23  ;;  %v160_v52 = vpack.c.bf16 %v123_v50, %v122_v49  ;;  %v126_v55 = vld [vmem:[#allocation2 + $0xc0] sm:$0xff]  ;;  %v127_v56 = vld [vmem:[#allocation2 + $0xc8] sm:$0xff]  ;;  %v161_v57 = vpack.c.bf16 %v125_v54, %v124_v53  ;;  %v128_v59 = vld [vmem:[#allocation2 + $0xd0] sm:$0xff] }
  0x6b   :  { %v162_v58 = vpack.c.bf16 %v127_v56, %v126_v55  ;;  %v129_v60 = vld [vmem:[#allocation2 + $0xd8] sm:$0xff]  ;;  %v130_v61 = vld [vmem:[#allocation2 + $0xe0] sm:$0xff]  ;;  %v131_v62 = vld [vmem:[#allocation2 + $0xe8] sm:$0xff] }
  0x6c   :  { %v163_v63 = vpack.c.bf16 %v129_v60, %v128_v59  ;;  %v164_v0 = vpack.c.bf16 %v131_v62, %v130_v61  ;;  %v132_v1 = vld [vmem:[#allocation2 + $0xf0] sm:$0xff]  ;;  %v133_v2 = vld [vmem:[#allocation2 + $0xf8] sm:$0xff]  ;;  %v134_v3 = vld [vmem:[#allocation2 + $0x100] sm:$0xff] }
  0x6d   :  { %3418 = vmatpush3.bf16.msra.mxu0 %v3630_v7  ;;  %633 = vmatpush1.bf16.msra.mxu1 %v3645_v26  ;;  %v135_v4 = vld [vmem:[#allocation2 + $0x108] sm:$0xff]  ;;  %v165_v5 = vpack.c.bf16 %v133_v2, %v132_v1  ;;  %v136_v7 = vld [vmem:[#allocation2 + $0x110] sm:$0xff]  ;;  %v141_v14 = vld [vmem:[#allocation2 + $0x138] sm:$0xff] }
  0x6e   :  { %3419 = vmatprep.subr.bf16.mxu0 %v3631_v8  ;;  %634 = vmatprep.subr.bf16.mxu1 %v3646_v29  ;;  %v166_v6 = vpack.c.bf16 %v135_v4, %v134_v3  ;;  %v140_v13 = vld [vmem:[#allocation2 + $0x130] sm:$0xff]  ;;  %v142_v15 = vld [vmem:[#allocation2 + $0x140] sm:$0xff]  ;;  %v143_v16 = vld [vmem:[#allocation2 + $0x148] sm:$0xff] }
  0x6f   :  { %v169_v17 = vpack.c.bf16 %v141_v14, %v140_v13  ;;  %v170_v18 = vpack.c.bf16 %v143_v16, %v142_v15  ;;  %v144_v19 = vld [vmem:[#allocation2 + $0x150] sm:$0xff]  ;;  %v147_v22 = vld [vmem:[#allocation2 + $0x168] sm:$0xff]  ;;  %v149_v26 = vld [vmem:[#allocation2 + $0x178] sm:$0xff] }
  0x70   :  { %v148_v25 = vld [vmem:[#allocation2 + $0x170] sm:$0xff]  ;;  %v3652_v27 = vld [vmem:[#allocation7 + $0x64] ss:$8 sps:$4 sm:$0xff]   ;;  %v3654_v29 = vld [vmem:[#allocation7 + $0x60] ss:$8 sps:$4 sm:$0xff]  }
  0x71   :  { %3420 = vmatpush3.bf16.msra.mxu0 %v3631_v8  ;;  %635 = vmatpush1.bf16.msra.mxu1 %v3648_v30  ;;  %v137_v8 = vld [vmem:[#allocation2 + $0x118] sm:$0xff]  ;;  %v173_v28 = vpack.c.bf16 %v149_v26, %v148_v25  ;;  %v4258_v35 = vld [vmem:[%s5260_s2] ss:$0 sm:$0xff]  ;;  %v3678_v56 = vld [vmem:[#allocation8 + $0x24] ss:$16 sps:$4 sm:$0xff]  }
  0x72   :  { %3421 = vmatprep.subr.bf16.mxu0 %v3632_v9  ;;  %636 = vmatprep.subr.bf16.mxu1 %v3649_v32  ;;  %v167_v11 = vpack.c.bf16 %v137_v8, %v136_v7  ;;  %v3655_v30 = vld [vmem:[#allocation7 + $0x74] ss:$8 sps:$4 sm:$0xff]   ;;  %v4130_v32 = vmov 0   ;;  %v3670_v38 = vld [vmem:[#allocation8] ss:$16 sps:$4 sm:$0xff]  }
  0x73   :  { %658 = vmatprep.mubr.bf16.mxu1 %v4130_v32  ;;  %v3658_v47 = vld [vmem:[#allocation8 + $0x8] ss:$16 sps:$4 sm:$0xff]   ;;  %v3663_v50 = vld [vmem:[#allocation8 + $0x2c] ss:$16 sps:$4 sm:$0xff]   ;;  %v3676_v55 = vld [vmem:[#allocation8 + $0x20] ss:$16 sps:$4 sm:$0xff]  }
  0x74   :  { %v3661_v59 = vld [vmem:[#allocation8 + $0x28] ss:$16 sps:$4 sm:$0xff]   ;;  %v3666_v61 = vld [vmem:[#allocation8 + $0x4c] ss:$16 sps:$4 sm:$0xff]   ;;  %v3679_v8 = vld [vmem:[#allocation8 + $0x40] ss:$16 sps:$4 sm:$0xff]  }
  0x75   :  { %3422 = vmatpush3.bf16.msra.mxu0 %v3632_v9  ;;  %637 = vmatpush1.bf16.msra.mxu1 %v3651_v36  ;;  %v138_v9 = vld [vmem:[#allocation2 + $0x120] sm:$0xff]  ;;  %v3669_v3 = vld [vmem:[#allocation8 + $0x6c] ss:$16 sps:$4 sm:$0xff]  }
  0x76   :  { %3423 = vmatprep.subr.bf16.mxu0 %v3633_v10  ;;  %638 = vmatprep.subr.bf16.mxu1 %v3652_v27  ;;  %v3675_v14 = vld [vmem:[#allocation8 + $0x8c] ss:$16 sps:$4 sm:$0xff]   ;;  %v3687_v15 = vld [vmem:[#allocation8 + $0x64] ss:$16 sps:$4 sm:$0xff]   ;;  %v3688_v27 = vld [vmem:[#allocation8 + $0x80] ss:$16 sps:$4 sm:$0xff]  }
  0x79   :  { %3424 = vmatpush3.bf16.msra.mxu0 %v3633_v10  ;;  %v139_v10 = vld [vmem:[#allocation2 + $0x128] sm:$0xff]  ;;  %639 = vmatpush1.bf16.msra.mxu1 %v3654_v29 }
  0x7a   :  { %v168_v12 = vpack.c.bf16 %v139_v10, %v138_v9  ;;  %640 = vmatprep.subr.bf16.mxu1 %v3655_v30  ;;  %v3681_v9 = vld [vmem:[#allocation8 + $0x44] ss:$16 sps:$4 sm:$0xff]  }
  0x7c   :  { %3426 = vmatmul.mubr.bf16.vlgmr.msra.gmra.mrb[0].mxu0 %v151_v20  ;;  %v145_v20 = vld [vmem:[#allocation2 + $0x158] sm:$0xff] }
  0x7d   :  { %3429 = vmatprep.mubr.bf16.mxu0 %v152_v21  ;;  %v146_v21 = vld [vmem:[#allocation2 + $0x160] sm:$0xff]  ;;  %v171_v23 = vpack.c.bf16 %v145_v20, %v144_v19  ;;  %v3673_v19 = vld [vmem:[#allocation8 + $0x88] ss:$16 sps:$4 sm:$0xff]  }
  0x7e   :  { %v172_v24 = vpack.c.bf16 %v147_v22, %v146_v21  ;;  %v3684_v22 = vld [vmem:[#allocation8 + $0xac] ss:$16 sps:$4 sm:$0xff]  }
  0x84   :  { %3430 = vmatmul.mubr.bf16.gmra.mrb[4].mxu0 %v153_v31  ;;  %v3657_v31 = vld [vmem:[#allocation7 + $0x70] ss:$8 sps:$4 sm:$0xff]  }
  0x85   :  { %3433 = vmatprep.mubr.bf16.mxu0 %v154_v33  ;;  %641 = vmatpush1.bf16.msra.mxu1 %v3657_v31  ;;  %v3660_v33 = vld [vmem:[#allocation8 + $0xc] ss:$16 sps:$4 sm:$0xff]   ;;  %v3682_v31 = vld [vmem:[#allocation8 + $0xa8] ss:$16 sps:$4 sm:$0xff]  }
  0x86   :  { %1674 = vmatprep.subr.bf16.mxu1 %v3660_v33 }
  0x8c   :  { %3434 = vmatmul.mubr.bf16.gmra.mrb[8].mxu0 %v155_v39  ;;  %v3672_v39 = vld [vmem:[#allocation8 + $0x4] ss:$16 sps:$4 sm:$0xff]  }
  0x8d   :  { %3437 = vmatprep.mubr.bf16.mxu0 %v156_v40  ;;  %1401 = vmatprep.subr.bf16.mxu0 %v3672_v39 }
  0x8e   :  { %1402 = vmatpush1.bf16.msra.mxu0 %v3670_v38  ;;  %v3691_v38 = vld [vmem:[#allocation8 + $0xc8] ss:$16 sps:$4 sm:$0xff]  }
  0x8f   :  { %1403 = vmatprep.subr.bf16.mxu0 %v3678_v56 }
  0x92   :  { %1404 = vmatpush1.bf16.msra.mxu0 %v3676_v55 }
  0x93   :  { %1405 = vmatprep.subr.bf16.mxu0 %v3681_v9 }
  0x94   :  { %3438 = vmatmul.mubr.bf16.gmra.mrb[12].mxu0 %v157_v45 }
  0x95   :  { %3441 = vmatprep.mubr.bf16.mxu0 %v158_v46 }
  0x96   :  { %1406 = vmatpush1.bf16.msra.mxu0 %v3679_v8 }
  0x97   :  { %1407 = vmatprep.subr.bf16.mxu0 %v3687_v15 }
  0x9c   :  { %3442 = vmatmul.mubr.bf16.gmra.mrb[16].mxu0 %v159_v51 }
  0x9d   :  { %3445 = vmatprep.mubr.bf16.mxu0 %v160_v52 }
  0xa4   :  { %3446 = vmatmul.mubr.bf16.gmra.mrb[20].mxu0 %v161_v57 }
  0xa5   :  { %3449 = vmatprep.mubr.bf16.mxu0 %v162_v58 }
  0xac   :  { %3450 = vmatmul.mubr.bf16.gmra.mrb[24].mxu0 %v163_v63 }
  0xad   :  { %3453 = vmatprep.mubr.bf16.mxu0 %v164_v0  ;;  %v3664_v0 = vld [vmem:[#allocation8 + $0x48] ss:$16 sps:$4 sm:$0xff]  }
  0xb4   :  { %3454 = vmatmul.mubr.bf16.gmra.mrb[28].mxu0 %v165_v5 }
  0xb5   :  { %3457 = vmatprep.mubr.bf16.mxu0 %v166_v6 }
  0xbc   :  { %3458 = vmatmul.mubr.bf16.gmra.mrb[32].mxu0 %v167_v11 }
  0xbd   :  { %3461 = vmatprep.mubr.bf16.mxu0 %v168_v12  ;;  %v3667_v12 = vld [vmem:[#allocation8 + $0x68] ss:$16 sps:$4 sm:$0xff]  }
  0xc4   :  { %3462 = vmatmul.mubr.bf16.gmra.mrb[36].mxu0 %v169_v17  ;;  %v3685_v17 = vld [vmem:[#allocation8 + $0x60] ss:$16 sps:$4 sm:$0xff]  }
  0xc5   :  { %3465 = vmatprep.mubr.bf16.mxu0 %v170_v18  ;;  %1408 = vmatpush1.bf16.msra.mxu0 %v3685_v17 }
  0xcc   :  { %3466 = vmatmul.mubr.bf16.gmra.mrb[40].mxu0 %v171_v23 }
  0xcd   :  { %3469 = vmatprep.mubr.bf16.mxu0 %v172_v24 }
  0xd4   :  { %3470 = vmatmul.mubr.bf16.gmra.mrb[44].mxu0 %v173_v28  ;;  %v3690_v28 = vld [vmem:[#allocation8 + $0x84] ss:$16 sps:$4 sm:$0xff]  }
  0xd5   :  { %1409 = vmatprep.subr.bf16.mxu0 %v3690_v28  ;;  %v3712_v28 = vld [vmem:[#allocation8 + $0x120] ss:$16 sps:$4 sm:$0xff]  }
  0xd6   :  { %1410 = vmatpush1.bf16.msra.mxu0 %v3688_v27 }
 0x14f   :  { %v3427_v34 = vpop.f32.mrb[0].mxu0 }
 0x150   :  { %v279_v36 = vpop.f32.mrb[1].mxu0  ;;  %v288_v40 = vadd.f32 %v3427_v34, %v4258_v35  ;;  %v3693_v34 = vld [vmem:[#allocation8 + $0xcc] ss:$16 sps:$4 sm:$0xff]  }
 0x151   :  { %v3428_v37 = vpop.f32.mrb[2].mxu0  ;;  %v280_v43 = vadd.f32 %v4258_v35, %v279_v36 }
 0x152   :  { %v291_v41 = vadd.f32 %v3428_v37, %v4258_v35  ;;  %v282_v42 = vpop.f32.mrb[3].mxu0 }
 0x153   :  { %v283_v44 = vadd.f32 %v4258_v35, %v282_v42 }
 0x154   :  { %v471_v45 = vpack.c.bf16 %v291_v41, %v288_v40 }
 0x155   :  { %v470_v46 = vpack.c.bf16 %v283_v44, %v280_v43 }
 0x156   :  { %v495_v1 = vmax.bf16 %v4130_v32, %v471_v45  ;;  %v3694_v45 = vld [vmem:[#allocation8 + $0xa0] ss:$16 sps:$4 sm:$0xff]  }
 0x157   :  { %v494_v48 = vmax.bf16 %v4130_v32, %v470_v46  ;;  %v3431_v49 = vpop.f32.mrb[4].mxu0  ;;  %v3696_v46 = vld [vmem:[#allocation8 + $0xa4] ss:$16 sps:$4 sm:$0xff]  }
 0x158   :  { %v4266_v51 = vadd.f32 %v3431_v49, %v4258_v35  ;;  %v295_v52 = vpop.f32.mrb[5].mxu0  ;;  %1411 = vmatprep.subr.bf16.mxu0 %v3696_v46  ;;  %v3715_v46 = vld [vmem:[#allocation8 + $0x140] ss:$16 sps:$4 sm:$0xff]  }
 0x159   :  { %659 = vmatmul.mubr.bf16.vlgmr.msra.gmra.mrb[0].mxu1 %v494_v48  ;;  %v296_v53 = vadd.f32 %v4258_v35, %v295_v52  ;;  %v3432_v54 = vpop.f32.mrb[6].mxu0  ;;  %1412 = vmatpush1.bf16.msra.mxu0 %v3694_v45 }
 0x15a   :  { %v4270_v57 = vadd.f32 %v3432_v54, %v4258_v35  ;;  %v298_v58 = vpop.f32.mrb[7].mxu0  ;;  %668 = vmatprep.mubr.bf16.mxu1 %v4130_v32  ;;  %1675 = vmatpush1.bf16.msra.mxu1 %v3658_v47 }
 0x15b   :  { %v299_v60 = vadd.f32 %v4258_v35, %v298_v58  ;;  %1676 = vmatprep.subr.bf16.mxu1 %v3663_v50  ;;  %v3697_v58 = vld [vmem:[#allocation8 + $0xc0] ss:$16 sps:$4 sm:$0xff]  }
 0x15c   :  { %v473_v62 = vpack.c.bf16 %v4270_v57, %v4266_v51 }
 0x15d   :  { %v472_v63 = vpack.c.bf16 %v299_v60, %v296_v53 }
 0x15e   :  { %1677 = vmatpush1.bf16.msra.mxu1 %v3661_v59  ;;  %v497_v39 = vmax.bf16 %v4130_v32, %v473_v62  ;;  %v3699_v59 = vld [vmem:[#allocation8 + $0xc4] ss:$16 sps:$4 sm:$0xff]   ;;  %v3700_v62 = vld [vmem:[#allocation8 + $0xe8] ss:$16 sps:$4 sm:$0xff]  }
 0x15f   :  { %v3435_v2 = vpop.f32.mrb[8].mxu0  ;;  %1678 = vmatprep.subr.bf16.mxu1 %v3666_v61  ;;  %v496_v20 = vmax.bf16 %v4130_v32, %v472_v63  ;;  %v3702_v63 = vld [vmem:[#allocation8 + $0xec] ss:$16 sps:$4 sm:$0xff]   ;;  %1413 = vmatprep.subr.bf16.mxu0 %v3699_v59 }
 0x160   :  { %v4278_v4 = vadd.f32 %v3435_v2, %v4258_v35  ;;  %v311_v5 = vpop.f32.mrb[9].mxu0  ;;  %1414 = vmatpush1.bf16.msra.mxu0 %v3697_v58  ;;  %v3721_v58 = vld [vmem:[#allocation8 + $0x160] ss:$16 sps:$4 sm:$0xff]   ;;  %v3729_v59 = vld [vmem:[#allocation8 + $0x14c] ss:$16 sps:$4 sm:$0xff]  }
 0x161   :  { %669 = vmatmul.mubr.bf16.gmra.mrb[4].mxu1 %v495_v1  ;;  %v4281_v6 = vadd.f32 %v4258_v35, %v311_v5  ;;  %v3436_v7 = vpop.f32.mrb[10].mxu0  ;;  %v3705_v1 = vld [vmem:[#allocation8 + $0xe4] ss:$16 sps:$4 sm:$0xff]  }
 0x162   :  { %678 = vmatprep.mubr.bf16.mxu1 %v4130_v32  ;;  %v4285_v10 = vadd.f32 %v3436_v7, %v4258_v35  ;;  %v314_v11 = vpop.f32.mrb[11].mxu0  ;;  %1679 = vmatpush1.bf16.msra.mxu1 %v3664_v0 }
 0x163   :  { %v315_v13 = vadd.f32 %v4258_v35, %v314_v11  ;;  %1680 = vmatprep.subr.bf16.mxu1 %v3669_v3  ;;  %v3703_v3 = vld [vmem:[#allocation8 + $0xe0] ss:$16 sps:$4 sm:$0xff]   ;;  %1415 = vmatprep.subr.bf16.mxu0 %v3705_v1 }
 0x164   :  { %v475_v16 = vpack.c.bf16 %v4285_v10, %v4278_v4  ;;  %1416 = vmatpush1.bf16.msra.mxu0 %v3703_v3  ;;  %v3709_v10 = vld [vmem:[#allocation8 + $0x108] ss:$16 sps:$4 sm:$0xff]  }
 0x165   :  { %v474_v18 = vpack.c.bf16 %v315_v13, %v4281_v6  ;;  %v3706_v13 = vld [vmem:[#allocation8 + $0x100] ss:$16 sps:$4 sm:$0xff]  }
 0x166   :  { %1681 = vmatpush1.bf16.msra.mxu1 %v3667_v12  ;;  %v499_v6 = vmax.bf16 %v4130_v32, %v475_v16  ;;  %v3711_v16 = vld [vmem:[#allocation8 + $0x10c] ss:$16 sps:$4 sm:$0xff]  }
 0x167   :  { %v3439_v21 = vpop.f32.mrb[12].mxu0  ;;  %1682 = vmatprep.subr.bf16.mxu1 %v3675_v14  ;;  %v498_v52 = vmax.bf16 %v4130_v32, %v474_v18  ;;  %v3708_v14 = vld [vmem:[#allocation8 + $0x104] ss:$16 sps:$4 sm:$0xff]  }
 0x168   :  { %v4293_v23 = vadd.f32 %v3439_v21, %v4258_v35  ;;  %v327_v24 = vpop.f32.mrb[13].mxu0  ;;  %1417 = vmatprep.subr.bf16.mxu0 %v3708_v14 }
 0x169   :  { %679 = vmatmul.mubr.bf16.gmra.mrb[8].mxu1 %v496_v20  ;;  %v4296_v25 = vadd.f32 %v4258_v35, %v327_v24  ;;  %v3440_v26 = vpop.f32.mrb[14].mxu0  ;;  %1418 = vmatpush1.bf16.msra.mxu0 %v3706_v13 }
 0x16a   :  { %688 = vmatprep.mubr.bf16.mxu1 %v4130_v32  ;;  %v4300_v29 = vadd.f32 %v3440_v26, %v4258_v35  ;;  %v330_v30 = vpop.f32.mrb[15].mxu0  ;;  %1683 = vmatpush1.bf16.msra.mxu1 %v3673_v19 }
 0x16b   :  { %v4303_v33 = vadd.f32 %v4258_v35, %v330_v30  ;;  %1684 = vmatprep.subr.bf16.mxu1 %v3684_v22  ;;  %v3714_v30 = vld [vmem:[#allocation8 + $0x124] ss:$16 sps:$4 sm:$0xff]  }
 0x16c   :  { %v477_v36 = vpack.c.bf16 %v4300_v29, %v4293_v23  ;;  %1419 = vmatprep.subr.bf16.mxu0 %v3714_v30  ;;  %v3718_v29 = vld [vmem:[#allocation8 + $0x128] ss:$16 sps:$4 sm:$0xff]  }
 0x16d   :  { %v476_v37 = vpack.c.bf16 %v4303_v33, %v4296_v25  ;;  %1420 = vmatpush1.bf16.msra.mxu0 %v3712_v28  ;;  %v3736_v28 = vld [vmem:[#allocation8 + $0x188] ss:$16 sps:$4 sm:$0xff]  }
 0x16e   :  { %1685 = vmatpush1.bf16.msra.mxu1 %v3682_v31 }
 0x16f   :  { %v3443_v40 = vpop.f32.mrb[16].mxu0  ;;  %1686 = vmatprep.subr.bf16.mxu1 %v3693_v34  ;;  %v500_v20 = vmax.bf16 %v4130_v32, %v476_v37 }
 0x170   :  { %v4311_v41 = vadd.f32 %v3443_v40, %v4258_v35  ;;  %v343_v42 = vpop.f32.mrb[17].mxu0 }
 0x171   :  { %689 = vmatmul.mubr.bf16.gmra.mrb[12].mxu1 %v497_v39  ;;  %v4314_v43 = vadd.f32 %v4258_v35, %v343_v42  ;;  %v3444_v44 = vpop.f32.mrb[18].mxu0 }
 0x172   :  { %698 = vmatprep.mubr.bf16.mxu1 %v4130_v32  ;;  %v4318_v47 = vadd.f32 %v3444_v44, %v4258_v35  ;;  %v346_v48 = vpop.f32.mrb[19].mxu0  ;;  %1687 = vmatpush1.bf16.msra.mxu1 %v3691_v38  ;;  %v501_v38 = vmax.bf16 %v4130_v32, %v477_v36  ;;  %v3720_v36 = vld [vmem:[#allocation8 + $0x12c] ss:$16 sps:$4 sm:$0xff]  }
 0x173   :  { %v4321_v49 = vadd.f32 %v4258_v35, %v346_v48  ;;  %1688 = vmatprep.subr.bf16.mxu1 %v3702_v63  ;;  %v3717_v48 = vld [vmem:[#allocation8 + $0x144] ss:$16 sps:$4 sm:$0xff]   ;;  %v3727_v63 = vld [vmem:[#allocation8 + $0x148] ss:$16 sps:$4 sm:$0xff]  }
 0x174   :  { %v479_v50 = vpack.c.bf16 %v4318_v47, %v4311_v41  ;;  %1421 = vmatprep.subr.bf16.mxu0 %v3717_v48 }
 0x175   :  { %v478_v51 = vpack.c.bf16 %v4321_v49, %v4314_v43  ;;  %1422 = vmatpush1.bf16.msra.mxu0 %v3715_v46 }
 0x176   :  { %1689 = vmatpush1.bf16.msra.mxu1 %v3700_v62  ;;  %v3726_v62 = vld [vmem:[#allocation8 + $0x184] ss:$16 sps:$4 sm:$0xff]   ;;  %v503_v30 = vmax.bf16 %v4130_v32, %v479_v50  ;;  %v3742_v50 = vld [vmem:[#allocation8 + $0x1a8] ss:$16 sps:$4 sm:$0xff]  }
 0x177   :  { %v3447_v53 = vpop.f32.mrb[20].mxu0  ;;  %1690 = vmatprep.subr.bf16.mxu1 %v3711_v16  ;;  %v502_v1 = vmax.bf16 %v4130_v32, %v478_v51  ;;  %v3730_v51 = vld [vmem:[#allocation8 + $0x168] ss:$16 sps:$4 sm:$0xff]   ;;  %v3738_v16 = vld [vmem:[#allocation8 + $0x18c] ss:$16 sps:$4 sm:$0xff]  }
 0x178   :  { %v4329_v54 = vadd.f32 %v3447_v53, %v4258_v35  ;;  %v359_v55 = vpop.f32.mrb[21].mxu0 }
 0x179   :  { %699 = vmatmul.mubr.bf16.gmra.mrb[16].mxu1 %v498_v52  ;;  %v4332_v56 = vadd.f32 %v4258_v35, %v359_v55  ;;  %v3448_v57 = vpop.f32.mrb[22].mxu0  ;;  %v3723_v55 = vld [vmem:[#allocation8 + $0x164] ss:$16 sps:$4 sm:$0xff]  }
 0x17a   :  { %708 = vmatprep.mubr.bf16.mxu1 %v4130_v32  ;;  %v4336_v60 = vadd.f32 %v3448_v57, %v4258_v35  ;;  %v362_v61 = vpop.f32.mrb[23].mxu0  ;;  %1691 = vmatpush1.bf16.msra.mxu1 %v3709_v10 }
 0x17b   :  { %v4339_v0 = vadd.f32 %v4258_v35, %v362_v61  ;;  %1692 = vmatprep.subr.bf16.mxu1 %v3720_v36  ;;  %1423 = vmatprep.subr.bf16.mxu0 %v3723_v55 }
 0x17c   :  { %v481_v2 = vpack.c.bf16 %v4336_v60, %v4329_v54  ;;  %1424 = vmatpush1.bf16.msra.mxu0 %v3721_v58 }
 0x17d   :  { %v480_v5 = vpack.c.bf16 %v4339_v0, %v4332_v56  ;;  %1425 = vmatprep.subr.bf16.mxu0 %v3726_v62  ;;  %v3747_v56 = vld [vmem:[#allocation8 + $0x1cc] ss:$16 sps:$4 sm:$0xff]   ;;  %v3745_v0 = vld [vmem:[#allocation8 + $0x1c8] ss:$16 sps:$4 sm:$0xff]  }
 0x17e   :  { %1693 = vmatpush1.bf16.msra.mxu1 %v3718_v29 }
 0x17f   :  { %v3451_v7 = vpop.f32.mrb[24].mxu0  ;;  %1694 = vmatprep.subr.bf16.mxu1 %v3729_v59  ;;  %v504_v55 = vmax.bf16 %v4130_v32, %v480_v5  ;;  %v505_v5 = vmax.bf16 %v4130_v32, %v481_v2 }
 0x180   :  { %v4350_v8 = vadd.f32 %v3451_v7, %v4258_v35  ;;  %v375_v9 = vpop.f32.mrb[25].mxu0 }
 0x181   :  { %709 = vmatmul.mubr.bf16.gmra.mrb[20].mxu1 %v499_v6  ;;  %v4353_v11 = vadd.f32 %v4258_v35, %v375_v9  ;;  %v3452_v12 = vpop.f32.mrb[26].mxu0  ;;  %v3732_v6 = vld [vmem:[#allocation8 + $0x16c] ss:$16 sps:$4 sm:$0xff]  }
 0x182   :  { %718 = vmatprep.mubr.bf16.mxu1 %v4130_v32  ;;  %v4357_v15 = vadd.f32 %v3452_v12, %v4258_v35  ;;  %v378_v4 = vpop.f32.mrb[27].mxu0  ;;  %v3724_v12 = vld [vmem:[#allocation8 + $0x180] ss:$16 sps:$4 sm:$0xff]   ;;  %1695 = vmatpush1.bf16.msra.mxu1 %v3727_v63 }
 0x183   :  { %v4360_v17 = vadd.f32 %v4258_v35, %v378_v4  ;;  %v3735_v4 = vld [vmem:[#allocation8 + $0x1a4] ss:$16 sps:$4 sm:$0xff]   ;;  %1696 = vmatprep.subr.bf16.mxu1 %v3732_v6  ;;  %1426 = vmatpush1.bf16.msra.mxu0 %v3724_v12 }
 0x184   :  { %v483_v18 = vpack.c.bf16 %v4357_v15, %v4350_v8  ;;  %1427 = vmatprep.subr.bf16.mxu0 %v3735_v4  ;;  %v3750_v4 = vld [vmem:[#allocation8 + $0x1e4] ss:$16 sps:$4 sm:$0xff]  }
 0x185   :  { %v482_v19 = vpack.c.bf16 %v4360_v17, %v4353_v11 }
 0x186   :  { %1697 = vmatpush1.bf16.msra.mxu1 %v3730_v51  ;;  %v3748_v51 = vld [vmem:[#allocation8 + $0x1e0] ss:$16 sps:$4 sm:$0xff]   ;;  %v507_v54 = vmax.bf16 %v4130_v32, %v483_v18 }
 0x187   :  { %v3455_v21 = vpop.f32.mrb[28].mxu0  ;;  %1698 = vmatprep.subr.bf16.mxu1 %v3738_v16  ;;  %v3751_v16 = vld [vmem:[#allocation8 + $0x1e8] ss:$16 sps:$4 sm:$0xff]  }
 0x188   :  { %v4371_v22 = vadd.f32 %v3455_v21, %v4258_v35  ;;  %v391_v24 = vpop.f32.mrb[29].mxu0  ;;  %v3733_v21 = vld [vmem:[#allocation8 + $0x1a0] ss:$16 sps:$4 sm:$0xff]  }
 0x189   :  { %719 = vmatmul.mubr.bf16.gmra.mrb[24].mxu1 %v500_v20  ;;  %v4374_v26 = vadd.f32 %v4258_v35, %v391_v24  ;;  %v3456_v27 = vpop.f32.mrb[30].mxu0  ;;  %1428 = vmatpush1.bf16.msra.mxu0 %v3733_v21 }
 0x18a   :  { %728 = vmatprep.mubr.bf16.mxu1 %v4130_v32  ;;  %v4378_v31 = vadd.f32 %v3456_v27, %v4258_v35  ;;  %v394_v25 = vpop.f32.mrb[31].mxu0  ;;  %v3741_v27 = vld [vmem:[#allocation8 + $0x1c4] ss:$16 sps:$4 sm:$0xff]   ;;  %1699 = vmatpush1.bf16.msra.mxu1 %v3736_v28 }
 0x18b   :  { %v4381_v33 = vadd.f32 %v4258_v35, %v394_v25  ;;  %1429 = vmatprep.subr.bf16.mxu0 %v3741_v27 }
 0x18c   :  { %v485_v34 = vpack.c.bf16 %v4378_v31, %v4371_v22  ;;  %v536_v31 = vlaneseq }
 0x18d   :  { %v484_v37 = vpack.c.bf16 %v4381_v33, %v4374_v26 }
 0x18e   :  { %v509_v2 = vmax.bf16 %v4130_v32, %v485_v34  ;;  %v4510_v33 = vshrl.u32 %v536_v31, 7  ;;  %v3760_v31 = vld [vmem:[#allocation10 + $0x30] sm:$0xff]  }
 0x18f   :  { %v3459_v39 = vpop.f32.mrb[32].mxu0  ;;  %v508_v60 = vmax.bf16 %v4130_v32, %v484_v37  ;;  %v534_v37 = vld [vmem:[%s5262_s4] sm:$0x3] }
 0x190   :  { %v4392_v40 = vadd.f32 %v3459_v39, %v4258_v35  ;;  %v407_v42 = vpop.f32.mrb[33].mxu0  ;;  %v538_v34 = vsub.s32 0, %v4510_v33 }
 0x191   :  { %729 = vmatmul.mubr.bf16.gmra.mrb[28].mxu1 %v501_v38  ;;  %v4395_v44 = vadd.f32 %v4258_v35, %v407_v42  ;;  %v3460_v45 = vpop.f32.mrb[34].mxu0  ;;  %v3744_v38 = vld [vmem:[#allocation8 + $0x1ac] ss:$16 sps:$4 sm:$0xff]  }
 0x192   :  { %738 = vmatprep.mubr.bf16.mxu1 %v4130_v32  ;;  %v4399_v52 = vadd.f32 %v3460_v45, %v4258_v35  ;;  %v410_v23 = vpop.f32.mrb[35].mxu0  ;;  %v3739_v45 = vld [vmem:[#allocation8 + $0x1c0] ss:$16 sps:$4 sm:$0xff]   ;;  %1700 = vmatprep.subr.bf16.mxu1 %v3744_v38 }
 0x193   :  { %v4402_v53 = vadd.f32 %v4258_v35, %v410_v23  ;;  %1430 = vmatpush1.bf16.msra.mxu0 %v3739_v45  ;;  %1701 = vmatpush1.bf16.msra.mxu1 %v3742_v50  ;;  %v3755_v50 = vld [vmem:[#allocation10 + $0x8] sm:$0xff]  }
 0x194   :  { %v487_v57 = vpack.c.bf16 %v4399_v52, %v4392_v40  ;;  %1702 = vmatprep.subr.bf16.mxu1 %v3747_v56  ;;  %1431 = vmatprep.subr.bf16.mxu0 %v3750_v4  ;;  %v542_v40 = vsub.s32 1, %v4510_v33 }
 0x195   :  { %v486_v61 = vpack.c.bf16 %v4402_v53, %v4395_v44  ;;  %v4519_v44 = vrot.slane %v534_v37, %v538_v34 }
 0x196   :  { %v511_v11 = vmax.bf16 %v4130_v32, %v487_v57  ;;  %v4523_v53 = vrot.slane %v534_v37, %v542_v40 }
 0x197   :  { %v3463_v3 = vpop.f32.mrb[36].mxu0  ;;  %1703 = vmatpush1.bf16.msra.mxu1 %v3745_v0  ;;  %1432 = vmatpush1.bf16.msra.mxu0 %v3748_v51  ;;  %v510_v8 = vmax.bf16 %v4130_v32, %v486_v61  ;;  %v3758_v51 = vld [vmem:[#allocation10 + $0x20] sm:$0xff]  }
 0x198   :  { %v4413_v7 = vadd.f32 %v3463_v3, %v4258_v35  ;;  %v423_v9 = vpop.f32.mrb[37].mxu0  ;;  %2402 = vmatprep.subr.bf16.mxu0 %v4130_v32 }
 0x199   :  { %739 = vmatmul.mubr.bf16.gmra.mrb[32].mxu1 %v502_v1  ;;  %v4416_v13 = vadd.f32 %v4258_v35, %v423_v9  ;;  %v3464_v14 = vpop.f32.mrb[38].mxu0 }
 0x19a   :  { %748 = vmatprep.mubr.bf16.mxu1 %v4130_v32  ;;  %v4420_v43 = vadd.f32 %v3464_v14, %v4258_v35  ;;  %v426_v49 = vpop.f32.mrb[39].mxu0 }
 0x19b   :  { %v4423_v10 = vadd.f32 %v4258_v35, %v426_v49  ;;  %v3753_v49 = vld [vmem:[#allocation8 + $0x1ec] ss:$16 sps:$4 sm:$0xff]  }
 0x19c   :  { %v489_v20 = vpack.c.bf16 %v4420_v43, %v4413_v7  ;;  %1704 = vmatprep.subr.bf16.mxu1 %v3753_v49 }
 0x19d   :  { %v488_v24 = vpack.c.bf16 %v4423_v10, %v4416_v13  ;;  %1705 = vmatpush1.bf16.msra.mxu1 %v3751_v16 }
 0x19e   :  { %3473 = vmatprep.subr.bf16.mxu1 %v4130_v32  ;;  %v513_v17 = vmax.bf16 %v4130_v32, %v489_v20 }
 0x19f   :  { %v3467_v25 = vpop.f32.mrb[40].mxu0  ;;  %v512_v15 = vmax.bf16 %v4130_v32, %v488_v24 }
 0x1a0   :  { %v4434_v39 = vadd.f32 %v3467_v25, %v4258_v35  ;;  %v439_v42 = vpop.f32.mrb[41].mxu0 }
 0x1a1   :  { %749 = vmatmul.mubr.bf16.gmra.mrb[36].mxu1 %v503_v30  ;;  %v4437_v46 = vadd.f32 %v4258_v35, %v439_v42  ;;  %v3468_v48 = vpop.f32.mrb[42].mxu0  ;;  %v3754_v30 = vld [vmem:[#allocation10] sm:$0xff]  }
 0x1a2   :  { %758 = vmatprep.mubr.bf16.mxu1 %v4130_v32  ;;  %v4441_v41 = vadd.f32 %v3468_v48, %v4258_v35  ;;  %v442_v47 = vpop.f32.mrb[43].mxu0  ;;  %v4531_v42 = vld [vmem:[#allocation10 + $0x80] sm:$0xff]  }
 0x1a3   :  { %v443_v23 = vadd.f32 %v4258_v35, %v442_v47 }
 0x1a4   :  { %v491_v29 = vpack.c.bf16 %v4441_v41, %v4434_v39 }
 0x1a5   :  { %v490_v36 = vpack.c.bf16 %v443_v23, %v4437_v46 }
 0x1a7   :  { %v3471_v58 = vpop.f32.mrb[44].mxu0  ;;  %v514_v18 = vmax.bf16 %v4130_v32, %v490_v36 }
 0x1a8   :  { %v464_v59 = vadd.f32 %v3471_v58, %v4258_v35  ;;  %v455_v62 = vpop.f32.mrb[45].mxu0  ;;  %v3756_v58 = vld [vmem:[#allocation10 + $0x10] sm:$0xff]  }
 0x1a9   :  { %759 = vmatmul.mubr.bf16.gmra.mrb[40].mxu1 %v504_v55  ;;  %v456_v63 = vadd.f32 %v4258_v35, %v455_v62  ;;  %v3472_v1 = vpop.f32.mrb[46].mxu0 }
 0x1aa   :  { %768 = vmatprep.mubr.bf16.mxu1 %v4130_v32  ;;  %v467_v3 = vadd.f32 %v3472_v1, %v4258_v35  ;;  %v458_v6 = vpop.f32.mrb[47].mxu0 }
 0x1ab   :  { %v459_v9 = vadd.f32 %v4258_v35, %v458_v6  ;;  %v506_v35 = vmax.bf16 %v4130_v32, %v482_v19  ;;  %v515_v19 = vmax.bf16 %v4130_v32, %v491_v29 }
 0x1ac   :  { %v493_v12 = vpack.c.bf16 %v467_v3, %v464_v59 }
 0x1ad   :  { %v492_v14 = vpack.c.bf16 %v459_v9, %v456_v63 }
 0x1ae   :  { %v517_v26 = vmax.bf16 %v4130_v32, %v493_v12 }
 0x1af   :  { %v516_v22 = vmax.bf16 %v4130_v32, %v492_v14  ;;  %v3757_v14 = vld [vmem:[#allocation10 + $0x18] sm:$0xff]  }
 0x1b1   :  { %769 = vmatmul.mubr.bf16.gmra.mrb[44].mxu1 %v505_v5  ;;  %v4548_v5 = vld [vmem:[#allocation10 + $0x88] sm:$0xff]  }
 0x1b2   :  { %778 = vmatprep.mubr.bf16.mxu1 %v4130_v32 }
 0x1b9   :  { %779 = vmatmul.mubr.bf16.gmra.mrb[48].mxu1 %v506_v35 }
 0x1ba   :  { %788 = vmatprep.mubr.bf16.mxu1 %v4130_v32 }
 0x1c1   :  { %789 = vmatmul.mubr.bf16.gmra.mrb[52].mxu1 %v507_v54 }
 0x1c2   :  { %798 = vmatprep.mubr.bf16.mxu1 %v4130_v32 }
 0x1c9   :  { %799 = vmatmul.mubr.bf16.gmra.mrb[56].mxu1 %v508_v60 }
 0x1ca   :  { %808 = vmatprep.mubr.bf16.mxu1 %v4130_v32 }
 0x1d1   :  { %809 = vmatmul.mubr.bf16.gmra.mrb[60].mxu1 %v509_v2 }
 0x1d2   :  { %818 = vmatprep.mubr.bf16.mxu1 %v4130_v32 }
 0x1d9   :  { %819 = vmatmul.mubr.bf16.gmra.mrb[64].mxu1 %v510_v8 }
 0x1da   :  { %828 = vmatprep.mubr.bf16.mxu1 %v4130_v32 }
 0x1e1   :  { %829 = vmatmul.mubr.bf16.gmra.mrb[68].mxu1 %v511_v11 }
 0x1e2   :  { %838 = vmatprep.mubr.bf16.mxu1 %v4130_v32 }
 0x1e9   :  { %839 = vmatmul.mubr.bf16.gmra.mrb[72].mxu1 %v512_v15 }
 0x1ea   :  { %848 = vmatprep.mubr.bf16.mxu1 %v4130_v32 }
 0x1f1   :  { %849 = vmatmul.mubr.bf16.gmra.mrb[76].mxu1 %v513_v17  ;;  %v3759_v17 = vld [vmem:[#allocation10 + $0x28] sm:$0xff]  }
 0x1f2   :  { %858 = vmatprep.mubr.bf16.mxu1 %v4130_v32 }
 0x1f9   :  { %859 = vmatmul.mubr.bf16.gmra.mrb[80].mxu1 %v514_v18 }
 0x1fa   :  { %868 = vmatprep.mubr.bf16.mxu1 %v4130_v32 }
 0x201   :  { %869 = vmatmul.mubr.bf16.gmra.mrb[84].mxu1 %v515_v19 }
 0x202   :  { %878 = vmatprep.mubr.bf16.mxu1 %v4130_v32 }
 0x209   :  { %879 = vmatmul.mubr.bf16.gmra.mrb[88].mxu1 %v516_v22 }
 0x20a   :  { %888 = vmatprep.mubr.bf16.mxu1 %v4130_v32 }
 0x211   :  { %889 = vmatmul.mubr.bf16.gmra.mrb[92].mxu1 %v517_v26 }
 0x22c   :  { %v660_v52 = vpop.f32.mrb[0].mxu1 }
 0x22d   :  { %v662_v57 = vpop.f32.mrb[1].mxu1  ;;  %v661_v7 = vadd.f32 %v660_v52, %v4519_v44 }
 0x22e   :  { %v664_v61 = vpop.f32.mrb[2].mxu1  ;;  %v663_v10 = vadd.f32 %v662_v57, %v4523_v53 }
 0x22f   :  { %v665_v13 = vadd.f32 %v664_v61, %v4519_v44  ;;  %v666_v43 = vpop.f32.mrb[3].mxu1  ;;  %v4563_v61 = vld [vmem:[#allocation10 + $0x90] sm:$0xff]  }
 0x230   :  { %v667_v20 = vadd.f32 %v666_v43, %v4523_v53 }
 0x231   :  { %v899_v21 = vpack.c.bf16 %v665_v13, %v661_v7 }
 0x232   :  { %v900_v24 = vpack.c.bf16 %v667_v20, %v663_v10 }
 0x233   :  { %v947_v25 = vmax.bf16 %v4130_v32, %v899_v21  ;;  %v3761_v21 = vld [vmem:[#allocation10 + $0x38] sm:$0xff]  }
 0x234   :  { %v670_v27 = vpop.f32.mrb[4].mxu1  ;;  %v948_v28 = vmax.bf16 %v4130_v32, %v900_v24 }
 0x235   :  { %v672_v38 = vpop.f32.mrb[5].mxu1  ;;  %v671_v45 = vadd.f32 %v670_v27, %v4519_v44 }
 0x236   :  { %v674_v39 = vpop.f32.mrb[6].mxu1  ;;  %1433 = vmatprep.mubr.bf16.mxu0 %v948_v28  ;;  %1706 = vmatprep.mubr.bf16.mxu1 %v948_v28  ;;  %v673_v41 = vadd.f32 %v672_v38, %v4523_v53 }
 0x237   :  { %v675_v46 = vadd.f32 %v674_v39, %v4519_v44  ;;  %v676_v48 = vpop.f32.mrb[7].mxu1  ;;  %1434 = vmatmul.mubr.bf16.vlgmr.msra.gmra.mrb[48].mxu0 %v947_v25  ;;  %1707 = vmatmul.mubr.bf16.vlgmr.msra.gmra.mrb[96].mxu1 %v947_v25  ;;  %v3762_v25 = vld [vmem:[#allocation10 + $0x40] sm:$0xff]  }
 0x238   :  { %v677_v47 = vadd.f32 %v676_v48, %v4523_v53  ;;  %2403 = vmatpush1.bf16.msra.mxu0 %v3754_v30  ;;  %3489 = vmatpush1.bf16.msra.mxu1 %v4531_v42 }
 0x239   :  { %v901_v23 = vpack.c.bf16 %v675_v46, %v671_v45  ;;  %2404 = vmatprep.subr.bf16.mxu0 %v4130_v32  ;;  %3474 = vmatprep.subr.bf16.mxu1 %v4130_v32 }
 0x23a   :  { %v902_v29 = vpack.c.bf16 %v677_v47, %v673_v41 }
 0x23b   :  { %v949_v62 = vmax.bf16 %v4130_v32, %v901_v23  ;;  %v3764_v23 = vld [vmem:[#allocation10 + $0x48] sm:$0xff]  }
 0x23c   :  { %v680_v36 = vpop.f32.mrb[8].mxu1  ;;  %v950_v55 = vmax.bf16 %v4130_v32, %v902_v29  ;;  %2405 = vmatpush1.bf16.msra.mxu0 %v3755_v50  ;;  %3490 = vmatpush1.bf16.msra.mxu1 %v4548_v5 }
 0x23d   :  { %v682_v59 = vpop.f32.mrb[9].mxu1  ;;  %2406 = vmatprep.subr.bf16.mxu0 %v4130_v32  ;;  %v681_v1 = vadd.f32 %v680_v36, %v4519_v44  ;;  %3475 = vmatprep.subr.bf16.mxu1 %v4130_v32 }
 0x23e   :  { %v684_v63 = vpop.f32.mrb[10].mxu1  ;;  %1443 = vmatprep.mubr.bf16.mxu0 %v950_v55  ;;  %1716 = vmatprep.mubr.bf16.mxu1 %v950_v55  ;;  %v683_v9 = vadd.f32 %v682_v59, %v4523_v53  ;;  %v4580_v55 = vld [vmem:[#allocation10 + $0x98] sm:$0xff]  }
 0x23f   :  { %v685_v3 = vadd.f32 %v684_v63, %v4519_v44  ;;  %v686_v6 = vpop.f32.mrb[11].mxu1  ;;  %1444 = vmatmul.mubr.bf16.gmra.mrb[52].mxu0 %v949_v62  ;;  %1717 = vmatmul.mubr.bf16.gmra.mrb[100].mxu1 %v949_v62  ;;  %v3766_v62 = vld [vmem:[#allocation10 + $0x50] sm:$0xff]  }
 0x240   :  { %v687_v12 = vadd.f32 %v686_v6, %v4523_v53  ;;  %2407 = vmatpush1.bf16.msra.mxu0 %v3756_v58  ;;  %3491 = vmatpush1.bf16.msra.mxu1 %v4563_v61 }
 0x241   :  { %v903_v56 = vpack.c.bf16 %v685_v3, %v681_v1  ;;  %2408 = vmatprep.subr.bf16.mxu0 %v4130_v32  ;;  %3476 = vmatprep.subr.bf16.mxu1 %v4130_v32 }
 0x242   :  { %v904_v0 = vpack.c.bf16 %v687_v12, %v683_v9 }
 0x243   :  { %v951_v35 = vmax.bf16 %v4130_v32, %v903_v56 }
 0x244   :  { %v690_v4 = vpop.f32.mrb[12].mxu1  ;;  %v952_v49 = vmax.bf16 %v4130_v32, %v904_v0  ;;  %2409 = vmatpush1.bf16.msra.mxu0 %v3757_v14  ;;  %3492 = vmatpush1.bf16.msra.mxu1 %v4580_v55  ;;  %v3768_v0 = vld [vmem:[#allocation10 + $0x58] sm:$0xff]  }
 0x245   :  { %v692_v16 = vpop.f32.mrb[13].mxu1  ;;  %2410 = vmatprep.subr.bf16.mxu0 %v4130_v32  ;;  %v691_v60 = vadd.f32 %v690_v4, %v4519_v44  ;;  %3477 = vmatprep.subr.bf16.mxu1 %v4130_v32 }
 0x246   :  { %v694_v54 = vpop.f32.mrb[14].mxu1  ;;  %1453 = vmatprep.mubr.bf16.mxu0 %v952_v49  ;;  %1726 = vmatprep.mubr.bf16.mxu1 %v952_v49  ;;  %v693_v11 = vadd.f32 %v692_v16, %v4523_v53 }
 0x247   :  { %v695_v2 = vadd.f32 %v694_v54, %v4519_v44  ;;  %v696_v8 = vpop.f32.mrb[15].mxu1  ;;  %1454 = vmatmul.mubr.bf16.gmra.mrb[56].mxu0 %v951_v35  ;;  %1727 = vmatmul.mubr.bf16.gmra.mrb[104].mxu1 %v951_v35 }
 0x248   :  { %v697_v15 = vadd.f32 %v696_v8, %v4523_v53  ;;  %2411 = vmatpush1.bf16.msra.mxu0 %v3758_v51  ;;  %v4595_v8 = vld [vmem:[#allocation10 + $0xa0] sm:$0xff]  }
 0x249   :  { %v905_v18 = vpack.c.bf16 %v695_v2, %v691_v60  ;;  %2412 = vmatprep.subr.bf16.mxu0 %v4130_v32  ;;  %v3770_v2 = vld [vmem:[#allocation10 + $0x60] sm:$0xff]   ;;  %3493 = vmatpush1.bf16.msra.mxu1 %v4595_v8 }
 0x24a   :  { %v906_v19 = vpack.c.bf16 %v697_v15, %v693_v11  ;;  %3478 = vmatprep.subr.bf16.mxu1 %v4130_v32 }
 0x24b   :  { %v953_v52 = vmax.bf16 %v4130_v32, %v905_v18 }
 0x24c   :  { %v700_v22 = vpop.f32.mrb[16].mxu1  ;;  %v954_v26 = vmax.bf16 %v4130_v32, %v906_v19  ;;  %2413 = vmatpush1.bf16.msra.mxu0 %v3759_v17 }
 0x24d   :  { %v702_v37 = vpop.f32.mrb[17].mxu1  ;;  %2414 = vmatprep.subr.bf16.mxu0 %v4130_v32  ;;  %v701_v7 = vadd.f32 %v700_v22, %v4519_v44 }
 0x24e   :  { %v704_v57 = vpop.f32.mrb[18].mxu1  ;;  %1463 = vmatprep.mubr.bf16.mxu0 %v954_v26  ;;  %1736 = vmatprep.mubr.bf16.mxu1 %v954_v26  ;;  %v703_v10 = vadd.f32 %v702_v37, %v4523_v53 }
 0x24f   :  { %v705_v13 = vadd.f32 %v704_v57, %v4519_v44  ;;  %v706_v43 = vpop.f32.mrb[19].mxu1  ;;  %1464 = vmatmul.mubr.bf16.gmra.mrb[60].mxu0 %v953_v52  ;;  %1737 = vmatmul.mubr.bf16.gmra.mrb[108].mxu1 %v953_v52 }
 0x250   :  { %v707_v20 = vadd.f32 %v706_v43, %v4523_v53  ;;  %2415 = vmatpush1.bf16.msra.mxu0 %v3760_v31 }
 0x251   :  { %v907_v24 = vpack.c.bf16 %v705_v13, %v701_v7  ;;  %2416 = vmatprep.subr.bf16.mxu0 %v4130_v32 }
 0x252   :  { %v908_v27 = vpack.c.bf16 %v707_v20, %v703_v10  ;;  %v3772_v20 = vld [vmem:[#allocation10 + $0x68] sm:$0xff]  }
 0x253   :  { %v955_v39 = vmax.bf16 %v4130_v32, %v907_v24 }
 0x254   :  { %v710_v28 = vpop.f32.mrb[20].mxu1  ;;  %v956_v30 = vmax.bf16 %v4130_v32, %v908_v27  ;;  %2417 = vmatpush1.bf16.msra.mxu0 %v3761_v21  ;;  %v4608_v21 = vld [vmem:[#allocation10 + $0xa8] sm:$0xff]  }
 0x255   :  { %v712_v38 = vpop.f32.mrb[21].mxu1  ;;  %2418 = vmatprep.subr.bf16.mxu0 %v4130_v32  ;;  %v711_v46 = vadd.f32 %v710_v28, %v4519_v44  ;;  %3494 = vmatpush1.bf16.msra.mxu1 %v4608_v21 }
 0x256   :  { %v714_v45 = vpop.f32.mrb[22].mxu1  ;;  %1473 = vmatprep.mubr.bf16.mxu0 %v956_v30  ;;  %1746 = vmatprep.mubr.bf16.mxu1 %v956_v30  ;;  %v713_v47 = vadd.f32 %v712_v38, %v4523_v53  ;;  %v3774_v30 = vld [vmem:[#allocation10 + $0x70] sm:$0xff]  }
 0x257   :  { %v715_v48 = vadd.f32 %v714_v45, %v4519_v44  ;;  %v716_v41 = vpop.f32.mrb[23].mxu1  ;;  %1474 = vmatmul.mubr.bf16.gmra.mrb[64].mxu0 %v955_v39  ;;  %1747 = vmatmul.mubr.bf16.gmra.mrb[112].mxu1 %v955_v39 }
 0x258   :  { %v717_v50 = vadd.f32 %v716_v41, %v4523_v53  ;;  %2419 = vmatpush1.bf16.msra.mxu0 %v3762_v25  ;;  %v4613_v25 = vld [vmem:[#allocation10 + $0xb0] sm:$0xff]   ;;  %3479 = vmatprep.subr.bf16.mxu1 %v4130_v32  ;;  %v3776_v41 = vld [vmem:[#allocation10 + $0x78] sm:$0xff]  }
 0x259   :  { %v909_v29 = vpack.c.bf16 %v715_v48, %v711_v46  ;;  %2420 = vmatprep.subr.bf16.mxu0 %v4130_v32  ;;  %3495 = vmatpush1.bf16.msra.mxu1 %v4613_v25 }
 0x25a   :  { %v910_v36 = vpack.c.bf16 %v717_v50, %v713_v47  ;;  %v4620_v47 = vld [vmem:[#allocation10 + $0xb8] sm:$0xff]   ;;  %3480 = vmatprep.subr.bf16.mxu1 %v4130_v32 }
 0x25b   :  { %v957_v1 = vmax.bf16 %v4130_v32, %v909_v29 }
 0x25c   :  { %v720_v58 = vpop.f32.mrb[24].mxu1  ;;  %v958_v59 = vmax.bf16 %v4130_v32, %v910_v36  ;;  %2421 = vmatpush1.bf16.msra.mxu0 %v3764_v23 }
 0x25d   :  { %v722_v63 = vpop.f32.mrb[25].mxu1  ;;  %2422 = vmatprep.subr.bf16.mxu0 %v4130_v32  ;;  %v721_v6 = vadd.f32 %v720_v58, %v4519_v44  ;;  %3496 = vmatpush1.bf16.msra.mxu1 %v4620_v47 }
 0x25e   :  { %v724_v3 = vpop.f32.mrb[26].mxu1  ;;  %1483 = vmatprep.mubr.bf16.mxu0 %v958_v59  ;;  %1756 = vmatprep.mubr.bf16.mxu1 %v958_v59  ;;  %v723_v14 = vadd.f32 %v722_v63, %v4523_v53 }
 0x25f   :  { %v725_v9 = vadd.f32 %v724_v3, %v4519_v44  ;;  %v726_v12 = vpop.f32.mrb[27].mxu1  ;;  %1484 = vmatmul.mubr.bf16.gmra.mrb[68].mxu0 %v957_v1  ;;  %1757 = vmatmul.mubr.bf16.gmra.mrb[116].mxu1 %v957_v1 }
 0x260   :  { %v727_v56 = vadd.f32 %v726_v12, %v4523_v53  ;;  %2423 = vmatpush1.bf16.msra.mxu0 %v3766_v62  ;;  %3481 = vmatprep.subr.bf16.mxu1 %v4130_v32 }
 0x261   :  { %v911_v4 = vpack.c.bf16 %v725_v9, %v721_v6  ;;  %2424 = vmatprep.subr.bf16.mxu0 %v4130_v32 }
 0x262   :  { %v912_v49 = vpack.c.bf16 %v727_v56, %v723_v14 }
 0x263   :  { %v959_v54 = vmax.bf16 %v4130_v32, %v911_v4 }
 0x264   :  { %v730_v51 = vpop.f32.mrb[28].mxu1  ;;  %v960_v16 = vmax.bf16 %v4130_v32, %v912_v49  ;;  %2425 = vmatpush1.bf16.msra.mxu0 %v3768_v0 }
 0x265   :  { %v732_v35 = vpop.f32.mrb[29].mxu1  ;;  %2426 = vmatprep.subr.bf16.mxu0 %v4130_v32  ;;  %v731_v11 = vadd.f32 %v730_v51, %v4519_v44 }
 0x266   :  { %v734_v60 = vpop.f32.mrb[30].mxu1  ;;  %1493 = vmatprep.mubr.bf16.mxu0 %v960_v16  ;;  %1766 = vmatprep.mubr.bf16.mxu1 %v960_v16  ;;  %v733_v18 = vadd.f32 %v732_v35, %v4523_v53 }
 0x267   :  { %v735_v15 = vadd.f32 %v734_v60, %v4519_v44  ;;  %v736_v17 = vpop.f32.mrb[31].mxu1  ;;  %1494 = vmatmul.mubr.bf16.gmra.mrb[72].mxu0 %v959_v54  ;;  %1767 = vmatmul.mubr.bf16.gmra.mrb[120].mxu1 %v959_v54 }
 0x268   :  { %v737_v19 = vadd.f32 %v736_v17, %v4523_v53  ;;  %2427 = vmatpush1.bf16.msra.mxu0 %v3770_v2 }
 0x269   :  { %v913_v22 = vpack.c.bf16 %v735_v15, %v731_v11  ;;  %2428 = vmatprep.subr.bf16.mxu0 %v4130_v32 }
 0x26a   :  { %v914_v26 = vpack.c.bf16 %v737_v19, %v733_v18 }
 0x26b   :  { %v961_v57 = vmax.bf16 %v4130_v32, %v913_v22 }
 0x26c   :  { %v740_v31 = vpop.f32.mrb[32].mxu1  ;;  %v962_v37 = vmax.bf16 %v4130_v32, %v914_v26  ;;  %2429 = vmatpush1.bf16.msra.mxu0 %v3772_v20 }
 0x26d   :  { %v742_v52 = vpop.f32.mrb[33].mxu1  ;;  %v741_v13 = vadd.f32 %v740_v31, %v4519_v44  ;;  %2430 = vmatprep.subr.bf16.mxu0 %v4130_v32 }
 0x26e   :  { %v744_v7 = vpop.f32.mrb[34].mxu1  ;;  %1503 = vmatprep.mubr.bf16.mxu0 %v962_v37  ;;  %1776 = vmatprep.mubr.bf16.mxu1 %v962_v37  ;;  %v743_v24 = vadd.f32 %v742_v52, %v4523_v53 }
 0x26f   :  { %v745_v43 = vadd.f32 %v744_v7, %v4519_v44  ;;  %v746_v10 = vpop.f32.mrb[35].mxu1  ;;  %1504 = vmatmul.mubr.bf16.gmra.mrb[76].mxu0 %v961_v57  ;;  %1777 = vmatmul.mubr.bf16.gmra.mrb[124].mxu1 %v961_v57 }
 0x270   :  { %v747_v27 = vadd.f32 %v746_v10, %v4523_v53  ;;  %2431 = vmatpush1.bf16.msra.mxu0 %v3774_v30 }
 0x271   :  { %v915_v28 = vpack.c.bf16 %v745_v43, %v741_v13  ;;  %2432 = vmatprep.subr.bf16.mxu0 %v4130_v32 }
 0x272   :  { %v916_v38 = vpack.c.bf16 %v747_v27, %v743_v24 }
 0x273   :  { %v963_v48 = vmax.bf16 %v4130_v32, %v915_v28 }
 0x274   :  { %v750_v39 = vpop.f32.mrb[36].mxu1  ;;  %v964_v45 = vmax.bf16 %v4130_v32, %v916_v38  ;;  %2433 = vmatpush1.bf16.msra.mxu0 %v3776_v41 }
 0x275   :  { %v752_v46 = vpop.f32.mrb[37].mxu1  ;;  %v751_v23 = vadd.f32 %v750_v39, %v4519_v44  ;;  %2627 = vmatprep.subr.bf16.mxu0 %v4130_v32 }
 0x276   :  { %v754_v50 = vpop.f32.mrb[38].mxu1  ;;  %1513 = vmatprep.mubr.bf16.mxu0 %v964_v45  ;;  %1786 = vmatprep.mubr.bf16.mxu1 %v964_v45  ;;  %v753_v58 = vadd.f32 %v752_v46, %v4523_v53 }
 0x277   :  { %v755_v29 = vadd.f32 %v754_v50, %v4519_v44  ;;  %v756_v36 = vpop.f32.mrb[39].mxu1  ;;  %1514 = vmatmul.mubr.bf16.gmra.mrb[80].mxu0 %v963_v48  ;;  %1787 = vmatmul.mubr.bf16.gmra.mrb[128].mxu1 %v963_v48 }
 0x278   :  { %v757_v59 = vadd.f32 %v756_v36, %v4523_v53 }
 0x279   :  { %v917_v62 = vpack.c.bf16 %v755_v29, %v751_v23 }
 0x27a   :  { %v918_v63 = vpack.c.bf16 %v757_v59, %v753_v58  ;;  %v4655_v58 = vld [vmem:[#allocation10 + $0xc0] sm:$0xff]  }
 0x27b   :  { %v965_v9 = vmax.bf16 %v4130_v32, %v917_v62  ;;  %3497 = vmatpush1.bf16.msra.mxu1 %v4655_v58 }
 0x27c   :  { %v760_v1 = vpop.f32.mrb[40].mxu1  ;;  %v966_v3 = vmax.bf16 %v4130_v32, %v918_v63  ;;  %3482 = vmatprep.subr.bf16.mxu1 %v4130_v32 }
 0x27d   :  { %v762_v6 = vpop.f32.mrb[41].mxu1  ;;  %v761_v14 = vadd.f32 %v760_v1, %v4519_v44 }
 0x27e   :  { %v764_v12 = vpop.f32.mrb[42].mxu1  ;;  %1523 = vmatprep.mubr.bf16.mxu0 %v966_v3  ;;  %1796 = vmatprep.mubr.bf16.mxu1 %v966_v3  ;;  %v763_v4 = vadd.f32 %v762_v6, %v4523_v53 }
 0x27f   :  { %v765_v56 = vadd.f32 %v764_v12, %v4519_v44  ;;  %v766_v0 = vpop.f32.mrb[43].mxu1  ;;  %1524 = vmatmul.mubr.bf16.gmra.mrb[84].mxu0 %v965_v9  ;;  %1797 = vmatmul.mubr.bf16.gmra.mrb[132].mxu1 %v965_v9 }
 0x280   :  { %v767_v49 = vadd.f32 %v766_v0, %v4523_v53 }
 0x281   :  { %v919_v51 = vpack.c.bf16 %v765_v56, %v761_v14 }
 0x282   :  { %v920_v16 = vpack.c.bf16 %v767_v49, %v763_v4  ;;  %v4665_v49 = vld [vmem:[#allocation10 + $0xc8] sm:$0xff]  }
 0x283   :  { %v967_v2 = vmax.bf16 %v4130_v32, %v919_v51  ;;  %3498 = vmatpush1.bf16.msra.mxu1 %v4665_v49 }
 0x284   :  { %v770_v35 = vpop.f32.mrb[44].mxu1  ;;  %v968_v54 = vmax.bf16 %v4130_v32, %v920_v16  ;;  %3483 = vmatprep.subr.bf16.mxu1 %v4130_v32 }
 0x285   :  { %v772_v60 = vpop.f32.mrb[45].mxu1  ;;  %v771_v15 = vadd.f32 %v770_v35, %v4519_v44 }
 0x286   :  { %v774_v11 = vpop.f32.mrb[46].mxu1  ;;  %1533 = vmatprep.mubr.bf16.mxu0 %v968_v54  ;;  %1806 = vmatprep.mubr.bf16.mxu1 %v968_v54  ;;  %v773_v19 = vadd.f32 %v772_v60, %v4523_v53 }
 0x287   :  { %v775_v17 = vadd.f32 %v774_v11, %v4519_v44  ;;  %v776_v18 = vpop.f32.mrb[47].mxu1  ;;  %1534 = vmatmul.mubr.bf16.gmra.mrb[88].mxu0 %v967_v2  ;;  %1807 = vmatmul.mubr.bf16.gmra.mrb[136].mxu1 %v967_v2 }
 0x288   :  { %v777_v22 = vadd.f32 %v776_v18, %v4523_v53 }
 0x289   :  { %v921_v26 = vpack.c.bf16 %v775_v17, %v771_v15 }
 0x28a   :  { %v922_v31 = vpack.c.bf16 %v777_v22, %v773_v19 }
 0x28b   :  { %v969_v7 = vmax.bf16 %v4130_v32, %v921_v26 }
 0x28c   :  { %v780_v37 = vpop.f32.mrb[48].mxu1  ;;  %v970_v52 = vmax.bf16 %v4130_v32, %v922_v31 }
 0x28d   :  { %v782_v57 = vpop.f32.mrb[49].mxu1  ;;  %v781_v43 = vadd.f32 %v780_v37, %v4519_v44 }
 0x28e   :  { %v784_v13 = vpop.f32.mrb[50].mxu1  ;;  %1543 = vmatprep.mubr.bf16.mxu0 %v970_v52  ;;  %1816 = vmatprep.mubr.bf16.mxu1 %v970_v52  ;;  %v783_v24 = vadd.f32 %v782_v57, %v4523_v53  ;;  %v4676_v57 = vld [vmem:[#allocation10 + $0xd0] sm:$0xff]  }
 0x28f   :  { %v785_v10 = vadd.f32 %v784_v13, %v4519_v44  ;;  %v786_v20 = vpop.f32.mrb[51].mxu1  ;;  %1544 = vmatmul.mubr.bf16.gmra.mrb[92].mxu0 %v969_v7  ;;  %1817 = vmatmul.mubr.bf16.gmra.mrb[140].mxu1 %v969_v7 }
 0x290   :  { %v787_v27 = vadd.f32 %v786_v20, %v4523_v53  ;;  %3499 = vmatpush1.bf16.msra.mxu1 %v4676_v57 }
 0x291   :  { %v923_v28 = vpack.c.bf16 %v785_v10, %v781_v43  ;;  %3484 = vmatprep.subr.bf16.mxu1 %v4130_v32 }
 0x292   :  { %v924_v30 = vpack.c.bf16 %v787_v27, %v783_v24 }
 0x293   :  { %v971_v46 = vmax.bf16 %v4130_v32, %v923_v28 }
 0x294   :  { %v790_v38 = vpop.f32.mrb[52].mxu1  ;;  %v972_v39 = vmax.bf16 %v4130_v32, %v924_v30  ;;  %v4684_v30 = vld [vmem:[#allocation10 + $0xd8] sm:$0xff]  }
 0x295   :  { %v792_v45 = vpop.f32.mrb[53].mxu1  ;;  %v791_v41 = vadd.f32 %v790_v38, %v4519_v44  ;;  %3500 = vmatpush1.bf16.msra.mxu1 %v4684_v30 }
 0x296   :  { %v794_v48 = vpop.f32.mrb[54].mxu1  ;;  %1553 = vmatprep.mubr.bf16.mxu0 %v972_v39  ;;  %1826 = vmatprep.mubr.bf16.mxu1 %v972_v39  ;;  %v793_v29 = vadd.f32 %v792_v45, %v4523_v53 }
 0x297   :  { %v795_v50 = vadd.f32 %v794_v48, %v4519_v44  ;;  %v796_v23 = vpop.f32.mrb[55].mxu1  ;;  %1554 = vmatmul.mubr.bf16.gmra.mrb[96].mxu0 %v971_v46  ;;  %1827 = vmatmul.mubr.bf16.gmra.mrb[144].mxu1 %v971_v46  ;;  %v4689_v48 = vld [vmem:[#allocation10 + $0xe0] sm:$0xff]  }
 0x298   :  { %v797_v36 = vadd.f32 %v796_v23, %v4523_v53  ;;  %3485 = vmatprep.subr.bf16.mxu1 %v4130_v32 }
 0x299   :  { %v925_v59 = vpack.c.bf16 %v795_v50, %v791_v41  ;;  %3501 = vmatpush1.bf16.msra.mxu1 %v4689_v48 }
 0x29a   :  { %v926_v62 = vpack.c.bf16 %v797_v36, %v793_v29  ;;  %3486 = vmatprep.subr.bf16.mxu1 %v4130_v32 }
 0x29b   :  { %v973_v6 = vmax.bf16 %v4130_v32, %v925_v59 }
 0x29c   :  { %v800_v63 = vpop.f32.mrb[56].mxu1  ;;  %v974_v1 = vmax.bf16 %v4130_v32, %v926_v62 }
 0x29d   :  { %v802_v3 = vpop.f32.mrb[57].mxu1  ;;  %v801_v12 = vadd.f32 %v800_v63, %v4519_v44 }
 0x29e   :  { %v804_v9 = vpop.f32.mrb[58].mxu1  ;;  %1563 = vmatprep.mubr.bf16.mxu0 %v974_v1  ;;  %1836 = vmatprep.mubr.bf16.mxu1 %v974_v1  ;;  %v803_v0 = vadd.f32 %v802_v3, %v4523_v53  ;;  %v4698_v1 = vld [vmem:[#allocation10 + $0xe8] sm:$0xff]  }
 0x29f   :  { %v805_v14 = vadd.f32 %v804_v9, %v4519_v44  ;;  %v806_v56 = vpop.f32.mrb[59].mxu1  ;;  %1564 = vmatmul.mubr.bf16.gmra.mrb[100].mxu0 %v973_v6  ;;  %1837 = vmatmul.mubr.bf16.gmra.mrb[148].mxu1 %v973_v6 }
 0x2a0   :  { %v807_v4 = vadd.f32 %v806_v56, %v4523_v53  ;;  %3502 = vmatpush1.bf16.msra.mxu1 %v4698_v1 }
 0x2a1   :  { %v927_v51 = vpack.c.bf16 %v805_v14, %v801_v12  ;;  %v4703_v14 = vld [vmem:[#allocation10 + $0xf0] sm:$0xff]   ;;  %3487 = vmatprep.subr.bf16.mxu1 %v4130_v32 }
 0x2a2   :  { %v928_v16 = vpack.c.bf16 %v807_v4, %v803_v0 }
 0x2a3   :  { %v975_v2 = vmax.bf16 %v4130_v32, %v927_v51 }
 0x2a4   :  { %v810_v35 = vpop.f32.mrb[60].mxu1  ;;  %v976_v54 = vmax.bf16 %v4130_v32, %v928_v16  ;;  %3503 = vmatpush1.bf16.msra.mxu1 %v4703_v14 }
 0x2a5   :  { %v812_v60 = vpop.f32.mrb[61].mxu1  ;;  %v811_v15 = vadd.f32 %v810_v35, %v4519_v44  ;;  %3488 = vmatprep.subr.bf16.mxu1 %v4130_v32 }
 0x2a6   :  { %v814_v11 = vpop.f32.mrb[62].mxu1  ;;  %1573 = vmatprep.mubr.bf16.mxu0 %v976_v54  ;;  %1846 = vmatprep.mubr.bf16.mxu1 %v976_v54  ;;  %v813_v19 = vadd.f32 %v812_v60, %v4523_v53 }
 0x2a7   :  { %v815_v17 = vadd.f32 %v814_v11, %v4519_v44  ;;  %v816_v18 = vpop.f32.mrb[63].mxu1  ;;  %1574 = vmatmul.mubr.bf16.gmra.mrb[104].mxu0 %v975_v2  ;;  %1847 = vmatmul.mubr.bf16.gmra.mrb[152].mxu1 %v975_v2  ;;  %v4712_v2 = vld [vmem:[#allocation10 + $0xf8] sm:$0xff]  }
 0x2a8   :  { %v817_v22 = vadd.f32 %v816_v18, %v4523_v53  ;;  %3504 = vmatpush1.bf16.msra.mxu1 %v4712_v2 }
 0x2a9   :  { %v929_v26 = vpack.c.bf16 %v815_v17, %v811_v15 }
 0x2aa   :  { %v930_v31 = vpack.c.bf16 %v817_v22, %v813_v19 }
 0x2ab   :  { %v977_v13 = vmax.bf16 %v4130_v32, %v929_v26 }
 0x2ac   :  { %v820_v37 = vpop.f32.mrb[64].mxu1  ;;  %v978_v52 = vmax.bf16 %v4130_v32, %v930_v31 }
 0x2ad   :  { %v822_v7 = vpop.f32.mrb[65].mxu1  ;;  %v821_v10 = vadd.f32 %v820_v37, %v4519_v44 }
 0x2ae   :  { %v824_v43 = vpop.f32.mrb[66].mxu1  ;;  %1583 = vmatprep.mubr.bf16.mxu0 %v978_v52  ;;  %1856 = vmatprep.mubr.bf16.mxu1 %v978_v52  ;;  %v823_v27 = vadd.f32 %v822_v7, %v4523_v53 }
 0x2af   :  { %v825_v20 = vadd.f32 %v824_v43, %v4519_v44  ;;  %v826_v24 = vpop.f32.mrb[67].mxu1  ;;  %1584 = vmatmul.mubr.bf16.gmra.mrb[108].mxu0 %v977_v13  ;;  %1857 = vmatmul.mubr.bf16.gmra.mrb[156].mxu1 %v977_v13 }
 0x2b0   :  { %v827_v28 = vadd.f32 %v826_v24, %v4523_v53 }
 0x2b1   :  { %v931_v38 = vpack.c.bf16 %v825_v20, %v821_v10 }
 0x2b2   :  { %v932_v39 = vpack.c.bf16 %v827_v28, %v823_v27 }
 0x2b3   :  { %v979_v50 = vmax.bf16 %v4130_v32, %v931_v38 }
 0x2b4   :  { %v830_v45 = vpop.f32.mrb[68].mxu1  ;;  %v980_v46 = vmax.bf16 %v4130_v32, %v932_v39 }
 0x2b5   :  { %v832_v41 = vpop.f32.mrb[69].mxu1  ;;  %v831_v29 = vadd.f32 %v830_v45, %v4519_v44 }
 0x2b6   :  { %v834_v23 = vpop.f32.mrb[70].mxu1  ;;  %1593 = vmatprep.mubr.bf16.mxu0 %v980_v46  ;;  %1866 = vmatprep.mubr.bf16.mxu1 %v980_v46  ;;  %v833_v62 = vadd.f32 %v832_v41, %v4523_v53 }
 0x2b7   :  { %v835_v36 = vadd.f32 %v834_v23, %v4519_v44  ;;  %v836_v59 = vpop.f32.mrb[71].mxu1  ;;  %1594 = vmatmul.mubr.bf16.gmra.mrb[112].mxu0 %v979_v50  ;;  %1867 = vmatmul.mubr.bf16.gmra.mrb[160].mxu1 %v979_v50 }
 0x2b8   :  { %v837_v63 = vadd.f32 %v836_v59, %v4523_v53 }
 0x2b9   :  { %v933_v3 = vpack.c.bf16 %v835_v36, %v831_v29 }
 0x2ba   :  { %v934_v6 = vpack.c.bf16 %v837_v63, %v833_v62 }
 0x2bb   :  { %v981_v0 = vmax.bf16 %v4130_v32, %v933_v3 }
 0x2bc   :  { %v840_v9 = vpop.f32.mrb[72].mxu1  ;;  %v982_v12 = vmax.bf16 %v4130_v32, %v934_v6 }
 0x2bd   :  { %v842_v56 = vpop.f32.mrb[73].mxu1  ;;  %v841_v51 = vadd.f32 %v840_v9, %v4519_v44 }
 0x2be   :  { %v844_v4 = vpop.f32.mrb[74].mxu1  ;;  %1603 = vmatprep.mubr.bf16.mxu0 %v982_v12  ;;  %1876 = vmatprep.mubr.bf16.mxu1 %v982_v12  ;;  %v843_v54 = vadd.f32 %v842_v56, %v4523_v53 }
 0x2bf   :  { %v845_v16 = vadd.f32 %v844_v4, %v4519_v44  ;;  %v846_v35 = vpop.f32.mrb[75].mxu1  ;;  %1604 = vmatmul.mubr.bf16.gmra.mrb[116].mxu0 %v981_v0  ;;  %1877 = vmatmul.mubr.bf16.gmra.mrb[164].mxu1 %v981_v0 }
 0x2c0   :  { %v847_v60 = vadd.f32 %v846_v35, %v4523_v53 }
 0x2c1   :  { %v935_v11 = vpack.c.bf16 %v845_v16, %v841_v51 }
 0x2c2   :  { %v936_v15 = vpack.c.bf16 %v847_v60, %v843_v54 }
 0x2c3   :  { %v983_v22 = vmax.bf16 %v4130_v32, %v935_v11 }
 0x2c4   :  { %v850_v17 = vpop.f32.mrb[76].mxu1  ;;  %v984_v18 = vmax.bf16 %v4130_v32, %v936_v15 }
 0x2c5   :  { %v852_v19 = vpop.f32.mrb[77].mxu1  ;;  %v851_v31 = vadd.f32 %v850_v17, %v4519_v44 }
 0x2c6   :  { %v854_v26 = vpop.f32.mrb[78].mxu1  ;;  %1613 = vmatprep.mubr.bf16.mxu0 %v984_v18  ;;  %1886 = vmatprep.mubr.bf16.mxu1 %v984_v18  ;;  %v853_v7 = vadd.f32 %v852_v19, %v4523_v53 }
 0x2c7   :  { %v855_v37 = vadd.f32 %v854_v26, %v4519_v44  ;;  %v856_v52 = vpop.f32.mrb[79].mxu1  ;;  %1614 = vmatmul.mubr.bf16.gmra.mrb[120].mxu0 %v983_v22  ;;  %1887 = vmatmul.mubr.bf16.gmra.mrb[168].mxu1 %v983_v22 }
 0x2c8   :  { %v857_v13 = vadd.f32 %v856_v52, %v4523_v53 }
 0x2c9   :  { %v937_v43 = vpack.c.bf16 %v855_v37, %v851_v31 }
 0x2ca   :  { %v938_v10 = vpack.c.bf16 %v857_v13, %v853_v7 }
 0x2cb   :  { %v985_v28 = vmax.bf16 %v4130_v32, %v937_v43 }
 0x2cc   :  { %v860_v20 = vpop.f32.mrb[80].mxu1  ;;  %v986_v24 = vmax.bf16 %v4130_v32, %v938_v10 }
 0x2cd   :  { %v862_v27 = vpop.f32.mrb[81].mxu1  ;;  %v861_v39 = vadd.f32 %v860_v20, %v4519_v44 }
 0x2ce   :  { %v864_v38 = vpop.f32.mrb[82].mxu1  ;;  %1623 = vmatprep.mubr.bf16.mxu0 %v986_v24  ;;  %1896 = vmatprep.mubr.bf16.mxu1 %v986_v24  ;;  %v863_v41 = vadd.f32 %v862_v27, %v4523_v53 }
 0x2cf   :  { %v865_v45 = vadd.f32 %v864_v38, %v4519_v44  ;;  %v866_v46 = vpop.f32.mrb[83].mxu1  ;;  %1624 = vmatmul.mubr.bf16.gmra.mrb[124].mxu0 %v985_v28  ;;  %1897 = vmatmul.mubr.bf16.gmra.mrb[172].mxu1 %v985_v28 }
 0x2d0   :  { %v867_v50 = vadd.f32 %v866_v46, %v4523_v53 }
 0x2d1   :  { %v939_v23 = vpack.c.bf16 %v865_v45, %v861_v39 }
 0x2d2   :  { %v940_v29 = vpack.c.bf16 %v867_v50, %v863_v41  ;;  %v1071_v41 = vsub.s32 2, %v4510_v33  ;;  %v1075_v50 = vsub.s32 3, %v4510_v33 }
 0x2d3   :  { %v987_v63 = vmax.bf16 %v4130_v32, %v939_v23 }
 0x2d4   :  { %v870_v36 = vpop.f32.mrb[84].mxu1  ;;  %v988_v59 = vmax.bf16 %v4130_v32, %v940_v29 }
 0x2d5   :  { %v872_v62 = vpop.f32.mrb[85].mxu1  ;;  %v871_v6 = vadd.f32 %v870_v36, %v4519_v44 }
 0x2d6   :  { %v874_v3 = vpop.f32.mrb[86].mxu1  ;;  %1633 = vmatprep.mubr.bf16.mxu0 %v988_v59  ;;  %1906 = vmatprep.mubr.bf16.mxu1 %v988_v59  ;;  %v873_v56 = vadd.f32 %v872_v62, %v4523_v53 }
 0x2d7   :  { %v875_v9 = vadd.f32 %v874_v3, %v4519_v44  ;;  %v876_v12 = vpop.f32.mrb[87].mxu1  ;;  %1634 = vmatmul.mubr.bf16.gmra.mrb[128].mxu0 %v987_v63  ;;  %1907 = vmatmul.mubr.bf16.gmra.mrb[176].mxu1 %v987_v63 }
 0x2d8   :  { %v877_v0 = vadd.f32 %v876_v12, %v4523_v53 }
 0x2d9   :  { %v941_v4 = vpack.c.bf16 %v875_v9, %v871_v6 }
 0x2da   :  { %v942_v51 = vpack.c.bf16 %v877_v0, %v873_v56 }
 0x2db   :  { %v989_v60 = vmax.bf16 %v4130_v32, %v941_v4 }
 0x2dc   :  { %v880_v16 = vpop.f32.mrb[88].mxu1  ;;  %v990_v35 = vmax.bf16 %v4130_v32, %v942_v51 }
 0x2dd   :  { %v882_v54 = vpop.f32.mrb[89].mxu1  ;;  %v881_v15 = vadd.f32 %v880_v16, %v4519_v44 }
 0x2de   :  { %v884_v11 = vpop.f32.mrb[90].mxu1  ;;  %1643 = vmatprep.mubr.bf16.mxu0 %v990_v35  ;;  %1916 = vmatprep.mubr.bf16.mxu1 %v990_v35  ;;  %v883_v19 = vadd.f32 %v882_v54, %v4523_v53 }
 0x2df   :  { %v885_v17 = vadd.f32 %v884_v11, %v4519_v44  ;;  %v886_v18 = vpop.f32.mrb[91].mxu1  ;;  %1644 = vmatmul.mubr.bf16.gmra.mrb[132].mxu0 %v989_v60  ;;  %1917 = vmatmul.mubr.bf16.gmra.mrb[180].mxu1 %v989_v60 }
 0x2e0   :  { %v887_v22 = vadd.f32 %v886_v18, %v4523_v53 }
 0x2e1   :  { %v943_v26 = vpack.c.bf16 %v885_v17, %v881_v15 }
 0x2e2   :  { %v944_v31 = vpack.c.bf16 %v887_v22, %v883_v19 }
 0x2e3   :  { %v991_v13 = vmax.bf16 %v4130_v32, %v943_v26 }
 0x2e4   :  { %v890_v37 = vpop.f32.mrb[92].mxu1  ;;  %v992_v52 = vmax.bf16 %v4130_v32, %v944_v31 }
 0x2e5   :  { %v892_v7 = vpop.f32.mrb[93].mxu1  ;;  %v891_v10 = vadd.f32 %v890_v37, %v4519_v44 }
 0x2e6   :  { %v894_v43 = vpop.f32.mrb[94].mxu1  ;;  %1653 = vmatprep.mubr.bf16.mxu0 %v992_v52  ;;  %1926 = vmatprep.mubr.bf16.mxu1 %v992_v52  ;;  %v893_v27 = vadd.f32 %v892_v7, %v4523_v53 }
 0x2e7   :  { %v895_v20 = vadd.f32 %v894_v43, %v4519_v44  ;;  %v896_v24 = vpop.f32.mrb[95].mxu1  ;;  %1654 = vmatmul.mubr.bf16.gmra.mrb[136].mxu0 %v991_v13  ;;  %1927 = vmatmul.mubr.bf16.gmra.mrb[184].mxu1 %v991_v13  ;;  %v1059_v44 = vld [vmem:[%s5264_s6] sm:$0xf] }
 0x2e8   :  { %v897_v28 = vadd.f32 %v896_v24, %v4523_v53  ;;  %v4755_v53 = vrot.slane %v1059_v44, %v538_v34  ;;  %v4757_v23 = vrot.slane %v1059_v44, %v1071_v41  ;;  %v4761_v59 = vrot.slane %v1059_v44, %v542_v40 }
 0x2e9   :  { %v945_v38 = vpack.c.bf16 %v895_v20, %v891_v10  ;;  %v4763_v62 = vrot.slane %v1059_v44, %v1075_v50 }
 0x2ea   :  { %v946_v39 = vpack.c.bf16 %v897_v28, %v893_v27 }
 0x2eb   :  { %v993_v46 = vmax.bf16 %v4130_v32, %v945_v38 }
 0x2ec   :  { %v994_v45 = vmax.bf16 %v4130_v32, %v946_v39 }
 0x2ee   :  { %1663 = vmatprep.mubr.bf16.mxu0 %v994_v45  ;;  %1936 = vmatprep.mubr.bf16.mxu1 %v994_v45 }
 0x2ef   :  { %1664 = vmatmul.mubr.bf16.gmra.mrb[140].mxu0 %v993_v46  ;;  %1937 = vmatmul.mubr.bf16.gmra.mrb[188].mxu1 %v993_v46 }
 0x30a   :  { %v1435_v29 = vpop.f32.mrb[48].mxu0  ;;  %v1708_v36 = vpop.f32.mrb[96].mxu1 }
 0x30b   :  { %v1437_v63 = vpop.f32.mrb[49].mxu0  ;;  %v1710_v3 = vpop.f32.mrb[97].mxu1  ;;  %v1436_v12 = vadd.f32 %v1435_v29, %v4755_v53  ;;  %v4767_v56 = vadd.f32 %v1708_v36, %v4757_v23 }
 0x30c   :  { %v1439_v6 = vpop.f32.mrb[50].mxu0  ;;  %v1712_v9 = vpop.f32.mrb[98].mxu1  ;;  %v1438_v40 = vadd.f32 %v1437_v63, %v4761_v59  ;;  %v4775_v51 = vadd.f32 %v1710_v3, %v4763_v62 }
 0x30d   :  { %v1440_v34 = vadd.f32 %v1439_v6, %v4755_v53  ;;  %v4771_v0 = vadd.f32 %v1712_v9, %v4757_v23  ;;  %v1441_v4 = vpop.f32.mrb[51].mxu0  ;;  %v1714_v33 = vpop.f32.mrb[99].mxu1 }
 0x30e   :  { %v1442_v16 = vadd.f32 %v1441_v4, %v4761_v59  ;;  %v4779_v35 = vadd.f32 %v1714_v33, %v4763_v62 }
 0x30f   :  { %v1947_v54 = vpack.c.bf16 %v1440_v34, %v1436_v12  ;;  %v1949_v60 = vpack.c.bf16 %v4771_v0, %v4767_v56 }
 0x310   :  { %v1948_v11 = vpack.c.bf16 %v1442_v16, %v1438_v40  ;;  %v1950_v15 = vpack.c.bf16 %v4779_v35, %v4775_v51 }
 0x311   :  { %v2043_v22 = vmax.bf16 %v4130_v32, %v1947_v54 }
 0x312   :  { %v1445_v17 = vpop.f32.mrb[52].mxu0  ;;  %v1718_v18 = vpop.f32.mrb[100].mxu1  ;;  %v2044_v19 = vmax.bf16 %v4130_v32, %v1948_v11 }
 0x313   :  { %v1447_v26 = vpop.f32.mrb[53].mxu0  ;;  %v1720_v31 = vpop.f32.mrb[101].mxu1  ;;  %v1446_v7 = vadd.f32 %v1445_v17, %v4755_v53  ;;  %v4789_v13 = vadd.f32 %v1718_v18, %v4757_v23 }
 0x314   :  { %v1449_v37 = vpop.f32.mrb[54].mxu0  ;;  %v1722_v52 = vpop.f32.mrb[102].mxu1  ;;  %2434 = vmatprep.mubr.bf16.mxu0 %v2044_v19  ;;  %v1448_v27 = vadd.f32 %v1447_v26, %v4761_v59  ;;  %v4797_v28 = vadd.f32 %v1720_v31, %v4763_v62 }
 0x315   :  { %v1450_v43 = vadd.f32 %v1449_v37, %v4755_v53  ;;  %v4793_v10 = vadd.f32 %v1722_v52, %v4757_v23  ;;  %v1451_v20 = vpop.f32.mrb[55].mxu0  ;;  %v1724_v24 = vpop.f32.mrb[103].mxu1  ;;  %2435 = vmatmul.mubr.bf16.vlgmr.msra.gmra.mrb[144].mxu0 %v2043_v22 }
 0x316   :  { %v1452_v38 = vadd.f32 %v1451_v20, %v4761_v59  ;;  %v4801_v39 = vadd.f32 %v1724_v24, %v4763_v62  ;;  %2628 = vmatpush1.bf16.msra.mxu0 %v4531_v42 }
 0x317   :  { %v1951_v45 = vpack.c.bf16 %v1450_v43, %v1446_v7  ;;  %v1953_v46 = vpack.c.bf16 %v4793_v10, %v4789_v13  ;;  %2629 = vmatprep.subr.bf16.mxu0 %v4130_v32 }
 0x318   :  { %v1952_v41 = vpack.c.bf16 %v1452_v38, %v1448_v27  ;;  %v1954_v44 = vpack.c.bf16 %v4801_v39, %v4797_v28 }
 0x319   :  { %v2047_v42 = vmax.bf16 %v4130_v32, %v1951_v45  ;;  %v2049_v51 = vmax.bf16 %v4130_v32, %v1953_v46 }
 0x31a   :  { %v1455_v50 = vpop.f32.mrb[56].mxu0  ;;  %v1728_v29 = vpop.f32.mrb[104].mxu1  ;;  %v2048_v36 = vmax.bf16 %v4130_v32, %v1952_v41  ;;  %2630 = vmatpush1.bf16.msra.mxu0 %v4548_v5 }
 0x31b   :  { %v1457_v63 = vpop.f32.mrb[57].mxu0  ;;  %v1730_v3 = vpop.f32.mrb[105].mxu1  ;;  %2631 = vmatprep.subr.bf16.mxu0 %v4130_v32  ;;  %v1456_v12 = vadd.f32 %v1455_v50, %v4755_v53  ;;  %v4815_v34 = vadd.f32 %v1728_v29, %v4757_v23 }
 0x31c   :  { %v1459_v6 = vpop.f32.mrb[58].mxu0  ;;  %v1732_v9 = vpop.f32.mrb[106].mxu1  ;;  %2442 = vmatprep.mubr.bf16.mxu0 %v2048_v36  ;;  %v1458_v16 = vadd.f32 %v1457_v63, %v4761_v59  ;;  %v4823_v54 = vadd.f32 %v1730_v3, %v4763_v62 }
 0x31d   :  { %v1460_v4 = vadd.f32 %v1459_v6, %v4755_v53  ;;  %v4819_v33 = vadd.f32 %v1732_v9, %v4757_v23  ;;  %v1461_v5 = vpop.f32.mrb[59].mxu0  ;;  %v1734_v40 = vpop.f32.mrb[107].mxu1  ;;  %2443 = vmatmul.mubr.bf16.gmra.mrb[148].mxu0 %v2047_v42 }
 0x31e   :  { %v1462_v11 = vadd.f32 %v1461_v5, %v4761_v59  ;;  %v4827_v17 = vadd.f32 %v1734_v40, %v4763_v62  ;;  %2632 = vmatpush1.bf16.msra.mxu0 %v4563_v61 }
 0x31f   :  { %v1955_v18 = vpack.c.bf16 %v1460_v4, %v1456_v12  ;;  %v1957_v19 = vpack.c.bf16 %v4819_v33, %v4815_v34  ;;  %2633 = vmatprep.subr.bf16.mxu0 %v4130_v32 }
 0x320   :  { %v1956_v22 = vpack.c.bf16 %v1462_v11, %v1458_v16  ;;  %v1958_v26 = vpack.c.bf16 %v4827_v17, %v4823_v54 }
 0x321   :  { %v2051_v61 = vmax.bf16 %v4130_v32, %v1955_v18  ;;  %v2053_v56 = vmax.bf16 %v4130_v32, %v1957_v19 }
 0x322   :  { %v1465_v31 = vpop.f32.mrb[60].mxu0  ;;  %v1738_v37 = vpop.f32.mrb[108].mxu1  ;;  %v2052_v52 = vmax.bf16 %v4130_v32, %v1956_v22  ;;  %2634 = vmatpush1.bf16.msra.mxu0 %v4580_v55  ;;  %v2054_v35 = vmax.bf16 %v4130_v32, %v1958_v26 }
 0x323   :  { %v1467_v7 = vpop.f32.mrb[61].mxu0  ;;  %v1740_v43 = vpop.f32.mrb[109].mxu1  ;;  %2635 = vmatprep.subr.bf16.mxu0 %v4130_v32  ;;  %v1466_v27 = vadd.f32 %v1465_v31, %v4755_v53  ;;  %v4841_v38 = vadd.f32 %v1738_v37, %v4757_v23 }
 0x324   :  { %v1469_v20 = vpop.f32.mrb[62].mxu0  ;;  %v1742_v24 = vpop.f32.mrb[110].mxu1  ;;  %2450 = vmatprep.mubr.bf16.mxu0 %v2052_v52  ;;  %v1468_v29 = vadd.f32 %v1467_v7, %v4761_v59  ;;  %v4849_v36 = vadd.f32 %v1740_v43, %v4763_v62 }
 0x325   :  { %v1470_v45 = vadd.f32 %v1469_v20, %v4755_v53  ;;  %v4845_v41 = vadd.f32 %v1742_v24, %v4757_v23  ;;  %v1471_v55 = vpop.f32.mrb[63].mxu0  ;;  %v1744_v50 = vpop.f32.mrb[111].mxu1  ;;  %2451 = vmatmul.mubr.bf16.gmra.mrb[152].mxu0 %v2051_v61 }
 0x326   :  { %v1472_v63 = vadd.f32 %v1471_v55, %v4761_v59  ;;  %v4853_v3 = vadd.f32 %v1744_v50, %v4763_v62  ;;  %2636 = vmatpush1.bf16.msra.mxu0 %v4595_v8 }
 0x327   :  { %v1959_v42 = vpack.c.bf16 %v1470_v45, %v1466_v27  ;;  %v1961_v6 = vpack.c.bf16 %v4845_v41, %v4841_v38  ;;  %2637 = vmatprep.subr.bf16.mxu0 %v4130_v32 }
 0x328   :  { %v1960_v9 = vpack.c.bf16 %v1472_v63, %v1468_v29  ;;  %v1962_v12 = vpack.c.bf16 %v4853_v3, %v4849_v36 }
 0x329   :  { %v2055_v8 = vmax.bf16 %v4130_v32, %v1959_v42 }
 0x32a   :  { %v1475_v4 = vpop.f32.mrb[64].mxu0  ;;  %v1748_v5 = vpop.f32.mrb[112].mxu1  ;;  %v2056_v40 = vmax.bf16 %v4130_v32, %v1960_v9  ;;  %2638 = vmatpush1.bf16.msra.mxu0 %v4608_v21  ;;  %v2058_v0 = vmax.bf16 %v4130_v32, %v1962_v12 }
 0x32b   :  { %v1477_v16 = vpop.f32.mrb[65].mxu0  ;;  %v1750_v11 = vpop.f32.mrb[113].mxu1  ;;  %2639 = vmatprep.subr.bf16.mxu0 %v4130_v32  ;;  %v1476_v31 = vadd.f32 %v1475_v4, %v4755_v53  ;;  %v4867_v37 = vadd.f32 %v1748_v5, %v4757_v23 }
 0x32c   :  { %v1479_v18 = vpop.f32.mrb[66].mxu0  ;;  %v1752_v22 = vpop.f32.mrb[114].mxu1  ;;  %2458 = vmatprep.mubr.bf16.mxu0 %v2056_v40  ;;  %v1478_v61 = vadd.f32 %v1477_v16, %v4761_v59  ;;  %v4875_v20 = vadd.f32 %v1750_v11, %v4763_v62 }
 0x32d   :  { %v1480_v52 = vadd.f32 %v1479_v18, %v4755_v53  ;;  %v4871_v7 = vadd.f32 %v1752_v22, %v4757_v23  ;;  %v1481_v21 = vpop.f32.mrb[67].mxu0  ;;  %v1754_v43 = vpop.f32.mrb[115].mxu1  ;;  %2459 = vmatmul.mubr.bf16.gmra.mrb[156].mxu0 %v2055_v8 }
 0x32e   :  { %v1482_v24 = vadd.f32 %v1481_v21, %v4761_v59  ;;  %v4879_v27 = vadd.f32 %v1754_v43, %v4763_v62  ;;  %2640 = vmatpush1.bf16.msra.mxu0 %v4613_v25 }
 0x32f   :  { %v1963_v45 = vpack.c.bf16 %v1480_v52, %v1476_v31  ;;  %v1965_v55 = vpack.c.bf16 %v4871_v7, %v4867_v37  ;;  %2641 = vmatprep.subr.bf16.mxu0 %v4130_v32 }
 0x330   :  { %v1964_v50 = vpack.c.bf16 %v1482_v24, %v1478_v61  ;;  %v1966_v29 = vpack.c.bf16 %v4879_v27, %v4875_v20 }
 0x331   :  { %v2059_v25 = vmax.bf16 %v4130_v32, %v1963_v45  ;;  %v2061_v13 = vmax.bf16 %v4130_v32, %v1965_v55 }
 0x332   :  { %v1485_v63 = vpop.f32.mrb[68].mxu0  ;;  %v1758_v42 = vpop.f32.mrb[116].mxu1  ;;  %v2060_v9 = vmax.bf16 %v4130_v32, %v1964_v50  ;;  %2642 = vmatpush1.bf16.msra.mxu0 %v4620_v47 }
 0x333   :  { %v1487_v4 = vpop.f32.mrb[69].mxu0  ;;  %v1760_v5 = vpop.f32.mrb[117].mxu1  ;;  %2643 = vmatprep.subr.bf16.mxu0 %v4130_v32  ;;  %v1486_v11 = vadd.f32 %v1485_v63, %v4755_v53  ;;  %v4893_v8 = vadd.f32 %v1758_v42, %v4757_v23 }
 0x334   :  { %v1489_v40 = vpop.f32.mrb[70].mxu0  ;;  %v1762_v16 = vpop.f32.mrb[118].mxu1  ;;  %2466 = vmatprep.mubr.bf16.mxu0 %v2060_v9  ;;  %v1488_v52 = vadd.f32 %v1487_v4, %v4761_v59  ;;  %v4901_v21 = vadd.f32 %v1760_v5, %v4763_v62 }
 0x335   :  { %v1490_v18 = vadd.f32 %v1489_v40, %v4755_v53  ;;  %v4897_v22 = vadd.f32 %v1762_v16, %v4757_v23  ;;  %v1491_v47 = vpop.f32.mrb[71].mxu0  ;;  %v1764_v31 = vpop.f32.mrb[119].mxu1  ;;  %2467 = vmatmul.mubr.bf16.gmra.mrb[160].mxu0 %v2059_v25 }
 0x336   :  { %v1492_v43 = vadd.f32 %v1491_v47, %v4761_v59  ;;  %v4905_v61 = vadd.f32 %v1764_v31, %v4763_v62  ;;  %2644 = vmatpush1.bf16.msra.mxu0 %v4655_v58 }
 0x337   :  { %v1967_v24 = vpack.c.bf16 %v1490_v18, %v1486_v11  ;;  %2645 = vmatprep.subr.bf16.mxu0 %v4130_v32  ;;  %v5269_v39 = vpack.c.bf16 %v4897_v22, %v4893_v8 }
 0x338   :  { %v1968_v50 = vpack.c.bf16 %v1492_v43, %v1488_v52  ;;  %v5268_v10 = vpack.c.bf16 %v4905_v61, %v4901_v21 }
 0x339   :  { %v2063_v58 = vmax.bf16 %v4130_v32, %v1967_v24  ;;  %v2065_v46 = vmax.bf16 %v4130_v32, %v5269_v39 }
 0x33a   :  { %v1495_v42 = vpop.f32.mrb[72].mxu0  ;;  %v1768_v9 = vpop.f32.mrb[120].mxu1  ;;  %v2064_v4 = vmax.bf16 %v4130_v32, %v1968_v50  ;;  %2646 = vmatpush1.bf16.msra.mxu0 %v4665_v49  ;;  %v2066_v28 = vmax.bf16 %v4130_v32, %v5268_v10 }
 0x33b   :  { %v1497_v5 = vpop.f32.mrb[73].mxu0  ;;  %v1770_v25 = vpop.f32.mrb[121].mxu1  ;;  %2647 = vmatprep.subr.bf16.mxu0 %v4130_v32  ;;  %v1496_v11 = vadd.f32 %v1495_v42, %v4755_v53  ;;  %v1769_v18 = vadd.f32 %v1768_v9, %v4757_v23 }
 0x33c   :  { %v1499_v40 = vpop.f32.mrb[74].mxu0  ;;  %v1772_v16 = vpop.f32.mrb[122].mxu1  ;;  %2474 = vmatprep.mubr.bf16.mxu0 %v2064_v4  ;;  %v1498_v49 = vadd.f32 %v1497_v5, %v4761_v59  ;;  %v1771_v24 = vadd.f32 %v1770_v25, %v4763_v62 }
 0x33d   :  { %v1500_v47 = vadd.f32 %v1499_v40, %v4755_v53  ;;  %v1773_v31 = vadd.f32 %v1772_v16, %v4757_v23  ;;  %v1501_v52 = vpop.f32.mrb[75].mxu0  ;;  %v1774_v43 = vpop.f32.mrb[123].mxu1  ;;  %2475 = vmatmul.mubr.bf16.gmra.mrb[164].mxu0 %v2063_v58 }
 0x33e   :  { %v1502_v50 = vadd.f32 %v1501_v52, %v4761_v59  ;;  %v1775_v45 = vadd.f32 %v1774_v43, %v4763_v62  ;;  %2648 = vmatpush1.bf16.msra.mxu0 %v4676_v57 }
 0x33f   :  { %v1971_v42 = vpack.c.bf16 %v1500_v47, %v1496_v11  ;;  %v1973_v4 = vpack.c.bf16 %v1773_v31, %v1769_v18  ;;  %2649 = vmatprep.subr.bf16.mxu0 %v4130_v32 }
 0x340   :  { %v1972_v9 = vpack.c.bf16 %v1502_v50, %v1498_v49  ;;  %v1974_v40 = vpack.c.bf16 %v1775_v45, %v1771_v24 }
 0x341   :  { %v2069_v25 = vmax.bf16 %v4130_v32, %v1973_v4  ;;  %v2067_v57 = vmax.bf16 %v4130_v32, %v1971_v42 }
 0x342   :  { %v1505_v16 = vpop.f32.mrb[76].mxu0  ;;  %v1778_v63 = vpop.f32.mrb[124].mxu1  ;;  %v2068_v58 = vmax.bf16 %v4130_v32, %v1972_v9  ;;  %v2070_v5 = vmax.bf16 %v4130_v32, %v1974_v40  ;;  %2650 = vmatpush1.bf16.msra.mxu0 %v4684_v30 }
 0x343   :  { %v1507_v52 = vpop.f32.mrb[77].mxu0  ;;  %v1780_v43 = vpop.f32.mrb[125].mxu1  ;;  %2651 = vmatprep.subr.bf16.mxu0 %v4130_v32  ;;  %v1506_v11 = vadd.f32 %v1505_v16, %v4755_v53  ;;  %v1779_v47 = vadd.f32 %v1778_v63, %v4757_v23 }
 0x344   :  { %v1509_v18 = vpop.f32.mrb[78].mxu0  ;;  %v1782_v45 = vpop.f32.mrb[126].mxu1  ;;  %2482 = vmatprep.mubr.bf16.mxu0 %v2068_v58  ;;  %2707 = vmatprep.mubr.bf16.mxu1 %v2070_v5  ;;  %v1508_v50 = vadd.f32 %v1507_v52, %v4761_v59  ;;  %v1781_v42 = vadd.f32 %v1780_v43, %v4763_v62 }
 0x345   :  { %v1510_v31 = vadd.f32 %v1509_v18, %v4755_v53  ;;  %v1783_v30 = vadd.f32 %v1782_v45, %v4757_v23  ;;  %v1511_v49 = vpop.f32.mrb[79].mxu0  ;;  %v1784_v24 = vpop.f32.mrb[127].mxu1  ;;  %2483 = vmatmul.mubr.bf16.gmra.mrb[168].mxu0 %v2067_v57  ;;  %2708 = vmatmul.mubr.bf16.vlgmr.msra.gmra.mrb[192].mxu1 %v2069_v25 }
 0x346   :  { %v1512_v4 = vadd.f32 %v1511_v49, %v4761_v59  ;;  %v1785_v9 = vadd.f32 %v1784_v24, %v4763_v62  ;;  %2652 = vmatpush1.bf16.msra.mxu0 %v4689_v48 }
 0x347   :  { %v1975_v40 = vpack.c.bf16 %v1510_v31, %v1506_v11  ;;  %v1977_v63 = vpack.c.bf16 %v1783_v30, %v1779_v47  ;;  %2653 = vmatprep.subr.bf16.mxu0 %v4130_v32 }
 0x348   :  { %v1976_v16 = vpack.c.bf16 %v1512_v4, %v1508_v50  ;;  %v1978_v58 = vpack.c.bf16 %v1785_v9, %v1781_v42 }
 0x349   :  { %v2071_v45 = vmax.bf16 %v4130_v32, %v1975_v40  ;;  %v2073_v48 = vmax.bf16 %v4130_v32, %v1977_v63 }
 0x34a   :  { %v1515_v5 = vpop.f32.mrb[80].mxu0  ;;  %v1788_v18 = vpop.f32.mrb[128].mxu1  ;;  %v2072_v25 = vmax.bf16 %v4130_v32, %v1976_v16  ;;  %v2074_v52 = vmax.bf16 %v4130_v32, %v1978_v58  ;;  %2654 = vmatpush1.bf16.msra.mxu0 %v4698_v1 }
 0x34b   :  { %v1517_v43 = vpop.f32.mrb[81].mxu0  ;;  %v1790_v57 = vpop.f32.mrb[129].mxu1  ;;  %2655 = vmatprep.subr.bf16.mxu0 %v4130_v32  ;;  %v1516_v11 = vadd.f32 %v1515_v5, %v4755_v53  ;;  %v1789_v30 = vadd.f32 %v1788_v18, %v4757_v23 }
 0x34c   :  { %v1519_v47 = vpop.f32.mrb[82].mxu0  ;;  %v1792_v31 = vpop.f32.mrb[130].mxu1  ;;  %2490 = vmatprep.mubr.bf16.mxu0 %v2072_v25  ;;  %2715 = vmatprep.mubr.bf16.mxu1 %v2074_v52  ;;  %v1518_v42 = vadd.f32 %v1517_v43, %v4761_v59  ;;  %v1791_v4 = vadd.f32 %v1790_v57, %v4763_v62 }
 0x34d   :  { %v1520_v49 = vadd.f32 %v1519_v47, %v4755_v53  ;;  %v1793_v1 = vadd.f32 %v1792_v31, %v4757_v23  ;;  %v1521_v24 = vpop.f32.mrb[83].mxu0  ;;  %v1794_v50 = vpop.f32.mrb[131].mxu1  ;;  %2491 = vmatmul.mubr.bf16.gmra.mrb[172].mxu0 %v2071_v45  ;;  %2716 = vmatmul.mubr.bf16.gmra.mrb[196].mxu1 %v2073_v48 }
 0x34e   :  { %v1522_v9 = vadd.f32 %v1521_v24, %v4761_v59  ;;  %v1795_v40 = vadd.f32 %v1794_v50, %v4763_v62  ;;  %2656 = vmatpush1.bf16.msra.mxu0 %v4703_v14 }
 0x34f   :  { %v1979_v63 = vpack.c.bf16 %v1520_v49, %v1516_v11  ;;  %v1981_v16 = vpack.c.bf16 %v1793_v1, %v1789_v30  ;;  %2657 = vmatprep.subr.bf16.mxu0 %v4130_v32 }
 0x350   :  { %v1980_v58 = vpack.c.bf16 %v1522_v9, %v1518_v42  ;;  %v1982_v5 = vpack.c.bf16 %v1795_v40, %v1791_v4 }
 0x351   :  { %v2075_v48 = vmax.bf16 %v4130_v32, %v1979_v63  ;;  %v2077_v14 = vmax.bf16 %v4130_v32, %v1981_v16 }
 0x352   :  { %v1525_v18 = vpop.f32.mrb[84].mxu0  ;;  %v1798_v25 = vpop.f32.mrb[132].mxu1  ;;  %v2076_v52 = vmax.bf16 %v4130_v32, %v1980_v58  ;;  %v2078_v43 = vmax.bf16 %v4130_v32, %v1982_v5  ;;  %2658 = vmatpush1.bf16.msra.mxu0 %v4712_v2 }
 0x353   :  { %v1527_v57 = vpop.f32.mrb[85].mxu0  ;;  %v1800_v45 = vpop.f32.mrb[133].mxu1  ;;  %v1526_v11 = vadd.f32 %v1525_v18, %v4755_v53  ;;  %v1799_v30 = vadd.f32 %v1798_v25, %v4757_v23 }
 0x354   :  { %v1529_v47 = vpop.f32.mrb[86].mxu0  ;;  %v1802_v31 = vpop.f32.mrb[134].mxu1  ;;  %2498 = vmatprep.mubr.bf16.mxu0 %v2076_v52  ;;  %2723 = vmatprep.mubr.bf16.mxu1 %v2078_v43  ;;  %v1528_v50 = vadd.f32 %v1527_v57, %v4761_v59  ;;  %v1801_v42 = vadd.f32 %v1800_v45, %v4763_v62 }
 0x355   :  { %v1530_v49 = vadd.f32 %v1529_v47, %v4755_v53  ;;  %v1803_v1 = vadd.f32 %v1802_v31, %v4757_v23  ;;  %v1531_v24 = vpop.f32.mrb[87].mxu0  ;;  %v1804_v2 = vpop.f32.mrb[135].mxu1  ;;  %2499 = vmatmul.mubr.bf16.gmra.mrb[176].mxu0 %v2075_v48  ;;  %2724 = vmatmul.mubr.bf16.gmra.mrb[200].mxu1 %v2077_v14 }
 0x356   :  { %v1532_v4 = vadd.f32 %v1531_v24, %v4761_v59  ;;  %v1805_v9 = vadd.f32 %v1804_v2, %v4763_v62 }
 0x357   :  { %v1983_v40 = vpack.c.bf16 %v1530_v49, %v1526_v11  ;;  %v1985_v63 = vpack.c.bf16 %v1803_v1, %v1799_v30 }
 0x358   :  { %v1984_v16 = vpack.c.bf16 %v1532_v4, %v1528_v50  ;;  %v1986_v58 = vpack.c.bf16 %v1805_v9, %v1801_v42 }
 0x359   :  { %v2079_v57 = vmax.bf16 %v4130_v32, %v1983_v40  ;;  %v2081_v45 = vmax.bf16 %v4130_v32, %v1985_v63 }
 0x35a   :  { %v1535_v5 = vpop.f32.mrb[88].mxu0  ;;  %v1808_v18 = vpop.f32.mrb[136].mxu1  ;;  %v2080_v25 = vmax.bf16 %v4130_v32, %v1984_v16  ;;  %v2082_v52 = vmax.bf16 %v4130_v32, %v1986_v58 }
 0x35b   :  { %v1537_v43 = vpop.f32.mrb[89].mxu0  ;;  %v1810_v48 = vpop.f32.mrb[137].mxu1  ;;  %v1536_v14 = vadd.f32 %v1535_v5, %v4755_v53  ;;  %v1809_v11 = vadd.f32 %v1808_v18, %v4757_v23 }
 0x35c   :  { %v1539_v47 = vpop.f32.mrb[90].mxu0  ;;  %v1812_v31 = vpop.f32.mrb[138].mxu1  ;;  %2506 = vmatprep.mubr.bf16.mxu0 %v2080_v25  ;;  %2731 = vmatprep.mubr.bf16.mxu1 %v2082_v52  ;;  %v1538_v2 = vadd.f32 %v1537_v43, %v4761_v59  ;;  %v1811_v50 = vadd.f32 %v1810_v48, %v4763_v62 }
 0x35d   :  { %v1540_v30 = vadd.f32 %v1539_v47, %v4755_v53  ;;  %v1813_v49 = vadd.f32 %v1812_v31, %v4757_v23  ;;  %v1541_v1 = vpop.f32.mrb[91].mxu0  ;;  %v1814_v24 = vpop.f32.mrb[139].mxu1  ;;  %2507 = vmatmul.mubr.bf16.gmra.mrb[180].mxu0 %v2079_v57  ;;  %2732 = vmatmul.mubr.bf16.gmra.mrb[204].mxu1 %v2081_v45 }
 0x35e   :  { %v1542_v42 = vadd.f32 %v1541_v1, %v4761_v59  ;;  %v1815_v4 = vadd.f32 %v1814_v24, %v4763_v62 }
 0x35f   :  { %v1987_v9 = vpack.c.bf16 %v1540_v30, %v1536_v14  ;;  %v1989_v40 = vpack.c.bf16 %v1813_v49, %v1809_v11 }
 0x360   :  { %v1988_v63 = vpack.c.bf16 %v1542_v42, %v1538_v2  ;;  %v1990_v16 = vpack.c.bf16 %v1815_v4, %v1811_v50 }
 0x361   :  { %v2083_v43 = vmax.bf16 %v4130_v32, %v1987_v9  ;;  %v2085_v48 = vmax.bf16 %v4130_v32, %v1989_v40 }
 0x362   :  { %v1545_v58 = vpop.f32.mrb[92].mxu0  ;;  %v1818_v5 = vpop.f32.mrb[140].mxu1  ;;  %v2084_v18 = vmax.bf16 %v4130_v32, %v1988_v63  ;;  %v2086_v25 = vmax.bf16 %v4130_v32, %v1990_v16 }
 0x363   :  { %v1547_v52 = vpop.f32.mrb[93].mxu0  ;;  %v1820_v57 = vpop.f32.mrb[141].mxu1  ;;  %v1546_v45 = vadd.f32 %v1545_v58, %v4755_v53  ;;  %v1819_v14 = vadd.f32 %v1818_v5, %v4757_v23 }
 0x364   :  { %v1549_v47 = vpop.f32.mrb[94].mxu0  ;;  %v1822_v31 = vpop.f32.mrb[142].mxu1  ;;  %2514 = vmatprep.mubr.bf16.mxu0 %v2084_v18  ;;  %2739 = vmatprep.mubr.bf16.mxu1 %v2086_v25  ;;  %v1548_v24 = vadd.f32 %v1547_v52, %v4761_v59  ;;  %v1821_v2 = vadd.f32 %v1820_v57, %v4763_v62 }
 0x365   :  { %v1550_v11 = vadd.f32 %v1549_v47, %v4755_v53  ;;  %v1823_v30 = vadd.f32 %v1822_v31, %v4757_v23  ;;  %v1551_v49 = vpop.f32.mrb[95].mxu0  ;;  %v1824_v1 = vpop.f32.mrb[143].mxu1  ;;  %2515 = vmatmul.mubr.bf16.gmra.mrb[184].mxu0 %v2083_v43  ;;  %2740 = vmatmul.mubr.bf16.gmra.mrb[208].mxu1 %v2085_v48 }
 0x366   :  { %v1552_v50 = vadd.f32 %v1551_v49, %v4761_v59  ;;  %v1825_v42 = vadd.f32 %v1824_v1, %v4763_v62 }
 0x367   :  { %v1991_v4 = vpack.c.bf16 %v1550_v11, %v1546_v45  ;;  %v1993_v9 = vpack.c.bf16 %v1823_v30, %v1819_v14 }
 0x368   :  { %v1992_v40 = vpack.c.bf16 %v1552_v50, %v1548_v24  ;;  %v1994_v63 = vpack.c.bf16 %v1825_v42, %v1821_v2 }
 0x369   :  { %v2087_v52 = vmax.bf16 %v4130_v32, %v1991_v4  ;;  %v2089_v57 = vmax.bf16 %v4130_v32, %v1993_v9 }
 0x36a   :  { %v1555_v16 = vpop.f32.mrb[96].mxu0  ;;  %v1828_v58 = vpop.f32.mrb[144].mxu1  ;;  %v2088_v5 = vmax.bf16 %v4130_v32, %v1992_v40  ;;  %v2090_v18 = vmax.bf16 %v4130_v32, %v1994_v63 }
 0x36b   :  { %v1557_v25 = vpop.f32.mrb[97].mxu0  ;;  %v1830_v43 = vpop.f32.mrb[145].mxu1  ;;  %v1556_v48 = vadd.f32 %v1555_v16, %v4755_v53  ;;  %v1829_v45 = vadd.f32 %v1828_v58, %v4757_v23 }
 0x36c   :  { %v1559_v47 = vpop.f32.mrb[98].mxu0  ;;  %v1832_v31 = vpop.f32.mrb[146].mxu1  ;;  %2522 = vmatprep.mubr.bf16.mxu0 %v2088_v5  ;;  %2747 = vmatprep.mubr.bf16.mxu1 %v2090_v18  ;;  %v1558_v1 = vadd.f32 %v1557_v25, %v4761_v59  ;;  %v1831_v24 = vadd.f32 %v1830_v43, %v4763_v62 }
 0x36d   :  { %v1560_v14 = vadd.f32 %v1559_v47, %v4755_v53  ;;  %v1833_v11 = vadd.f32 %v1832_v31, %v4757_v23  ;;  %v1561_v30 = vpop.f32.mrb[99].mxu0  ;;  %v1834_v49 = vpop.f32.mrb[147].mxu1  ;;  %2523 = vmatmul.mubr.bf16.gmra.mrb[188].mxu0 %v2087_v52  ;;  %2748 = vmatmul.mubr.bf16.gmra.mrb[212].mxu1 %v2089_v57 }
 0x36e   :  { %v1562_v2 = vadd.f32 %v1561_v30, %v4761_v59  ;;  %v1835_v50 = vadd.f32 %v1834_v49, %v4763_v62 }
 0x36f   :  { %v1995_v42 = vpack.c.bf16 %v1560_v14, %v1556_v48  ;;  %v1997_v4 = vpack.c.bf16 %v1833_v11, %v1829_v45 }
 0x370   :  { %v1996_v9 = vpack.c.bf16 %v1562_v2, %v1558_v1  ;;  %v1998_v40 = vpack.c.bf16 %v1835_v50, %v1831_v24 }
 0x371   :  { %v2091_v25 = vmax.bf16 %v4130_v32, %v1995_v42  ;;  %v2093_v43 = vmax.bf16 %v4130_v32, %v1997_v4 }
 0x372   :  { %v1565_v63 = vpop.f32.mrb[100].mxu0  ;;  %v1838_v16 = vpop.f32.mrb[148].mxu1  ;;  %v2092_v58 = vmax.bf16 %v4130_v32, %v1996_v9  ;;  %v2094_v5 = vmax.bf16 %v4130_v32, %v1998_v40 }
 0x373   :  { %v1567_v18 = vpop.f32.mrb[101].mxu0  ;;  %v1840_v52 = vpop.f32.mrb[149].mxu1  ;;  %v1566_v57 = vadd.f32 %v1565_v63, %v4755_v53  ;;  %v1839_v48 = vadd.f32 %v1838_v16, %v4757_v23 }
 0x374   :  { %v1569_v47 = vpop.f32.mrb[102].mxu0  ;;  %v1842_v31 = vpop.f32.mrb[150].mxu1  ;;  %2530 = vmatprep.mubr.bf16.mxu0 %v2092_v58  ;;  %2755 = vmatprep.mubr.bf16.mxu1 %v2094_v5  ;;  %v1568_v49 = vadd.f32 %v1567_v18, %v4761_v59  ;;  %v1841_v1 = vadd.f32 %v1840_v52, %v4763_v62 }
 0x375   :  { %v1570_v45 = vadd.f32 %v1569_v47, %v4755_v53  ;;  %v1843_v14 = vadd.f32 %v1842_v31, %v4757_v23  ;;  %v1571_v11 = vpop.f32.mrb[103].mxu0  ;;  %v1844_v30 = vpop.f32.mrb[151].mxu1  ;;  %2531 = vmatmul.mubr.bf16.gmra.mrb[192].mxu0 %v2091_v25  ;;  %2756 = vmatmul.mubr.bf16.gmra.mrb[216].mxu1 %v2093_v43 }
 0x376   :  { %v1572_v24 = vadd.f32 %v1571_v11, %v4761_v59  ;;  %v1845_v2 = vadd.f32 %v1844_v30, %v4763_v62 }
 0x377   :  { %v1999_v50 = vpack.c.bf16 %v1570_v45, %v1566_v57  ;;  %v2001_v42 = vpack.c.bf16 %v1843_v14, %v1839_v48 }
 0x378   :  { %v2000_v4 = vpack.c.bf16 %v1572_v24, %v1568_v49  ;;  %v2002_v9 = vpack.c.bf16 %v1845_v2, %v1841_v1 }
 0x379   :  { %v2095_v18 = vmax.bf16 %v4130_v32, %v1999_v50  ;;  %v2097_v52 = vmax.bf16 %v4130_v32, %v2001_v42 }
 0x37a   :  { %v1575_v40 = vpop.f32.mrb[104].mxu0  ;;  %v1848_v63 = vpop.f32.mrb[152].mxu1  ;;  %v2096_v16 = vmax.bf16 %v4130_v32, %v2000_v4  ;;  %v2098_v58 = vmax.bf16 %v4130_v32, %v2002_v9 }
 0x37b   :  { %v1577_v5 = vpop.f32.mrb[105].mxu0  ;;  %v1850_v25 = vpop.f32.mrb[153].mxu1  ;;  %v1576_v43 = vadd.f32 %v1575_v40, %v4755_v53  ;;  %v1849_v57 = vadd.f32 %v1848_v63, %v4757_v23 }
 0x37c   :  { %v1579_v47 = vpop.f32.mrb[106].mxu0  ;;  %v1852_v31 = vpop.f32.mrb[154].mxu1  ;;  %2538 = vmatprep.mubr.bf16.mxu0 %v2096_v16  ;;  %2763 = vmatprep.mubr.bf16.mxu1 %v2098_v58  ;;  %v1578_v30 = vadd.f32 %v1577_v5, %v4761_v59  ;;  %v1851_v49 = vadd.f32 %v1850_v25, %v4763_v62 }
 0x37d   :  { %v1580_v48 = vadd.f32 %v1579_v47, %v4755_v53  ;;  %v1853_v45 = vadd.f32 %v1852_v31, %v4757_v23  ;;  %v1581_v14 = vpop.f32.mrb[107].mxu0  ;;  %v1854_v11 = vpop.f32.mrb[155].mxu1  ;;  %2539 = vmatmul.mubr.bf16.gmra.mrb[196].mxu0 %v2095_v18  ;;  %2764 = vmatmul.mubr.bf16.gmra.mrb[220].mxu1 %v2097_v52 }
 0x37e   :  { %v1582_v1 = vadd.f32 %v1581_v14, %v4761_v59  ;;  %v1855_v24 = vadd.f32 %v1854_v11, %v4763_v62 }
 0x37f   :  { %v2003_v2 = vpack.c.bf16 %v1580_v48, %v1576_v43  ;;  %v2005_v50 = vpack.c.bf16 %v1853_v45, %v1849_v57 }
 0x380   :  { %v2004_v42 = vpack.c.bf16 %v1582_v1, %v1578_v30  ;;  %v2006_v4 = vpack.c.bf16 %v1855_v24, %v1851_v49 }
 0x381   :  { %v2099_v5 = vmax.bf16 %v4130_v32, %v2003_v2  ;;  %v2101_v25 = vmax.bf16 %v4130_v32, %v2005_v50 }
 0x382   :  { %v1585_v9 = vpop.f32.mrb[108].mxu0  ;;  %v1858_v40 = vpop.f32.mrb[156].mxu1  ;;  %v2100_v63 = vmax.bf16 %v4130_v32, %v2004_v42  ;;  %v2102_v16 = vmax.bf16 %v4130_v32, %v2006_v4 }
 0x383   :  { %v1587_v58 = vpop.f32.mrb[109].mxu0  ;;  %v1860_v18 = vpop.f32.mrb[157].mxu1  ;;  %v1586_v52 = vadd.f32 %v1585_v9, %v4755_v53  ;;  %v1859_v43 = vadd.f32 %v1858_v40, %v4757_v23 }
 0x384   :  { %v1589_v47 = vpop.f32.mrb[110].mxu0  ;;  %v1862_v31 = vpop.f32.mrb[158].mxu1  ;;  %2546 = vmatprep.mubr.bf16.mxu0 %v2100_v63  ;;  %2771 = vmatprep.mubr.bf16.mxu1 %v2102_v16  ;;  %v1588_v11 = vadd.f32 %v1587_v58, %v4761_v59  ;;  %v1861_v30 = vadd.f32 %v1860_v18, %v4763_v62 }
 0x385   :  { %v1590_v57 = vadd.f32 %v1589_v47, %v4755_v53  ;;  %v1863_v48 = vadd.f32 %v1862_v31, %v4757_v23  ;;  %v1591_v45 = vpop.f32.mrb[111].mxu0  ;;  %v1864_v14 = vpop.f32.mrb[159].mxu1  ;;  %2547 = vmatmul.mubr.bf16.gmra.mrb[200].mxu0 %v2099_v5  ;;  %2772 = vmatmul.mubr.bf16.gmra.mrb[224].mxu1 %v2101_v25 }
 0x386   :  { %v1592_v49 = vadd.f32 %v1591_v45, %v4761_v59  ;;  %v1865_v1 = vadd.f32 %v1864_v14, %v4763_v62 }
 0x387   :  { %v2007_v24 = vpack.c.bf16 %v1590_v57, %v1586_v52  ;;  %v2009_v2 = vpack.c.bf16 %v1863_v48, %v1859_v43 }
 0x388   :  { %v2008_v50 = vpack.c.bf16 %v1592_v49, %v1588_v11  ;;  %v2010_v42 = vpack.c.bf16 %v1865_v1, %v1861_v30 }
 0x389   :  { %v2103_v58 = vmax.bf16 %v4130_v32, %v2007_v24  ;;  %v2105_v18 = vmax.bf16 %v4130_v32, %v2009_v2 }
 0x38a   :  { %v1595_v4 = vpop.f32.mrb[112].mxu0  ;;  %v1868_v9 = vpop.f32.mrb[160].mxu1  ;;  %v2104_v40 = vmax.bf16 %v4130_v32, %v2008_v50  ;;  %v2106_v63 = vmax.bf16 %v4130_v32, %v2010_v42 }
 0x38b   :  { %v1597_v16 = vpop.f32.mrb[113].mxu0  ;;  %v1870_v5 = vpop.f32.mrb[161].mxu1  ;;  %v1596_v25 = vadd.f32 %v1595_v4, %v4755_v53  ;;  %v1869_v52 = vadd.f32 %v1868_v9, %v4757_v23 }
 0x38c   :  { %v1599_v47 = vpop.f32.mrb[114].mxu0  ;;  %v1872_v31 = vpop.f32.mrb[162].mxu1  ;;  %2554 = vmatprep.mubr.bf16.mxu0 %v2104_v40  ;;  %2779 = vmatprep.mubr.bf16.mxu1 %v2106_v63  ;;  %v1598_v14 = vadd.f32 %v1597_v16, %v4761_v59  ;;  %v1871_v11 = vadd.f32 %v1870_v5, %v4763_v62 }
 0x38d   :  { %v1600_v43 = vadd.f32 %v1599_v47, %v4755_v53  ;;  %v1873_v57 = vadd.f32 %v1872_v31, %v4757_v23  ;;  %v1601_v48 = vpop.f32.mrb[115].mxu0  ;;  %v1874_v45 = vpop.f32.mrb[163].mxu1  ;;  %2555 = vmatmul.mubr.bf16.gmra.mrb[204].mxu0 %v2103_v58  ;;  %2780 = vmatmul.mubr.bf16.gmra.mrb[228].mxu1 %v2105_v18 }
 0x38e   :  { %v1602_v30 = vadd.f32 %v1601_v48, %v4761_v59  ;;  %v1875_v49 = vadd.f32 %v1874_v45, %v4763_v62 }
 0x38f   :  { %v2011_v1 = vpack.c.bf16 %v1600_v43, %v1596_v25  ;;  %v2013_v24 = vpack.c.bf16 %v1873_v57, %v1869_v52 }
 0x390   :  { %v2012_v2 = vpack.c.bf16 %v1602_v30, %v1598_v14  ;;  %v2014_v50 = vpack.c.bf16 %v1875_v49, %v1871_v11 }
 0x391   :  { %v2107_v16 = vmax.bf16 %v4130_v32, %v2011_v1  ;;  %v2109_v5 = vmax.bf16 %v4130_v32, %v2013_v24 }
 0x392   :  { %v1605_v42 = vpop.f32.mrb[116].mxu0  ;;  %v1878_v4 = vpop.f32.mrb[164].mxu1  ;;  %v2108_v9 = vmax.bf16 %v4130_v32, %v2012_v2  ;;  %v2110_v40 = vmax.bf16 %v4130_v32, %v2014_v50 }
 0x393   :  { %v1607_v63 = vpop.f32.mrb[117].mxu0  ;;  %v1880_v58 = vpop.f32.mrb[165].mxu1  ;;  %v1606_v18 = vadd.f32 %v1605_v42, %v4755_v53  ;;  %v1879_v25 = vadd.f32 %v1878_v4, %v4757_v23 }
 0x394   :  { %v1609_v47 = vpop.f32.mrb[118].mxu0  ;;  %v1882_v31 = vpop.f32.mrb[166].mxu1  ;;  %2562 = vmatprep.mubr.bf16.mxu0 %v2108_v9  ;;  %2787 = vmatprep.mubr.bf16.mxu1 %v2110_v40  ;;  %v1608_v45 = vadd.f32 %v1607_v63, %v4761_v59  ;;  %v1881_v14 = vadd.f32 %v1880_v58, %v4763_v62 }
 0x395   :  { %v1610_v52 = vadd.f32 %v1609_v47, %v4755_v53  ;;  %v1883_v43 = vadd.f32 %v1882_v31, %v4757_v23  ;;  %v1611_v57 = vpop.f32.mrb[119].mxu0  ;;  %v1884_v48 = vpop.f32.mrb[167].mxu1  ;;  %2563 = vmatmul.mubr.bf16.gmra.mrb[208].mxu0 %v2107_v16  ;;  %2788 = vmatmul.mubr.bf16.gmra.mrb[232].mxu1 %v2109_v5 }
 0x396   :  { %v1612_v11 = vadd.f32 %v1611_v57, %v4761_v59  ;;  %v1885_v30 = vadd.f32 %v1884_v48, %v4763_v62 }
 0x397   :  { %v2015_v49 = vpack.c.bf16 %v1610_v52, %v1606_v18  ;;  %v2017_v1 = vpack.c.bf16 %v1883_v43, %v1879_v25 }
 0x398   :  { %v2016_v24 = vpack.c.bf16 %v1612_v11, %v1608_v45  ;;  %v2018_v2 = vpack.c.bf16 %v1885_v30, %v1881_v14 }
 0x399   :  { %v2111_v63 = vmax.bf16 %v4130_v32, %v2015_v49  ;;  %v2113_v58 = vmax.bf16 %v4130_v32, %v2017_v1 }
 0x39a   :  { %v1615_v50 = vpop.f32.mrb[120].mxu0  ;;  %v1888_v42 = vpop.f32.mrb[168].mxu1  ;;  %v2112_v4 = vmax.bf16 %v4130_v32, %v2016_v24  ;;  %v2114_v9 = vmax.bf16 %v4130_v32, %v2018_v2 }
 0x39b   :  { %v1617_v40 = vpop.f32.mrb[121].mxu0  ;;  %v1890_v16 = vpop.f32.mrb[169].mxu1  ;;  %v1616_v5 = vadd.f32 %v1615_v50, %v4755_v53  ;;  %v1889_v18 = vadd.f32 %v1888_v42, %v4757_v23 }
 0x39c   :  { %v1619_v47 = vpop.f32.mrb[122].mxu0  ;;  %v1892_v31 = vpop.f32.mrb[170].mxu1  ;;  %2570 = vmatprep.mubr.bf16.mxu0 %v2112_v4  ;;  %2795 = vmatprep.mubr.bf16.mxu1 %v2114_v9  ;;  %v1618_v48 = vadd.f32 %v1617_v40, %v4761_v59  ;;  %v1891_v45 = vadd.f32 %v1890_v16, %v4763_v62 }
 0x39d   :  { %v1620_v25 = vadd.f32 %v1619_v47, %v4755_v53  ;;  %v1893_v52 = vadd.f32 %v1892_v31, %v4757_v23  ;;  %v1621_v43 = vpop.f32.mrb[123].mxu0  ;;  %v1894_v57 = vpop.f32.mrb[171].mxu1  ;;  %2571 = vmatmul.mubr.bf16.gmra.mrb[212].mxu0 %v2111_v63  ;;  %2796 = vmatmul.mubr.bf16.gmra.mrb[236].mxu1 %v2113_v58 }
 0x39e   :  { %v1622_v14 = vadd.f32 %v1621_v43, %v4761_v59  ;;  %v1895_v11 = vadd.f32 %v1894_v57, %v4763_v62 }
 0x39f   :  { %v2019_v30 = vpack.c.bf16 %v1620_v25, %v1616_v5  ;;  %v2021_v49 = vpack.c.bf16 %v1893_v52, %v1889_v18 }
 0x3a0   :  { %v2020_v1 = vpack.c.bf16 %v1622_v14, %v1618_v48  ;;  %v2022_v24 = vpack.c.bf16 %v1895_v11, %v1891_v45 }
 0x3a1   :  { %v2115_v40 = vmax.bf16 %v4130_v32, %v2019_v30  ;;  %v2117_v16 = vmax.bf16 %v4130_v32, %v2021_v49 }
 0x3a2   :  { %v1625_v2 = vpop.f32.mrb[124].mxu0  ;;  %v1898_v50 = vpop.f32.mrb[172].mxu1  ;;  %v2116_v42 = vmax.bf16 %v4130_v32, %v2020_v1  ;;  %v2118_v4 = vmax.bf16 %v4130_v32, %v2022_v24 }
 0x3a3   :  { %v1627_v9 = vpop.f32.mrb[125].mxu0  ;;  %v1900_v63 = vpop.f32.mrb[173].mxu1  ;;  %v1626_v58 = vadd.f32 %v1625_v2, %v4755_v53  ;;  %v1899_v5 = vadd.f32 %v1898_v50, %v4757_v23 }
 0x3a4   :  { %v1629_v47 = vpop.f32.mrb[126].mxu0  ;;  %v1902_v31 = vpop.f32.mrb[174].mxu1  ;;  %2578 = vmatprep.mubr.bf16.mxu0 %v2116_v42  ;;  %2803 = vmatprep.mubr.bf16.mxu1 %v2118_v4  ;;  %v1628_v57 = vadd.f32 %v1627_v9, %v4761_v59  ;;  %v1901_v48 = vadd.f32 %v1900_v63, %v4763_v62 }
 0x3a5   :  { %v1630_v18 = vadd.f32 %v1629_v47, %v4755_v53  ;;  %v1903_v25 = vadd.f32 %v1902_v31, %v4757_v23  ;;  %v1631_v52 = vpop.f32.mrb[127].mxu0  ;;  %v1904_v43 = vpop.f32.mrb[175].mxu1  ;;  %2579 = vmatmul.mubr.bf16.gmra.mrb[216].mxu0 %v2115_v40  ;;  %2804 = vmatmul.mubr.bf16.gmra.mrb[240].mxu1 %v2117_v16 }
 0x3a6   :  { %v1632_v45 = vadd.f32 %v1631_v52, %v4761_v59  ;;  %v1905_v14 = vadd.f32 %v1904_v43, %v4763_v62 }
 0x3a7   :  { %v2023_v11 = vpack.c.bf16 %v1630_v18, %v1626_v58  ;;  %v2025_v30 = vpack.c.bf16 %v1903_v25, %v1899_v5 }
 0x3a8   :  { %v2024_v49 = vpack.c.bf16 %v1632_v45, %v1628_v57  ;;  %v2026_v1 = vpack.c.bf16 %v1905_v14, %v1901_v48 }
 0x3a9   :  { %v2119_v9 = vmax.bf16 %v4130_v32, %v2023_v11  ;;  %v2121_v63 = vmax.bf16 %v4130_v32, %v2025_v30 }
 0x3aa   :  { %v1635_v24 = vpop.f32.mrb[128].mxu0  ;;  %v1908_v2 = vpop.f32.mrb[176].mxu1  ;;  %v2120_v50 = vmax.bf16 %v4130_v32, %v2024_v49  ;;  %v2122_v42 = vmax.bf16 %v4130_v32, %v2026_v1 }
 0x3ab   :  { %v1637_v4 = vpop.f32.mrb[129].mxu0  ;;  %v1910_v40 = vpop.f32.mrb[177].mxu1  ;;  %v1636_v16 = vadd.f32 %v1635_v24, %v4755_v53  ;;  %v1909_v58 = vadd.f32 %v1908_v2, %v4757_v23 }
 0x3ac   :  { %v1639_v47 = vpop.f32.mrb[130].mxu0  ;;  %v1912_v31 = vpop.f32.mrb[178].mxu1  ;;  %2586 = vmatprep.mubr.bf16.mxu0 %v2120_v50  ;;  %2811 = vmatprep.mubr.bf16.mxu1 %v2122_v42  ;;  %v1638_v43 = vadd.f32 %v1637_v4, %v4761_v59  ;;  %v1911_v57 = vadd.f32 %v1910_v40, %v4763_v62 }
 0x3ad   :  { %v1640_v5 = vadd.f32 %v1639_v47, %v4755_v53  ;;  %v1913_v18 = vadd.f32 %v1912_v31, %v4757_v23  ;;  %v1641_v25 = vpop.f32.mrb[131].mxu0  ;;  %v1914_v52 = vpop.f32.mrb[179].mxu1  ;;  %2587 = vmatmul.mubr.bf16.gmra.mrb[220].mxu0 %v2119_v9  ;;  %2812 = vmatmul.mubr.bf16.gmra.mrb[244].mxu1 %v2121_v63 }
 0x3ae   :  { %v1642_v48 = vadd.f32 %v1641_v25, %v4761_v59  ;;  %v1915_v45 = vadd.f32 %v1914_v52, %v4763_v62 }
 0x3af   :  { %v2027_v14 = vpack.c.bf16 %v1640_v5, %v1636_v16  ;;  %v2029_v11 = vpack.c.bf16 %v1913_v18, %v1909_v58 }
 0x3b0   :  { %v2028_v30 = vpack.c.bf16 %v1642_v48, %v1638_v43  ;;  %v2030_v49 = vpack.c.bf16 %v1915_v45, %v1911_v57 }
 0x3b1   :  { %v2123_v4 = vmax.bf16 %v4130_v32, %v2027_v14  ;;  %v2125_v40 = vmax.bf16 %v4130_v32, %v2029_v11 }
 0x3b2   :  { %v1645_v1 = vpop.f32.mrb[132].mxu0  ;;  %v1918_v24 = vpop.f32.mrb[180].mxu1  ;;  %v2124_v2 = vmax.bf16 %v4130_v32, %v2028_v30  ;;  %v2126_v50 = vmax.bf16 %v4130_v32, %v2030_v49 }
 0x3b3   :  { %v1647_v42 = vpop.f32.mrb[133].mxu0  ;;  %v1920_v9 = vpop.f32.mrb[181].mxu1  ;;  %v1646_v63 = vadd.f32 %v1645_v1, %v4755_v53  ;;  %v1919_v16 = vadd.f32 %v1918_v24, %v4757_v23 }
 0x3b4   :  { %v1649_v47 = vpop.f32.mrb[134].mxu0  ;;  %v1922_v31 = vpop.f32.mrb[182].mxu1  ;;  %2594 = vmatprep.mubr.bf16.mxu0 %v2124_v2  ;;  %2819 = vmatprep.mubr.bf16.mxu1 %v2126_v50  ;;  %v1648_v52 = vadd.f32 %v1647_v42, %v4761_v59  ;;  %v1921_v43 = vadd.f32 %v1920_v9, %v4763_v62 }
 0x3b5   :  { %v1650_v58 = vadd.f32 %v1649_v47, %v4755_v53  ;;  %v1923_v5 = vadd.f32 %v1922_v31, %v4757_v23  ;;  %v1651_v18 = vpop.f32.mrb[135].mxu0  ;;  %v1924_v25 = vpop.f32.mrb[183].mxu1  ;;  %2595 = vmatmul.mubr.bf16.gmra.mrb[224].mxu0 %v2123_v4  ;;  %2820 = vmatmul.mubr.bf16.gmra.mrb[248].mxu1 %v2125_v40 }
 0x3b6   :  { %v1652_v57 = vadd.f32 %v1651_v18, %v4761_v59  ;;  %v1925_v48 = vadd.f32 %v1924_v25, %v4763_v62 }
 0x3b7   :  { %v2031_v45 = vpack.c.bf16 %v1650_v58, %v1646_v63  ;;  %v2033_v14 = vpack.c.bf16 %v1923_v5, %v1919_v16 }
 0x3b8   :  { %v2032_v11 = vpack.c.bf16 %v1652_v57, %v1648_v52  ;;  %v2034_v30 = vpack.c.bf16 %v1925_v48, %v1921_v43 }
 0x3b9   :  { %v2127_v42 = vmax.bf16 %v4130_v32, %v2031_v45  ;;  %v2129_v9 = vmax.bf16 %v4130_v32, %v2033_v14 }
 0x3ba   :  { %v1655_v49 = vpop.f32.mrb[136].mxu0  ;;  %v1928_v1 = vpop.f32.mrb[184].mxu1  ;;  %v2128_v24 = vmax.bf16 %v4130_v32, %v2032_v11  ;;  %v2130_v2 = vmax.bf16 %v4130_v32, %v2034_v30 }
 0x3bb   :  { %v1657_v50 = vpop.f32.mrb[137].mxu0  ;;  %v1930_v4 = vpop.f32.mrb[185].mxu1  ;;  %v1656_v40 = vadd.f32 %v1655_v49, %v4755_v53  ;;  %v1929_v63 = vadd.f32 %v1928_v1, %v4757_v23 }
 0x3bc   :  { %v1659_v47 = vpop.f32.mrb[138].mxu0  ;;  %v1932_v31 = vpop.f32.mrb[186].mxu1  ;;  %2602 = vmatprep.mubr.bf16.mxu0 %v2128_v24  ;;  %2827 = vmatprep.mubr.bf16.mxu1 %v2130_v2  ;;  %v1658_v25 = vadd.f32 %v1657_v50, %v4761_v59  ;;  %v1931_v52 = vadd.f32 %v1930_v4, %v4763_v62 }
 0x3bd   :  { %v1660_v16 = vadd.f32 %v1659_v47, %v4755_v53  ;;  %v1933_v58 = vadd.f32 %v1932_v31, %v4757_v23  ;;  %v1661_v5 = vpop.f32.mrb[139].mxu0  ;;  %v1934_v18 = vpop.f32.mrb[187].mxu1  ;;  %2603 = vmatmul.mubr.bf16.gmra.mrb[228].mxu0 %v2127_v42  ;;  %2828 = vmatmul.mubr.bf16.gmra.mrb[252].mxu1 %v2129_v9 }
 0x3be   :  { %v1662_v43 = vadd.f32 %v1661_v5, %v4761_v59  ;;  %v1935_v57 = vadd.f32 %v1934_v18, %v4763_v62 }
 0x3bf   :  { %v2035_v48 = vpack.c.bf16 %v1660_v16, %v1656_v40  ;;  %v2037_v45 = vpack.c.bf16 %v1933_v58, %v1929_v63 }
 0x3c0   :  { %v2036_v14 = vpack.c.bf16 %v1662_v43, %v1658_v25  ;;  %v2038_v11 = vpack.c.bf16 %v1935_v57, %v1931_v52 }
 0x3c1   :  { %v2133_v2 = vmax.bf16 %v4130_v32, %v2037_v45  ;;  %v2131_v4 = vmax.bf16 %v4130_v32, %v2035_v48 }
 0x3c2   :  { %v1665_v30 = vpop.f32.mrb[140].mxu0  ;;  %v1938_v49 = vpop.f32.mrb[188].mxu1  ;;  %v2132_v1 = vmax.bf16 %v4130_v32, %v2036_v14  ;;  %v2134_v24 = vmax.bf16 %v4130_v32, %v2038_v11 }
 0x3c3   :  { %v1667_v42 = vpop.f32.mrb[141].mxu0  ;;  %v1940_v50 = vpop.f32.mrb[189].mxu1  ;;  %v1666_v9 = vadd.f32 %v1665_v30, %v4755_v53  ;;  %v1939_v40 = vadd.f32 %v1938_v49, %v4757_v23  ;;  %v2050_v49 = vmax.bf16 %v4130_v32, %v1954_v44  ;;  %v5195_v44 = vld [vmem:[%s5266_s8] ss:$0 sm:$0xff] }
 0x3c4   :  { %v1669_v47 = vpop.f32.mrb[142].mxu0  ;;  %v1942_v31 = vpop.f32.mrb[190].mxu1  ;;  %2610 = vmatprep.mubr.bf16.mxu0 %v2132_v1  ;;  %2835 = vmatprep.mubr.bf16.mxu1 %v2134_v24  ;;  %v1668_v18 = vadd.f32 %v1667_v42, %v4761_v59  ;;  %v1941_v25 = vadd.f32 %v1940_v50, %v4763_v62 }
 0x3c5   :  { %v1670_v63 = vadd.f32 %v1669_v47, %v4755_v53  ;;  %v1943_v16 = vadd.f32 %v1942_v31, %v4757_v23  ;;  %v1671_v58 = vpop.f32.mrb[143].mxu0  ;;  %v1944_v5 = vpop.f32.mrb[191].mxu1  ;;  %2611 = vmatmul.mubr.bf16.gmra.mrb[232].mxu0 %v2131_v4  ;;  %2836 = vmatmul.mubr.bf16.gmra.mrb[0].mxu1 %v2133_v2 }
 0x3c6   :  { %v1672_v52 = vadd.f32 %v1671_v58, %v4761_v59  ;;  %v1945_v43 = vadd.f32 %v1944_v5, %v4763_v62  ;;  %v2046_v59 = vmax.bf16 %v4130_v32, %v1950_v15  ;;  %v2045_v62 = vmax.bf16 %v4130_v32, %v1949_v60 }
 0x3c7   :  { %v2039_v57 = vpack.c.bf16 %v1670_v63, %v1666_v9  ;;  %v2041_v48 = vpack.c.bf16 %v1943_v16, %v1939_v40  ;;  %v2057_v60 = vmax.bf16 %v4130_v32, %v1961_v6  ;;  %v2062_v15 = vmax.bf16 %v4130_v32, %v1966_v29 }
 0x3c8   :  { %v2040_v45 = vpack.c.bf16 %v1672_v52, %v1668_v18  ;;  %v2042_v14 = vpack.c.bf16 %v1945_v43, %v1941_v25 }
 0x3c9   :  { %v2137_v11 = vmax.bf16 %v4130_v32, %v2041_v48  ;;  %v2135_v30 = vmax.bf16 %v4130_v32, %v2039_v57 }
 0x3ca   :  { %v2136_v53 = vmax.bf16 %v4130_v32, %v2040_v45  ;;  %v2138_v23 = vmax.bf16 %v4130_v32, %v2042_v14 }
 0x3cc   :  { %2618 = vmatprep.mubr.bf16.mxu0 %v2136_v53  ;;  %2843 = vmatprep.mubr.bf16.mxu1 %v2138_v23 }
 0x3cd   :  { %2619 = vmatmul.mubr.bf16.gmra.mrb[236].mxu0 %v2135_v30  ;;  %2844 = vmatmul.mubr.bf16.gmra.mrb[4].mxu1 %v2137_v11 }
 0x3ce   :  { %2659 = vmatprep.mubr.bf16.mxu0 %v2046_v59 }
 0x3d5   :  { %2660 = vmatmul.mubr.bf16.vlgmr.msra.gmra.mrb[144].mxu0 %v2045_v62 }
 0x3d6   :  { %2667 = vmatprep.mubr.bf16.mxu0 %v2050_v49 }
 0x3dd   :  { %2668 = vmatmul.mubr.bf16.gmra.mrb[148].mxu0 %v2049_v51 }
 0x3de   :  { %2675 = vmatprep.mubr.bf16.mxu0 %v2054_v35 }
 0x3e5   :  { %2676 = vmatmul.mubr.bf16.gmra.mrb[152].mxu0 %v2053_v56 }
 0x3e6   :  { %2683 = vmatprep.mubr.bf16.mxu0 %v2058_v0 }
 0x3ed   :  { %2684 = vmatmul.mubr.bf16.gmra.mrb[156].mxu0 %v2057_v60 }
 0x3ee   :  { %2691 = vmatprep.mubr.bf16.mxu0 %v2062_v15 }
 0x3f5   :  { %2692 = vmatmul.mubr.bf16.gmra.mrb[160].mxu0 %v2061_v13 }
 0x3f6   :  { %2699 = vmatprep.mubr.bf16.mxu0 %v2066_v28 }
 0x3fd   :  { %2700 = vmatmul.mubr.bf16.gmra.mrb[164].mxu0 %v2065_v46 }
 0x418   :  { %v2484_v34 = vpop.f32.mrb[168].mxu0  ;;  %v2709_v33 = vpop.f32.mrb[192].mxu1 }
 0x419   :  { %v2485_v54 = vadd.f32 %v5195_v44, %v2484_v34  ;;  %v2486_v17 = vpop.f32.mrb[169].mxu0  ;;  %v2711_v19 = vpop.f32.mrb[193].mxu1 }
 0x41a   :  { %v2487_v26 = vpop.f32.mrb[170].mxu0  ;;  %v2712_v38 = vpop.f32.mrb[194].mxu1 }
 0x41b   :  { %v2710_v41 = vadd.f32 %v2709_v33, %v2485_v54  ;;  %v2488_v36 = vadd.f32 %v5195_v44, %v2487_v26  ;;  %v2489_v3 = vpop.f32.mrb[171].mxu0  ;;  %v2714_v6 = vpop.f32.mrb[195].mxu1 }
 0x41d   :  { %v3341_v32 = vmul.f32 -1.442695, %v2710_v41  ;;  %v2713_v12 = vadd.f32 %v2712_v38, %v2488_v36 }
 0x41f   :  { %3786 = vpow2.f32 %v3341_v32  ;;  %v3342_v37 = vmul.f32 -1.442695, %v2713_v12 }
 0x420   :  { %v2492_v7 = vpop.f32.mrb[172].mxu0  ;;  %v2717_v20 = vpop.f32.mrb[196].mxu1 }
 0x421   :  { %3788 = vpow2.f32 %v3342_v37  ;;  %v2493_v27 = vadd.f32 %v5195_v44, %v2492_v7  ;;  %v2494_v55 = vpop.f32.mrb[173].mxu0  ;;  %v2719_v29 = vpop.f32.mrb[197].mxu1 }
 0x422   :  { %v2495_v8 = vpop.f32.mrb[174].mxu0  ;;  %v2720_v22 = vpop.f32.mrb[198].mxu1 }
 0x423   :  { %v2718_v21 = vadd.f32 %v2717_v20, %v2493_v27  ;;  %v2496_v61 = vadd.f32 %v5195_v44, %v2495_v8  ;;  %v2497_v1 = vpop.f32.mrb[175].mxu0  ;;  %v2722_v24 = vpop.f32.mrb[199].mxu1 }
 0x425   :  { %v3343_v2 = vmul.f32 -1.442695, %v2718_v21  ;;  %v2721_v42 = vadd.f32 %v2720_v22, %v2496_v61 }
 0x427   :  { %3790 = vpow2.f32 %v3343_v2  ;;  %v3344_v50 = vmul.f32 -1.442695, %v2721_v42 }
 0x428   :  { %v2500_v4 = vpop.f32.mrb[176].mxu0  ;;  %v2725_v9 = vpop.f32.mrb[200].mxu1 }
 0x429   :  { %v3787_v47 = vpop.eup %3786  ;;  %3792 = vpow2.f32 %v3344_v50  ;;  %v2501_v31 = vadd.f32 %v5195_v44, %v2500_v4  ;;  %v2502_v40 = vpop.f32.mrb[177].mxu0 }
 0x42a   :  { %v2727_v63 = vpop.f32.mrb[201].mxu1  ;;  %v3008_v16 = vadd.f32 1.0, %v3787_v47  ;;  %v2503_v58 = vpop.f32.mrb[178].mxu0 }
 0x42b   :  { %v2728_v5 = vpop.f32.mrb[202].mxu1  ;;  %v3789_v18 = vpop.eup %3788  ;;  %v2726_v25 = vadd.f32 %v2725_v9, %v2501_v31  ;;  %v2504_v52 = vadd.f32 %v5195_v44, %v2503_v58 }
 0x42c   :  { %v2505_v43 = vpop.f32.mrb[179].mxu0  ;;  %v2730_v57 = vpop.f32.mrb[203].mxu1  ;;  %3794 = vrcp.f32 %v3008_v16  ;;  %v3009_v48 = vadd.f32 1.0, %v3789_v18 }
 0x42d   :  { %v3345_v45 = vmul.f32 -1.442695, %v2726_v25  ;;  %v2729_v14 = vadd.f32 %v2728_v5, %v2504_v52 }
 0x42e   :  { %3796 = vrcp.f32 %v3009_v48 }
 0x42f   :  { %3798 = vpow2.f32 %v3345_v45  ;;  %v3346_v53 = vmul.f32 -1.442695, %v2729_v14 }
 0x430   :  { %v2508_v23 = vpop.f32.mrb[180].mxu0  ;;  %v2733_v11 = vpop.f32.mrb[204].mxu1 }
 0x431   :  { %v3791_v30 = vpop.eup %3790  ;;  %3800 = vpow2.f32 %v3346_v53  ;;  %v2509_v59 = vadd.f32 %v5195_v44, %v2508_v23  ;;  %v2510_v62 = vpop.f32.mrb[181].mxu0 }
 0x432   :  { %v2735_v49 = vpop.f32.mrb[205].mxu1  ;;  %v3010_v51 = vadd.f32 1.0, %v3791_v30  ;;  %v2511_v35 = vpop.f32.mrb[182].mxu0 }
 0x433   :  { %v2736_v56 = vpop.f32.mrb[206].mxu1  ;;  %v3793_v0 = vpop.eup %3792  ;;  %v2734_v60 = vadd.f32 %v2733_v11, %v2509_v59  ;;  %v2512_v15 = vadd.f32 %v5195_v44, %v2511_v35 }
 0x434   :  { %v2513_v13 = vpop.f32.mrb[183].mxu0  ;;  %v2738_v10 = vpop.f32.mrb[207].mxu1  ;;  %3802 = vrcp.f32 %v3010_v51  ;;  %v3011_v28 = vadd.f32 1.0, %v3793_v0 }
 0x435   :  { %v3347_v39 = vmul.f32 -1.442695, %v2734_v60  ;;  %v2737_v46 = vadd.f32 %v2736_v56, %v2512_v15 }
 0x436   :  { %v3795_v34 = vpop.eup %3794  ;;  %3804 = vrcp.f32 %v3011_v28 }
 0x437   :  { %3152 = vst [vmem:[#allocation11 + $0x60] sm:$0xff] %v3795_v34  ;;  %3806 = vpow2.f32 %v3347_v39  ;;  %v3348_v33 = vmul.f32 -1.442695, %v2737_v46 }
 0x438   :  { %v3797_v54 = vpop.eup %3796  ;;  %v2516_v17 = vpop.f32.mrb[184].mxu0 }
 0x439   :  { %v2741_v19 = vpop.f32.mrb[208].mxu1  ;;  %v3799_v26 = vpop.eup %3798  ;;  %3153 = vst [vmem:[#allocation11 + $0x68] sm:$0xff] %v3797_v54  ;;  %3808 = vpow2.f32 %v3348_v33  ;;  %v2517_v38 = vadd.f32 %v5195_v44, %v2516_v17 }
 0x43a   :  { %v2518_v41 = vpop.f32.mrb[185].mxu0  ;;  %v2743_v36 = vpop.f32.mrb[209].mxu1  ;;  %v3012_v3 = vadd.f32 1.0, %v3799_v26 }
 0x43b   :  { %v2519_v6 = vpop.f32.mrb[186].mxu0  ;;  %v2744_v32 = vpop.f32.mrb[210].mxu1  ;;  %v2742_v37 = vadd.f32 %v2741_v19, %v2517_v38 }
 0x43c   :  { %v3801_v12 = vpop.eup %3800  ;;  %v2520_v7 = vadd.f32 %v5195_v44, %v2519_v6  ;;  %v2521_v20 = vpop.f32.mrb[187].mxu0  ;;  %3810 = vrcp.f32 %v3012_v3 }
 0x43d   :  { %v2746_v27 = vpop.f32.mrb[211].mxu1  ;;  %v3013_v55 = vadd.f32 1.0, %v3801_v12  ;;  %v3349_v29 = vmul.f32 -1.442695, %v2742_v37 }
 0x43e   :  { %v2745_v8 = vadd.f32 %v2744_v32, %v2520_v7  ;;  %v3803_v22 = vpop.eup %3802 }
 0x43f   :  { %3812 = vrcp.f32 %v3013_v55  ;;  %3154 = vst [vmem:[#allocation11 + $0x70] sm:$0xff] %v3803_v22 }
 0x440   :  { %3814 = vpow2.f32 %v3349_v29  ;;  %v3350_v21 = vmul.f32 -1.442695, %v2745_v8  ;;  %v3805_v61 = vpop.eup %3804  ;;  %v2524_v1 = vpop.f32.mrb[188].mxu0 }
 0x441   :  { %v2749_v24 = vpop.f32.mrb[212].mxu1  ;;  %v3807_v2 = vpop.eup %3806  ;;  %3155 = vst [vmem:[#allocation11 + $0x78] sm:$0xff] %v3805_v61  ;;  %v2525_v42 = vadd.f32 %v5195_v44, %v2524_v1 }
 0x442   :  { %3816 = vpow2.f32 %v3350_v21  ;;  %v2526_v50 = vpop.f32.mrb[189].mxu0  ;;  %v2751_v4 = vpop.f32.mrb[213].mxu1  ;;  %v3014_v9 = vadd.f32 1.0, %v3807_v2 }
 0x443   :  { %v2527_v47 = vpop.f32.mrb[190].mxu0  ;;  %v2752_v31 = vpop.f32.mrb[214].mxu1  ;;  %v2750_v63 = vadd.f32 %v2749_v24, %v2525_v42 }
 0x444   :  { %v3809_v40 = vpop.eup %3808  ;;  %v2528_v16 = vadd.f32 %v5195_v44, %v2527_v47  ;;  %v2529_v58 = vpop.f32.mrb[191].mxu0  ;;  %3818 = vrcp.f32 %v3014_v9 }
 0x445   :  { %v2754_v5 = vpop.f32.mrb[215].mxu1  ;;  %v3015_v18 = vadd.f32 1.0, %v3809_v40  ;;  %v3351_v25 = vmul.f32 -1.442695, %v2750_v63 }
 0x446   :  { %v2753_v52 = vadd.f32 %v2752_v31, %v2528_v16  ;;  %v3811_v43 = vpop.eup %3810 }
 0x447   :  { %3820 = vrcp.f32 %v3015_v18  ;;  %3156 = vst [vmem:[#allocation11 + $0x80] sm:$0xff] %v3811_v43 }
 0x448   :  { %3822 = vpow2.f32 %v3351_v25  ;;  %v3352_v57 = vmul.f32 -1.442695, %v2753_v52  ;;  %v2532_v45 = vpop.f32.mrb[192].mxu0  ;;  %v2757_v14 = vpop.f32.mrb[216].mxu1 }
 0x449   :  { %v3813_v48 = vpop.eup %3812  ;;  %v2533_v23 = vadd.f32 %v5195_v44, %v2532_v45  ;;  %v2534_v11 = vpop.f32.mrb[193].mxu0 }
 0x44a   :  { %v3815_v53 = vpop.eup %3814  ;;  %3157 = vst [vmem:[#allocation11 + $0x88] sm:$0xff] %v3813_v48  ;;  %3824 = vpow2.f32 %v3352_v57  ;;  %v2759_v30 = vpop.f32.mrb[217].mxu1 }
 0x44b   :  { %v3016_v59 = vadd.f32 1.0, %v3815_v53  ;;  %v2535_v62 = vpop.f32.mrb[194].mxu0  ;;  %v2760_v49 = vpop.f32.mrb[218].mxu1  ;;  %v2758_v35 = vadd.f32 %v2757_v14, %v2533_v23 }
 0x44c   :  { %v3817_v51 = vpop.eup %3816  ;;  %v2536_v56 = vadd.f32 %v5195_v44, %v2535_v62  ;;  %v2537_v0 = vpop.f32.mrb[195].mxu0 }
 0x44d   :  { %v2762_v60 = vpop.f32.mrb[219].mxu1  ;;  %3826 = vrcp.f32 %v3016_v59  ;;  %v3017_v15 = vadd.f32 1.0, %v3817_v51  ;;  %v3353_v13 = vmul.f32 -1.442695, %v2758_v35 }
 0x44e   :  { %v2761_v10 = vadd.f32 %v2760_v49, %v2536_v56  ;;  %v3819_v28 = vpop.eup %3818 }
 0x44f   :  { %3828 = vrcp.f32 %v3017_v15  ;;  %3158 = vst [vmem:[#allocation11 + $0x90] sm:$0xff] %v3819_v28 }
 0x450   :  { %3830 = vpow2.f32 %v3353_v13  ;;  %v3354_v39 = vmul.f32 -1.442695, %v2761_v10  ;;  %v2540_v34 = vpop.f32.mrb[196].mxu0  ;;  %v2765_v33 = vpop.f32.mrb[220].mxu1 }
 0x451   :  { %v3821_v46 = vpop.eup %3820  ;;  %v2541_v17 = vadd.f32 %v5195_v44, %v2540_v34  ;;  %v2542_v19 = vpop.f32.mrb[197].mxu0 }
 0x452   :  { %v3823_v54 = vpop.eup %3822  ;;  %3159 = vst [vmem:[#allocation11 + $0x98] sm:$0xff] %v3821_v46  ;;  %3832 = vpow2.f32 %v3354_v39  ;;  %v2767_v26 = vpop.f32.mrb[221].mxu1 }
 0x453   :  { %v3018_v38 = vadd.f32 1.0, %v3823_v54  ;;  %v2543_v41 = vpop.f32.mrb[198].mxu0  ;;  %v2768_v36 = vpop.f32.mrb[222].mxu1  ;;  %v2766_v6 = vadd.f32 %v2765_v33, %v2541_v17 }
 0x454   :  { %v3825_v3 = vpop.eup %3824  ;;  %v2544_v32 = vadd.f32 %v5195_v44, %v2543_v41  ;;  %v2545_v12 = vpop.f32.mrb[199].mxu0 }
 0x455   :  { %v2770_v37 = vpop.f32.mrb[223].mxu1  ;;  %3834 = vrcp.f32 %v3018_v38  ;;  %v3019_v7 = vadd.f32 1.0, %v3825_v3  ;;  %v3355_v20 = vmul.f32 -1.442695, %v2766_v6 }
 0x456   :  { %v2769_v27 = vadd.f32 %v2768_v36, %v2544_v32 }
 0x457   :  { %v3827_v55 = vpop.eup %3826  ;;  %3836 = vrcp.f32 %v3019_v7 }
 0x458   :  { %3160 = vst [vmem:[#allocation11 + $0xa0] sm:$0xff] %v3827_v55  ;;  %3838 = vpow2.f32 %v3355_v20  ;;  %v3356_v29 = vmul.f32 -1.442695, %v2769_v27  ;;  %v2548_v22 = vpop.f32.mrb[200].mxu0  ;;  %v2773_v21 = vpop.f32.mrb[224].mxu1 }
 0x459   :  { %v3829_v8 = vpop.eup %3828  ;;  %v2549_v1 = vadd.f32 %v5195_v44, %v2548_v22  ;;  %v2550_v24 = vpop.f32.mrb[201].mxu0 }
 0x45a   :  { %v3831_v61 = vpop.eup %3830  ;;  %3161 = vst [vmem:[#allocation11 + $0xa8] sm:$0xff] %v3829_v8  ;;  %3840 = vpow2.f32 %v3356_v29  ;;  %v2775_v2 = vpop.f32.mrb[225].mxu1 }
 0x45b   :  { %v3020_v42 = vadd.f32 1.0, %v3831_v61  ;;  %v2551_v50 = vpop.f32.mrb[202].mxu0  ;;  %v2776_v4 = vpop.f32.mrb[226].mxu1  ;;  %v2774_v47 = vadd.f32 %v2773_v21, %v2549_v1 }
 0x45c   :  { %v3833_v9 = vpop.eup %3832  ;;  %v2552_v31 = vadd.f32 %v5195_v44, %v2551_v50  ;;  %v2553_v40 = vpop.f32.mrb[203].mxu0 }
 0x45d   :  { %v2778_v63 = vpop.f32.mrb[227].mxu1  ;;  %3842 = vrcp.f32 %v3020_v42  ;;  %v3021_v16 = vadd.f32 1.0, %v3833_v9  ;;  %v3357_v58 = vmul.f32 -1.442695, %v2774_v47 }
 0x45e   :  { %v2777_v5 = vadd.f32 %v2776_v4, %v2552_v31 }
 0x45f   :  { %v3835_v18 = vpop.eup %3834  ;;  %3844 = vrcp.f32 %v3021_v16 }
 0x460   :  { %3162 = vst [vmem:[#allocation11 + $0xb0] sm:$0xff] %v3835_v18  ;;  %3846 = vpow2.f32 %v3357_v58  ;;  %v3358_v25 = vmul.f32 -1.442695, %v2777_v5  ;;  %v2556_v43 = vpop.f32.mrb[204].mxu0  ;;  %v2781_v57 = vpop.f32.mrb[228].mxu1 }
 0x461   :  { %v3837_v52 = vpop.eup %3836  ;;  %v2557_v45 = vadd.f32 %v5195_v44, %v2556_v43  ;;  %v2558_v14 = vpop.f32.mrb[205].mxu0 }
 0x462   :  { %v3839_v48 = vpop.eup %3838  ;;  %3163 = vst [vmem:[#allocation11 + $0xb8] sm:$0xff] %v3837_v52  ;;  %3848 = vpow2.f32 %v3358_v25  ;;  %v2783_v53 = vpop.f32.mrb[229].mxu1 }
 0x463   :  { %v3022_v23 = vadd.f32 1.0, %v3839_v48  ;;  %v2559_v11 = vpop.f32.mrb[206].mxu0  ;;  %v2784_v30 = vpop.f32.mrb[230].mxu1  ;;  %v2782_v62 = vadd.f32 %v2781_v57, %v2557_v45 }
 0x464   :  { %v3841_v59 = vpop.eup %3840  ;;  %v2560_v49 = vadd.f32 %v5195_v44, %v2559_v11  ;;  %v2561_v51 = vpop.f32.mrb[207].mxu0 }
 0x465   :  { %v2786_v35 = vpop.f32.mrb[231].mxu1  ;;  %3850 = vrcp.f32 %v3022_v23  ;;  %v3023_v56 = vadd.f32 1.0, %v3841_v59  ;;  %v3359_v0 = vmul.f32 -1.442695, %v2782_v62 }
 0x466   :  { %v2785_v60 = vadd.f32 %v2784_v30, %v2560_v49 }
 0x467   :  { %v3843_v15 = vpop.eup %3842  ;;  %3852 = vrcp.f32 %v3023_v56 }
 0x468   :  { %3164 = vst [vmem:[#allocation11 + $0xc0] sm:$0xff] %v3843_v15  ;;  %3854 = vpow2.f32 %v3359_v0  ;;  %v3360_v13 = vmul.f32 -1.442695, %v2785_v60  ;;  %v2564_v28 = vpop.f32.mrb[208].mxu0  ;;  %v2789_v39 = vpop.f32.mrb[232].mxu1 }
 0x469   :  { %v3845_v10 = vpop.eup %3844  ;;  %v2565_v34 = vadd.f32 %v5195_v44, %v2564_v28  ;;  %v2566_v33 = vpop.f32.mrb[209].mxu0 }
 0x46a   :  { %v3847_v46 = vpop.eup %3846  ;;  %3165 = vst [vmem:[#allocation11 + $0xc8] sm:$0xff] %v3845_v10  ;;  %3856 = vpow2.f32 %v3360_v13  ;;  %v2791_v54 = vpop.f32.mrb[233].mxu1 }
 0x46b   :  { %v3024_v17 = vadd.f32 1.0, %v3847_v46  ;;  %v2567_v19 = vpop.f32.mrb[210].mxu0  ;;  %v2792_v26 = vpop.f32.mrb[234].mxu1  ;;  %v2790_v41 = vadd.f32 %v2789_v39, %v2565_v34 }
 0x46c   :  { %v3849_v38 = vpop.eup %3848  ;;  %v2568_v36 = vadd.f32 %v5195_v44, %v2567_v19  ;;  %v2569_v3 = vpop.f32.mrb[211].mxu0 }
 0x46d   :  { %v2794_v6 = vpop.f32.mrb[235].mxu1  ;;  %3858 = vrcp.f32 %v3024_v17  ;;  %v3025_v32 = vadd.f32 1.0, %v3849_v38  ;;  %v3361_v12 = vmul.f32 -1.442695, %v2790_v41 }
 0x46e   :  { %v2793_v37 = vadd.f32 %v2792_v26, %v2568_v36 }
 0x46f   :  { %v3851_v7 = vpop.eup %3850  ;;  %3860 = vrcp.f32 %v3025_v32 }
 0x470   :  { %3166 = vst [vmem:[#allocation11 + $0xd0] sm:$0xff] %v3851_v7  ;;  %3862 = vpow2.f32 %v3361_v12  ;;  %v3362_v20 = vmul.f32 -1.442695, %v2793_v37  ;;  %v2572_v55 = vpop.f32.mrb[212].mxu0  ;;  %v2797_v29 = vpop.f32.mrb[236].mxu1 }
 0x471   :  { %v3853_v27 = vpop.eup %3852  ;;  %v2573_v22 = vadd.f32 %v5195_v44, %v2572_v55  ;;  %v2574_v21 = vpop.f32.mrb[213].mxu0 }
 0x472   :  { %v3855_v8 = vpop.eup %3854  ;;  %3167 = vst [vmem:[#allocation11 + $0xd8] sm:$0xff] %v3853_v27  ;;  %3864 = vpow2.f32 %v3362_v20  ;;  %v2799_v61 = vpop.f32.mrb[237].mxu1 }
 0x473   :  { %v3026_v1 = vadd.f32 1.0, %v3855_v8  ;;  %v2575_v24 = vpop.f32.mrb[214].mxu0  ;;  %v2800_v2 = vpop.f32.mrb[238].mxu1  ;;  %v2798_v50 = vadd.f32 %v2797_v29, %v2573_v22 }
 0x474   :  { %v3857_v42 = vpop.eup %3856  ;;  %v2576_v4 = vadd.f32 %v5195_v44, %v2575_v24  ;;  %v2577_v9 = vpop.f32.mrb[215].mxu0 }
 0x475   :  { %v2802_v47 = vpop.f32.mrb[239].mxu1  ;;  %3866 = vrcp.f32 %v3026_v1  ;;  %v3027_v31 = vadd.f32 1.0, %v3857_v42  ;;  %v3363_v40 = vmul.f32 -1.442695, %v2798_v50 }
 0x476   :  { %v2801_v63 = vadd.f32 %v2800_v2, %v2576_v4 }
 0x477   :  { %v3859_v16 = vpop.eup %3858  ;;  %3868 = vrcp.f32 %v3027_v31 }
 0x478   :  { %3168 = vst [vmem:[#allocation11 + $0xe0] sm:$0xff] %v3859_v16  ;;  %3870 = vpow2.f32 %v3363_v40  ;;  %v3364_v58 = vmul.f32 -1.442695, %v2801_v63  ;;  %v2580_v18 = vpop.f32.mrb[216].mxu0  ;;  %v2805_v25 = vpop.f32.mrb[240].mxu1 }
 0x479   :  { %v3861_v5 = vpop.eup %3860  ;;  %v2581_v43 = vadd.f32 %v5195_v44, %v2580_v18  ;;  %v2582_v57 = vpop.f32.mrb[217].mxu0 }
 0x47a   :  { %v3863_v52 = vpop.eup %3862  ;;  %3169 = vst [vmem:[#allocation11 + $0xe8] sm:$0xff] %v3861_v5  ;;  %3872 = vpow2.f32 %v3364_v58  ;;  %v2807_v48 = vpop.f32.mrb[241].mxu1 }
 0x47b   :  { %v3028_v45 = vadd.f32 1.0, %v3863_v52  ;;  %v2583_v14 = vpop.f32.mrb[218].mxu0  ;;  %v2808_v53 = vpop.f32.mrb[242].mxu1  ;;  %v2806_v11 = vadd.f32 %v2805_v25, %v2581_v43 }
 0x47c   :  { %v3865_v23 = vpop.eup %3864  ;;  %v2584_v30 = vadd.f32 %v5195_v44, %v2583_v14  ;;  %v2585_v59 = vpop.f32.mrb[219].mxu0 }
 0x47d   :  { %v2810_v62 = vpop.f32.mrb[243].mxu1  ;;  %3874 = vrcp.f32 %v3028_v45  ;;  %v3029_v49 = vadd.f32 1.0, %v3865_v23  ;;  %v3365_v51 = vmul.f32 -1.442695, %v2806_v11 }
 0x47e   :  { %v2809_v35 = vadd.f32 %v2808_v53, %v2584_v30 }
 0x47f   :  { %v3867_v56 = vpop.eup %3866  ;;  %3876 = vrcp.f32 %v3029_v49 }
 0x480   :  { %3170 = vst [vmem:[#allocation11 + $0xf0] sm:$0xff] %v3867_v56  ;;  %3878 = vpow2.f32 %v3365_v51  ;;  %v3366_v0 = vmul.f32 -1.442695, %v2809_v35  ;;  %v2588_v15 = vpop.f32.mrb[220].mxu0  ;;  %v2813_v13 = vpop.f32.mrb[244].mxu1 }
 0x481   :  { %v3869_v60 = vpop.eup %3868  ;;  %v2589_v28 = vadd.f32 %v5195_v44, %v2588_v15  ;;  %v2590_v39 = vpop.f32.mrb[221].mxu0 }
 0x482   :  { %v3871_v10 = vpop.eup %3870  ;;  %3171 = vst [vmem:[#allocation11 + $0xf8] sm:$0xff] %v3869_v60  ;;  %3880 = vpow2.f32 %v3366_v0  ;;  %v2815_v46 = vpop.f32.mrb[245].mxu1 }
 0x483   :  { %v3030_v34 = vadd.f32 1.0, %v3871_v10  ;;  %v2591_v33 = vpop.f32.mrb[222].mxu0  ;;  %v2816_v54 = vpop.f32.mrb[246].mxu1  ;;  %v2814_v19 = vadd.f32 %v2813_v13, %v2589_v28 }
 0x484   :  { %v3873_v17 = vpop.eup %3872  ;;  %v2592_v26 = vadd.f32 %v5195_v44, %v2591_v33  ;;  %v2593_v38 = vpop.f32.mrb[223].mxu0 }
 0x485   :  { %v2818_v41 = vpop.f32.mrb[247].mxu1  ;;  %3882 = vrcp.f32 %v3030_v34  ;;  %v3031_v36 = vadd.f32 1.0, %v3873_v17  ;;  %v3367_v3 = vmul.f32 -1.442695, %v2814_v19 }
 0x486   :  { %v2817_v6 = vadd.f32 %v2816_v54, %v2592_v26 }
 0x487   :  { %v3875_v32 = vpop.eup %3874  ;;  %3884 = vrcp.f32 %v3031_v36 }
 0x488   :  { %3172 = vst [vmem:[#allocation11 + $0x100] sm:$0xff] %v3875_v32  ;;  %3886 = vpow2.f32 %v3367_v3  ;;  %v3368_v12 = vmul.f32 -1.442695, %v2817_v6  ;;  %v2596_v7 = vpop.f32.mrb[224].mxu0  ;;  %v2821_v20 = vpop.f32.mrb[248].mxu1 }
 0x489   :  { %v3877_v37 = vpop.eup %3876  ;;  %v2597_v55 = vadd.f32 %v5195_v44, %v2596_v7  ;;  %v2598_v29 = vpop.f32.mrb[225].mxu0 }
 0x48a   :  { %v3879_v27 = vpop.eup %3878  ;;  %3173 = vst [vmem:[#allocation11 + $0x108] sm:$0xff] %v3877_v37  ;;  %3888 = vpow2.f32 %v3368_v12  ;;  %v2823_v8 = vpop.f32.mrb[249].mxu1 }
 0x48b   :  { %v3032_v22 = vadd.f32 1.0, %v3879_v27  ;;  %v2599_v21 = vpop.f32.mrb[226].mxu0  ;;  %v2824_v61 = vpop.f32.mrb[250].mxu1  ;;  %v2822_v24 = vadd.f32 %v2821_v20, %v2597_v55 }
 0x48c   :  { %v3881_v1 = vpop.eup %3880  ;;  %v2600_v2 = vadd.f32 %v5195_v44, %v2599_v21  ;;  %v2601_v42 = vpop.f32.mrb[227].mxu0 }
 0x48d   :  { %v2826_v50 = vpop.f32.mrb[251].mxu1  ;;  %3890 = vrcp.f32 %v3032_v22  ;;  %v3033_v4 = vadd.f32 1.0, %v3881_v1  ;;  %v3369_v9 = vmul.f32 -1.442695, %v2822_v24 }
 0x48e   :  { %v2825_v47 = vadd.f32 %v2824_v61, %v2600_v2 }
 0x48f   :  { %v3883_v31 = vpop.eup %3882  ;;  %3892 = vrcp.f32 %v3033_v4 }
 0x490   :  { %3174 = vst [vmem:[#allocation11 + $0x110] sm:$0xff] %v3883_v31  ;;  %3894 = vpow2.f32 %v3369_v9  ;;  %v3370_v40 = vmul.f32 -1.442695, %v2825_v47  ;;  %v2604_v16 = vpop.f32.mrb[228].mxu0  ;;  %v2829_v58 = vpop.f32.mrb[252].mxu1 }
 0x491   :  { %v3885_v63 = vpop.eup %3884  ;;  %v2605_v18 = vadd.f32 %v5195_v44, %v2604_v16  ;;  %v2606_v25 = vpop.f32.mrb[229].mxu0 }
 0x492   :  { %v3887_v5 = vpop.eup %3886  ;;  %3175 = vst [vmem:[#allocation11 + $0x118] sm:$0xff] %v3885_v63  ;;  %3896 = vpow2.f32 %v3370_v40  ;;  %v2831_v52 = vpop.f32.mrb[253].mxu1 }
 0x493   :  { %v3034_v43 = vadd.f32 1.0, %v3887_v5  ;;  %v2607_v57 = vpop.f32.mrb[230].mxu0  ;;  %v2832_v48 = vpop.f32.mrb[254].mxu1  ;;  %v2830_v14 = vadd.f32 %v2829_v58, %v2605_v18 }
 0x494   :  { %v3889_v45 = vpop.eup %3888  ;;  %v2608_v53 = vadd.f32 %v5195_v44, %v2607_v57  ;;  %v2609_v23 = vpop.f32.mrb[231].mxu0 }
 0x495   :  { %v2834_v11 = vpop.f32.mrb[255].mxu1  ;;  %3898 = vrcp.f32 %v3034_v43  ;;  %v3035_v30 = vadd.f32 1.0, %v3889_v45  ;;  %v3371_v59 = vmul.f32 -1.442695, %v2830_v14 }
 0x496   :  { %v2833_v62 = vadd.f32 %v2832_v48, %v2608_v53 }
 0x497   :  { %v3891_v49 = vpop.eup %3890  ;;  %3900 = vrcp.f32 %v3035_v30 }
 0x498   :  { %3176 = vst [vmem:[#allocation11 + $0x120] sm:$0xff] %v3891_v49  ;;  %3902 = vpow2.f32 %v3371_v59  ;;  %v3372_v51 = vmul.f32 -1.442695, %v2833_v62  ;;  %v2612_v56 = vpop.f32.mrb[232].mxu0  ;;  %v2837_v0 = vpop.f32.mrb[0].mxu1 }
 0x499   :  { %v3893_v35 = vpop.eup %3892  ;;  %v2613_v15 = vadd.f32 %v5195_v44, %v2612_v56  ;;  %v2614_v13 = vpop.f32.mrb[233].mxu0 }
 0x49a   :  { %v3895_v60 = vpop.eup %3894  ;;  %3177 = vst [vmem:[#allocation11 + $0x128] sm:$0xff] %v3893_v35  ;;  %3904 = vpow2.f32 %v3372_v51  ;;  %v2839_v10 = vpop.f32.mrb[1].mxu1 }
 0x49b   :  { %v3036_v28 = vadd.f32 1.0, %v3895_v60  ;;  %v2615_v39 = vpop.f32.mrb[234].mxu0  ;;  %v2840_v46 = vpop.f32.mrb[2].mxu1  ;;  %v2838_v33 = vadd.f32 %v2837_v0, %v2613_v15 }
 0x49c   :  { %v3897_v34 = vpop.eup %3896  ;;  %v2616_v54 = vadd.f32 %v5195_v44, %v2615_v39  ;;  %v2617_v17 = vpop.f32.mrb[235].mxu0 }
 0x49d   :  { %v2842_v19 = vpop.f32.mrb[3].mxu1  ;;  %3906 = vrcp.f32 %v3036_v28  ;;  %v3037_v26 = vadd.f32 1.0, %v3897_v34  ;;  %v3373_v38 = vmul.f32 -1.442695, %v2838_v33 }
 0x49e   :  { %v2841_v41 = vadd.f32 %v2840_v46, %v2616_v54 }
 0x49f   :  { %v3899_v36 = vpop.eup %3898  ;;  %3908 = vrcp.f32 %v3037_v26 }
 0x4a0   :  { %3178 = vst [vmem:[#allocation11 + $0x130] sm:$0xff] %v3899_v36  ;;  %3910 = vpow2.f32 %v3373_v38  ;;  %v3374_v3 = vmul.f32 -1.442695, %v2841_v41  ;;  %v2620_v32 = vpop.f32.mrb[236].mxu0  ;;  %v2845_v12 = vpop.f32.mrb[4].mxu1 }
 0x4a1   :  { %v3901_v6 = vpop.eup %3900  ;;  %v2621_v7 = vadd.f32 %v5195_v44, %v2620_v32  ;;  %v2622_v20 = vpop.f32.mrb[237].mxu0 }
 0x4a2   :  { %v3903_v37 = vpop.eup %3902  ;;  %3179 = vst [vmem:[#allocation11 + $0x138] sm:$0xff] %v3901_v6  ;;  %3912 = vpow2.f32 %v3374_v3  ;;  %v2847_v27 = vpop.f32.mrb[5].mxu1 }
 0x4a3   :  { %v3038_v55 = vadd.f32 1.0, %v3903_v37  ;;  %v2623_v29 = vpop.f32.mrb[238].mxu0  ;;  %v2848_v8 = vpop.f32.mrb[6].mxu1  ;;  %v2846_v21 = vadd.f32 %v2845_v12, %v2621_v7 }
 0x4a4   :  { %v3905_v22 = vpop.eup %3904  ;;  %v2624_v61 = vadd.f32 %v5195_v44, %v2623_v29  ;;  %v2625_v1 = vpop.f32.mrb[239].mxu0 }
 0x4a5   :  { %v2850_v24 = vpop.f32.mrb[7].mxu1  ;;  %3914 = vrcp.f32 %v3038_v55  ;;  %v3039_v2 = vadd.f32 1.0, %v3905_v22  ;;  %v3375_v42 = vmul.f32 -1.442695, %v2846_v21 }
 0x4a6   :  { %v2849_v50 = vadd.f32 %v2848_v8, %v2624_v61  ;;  %v3978_v8 = vld [vmem:[%s5266_s8] ss:$0 sm:$0xff]  ;;  %s4131_s8 = smov [#allocation11]  }
 0x4a7   :  { %v3907_v4 = vpop.eup %3906  ;;  %3916 = vrcp.f32 %v3039_v2  ;;  %s3193_s15 = sshll.u32 %s4131_s8, 4  ;;  %s3194_s15 = int_to_ptr.vmem [resolvable:$true] %s3193_s15 }
 0x4a8   :  { %3180 = vst [vmem:[#allocation11 + $0x140] sm:$0xff] %v3907_v4  ;;  %3918 = vpow2.f32 %v3375_v42  ;;  %v3376_v9 = vmul.f32 -1.442695, %v2849_v50  ;;  %v2661_v31 = vpop.f32.mrb[144].mxu0  ;;  %s4089_s17 = scalar_lea.vmem %s3194_s15, 6144  ;;  %p4094_p13 = scmp.lt.s32.totalorder %s3194_s15, %s3194_s15 }
 0x4a9   :  { %v3909_v47 = vpop.eup %3908  ;;  %v3505_v63 = vadd.f32 %v5195_v44, %v2661_v31  ;;  %v2663_v16 = vpop.f32.mrb[145].mxu0  ;;  %p4090_p12 = scmp.ne.s32.totalorder %s3194_s15, %s4089_s17  ;;  %p4095_p0 = scmp.lt.s32.totalorder %s4089_s17, %s4089_s17 }
 0x4aa   :  { %v3911_v40 = vpop.eup %3910  ;;  %3181 = vst [vmem:[#allocation11 + $0x148] sm:$0xff] %v3909_v47  ;;  %3920 = vpow2.f32 %v3376_v9  ;;  %v2664_v5 = vpop.f32.mrb[146].mxu0 }
 0x4ab   :  { %v3040_v58 = vadd.f32 1.0, %v3911_v40  ;;  %v3329_v25 = vmul.f32 -1.442695, %v3505_v63  ;;  %v3506_v52 = vadd.f32 %v5195_v44, %v2664_v5  ;;  %v2666_v43 = vpop.f32.mrb[147].mxu0  ;;  %p4096_p1 = por %p4095_p0, %p4094_p13 }
 0x4ac   :  { %v3913_v18 = vpop.eup %3912 }
 0x4ad   :  { %3922 = vrcp.f32 %v3040_v58  ;;  %v3041_v57 = vadd.f32 1.0, %v3913_v18  ;;  %v3330_v48 = vmul.f32 -1.442695, %v3506_v52  ;;  %p4097_p2 = pnand %p4096_p1, %p4090_p12 }
 0x4ae   :  { %3924 = vpow2.f32 %v3329_v25 }
 0x4af   :  { %v3915_v45 = vpop.eup %3914  ;;  %3926 = vrcp.f32 %v3041_v57 }
 0x4b0   :  { %3182 = vst [vmem:[#allocation11 + $0x150] sm:$0xff] %v3915_v45  ;;  %3928 = vpow2.f32 %v3330_v48  ;;  %v2669_v53 = vpop.f32.mrb[148].mxu0 }
 0x4b1   :  { %v3917_v14 = vpop.eup %3916  ;;  %v3507_v11 = vadd.f32 %v5195_v44, %v2669_v53  ;;  %v2671_v30 = vpop.f32.mrb[149].mxu0 }
 0x4b2   :  { %v3919_v23 = vpop.eup %3918  ;;  %3183 = vst [vmem:[#allocation11 + $0x158] sm:$0xff] %v3917_v14  ;;  %v2672_v62 = vpop.f32.mrb[150].mxu0 }
 0x4b3   :  { %v3042_v59 = vadd.f32 1.0, %v3919_v23  ;;  %v3331_v51 = vmul.f32 -1.442695, %v3507_v11  ;;  %v3508_v35 = vadd.f32 %v5195_v44, %v2672_v62  ;;  %v2674_v56 = vpop.f32.mrb[151].mxu0 }
 0x4b4   :  { %v3921_v49 = vpop.eup %3920 }
 0x4b5   :  { %3930 = vrcp.f32 %v3042_v59  ;;  %v3043_v0 = vadd.f32 1.0, %v3921_v49  ;;  %v3332_v60 = vmul.f32 -1.442695, %v3508_v35 }
 0x4b6   :  { %3932 = vpow2.f32 %v3331_v51 }
 0x4b7   :  { %v3923_v15 = vpop.eup %3922  ;;  %3934 = vrcp.f32 %v3043_v0 }
 0x4b8   :  { %v3925_v13 = vpop.eup %3924  ;;  %3184 = vst [vmem:[#allocation11 + $0x160] sm:$0xff] %v3923_v15  ;;  %3936 = vpow2.f32 %v3332_v60  ;;  %v2677_v39 = vpop.f32.mrb[152].mxu0 }
 0x4b9   :  { %v3927_v10 = vpop.eup %3926  ;;  %v2996_v28 = vadd.f32 1.0, %v3925_v13  ;;  %v3509_v34 = vadd.f32 %v5195_v44, %v2677_v39  ;;  %v2679_v33 = vpop.f32.mrb[153].mxu0 }
 0x4ba   :  { %v3929_v46 = vpop.eup %3928  ;;  %3185 = vst [vmem:[#allocation11 + $0x168] sm:$0xff] %v3927_v10  ;;  %v2680_v17 = vpop.f32.mrb[154].mxu0 }
 0x4bb   :  { %3938 = vrcp.f32 %v2996_v28  ;;  %v2997_v54 = vadd.f32 1.0, %v3929_v46  ;;  %v3333_v19 = vmul.f32 -1.442695, %v3509_v34  ;;  %v3510_v26 = vadd.f32 %v5195_v44, %v2680_v17  ;;  %v2682_v38 = vpop.f32.mrb[155].mxu0 }
 0x4bd   :  { %3940 = vrcp.f32 %v2997_v54  ;;  %v3334_v41 = vmul.f32 -1.442695, %v3510_v26 }
 0x4be   :  { %3942 = vpow2.f32 %v3333_v19 }
 0x4bf   :  { %v3931_v36 = vpop.eup %3930  ;;  %3944 = vpow2.f32 %v3334_v41 }
 0x4c0   :  { %v3933_v3 = vpop.eup %3932  ;;  %3186 = vst [vmem:[#allocation11 + $0x170] sm:$0xff] %v3931_v36  ;;  %v2685_v12 = vpop.f32.mrb[156].mxu0 }
 0x4c1   :  { %v3935_v6 = vpop.eup %3934  ;;  %v2998_v32 = vadd.f32 1.0, %v3933_v3  ;;  %v3511_v7 = vadd.f32 %v5195_v44, %v2685_v12  ;;  %v2687_v20 = vpop.f32.mrb[157].mxu0 }
 0x4c2   :  { %v3937_v37 = vpop.eup %3936  ;;  %3187 = vst [vmem:[#allocation11 + $0x178] sm:$0xff] %v3935_v6  ;;  %v2688_v55 = vpop.f32.mrb[158].mxu0 }
 0x4c3   :  { %3946 = vrcp.f32 %v2998_v32  ;;  %v2999_v27 = vadd.f32 1.0, %v3937_v37  ;;  %v3335_v29 = vmul.f32 -1.442695, %v3511_v7  ;;  %v3512_v22 = vadd.f32 %v3978_v8, %v2688_v55  ;;  %v2690_v21 = vpop.f32.mrb[159].mxu0 }
 0x4c5   :  { %v3939_v61 = vpop.eup %3938  ;;  %3948 = vrcp.f32 %v2999_v27  ;;  %v3336_v1 = vmul.f32 -1.442695, %v3512_v22 }
 0x4c6   :  { %3140 = vst [vmem:[#allocation11] sm:$0xff] %v3939_v61  ;;  %3950 = vpow2.f32 %v3335_v29 }
 0x4c7   :  { %v3941_v24 = vpop.eup %3940  ;;  %3952 = vpow2.f32 %v3336_v1 }
 0x4c8   :  { %v3943_v2 = vpop.eup %3942  ;;  %3141 = vst [vmem:[#allocation11 + $0x8] sm:$0xff] %v3941_v24  ;;  %v2693_v42 = vpop.f32.mrb[160].mxu0 }
 0x4c9   :  { %v3000_v44 = vadd.f32 1.0, %v3943_v2  ;;  %v3945_v50 = vpop.eup %3944  ;;  %v3513_v4 = vadd.f32 %v3978_v8, %v2693_v42  ;;  %v2695_v9 = vpop.f32.mrb[161].mxu0 }
 0x4ca   :  { %v3001_v47 = vadd.f32 1.0, %v3945_v50  ;;  %v2696_v31 = vpop.f32.mrb[162].mxu0 }
 0x4cb   :  { %3954 = vrcp.f32 %v3000_v44  ;;  %v3337_v40 = vmul.f32 -1.442695, %v3513_v4  ;;  %v3514_v63 = vadd.f32 %v3978_v8, %v2696_v31  ;;  %v2698_v16 = vpop.f32.mrb[163].mxu0 }
 0x4cc   :  { %3956 = vrcp.f32 %v3001_v47 }
 0x4cd   :  { %v3947_v58 = vpop.eup %3946  ;;  %3958 = vpow2.f32 %v3337_v40  ;;  %v3338_v5 = vmul.f32 -1.442695, %v3514_v63 }
 0x4ce   :  { %3142 = vst [vmem:[#allocation11 + $0x10] sm:$0xff] %v3947_v58 }
 0x4cf   :  { %v3949_v18 = vpop.eup %3948  ;;  %3960 = vpow2.f32 %v3338_v5 }
 0x4d0   :  { %v3951_v25 = vpop.eup %3950  ;;  %3143 = vst [vmem:[#allocation11 + $0x18] sm:$0xff] %v3949_v18  ;;  %v2701_v43 = vpop.f32.mrb[164].mxu0 }
 0x4d1   :  { %v3002_v52 = vadd.f32 1.0, %v3951_v25  ;;  %v3953_v57 = vpop.eup %3952  ;;  %v3515_v48 = vadd.f32 %v3978_v8, %v2701_v43  ;;  %v2703_v45 = vpop.f32.mrb[165].mxu0 }
 0x4d2   :  { %v3003_v14 = vadd.f32 1.0, %v3953_v57  ;;  %v2704_v53 = vpop.f32.mrb[166].mxu0 }
 0x4d3   :  { %3962 = vrcp.f32 %v3002_v52  ;;  %v3339_v23 = vmul.f32 -1.442695, %v3515_v48  ;;  %v3516_v11 = vadd.f32 %v3978_v8, %v2704_v53  ;;  %v2706_v30 = vpop.f32.mrb[167].mxu0 }
 0x4d4   :  { %3964 = vrcp.f32 %v3003_v14 }
 0x4d5   :  { %v3955_v59 = vpop.eup %3954  ;;  %3966 = vpow2.f32 %v3339_v23  ;;  %v3340_v62 = vmul.f32 -1.442695, %v3516_v11 }
 0x4d6   :  { %3144 = vst [vmem:[#allocation11 + $0x20] sm:$0xff] %v3955_v59  ;;  %v3957_v49 = vpop.eup %3956 }
 0x4d7   :  { %v3959_v51 = vpop.eup %3958  ;;  %3145 = vst [vmem:[#allocation11 + $0x28] sm:$0xff] %v3957_v49  ;;  %3968 = vpow2.f32 %v3340_v62 }
 0x4d8   :  { %v3004_v35 = vadd.f32 1.0, %v3959_v51 }
 0x4d9   :  { %v3961_v56 = vpop.eup %3960 }
 0x4da   :  { %3970 = vrcp.f32 %v3004_v35  ;;  %v3005_v0 = vadd.f32 1.0, %v3961_v56 }
 0x4dc   :  { %3972 = vrcp.f32 %v3005_v0 }
 0x4dd   :  { %v3963_v60 = vpop.eup %3962 }
 0x4de   :  { %3146 = vst [vmem:[#allocation11 + $0x30] sm:$0xff] %v3963_v60  ;;  %v3965_v15 = vpop.eup %3964 }
 0x4df   :  { %v3967_v13 = vpop.eup %3966  ;;  %3147 = vst [vmem:[#allocation11 + $0x38] sm:$0xff] %v3965_v15 }
 0x4e0   :  { %v3006_v10 = vadd.f32 1.0, %v3967_v13 }
 0x4e1   :  { %v3969_v28 = vpop.eup %3968 }
 0x4e2   :  { %3974 = vrcp.f32 %v3006_v10  ;;  %v3007_v39 = vadd.f32 1.0, %v3969_v28 }
 0x4e4   :  { %v3971_v46 = vpop.eup %3970  ;;  %3976 = vrcp.f32 %v3007_v39 }
 0x4e5   :  { %3148 = vst [vmem:[#allocation11 + $0x40] sm:$0xff] %v3971_v46 }
 0x4e6   :  { %v3973_v34 = vpop.eup %3972 }
 0x4e7   :  { %3149 = vst [vmem:[#allocation11 + $0x48] sm:$0xff] %v3973_v34 }
 0x4ec   :  { %v3975_v33 = vpop.eup %3974 }
 0x4ed   :  { %3150 = vst [vmem:[#allocation11 + $0x50] sm:$0xff] %v3975_v33 }
 0x4ee   :  { %v3977_v54 = vpop.eup %3976 }
 0x4ef   :  { %3151 = vst [vmem:[#allocation11 + $0x58] sm:$0xff] %v3977_v54 }
 0x4f0   :  { %4100 = shalt.err (!%p4097_p2)
}
 0x4f1   :  { %s4101_s0 = scalar_lea.hbm %s5267_s9, 6144 }
 0x4f2   :  { %p4102_p3 = scmp.ne.s32.totalorder %s5267_s9, %s4101_s0  ;;  %p4105_p4 = scmp.lt.u32.totalorder %s4101_s0, %s5267_s9 }
 0x4f4   :  { %p4107_p5 = pnand %p4105_p4, %p4102_p3 }
 0x4f6   :  { %4110 = shalt.err (!%p4107_p5)
}
 0x4f7   :  { %3199 = dma.vmem_to_hbm [thread:$0]  %s3194_s15, 6144, %s5267_s9, [#allocation4], %s4126_s5, %s4126_s5, %s4127_s24  }
 0x4f8   :  { %4117 = dma.done.wait [#allocation4], 6144  }
 0x4f9   :  { %4118 = vsyncadd [#allocation4], 4294961152 }
 0x4fa   :  { %3203 = vsyncpa [#allocation3], 1 }
 0x4fb   :  { %3204 = vsyncpa [#allocation6], 1 }
 0x4fc   :  { %3205 = vsyncpa [#allocation9], 1 }
 0x4fd   :  { %3206 = vsyncpa [#allocation4], 1 }

</bundles_post_ra>
